<compile_context>
chip_gen: v5e
topology: v5e:2x2
jax: 0.10.0
libtpu: 0.0.40
codegen_flags: <defaults>
</compile_context>

<pallas_src>
import jax
import jax.numpy as jnp
from jax.experimental import pallas as pl
from jax.experimental.pallas import tpu as pltpu


# Layer widths of the Encoder MLP.
_LAYER_DIMS = [30, 200, 400, 800, 800, 400, 200, 200, 100, 5]

_LANE = 128


def _make_kernel(douts):
    """Builds the fused kernel. `douts` are the (padded) out-widths per layer."""
    n_layers = len(douts)

    def kernel(x_ref, *refs):
        # refs = (w1, ..., w9, bias_pack, o_ref)
        o_ref = refs[-1]
        b_ref = refs[-2]
        w_refs = refs[:-2]

        h = x_ref[...].astype(jnp.float32)
        for i in range(n_layers):                  # unrolled at trace time
            dout = douts[i]
            w = w_refs[i][...]                     # bf16 (din, dout), VMEM-pinned
            b = b_ref[i:i + 1, :dout]              # f32 (1, dout), lane-aligned
            acc = jnp.dot(h.astype(jnp.bfloat16), w,
                          preferred_element_type=jnp.float32)
            h = acc + b                            # f32 VPU
            if i < n_layers - 1:
                h = jnp.maximum(h, 0.0)            # ReLU on all but fc_latent
        o_ref[...] = h.astype(o_ref.dtype)

    return kernel


def _batch_tile(batch: int, sublane: int) -> int:
    """Pick the batch tile.

    Large batches: 512-1024 row tiles reach ~85%+ of roofline and amortize
    MXU weight pushes.  Smaller batches: split into >=2 tiles (both v7x
    TensorCores get work) while respecting the sublane minimum.
    """
    if batch >= 2048:
        return 1024
    if batch >= 1024:
        return 512
    half = -(-batch // 2)                                   # ceil(batch / 2)
    tb = ((half + sublane - 1) // sublane) * sublane
    return max(sublane, tb)


def encoder_forward(params, x):
    """Runs the whole Encoder as one fused Pallas kernel, gridded over batch."""
    B, Din = x.shape
    n_layers = len(params)
    latent = params[-1][0].shape[1]
    out_pad = ((latent + _LANE - 1) // _LANE) * _LANE       # lane-dense output
    dtype = x.dtype

    sublane = {4: 8, 2: 16, 1: 32}.get(jnp.dtype(dtype).itemsize, 8)
    TB = _batch_tile(B, sublane)
    Bp = pl.cdiv(B, TB) * TB
    if Bp != B:
        x = jnp.pad(x, ((0, Bp - B), (0, 0)))
    grid = (Bp // TB,)

    # Prepare bf16 weights (final layer zero-padded to a lane-dense width)
    # and the packed f32 bias table.
    weights = []
    douts = []
    biases = []
    for li, (w, b) in enumerate(params):
        w = jnp.asarray(w, jnp.float32)
        b = jnp.asarray(b, jnp.float32)
        if li == n_layers - 1:
            din, dout = w.shape
            w = jnp.pad(w, ((0, 0), (0, out_pad - dout)))
            b = jnp.pad(b, ((0, out_pad - dout),))
        weights.append(w.astype(jnp.bfloat16))
        douts.append(w.shape[1])
        biases.append(b)
    max_dout = max(douts)
    bias_pack = jnp.zeros((n_layers, max_dout), jnp.float32)
    for li, b in enumerate(biases):
        bias_pack = bias_pack.at[li, :b.shape[0]].set(b)

    # Activation/output tiles follow the grid; weights & biases are pinned
    # (constant block index -> DMA'd once, revisited across all grid steps).
    # NOTE: pinned inputs don't really need double-buffering, but the bf16
    # weight set is only ~3 MB so the default buffering stays well inside the
    # 48 MiB budget on every generation.
    in_specs = [pl.BlockSpec((TB, Din), lambda i: (i, 0))]
    flat_inputs = [x]
    for w in weights:
        in_specs.append(pl.BlockSpec(w.shape, lambda i: (0, 0)))
        flat_inputs.append(w)
    in_specs.append(pl.BlockSpec(bias_pack.shape, lambda i: (0, 0)))
    flat_inputs.append(bias_pack)

    out_spec = pl.BlockSpec((TB, out_pad), lambda i: (i, 0))

    out = pl.pallas_call(
        _make_kernel(douts),
        out_shape=jax.ShapeDtypeStruct((Bp, out_pad), dtype),
        grid=grid,
        in_specs=in_specs,
        out_specs=out_spec,
        compiler_params=pltpu.CompilerParams(
            dimension_semantics=("parallel",),
            vmem_limit_bytes=48 << 20,
        ),
    )(*flat_inputs)

    return out[:B, :latent]


def init_encoder_params(key, input_size=30, latent_size=5, dtype=jnp.float32):
    dims = list(_LAYER_DIMS)
    dims[0] = input_size
    dims[-1] = latent_size
    params = []
    for i in range(len(dims) - 1):
        fan_in, fan_out = dims[i], dims[i + 1]
        key, kw, kb = jax.random.split(key, 3)
        bound = 1.0 / jnp.sqrt(jnp.asarray(fan_in, dtype))
        # PyTorch nn.Linear default init: U(-1/sqrt(fan_in), +1/sqrt(fan_in)).
        w = jax.random.uniform(kw, (fan_in, fan_out), dtype, -bound, bound)
        b = jax.random.uniform(kb, (fan_out,), dtype, -bound, bound)
        params.append((w, b))
    return params


if __name__ == "__main__":
    key = jax.random.PRNGKey(0)
    kparam, kx = jax.random.split(key)

    input_size, latent_size = 30, 5
    batch = 8

    params = init_encoder_params(kparam, input_size, latent_size)
    x = jax.random.normal(kx, (batch, input_size), jnp.float32)

    out = encoder_forward(params, x)
    out = jax.block_until_ready(out)

    # Reference check: same math (bf16 matmul inputs, f32 accumulation) in
    # plain JAX, so only accumulation-order differences remain.
    ref = x
    for i, (w, b) in enumerate(params):
        ref = jnp.dot(ref.astype(jnp.bfloat16), w.astype(jnp.bfloat16),
                      preferred_element_type=jnp.float32) + b
        if i < len(params) - 1:
            ref = jnp.maximum(ref, 0.0)

    assert out.shape == (batch, latent_size)
    assert jnp.allclose(out, ref, atol=2e-3, rtol=2e-3), (
        float(jnp.max(jnp.abs(out - ref))))

    print("KERNEL_OK")
</pallas_src>

<mosaic_0001>
module attributes {stable_mosaic.version = 11 : i64} {
  func.func @kernel(%arg0: i32, %arg1: memref<8x30xf32, #tpu.memory_space<vmem>>, %arg2: memref<30x200xbf16, #tpu.memory_space<vmem>>, %arg3: memref<200x400xbf16, #tpu.memory_space<vmem>>, %arg4: memref<400x800xbf16, #tpu.memory_space<vmem>>, %arg5: memref<800x800xbf16, #tpu.memory_space<vmem>>, %arg6: memref<800x400xbf16, #tpu.memory_space<vmem>>, %arg7: memref<400x200xbf16, #tpu.memory_space<vmem>>, %arg8: memref<200x200xbf16, #tpu.memory_space<vmem>>, %arg9: memref<200x100xbf16, #tpu.memory_space<vmem>>, %arg10: memref<100x128xbf16, #tpu.memory_space<vmem>>, %arg11: memref<9x800xf32, #tpu.memory_space<vmem>>, %arg12: memref<8x128xf32, #tpu.memory_space<vmem>>) attributes {dimension_semantics = [#tpu.dimension_semantics<parallel>], iteration_bounds = array<i64: 1>, scalar_prefetch = 0 : i64, scratch_operands = 0 : i64, tpu.core_type = #tpu.core_type<tc>, window_params = [{transform_indices = @transform_0, window_bounds = array<i64: 8, 30>}, {pipeline_mode = #tpu.pipeline_mode<synchronous>, transform_indices = @transform_1, window_bounds = array<i64: 30, 200>}, {pipeline_mode = #tpu.pipeline_mode<synchronous>, transform_indices = @transform_2, window_bounds = array<i64: 200, 400>}, {pipeline_mode = #tpu.pipeline_mode<synchronous>, transform_indices = @transform_3, window_bounds = array<i64: 400, 800>}, {pipeline_mode = #tpu.pipeline_mode<synchronous>, transform_indices = @transform_4, window_bounds = array<i64: 800, 800>}, {pipeline_mode = #tpu.pipeline_mode<synchronous>, transform_indices = @transform_5, window_bounds = array<i64: 800, 400>}, {pipeline_mode = #tpu.pipeline_mode<synchronous>, transform_indices = @transform_6, window_bounds = array<i64: 400, 200>}, {pipeline_mode = #tpu.pipeline_mode<synchronous>, transform_indices = @transform_7, window_bounds = array<i64: 200, 200>}, {pipeline_mode = #tpu.pipeline_mode<synchronous>, transform_indices = @transform_8, window_bounds = array<i64: 200, 100>}, {pipeline_mode = #tpu.pipeline_mode<synchronous>, transform_indices = @transform_9, window_bounds = array<i64: 100, 128>}, {pipeline_mode = #tpu.pipeline_mode<synchronous>, transform_indices = @transform_10, window_bounds = array<i64: 9, 800>}, {transform_indices = @transform_11, window_bounds = array<i64: 8, 128>}]} {
    %c0 = arith.constant 0 : index
    %c0_0 = arith.constant 0 : index
    %0 = vector.load %arg1[%c0, %c0_0] : memref<8x30xf32, #tpu.memory_space<vmem>>, vector<8x30xf32>
    %c0_1 = arith.constant 0 : index
    %c0_2 = arith.constant 0 : index
    %1 = vector.load %arg2[%c0_1, %c0_2] : memref<30x200xbf16, #tpu.memory_space<vmem>>, vector<30x200xbf16>
    %c0_3 = arith.constant 0 : index
    %c0_4 = arith.constant 0 : index
    %2 = vector.load %arg11[%c0_3, %c0_4] : memref<9x800xf32, #tpu.memory_space<vmem>>, vector<1x200xf32>
    %3 = arith.truncf %0 : vector<8x30xf32> to vector<8x30xbf16>
    %cst = arith.constant dense<0.000000e+00> : vector<8x200xf32>
    %4 = tpu.matmul %3, %1, %cst {dimension_numbers = #tpu.dot_dimension_numbers<[1], [0], [0], [1], [0, 0, 1, 1], [], []>} : vector<8x30xbf16>, vector<30x200xbf16>, vector<8x200xf32> -> vector<8x200xf32>
    %5 = vector.broadcast %2 : vector<1x200xf32> to vector<8x200xf32>
    %6 = arith.addf %4, %5 : vector<8x200xf32>
    %cst_5 = arith.constant 0.000000e+00 : f32
    %7 = vector.broadcast %cst_5 : f32 to vector<8x200xf32>
    %8 = arith.maximumf %6, %7 : vector<8x200xf32>
    %c0_6 = arith.constant 0 : index
    %c0_7 = arith.constant 0 : index
    %9 = vector.load %arg3[%c0_6, %c0_7] : memref<200x400xbf16, #tpu.memory_space<vmem>>, vector<200x400xbf16>
    %c1 = arith.constant 1 : index
    %c0_8 = arith.constant 0 : index
    %10 = vector.load %arg11[%c1, %c0_8] : memref<9x800xf32, #tpu.memory_space<vmem>>, vector<1x400xf32>
    %11 = arith.truncf %8 : vector<8x200xf32> to vector<8x200xbf16>
    %cst_9 = arith.constant dense<0.000000e+00> : vector<8x400xf32>
    %12 = tpu.matmul %11, %9, %cst_9 {dimension_numbers = #tpu.dot_dimension_numbers<[1], [0], [0], [1], [0, 0, 1, 1], [], []>} : vector<8x200xbf16>, vector<200x400xbf16>, vector<8x400xf32> -> vector<8x400xf32>
    %13 = vector.broadcast %10 : vector<1x400xf32> to vector<8x400xf32>
    %14 = arith.addf %12, %13 : vector<8x400xf32>
    %cst_10 = arith.constant 0.000000e+00 : f32
    %15 = vector.broadcast %cst_10 : f32 to vector<8x400xf32>
    %16 = arith.maximumf %14, %15 : vector<8x400xf32>
    %c0_11 = arith.constant 0 : index
    %c0_12 = arith.constant 0 : index
    %17 = vector.load %arg4[%c0_11, %c0_12] : memref<400x800xbf16, #tpu.memory_space<vmem>>, vector<400x800xbf16>
    %c2 = arith.constant 2 : index
    %c0_13 = arith.constant 0 : index
    %18 = vector.load %arg11[%c2, %c0_13] : memref<9x800xf32, #tpu.memory_space<vmem>>, vector<1x800xf32>
    %19 = arith.truncf %16 : vector<8x400xf32> to vector<8x400xbf16>
    %cst_14 = arith.constant dense<0.000000e+00> : vector<8x800xf32>
    %20 = tpu.matmul %19, %17, %cst_14 {dimension_numbers = #tpu.dot_dimension_numbers<[1], [0], [0], [1], [0, 0, 1, 1], [], []>} : vector<8x400xbf16>, vector<400x800xbf16>, vector<8x800xf32> -> vector<8x800xf32>
    %21 = vector.broadcast %18 : vector<1x800xf32> to vector<8x800xf32>
    %22 = arith.addf %20, %21 : vector<8x800xf32>
    %cst_15 = arith.constant 0.000000e+00 : f32
    %23 = vector.broadcast %cst_15 : f32 to vector<8x800xf32>
    %24 = arith.maximumf %22, %23 : vector<8x800xf32>
    %c0_16 = arith.constant 0 : index
    %c0_17 = arith.constant 0 : index
    %25 = vector.load %arg5[%c0_16, %c0_17] : memref<800x800xbf16, #tpu.memory_space<vmem>>, vector<800x800xbf16>
    %c3 = arith.constant 3 : index
    %c0_18 = arith.constant 0 : index
    %26 = vector.load %arg11[%c3, %c0_18] : memref<9x800xf32, #tpu.memory_space<vmem>>, vector<1x800xf32>
    %27 = arith.truncf %24 : vector<8x800xf32> to vector<8x800xbf16>
    %cst_19 = arith.constant dense<0.000000e+00> : vector<8x800xf32>
    %28 = tpu.matmul %27, %25, %cst_19 {dimension_numbers = #tpu.dot_dimension_numbers<[1], [0], [0], [1], [0, 0, 1, 1], [], []>} : vector<8x800xbf16>, vector<800x800xbf16>, vector<8x800xf32> -> vector<8x800xf32>
    %29 = vector.broadcast %26 : vector<1x800xf32> to vector<8x800xf32>
    %30 = arith.addf %28, %29 : vector<8x800xf32>
    %cst_20 = arith.constant 0.000000e+00 : f32
    %31 = vector.broadcast %cst_20 : f32 to vector<8x800xf32>
    %32 = arith.maximumf %30, %31 : vector<8x800xf32>
    %c0_21 = arith.constant 0 : index
    %c0_22 = arith.constant 0 : index
    %33 = vector.load %arg6[%c0_21, %c0_22] : memref<800x400xbf16, #tpu.memory_space<vmem>>, vector<800x400xbf16>
    %c4 = arith.constant 4 : index
    %c0_23 = arith.constant 0 : index
    %34 = vector.load %arg11[%c4, %c0_23] : memref<9x800xf32, #tpu.memory_space<vmem>>, vector<1x400xf32>
    %35 = arith.truncf %32 : vector<8x800xf32> to vector<8x800xbf16>
    %cst_24 = arith.constant dense<0.000000e+00> : vector<8x400xf32>
    %36 = tpu.matmul %35, %33, %cst_24 {dimension_numbers = #tpu.dot_dimension_numbers<[1], [0], [0], [1], [0, 0, 1, 1], [], []>} : vector<8x800xbf16>, vector<800x400xbf16>, vector<8x400xf32> -> vector<8x400xf32>
    %37 = vector.broadcast %34 : vector<1x400xf32> to vector<8x400xf32>
    %38 = arith.addf %36, %37 : vector<8x400xf32>
    %cst_25 = arith.constant 0.000000e+00 : f32
    %39 = vector.broadcast %cst_25 : f32 to vector<8x400xf32>
    %40 = arith.maximumf %38, %39 : vector<8x400xf32>
    %c0_26 = arith.constant 0 : index
    %c0_27 = arith.constant 0 : index
    %41 = vector.load %arg7[%c0_26, %c0_27] : memref<400x200xbf16, #tpu.memory_space<vmem>>, vector<400x200xbf16>
    %c5 = arith.constant 5 : index
    %c0_28 = arith.constant 0 : index
    %42 = vector.load %arg11[%c5, %c0_28] : memref<9x800xf32, #tpu.memory_space<vmem>>, vector<1x200xf32>
    %43 = arith.truncf %40 : vector<8x400xf32> to vector<8x400xbf16>
    %cst_29 = arith.constant dense<0.000000e+00> : vector<8x200xf32>
    %44 = tpu.matmul %43, %41, %cst_29 {dimension_numbers = #tpu.dot_dimension_numbers<[1], [0], [0], [1], [0, 0, 1, 1], [], []>} : vector<8x400xbf16>, vector<400x200xbf16>, vector<8x200xf32> -> vector<8x200xf32>
    %45 = vector.broadcast %42 : vector<1x200xf32> to vector<8x200xf32>
    %46 = arith.addf %44, %45 : vector<8x200xf32>
    %cst_30 = arith.constant 0.000000e+00 : f32
    %47 = vector.broadcast %cst_30 : f32 to vector<8x200xf32>
    %48 = arith.maximumf %46, %47 : vector<8x200xf32>
    %c0_31 = arith.constant 0 : index
    %c0_32 = arith.constant 0 : index
    %49 = vector.load %arg8[%c0_31, %c0_32] : memref<200x200xbf16, #tpu.memory_space<vmem>>, vector<200x200xbf16>
    %c6 = arith.constant 6 : index
    %c0_33 = arith.constant 0 : index
    %50 = vector.load %arg11[%c6, %c0_33] : memref<9x800xf32, #tpu.memory_space<vmem>>, vector<1x200xf32>
    %51 = arith.truncf %48 : vector<8x200xf32> to vector<8x200xbf16>
    %cst_34 = arith.constant dense<0.000000e+00> : vector<8x200xf32>
    %52 = tpu.matmul %51, %49, %cst_34 {dimension_numbers = #tpu.dot_dimension_numbers<[1], [0], [0], [1], [0, 0, 1, 1], [], []>} : vector<8x200xbf16>, vector<200x200xbf16>, vector<8x200xf32> -> vector<8x200xf32>
    %53 = vector.broadcast %50 : vector<1x200xf32> to vector<8x200xf32>
    %54 = arith.addf %52, %53 : vector<8x200xf32>
    %cst_35 = arith.constant 0.000000e+00 : f32
    %55 = vector.broadcast %cst_35 : f32 to vector<8x200xf32>
    %56 = arith.maximumf %54, %55 : vector<8x200xf32>
    %c0_36 = arith.constant 0 : index
    %c0_37 = arith.constant 0 : index
    %57 = vector.load %arg9[%c0_36, %c0_37] : memref<200x100xbf16, #tpu.memory_space<vmem>>, vector<200x100xbf16>
    %c7 = arith.constant 7 : index
    %c0_38 = arith.constant 0 : index
    %58 = vector.load %arg11[%c7, %c0_38] : memref<9x800xf32, #tpu.memory_space<vmem>>, vector<1x100xf32>
    %59 = arith.truncf %56 : vector<8x200xf32> to vector<8x200xbf16>
    %cst_39 = arith.constant dense<0.000000e+00> : vector<8x100xf32>
    %60 = tpu.matmul %59, %57, %cst_39 {dimension_numbers = #tpu.dot_dimension_numbers<[1], [0], [0], [1], [0, 0, 1, 1], [], []>} : vector<8x200xbf16>, vector<200x100xbf16>, vector<8x100xf32> -> vector<8x100xf32>
    %61 = vector.broadcast %58 : vector<1x100xf32> to vector<8x100xf32>
    %62 = arith.addf %60, %61 : vector<8x100xf32>
    %cst_40 = arith.constant 0.000000e+00 : f32
    %63 = vector.broadcast %cst_40 : f32 to vector<8x100xf32>
    %64 = arith.maximumf %62, %63 : vector<8x100xf32>
    %c0_41 = arith.constant 0 : index
    %c0_42 = arith.constant 0 : index
    %65 = vector.load %arg10[%c0_41, %c0_42] : memref<100x128xbf16, #tpu.memory_space<vmem>>, vector<100x128xbf16>
    %c8 = arith.constant 8 : index
    %c0_43 = arith.constant 0 : index
    %66 = vector.load %arg11[%c8, %c0_43] : memref<9x800xf32, #tpu.memory_space<vmem>>, vector<1x128xf32>
    %67 = arith.truncf %64 : vector<8x100xf32> to vector<8x100xbf16>
    %cst_44 = arith.constant dense<0.000000e+00> : vector<8x128xf32>
    %68 = tpu.matmul %67, %65, %cst_44 {dimension_numbers = #tpu.dot_dimension_numbers<[1], [0], [0], [1], [0, 0, 1, 1], [], []>} : vector<8x100xbf16>, vector<100x128xbf16>, vector<8x128xf32> -> vector<8x128xf32>
    %69 = vector.broadcast %66 : vector<1x128xf32> to vector<8x128xf32>
    %70 = arith.addf %68, %69 : vector<8x128xf32>
    %c0_45 = arith.constant 0 : index
    %c0_46 = arith.constant 0 : index
    %71 = vector.load %arg12[%c0_45, %c0_46] : memref<8x128xf32, #tpu.memory_space<vmem>>, vector<8x128xf32>
    tpu.vector_store %arg12[%c0_45, %c0_46], %70 {strides = array<i32>} : memref<8x128xf32, #tpu.memory_space<vmem>>, vector<8x128xf32>,
    return
  }
  func.func @transform_0(%arg0: i32) -> (i32, i32) {
    %c0_i32 = arith.constant 0 : i32
    %c0_i32_0 = arith.constant 0 : i32
    return %arg0, %c0_i32 : i32, i32
  }
  func.func @transform_1(%arg0: i32) -> (i32, i32) {
    %c0_i32 = arith.constant 0 : i32
    %c0_i32_0 = arith.constant 0 : i32
    %c0_i32_1 = arith.constant 0 : i32
    return %c0_i32, %c0_i32_0 : i32, i32
  }
  func.func @transform_2(%arg0: i32) -> (i32, i32) {
    %c0_i32 = arith.constant 0 : i32
    %c0_i32_0 = arith.constant 0 : i32
    %c0_i32_1 = arith.constant 0 : i32
    return %c0_i32, %c0_i32_0 : i32, i32
  }
  func.func @transform_3(%arg0: i32) -> (i32, i32) {
    %c0_i32 = arith.constant 0 : i32
    %c0_i32_0 = arith.constant 0 : i32
    %c0_i32_1 = arith.constant 0 : i32
    return %c0_i32, %c0_i32_0 : i32, i32
  }
  func.func @transform_4(%arg0: i32) -> (i32, i32) {
    %c0_i32 = arith.constant 0 : i32
    %c0_i32_0 = arith.constant 0 : i32
    %c0_i32_1 = arith.constant 0 : i32
    return %c0_i32, %c0_i32_0 : i32, i32
  }
  func.func @transform_5(%arg0: i32) -> (i32, i32) {
    %c0_i32 = arith.constant 0 : i32
    %c0_i32_0 = arith.constant 0 : i32
    %c0_i32_1 = arith.constant 0 : i32
    return %c0_i32, %c0_i32_0 : i32, i32
  }
  func.func @transform_6(%arg0: i32) -> (i32, i32) {
    %c0_i32 = arith.constant 0 : i32
    %c0_i32_0 = arith.constant 0 : i32
    %c0_i32_1 = arith.constant 0 : i32
    return %c0_i32, %c0_i32_0 : i32, i32
  }
  func.func @transform_7(%arg0: i32) -> (i32, i32) {
    %c0_i32 = arith.constant 0 : i32
    %c0_i32_0 = arith.constant 0 : i32
    %c0_i32_1 = arith.constant 0 : i32
    return %c0_i32, %c0_i32_0 : i32, i32
  }
  func.func @transform_8(%arg0: i32) -> (i32, i32) {
    %c0_i32 = arith.constant 0 : i32
    %c0_i32_0 = arith.constant 0 : i32
    %c0_i32_1 = arith.constant 0 : i32
    return %c0_i32, %c0_i32_0 : i32, i32
  }
  func.func @transform_9(%arg0: i32) -> (i32, i32) {
    %c0_i32 = arith.constant 0 : i32
    %c0_i32_0 = arith.constant 0 : i32
    %c0_i32_1 = arith.constant 0 : i32
    return %c0_i32, %c0_i32_0 : i32, i32
  }
  func.func @transform_10(%arg0: i32) -> (i32, i32) {
    %c0_i32 = arith.constant 0 : i32
    %c0_i32_0 = arith.constant 0 : i32
    %c0_i32_1 = arith.constant 0 : i32
    return %c0_i32, %c0_i32_0 : i32, i32
  }
  func.func @transform_11(%arg0: i32) -> (i32, i32) {
    %c0_i32 = arith.constant 0 : i32
    %c0_i32_0 = arith.constant 0 : i32
    return %arg0, %c0_i32 : i32, i32
  }
}

</mosaic_0001>

<bundles_post_ra>
// kernel: tpu_custom_call.1
= control target key start
LH: loop header
LB: loop body
LE: loop exit
PB: predicated region body
PF: predicated region fallthrough
CT: control target
= control target key end

     0   :  { %16 = vsyncpa [#allocation3], 0  ;;  %s16126_s0 = inlined_call_operand.hbm [shape: f32[8,30], index: 0, kind: input, shape index: {}]   ;;  %s16127_s1 = inlined_call_operand.hbm [shape: bf16[30,200], index: 1, kind: input, shape index: {}]   ;;  %s16128_s2 = inlined_call_operand.hbm [shape: bf16[200,400], index: 2, kind: input, shape index: {}]   ;;  %s16129_s3 = inlined_call_operand.hbm [shape: bf16[400,800], index: 3, kind: input, shape index: {}]   ;;  %s16130_s4 = inlined_call_operand.vmem [shape: bf16[800,800], index: 4, kind: input, shape index: {}]   ;;  %s16131_s5 = inlined_call_operand.vmem [shape: bf16[800,400], index: 5, kind: input, shape index: {}]   ;;  %s16132_s6 = inlined_call_operand.hbm [shape: bf16[400,200], index: 6, kind: input, shape index: {}]   ;;  %s16133_s7 = inlined_call_operand.vmem [shape: bf16[200,200], index: 7, kind: input, shape index: {}]   ;;  %s16134_s8 = inlined_call_operand.hbm [shape: bf16[200,100], index: 8, kind: input, shape index: {}]   ;;  %s16135_s9 = inlined_call_operand.hbm [shape: bf16[100,128], index: 9, kind: input, shape index: {}]   ;;  %s16136_s10 = inlined_call_operand.hbm [shape: f32[9,800], index: 10, kind: input, shape index: {}]   ;;  %s16137_s11 = inlined_call_operand.hbm [shape: f32[8,128], index: 11, kind: output, shape index: {}]  }
   0x1   :  { %17 = vsyncpa [#allocation6], 0 }
   0x2   :  { %18 = vsyncpa [#allocation9], 0 }
   0x3   :  { %19 = vsyncpa [#allocation12], 0 }
   0x4   :  { %20 = vsyncpa [#allocation15], 0  ;;  %s37_s19 = sshll.u32 %s16127_s1, 4  ;;  %s38_s19 = int_to_ptr.hbm [resolvable:$true] %s37_s19 }
   0x5   :  { %21 = vsyncpa [#allocation4], 0  ;;  %s12129_s20 = smov [#allocation5]   ;;  %s63_s24 = sshll.u32 %s16129_s3, 4  ;;  %s64_s24 = int_to_ptr.hbm [resolvable:$true] %s63_s24 }
   0x6   :  { %s39_s21 = sshll.u32 %s12129_s20, 4  ;;  %s12130_s25 = smov 128   ;;  %s40_s21 = int_to_ptr.vmem [resolvable:$true] %s39_s21 }
   0x7   :  { %s12131_s26 = smov 8   ;;  %s12132_s27 = smov [#allocation8]  }
   0x8   :  { %45 = dma.hbm_to_vmem [thread:$0]  %s38_s19, 512, %s40_s21, [#allocation6], %s12130_s25, %s12130_s25, %s12131_s26  }
   0x9   :  { %s65_s28 = sshll.u32 %s12132_s27, 4  ;;  %s12133_s1 = smov 448   ;;  %s66_s28 = int_to_ptr.vmem [resolvable:$true] %s65_s28 }
   0xa   :  { %s12134_s29 = smov 28   ;;  %s95_s13 = sshll.u32 %s16134_s8, 4  ;;  %s96_s13 = int_to_ptr.hbm [resolvable:$true] %s95_s13 }
   0xb   :  { %71 = dma.hbm_to_vmem [thread:$0]  %s64_s24, 22400, %s66_s28, [#allocation9], %s12133_s1, %s12133_s1, %s12134_s29  }
   0xc   :  { %s12135_s14 = smov [#allocation11]   ;;  %s27_s17 = sshll.u32 %s16126_s0, 4  ;;  %s28_s17 = int_to_ptr.hbm [resolvable:$true] %s27_s17 }
   0xd   :  { %s97_s3 = sshll.u32 %s12135_s14, 4  ;;  %s12136_s18 = smov 64   ;;  %s98_s3 = int_to_ptr.vmem [resolvable:$true] %s97_s3 }
   0xe   :  { %s12137_s19 = smov 4   ;;  %s12138_s20 = smov [#allocation2]  }
   0xf   :  { %103 = dma.hbm_to_vmem [thread:$0]  %s96_s13, 1600, %s98_s3, [#allocation12], %s12136_s18, %s12136_s18, %s12137_s19  }
  0x10   :  { %s29_s21 = sshll.u32 %s12138_s20, 4  ;;  %s50_s8 = sshll.u32 %s16128_s2, 4  ;;  %s30_s21 = int_to_ptr.vmem [resolvable:$true] %s29_s21  ;;  %s51_s8 = int_to_ptr.hbm [resolvable:$true] %s50_s8 }
  0x11   :  { %32 = dma.hbm_to_vmem [thread:$0]  %s28_s17, 128, %s30_s21, [#allocation3]  }
  0x12   :  { %s12139_s24 = smov [#allocation7]   ;;  %s80_s1 = sshll.u32 %s16132_s6, 4  ;;  %s81_s1 = int_to_ptr.hbm [resolvable:$true] %s80_s1 }
  0x13   :  { %s52_s27 = sshll.u32 %s12139_s24, 4  ;;  %s12140_s29 = smov 256   ;;  %s53_s27 = int_to_ptr.vmem [resolvable:$true] %s52_s27 }
  0x14   :  { %s12141_s30 = smov 16   ;;  %s12142_s12 = smov [#allocation10]  }
  0x15   :  { %58 = dma.hbm_to_vmem [thread:$0]  %s51_s8, 6400, %s53_s27, [#allocation6], %s12140_s29, %s12140_s29, %s12141_s30  }
  0x16   :  { %s82_s13 = sshll.u32 %s12142_s12, 4  ;;  %s108_s2 = sshll.u32 %s16135_s9, 4  ;;  %s83_s13 = int_to_ptr.vmem [resolvable:$true] %s82_s13  ;;  %s109_s2 = int_to_ptr.hbm [resolvable:$true] %s108_s2 }
  0x17   :  { %88 = dma.hbm_to_vmem [thread:$0]  %s81_s1, 6400, %s83_s13, [#allocation9], %s12130_s25, %s12130_s25, %s12131_s26  }
  0x18   :  { %s121_s6 = sshll.u32 %s16136_s10, 4  ;;  %s12143_s17 = smov [#allocation13]   ;;  %s122_s6 = int_to_ptr.hbm [resolvable:$true] %s121_s6 }
  0x19   :  { %s110_s20 = sshll.u32 %s12143_s17, 4  ;;  %s12144_s21 = smov [#allocation14]   ;;  %s111_s20 = int_to_ptr.vmem [resolvable:$true] %s110_s20 }
  0x1a   :  { %116 = dma.hbm_to_vmem [thread:$0]  %s109_s2, 832, %s111_s20, [#allocation12], %s12136_s18, %s12136_s18, %s12137_s19  }
  0x1b   :  { %s123_s9 = sshll.u32 %s12144_s21, 4  ;;  %s12145_s22 = smov 896   ;;  %s124_s9 = int_to_ptr.vmem [resolvable:$true] %s123_s9 }
  0x1c   :  { %s12146_s23 = smov 56  }
  0x1d   :  { %129 = dma.hbm_to_vmem [thread:$0]  %s122_s6, 1792, %s124_s9, [#allocation15], %s12145_s22, %s12145_s22, %s12146_s23  }
  0x1e   :  { %12117 = dma.done.wait [#allocation3], 128  }
  0x1f   :  { %12118 = vsyncadd [#allocation3], 4294967168 }
  0x20   :  { %12119 = dma.done.wait [#allocation6], 6912  }
  0x21   :  { %12120 = vsyncadd [#allocation6], 4294960384 }
  0x22   :  { %12121 = dma.done.wait [#allocation9], 28800  }
  0x23   :  { %12122 = vsyncadd [#allocation9], 4294938496 }
  0x24   :  { %12123 = dma.done.wait [#allocation12], 2432  }
  0x25   :  { %12124 = vsyncadd [#allocation12], 4294964864 }
  0x26   :  { %12125 = dma.done.wait [#allocation15], 1792  }
  0x27   :  { %12126 = vsyncadd [#allocation15], 4294965504  ;;  %vm197_vm0 = vcmask 1046528   ;;  %v7516_v0 = vld [vmem:[#allocation5 + $0x10] sm:$0xf]  ;;  %v280_v13 = vld [vmem:[#allocation7 + $0x180] sm:$0xff] }
  0x28   :  { %v11015_v1 = vld [vmem:[#allocation5 + $0x14] sm:$0x70]  ;;  %v11014_v2 = vld [vmem:[#allocation5 + $0x14] sm:$0xf]  ;;  %v7518_v4 = vld [vmem:[#allocation5 + $0x18] sm:$0x70]  ;;  %v441_v17 = vunpack.c.l.b16 %v280_v13  ;;  %v442_v18 = vunpack.c.h.b16 %v280_v13 }
  0x29   :  { %v7517_v3 = vor.u32 %v11015_v1, %v7516_v0  ;;  %v7508_v5 = vld [vmem:[#allocation5] sm:$0xf]  ;;  %v11013_v6 = vld [vmem:[#allocation5 + $0x4] sm:$0xf0]  ;;  %v7521_v7 = vor.u32 %v11014_v2, %v7518_v4  ;;  %v11012_v8 = vld [vmem:[#allocation5 + $0x4] sm:$0xf] }
  0x2a   :  { %v7510_v9 = vld [vmem:[#allocation5 + $0x8] sm:$0xf0]  ;;  %v7638_v11 = vld [vmem:[#allocation7 + $0xe0] sm:$0xf]  ;;  %v11046_v12 = vld [vmem:[#allocation7 + $0xec] sm:$0xf0]  ;;  %v7509_v15 = vor.u32 %v11013_v6, %v7508_v5  ;;  %v493_v23 = vpack.c.b16 %v441_v17, %v441_v17  ;;  %v494_v25 = vpack.c.b16 %v442_v18, %v442_v18 }
  0x2b   :  { %v199_v10 = vsel %vm197_vm0, %v7517_v3, 0  ;;  %v202_v14 = vsel %vm197_vm0, %v7521_v7, 0  ;;  %v163_v16 = vld [vmem:[#allocation2] sm:$0xff]  ;;  %v7513_v19 = vor.u32 %v11012_v8, %v7510_v9  ;;  %v7639_v20 = vor.u32 %v11046_v12, %v7638_v11  ;;  %v7622_v21 = vld [vmem:[#allocation7 + $0xc0] sm:$0xf]  ;;  %s7492_s10 = sshll.u32 %s16137_s11, 4  ;;  %s7493_s10 = int_to_ptr.hbm [resolvable:$true] %s7492_s10 }
  0x2c   :  { %210 = vmatpush.bf16.msra.mxu2 %v199_v10  ;;  %223 = vmatpush.bf16.msra.mxu1 %v202_v14  ;;  %vm549_vm1 = vcmask 1043456   ;;  %v11042_v22 = vld [vmem:[#allocation7 + $0xcc] sm:$0xf0]  ;;  %v7702_v24 = vld [vmem:[#allocation7 + $0x160] sm:$0xf]  ;;  %v169_v26 = vpack.c.bf16 %v163_v16, %v163_v16  ;;  %vm193_vm2 = vcmask 244736  }
  0x2d   :  { %v11062_v27 = vld [vmem:[#allocation7 + $0x16c] sm:$0xf0]  ;;  %v11044_v28 = vld [vmem:[#allocation7 + $0xe4] sm:$0xf]  ;;  %v7640_v29 = vld [vmem:[#allocation7 + $0xf0] sm:$0xf0]  ;;  %v7623_v33 = vor.u32 %v11042_v22, %v7622_v21 }
  0x2e   :  { %v551_v30 = vsel %vm549_vm1, %v493_v23, 0  ;;  %v7643_v31 = vor.u32 %v11044_v28, %v7640_v29  ;;  %v554_v32 = vsel %vm549_vm1, %v494_v25, 0  ;;  %v11040_v34 = vld [vmem:[#allocation7 + $0xc4] sm:$0xf]  ;;  %v7624_v35 = vld [vmem:[#allocation7 + $0xd0] sm:$0xf0]  ;;  %v7703_v38 = vor.u32 %v11062_v27, %v7702_v24 }
  0x2f   :  { %578 = vmatpush.bf16.msra.mxu3 %v551_v30  ;;  %v7606_v36 = vld [vmem:[#allocation7 + $0xa0] sm:$0xf]  ;;  %v11038_v37 = vld [vmem:[#allocation7 + $0xac] sm:$0xf0]  ;;  %v7627_v40 = vor.u32 %v11040_v34, %v7624_v35  ;;  %v11036_v42 = vld [vmem:[#allocation7 + $0xa4] sm:$0xf] }
  0x30   :  { %211 = vmatpush.bf16.msra.mxu2 %v7509_v15  ;;  %224 = vmatpush.bf16.msra.mxu1 %v7513_v19  ;;  %v7686_v39 = vld [vmem:[#allocation7 + $0x140] sm:$0xf]  ;;  %v11058_v41 = vld [vmem:[#allocation7 + $0x14c] sm:$0xf0]  ;;  %v7608_v43 = vld [vmem:[#allocation7 + $0xb0] sm:$0xf0]  ;;  %v7607_v45 = vor.u32 %v11038_v37, %v7606_v36 }
  0x31   :  { %588 = vmatpush.bf16.msra.mxu0 %v7643_v31  ;;  %v11060_v44 = vld [vmem:[#allocation7 + $0x164] sm:$0xf]  ;;  %v7590_v46 = vld [vmem:[#allocation7 + $0x80] sm:$0xf]  ;;  %v11034_v47 = vld [vmem:[#allocation7 + $0x8c] sm:$0xf0]  ;;  %v7687_v49 = vor.u32 %v11058_v41, %v7686_v39  ;;  %v7611_v52 = vor.u32 %v11036_v42, %v7608_v43 }
  0x32   :  { %v7704_v48 = vld [vmem:[#allocation7 + $0x170] sm:$0xf0]  ;;  %v7670_v50 = vld [vmem:[#allocation7 + $0x120] sm:$0xf]  ;;  %v11054_v51 = vld [vmem:[#allocation7 + $0x12c] sm:$0xf0]  ;;  %v7591_v59 = vor.u32 %v11034_v47, %v7590_v46 }
  0x33   :  { %7522 = vmatmul.msk.bf16.vlgmr.msra.gmra.mxu2 %vm193_vm2, %v169_v26  ;;  %7523 = vmatmul.msk.bf16.vlgmr.msra.gmra.mxu1 %vm193_vm2, %v169_v26  ;;  %v7707_v53 = vor.u32 %v11060_v44, %v7704_v48  ;;  %v11032_v54 = vld [vmem:[#allocation7 + $0x84] sm:$0xf]  ;;  %v7592_v55 = vld [vmem:[#allocation7 + $0x90] sm:$0xf0]  ;;  %v7574_v60 = vld [vmem:[#allocation7 + $0x60] sm:$0xf]  ;;  %v7671_v62 = vor.u32 %v11054_v51, %v7670_v50 }
  0x34   :  { %562 = vmatpush.bf16.msrb.mxu2 %v7639_v20  ;;  %604 = vmatpush.bf16.msrb.mxu1 %v554_v32  ;;  %v11056_v56 = vld [vmem:[#allocation7 + $0x144] sm:$0xf]  ;;  %v7688_v57 = vld [vmem:[#allocation7 + $0x150] sm:$0xf0]  ;;  %v11030_v61 = vld [vmem:[#allocation7 + $0x6c] sm:$0xf0]  ;;  %v7595_v1 = vor.u32 %v11032_v54, %v7592_v55 }
  0x35   :  { %579 = vmatpush.bf16.msra.mxu3 %v7703_v38  ;;  %589 = vmatpush.bf16.msra.mxu0 %v7627_v40  ;;  %v7691_v58 = vor.u32 %v11056_v56, %v7688_v57  ;;  %v7654_v63 = vld [vmem:[#allocation7 + $0x100] sm:$0xf]  ;;  %v11050_v0 = vld [vmem:[#allocation7 + $0x10c] sm:$0xf0]  ;;  %v11052_v2 = vld [vmem:[#allocation7 + $0x124] sm:$0xf]  ;;  %v7575_v9 = vor.u32 %v11030_v61, %v7574_v60 }
  0x36   :  { %v11028_v3 = vld [vmem:[#allocation7 + $0x64] sm:$0xf]  ;;  %v7576_v4 = vld [vmem:[#allocation7 + $0x70] sm:$0xf0]  ;;  %v7646_v6 = vld [vmem:[#allocation7 + $0xe8] sm:$0xf]  ;;  %v7655_v12 = vor.u32 %v11050_v0, %v7654_v63 }
  0x37   :  { %v7672_v5 = vld [vmem:[#allocation7 + $0x130] sm:$0xf0]  ;;  %v11047_v7 = vld [vmem:[#allocation7 + $0xf4] sm:$0xf0]  ;;  %v7558_v10 = vld [vmem:[#allocation7 + $0x40] sm:$0xf]  ;;  %v7579_v13 = vor.u32 %v11028_v3, %v7576_v4 }
  0x38   :  { %563 = vmatpush.bf16.msrb.mxu2 %v7623_v33  ;;  %605 = vmatpush.bf16.msrb.mxu1 %v7707_v53  ;;  %v7675_v8 = vor.u32 %v11052_v2, %v7672_v5  ;;  %v11026_v11 = vld [vmem:[#allocation7 + $0x4c] sm:$0xf0]  ;;  %v7647_v14 = vor.u32 %v11047_v7, %v7646_v6  ;;  %v7630_v15 = vld [vmem:[#allocation7 + $0xc8] sm:$0xf]  ;;  %v11043_v16 = vld [vmem:[#allocation7 + $0xd4] sm:$0xf0] }
  0x39   :  { %580 = vmatpush.bf16.msra.mxu3 %v7687_v49  ;;  %590 = vmatpush.bf16.msra.mxu0 %v7611_v52  ;;  %v7559_v17 = vor.u32 %v11026_v11, %v7558_v10  ;;  %v7542_v18 = vld [vmem:[#allocation7 + $0x20] sm:$0xf]  ;;  %v11022_v19 = vld [vmem:[#allocation7 + $0x2c] sm:$0xf0]  ;;  %v7631_v20 = vor.u32 %v11043_v16, %v7630_v15  ;;  %v11045_v24 = vld [vmem:[#allocation7 + $0xec] sm:$0xf] }
  0x3a   :  { %v7543_v21 = vor.u32 %v11022_v19, %v7542_v18  ;;  %v7526_v22 = vld [vmem:[#allocation7] sm:$0xf]  ;;  %v11018_v23 = vld [vmem:[#allocation7 + $0xc] sm:$0xf0]  ;;  %v7648_v25 = vld [vmem:[#allocation7 + $0xf8] sm:$0xf0] }
  0x3b   :  { %v7527_v26 = vor.u32 %v11018_v23, %v7526_v22  ;;  %v7651_v27 = vor.u32 %v11045_v24, %v7648_v25  ;;  %v7614_v28 = vld [vmem:[#allocation7 + $0xa8] sm:$0xf]  ;;  %v11039_v29 = vld [vmem:[#allocation7 + $0xb4] sm:$0xf0]  ;;  %v11024_v31 = vld [vmem:[#allocation7 + $0x44] sm:$0xf] }
  0x3c   :  { %564 = vmatpush.bf16.msrb.mxu2 %v7607_v45  ;;  %606 = vmatpush.bf16.msrb.mxu1 %v7691_v58  ;;  %v7615_v30 = vor.u32 %v11039_v29, %v7614_v28  ;;  %v7560_v32 = vld [vmem:[#allocation7 + $0x50] sm:$0xf0]  ;;  %v281_v33 = vld [vmem:[#allocation7 + $0x188] sm:$0xff]  ;;  %v7632_v36 = vld [vmem:[#allocation7 + $0xd8] sm:$0xf0]  ;;  %vm545_vm3 = vcmask 588800  }
  0x3d   :  { %581 = vmatpush.bf16.msra.mxu3 %v7671_v62  ;;  %591 = vmatpush.bf16.msra.mxu0 %v7595_v1  ;;  %v7563_v34 = vor.u32 %v11024_v31, %v7560_v32  ;;  %v11041_v35 = vld [vmem:[#allocation7 + $0xcc] sm:$0xf]  ;;  %v443_v37 = vunpack.c.l.b16 %v281_v33  ;;  %v11048_v39 = vld [vmem:[#allocation7 + $0x104] sm:$0xf]  ;;  %v7656_v40 = vld [vmem:[#allocation7 + $0x110] sm:$0xf0]  ;;  %v444_v55 = vunpack.c.h.b16 %v281_v33 }
  0x3e   :  { %v7635_v38 = vor.u32 %v11041_v35, %v7632_v36  ;;  %v7659_v41 = vor.u32 %v11048_v39, %v7656_v40  ;;  %v7598_v42 = vld [vmem:[#allocation7 + $0x88] sm:$0xf]  ;;  %v11035_v43 = vld [vmem:[#allocation7 + $0x94] sm:$0xf0]  ;;  %v11020_v46 = vld [vmem:[#allocation7 + $0x24] sm:$0xf] }
  0x3f   :  { %v495_v44 = vpack.c.b16 %v443_v37, %v443_v37  ;;  %v7599_v45 = vor.u32 %v11035_v43, %v7598_v42  ;;  %v7544_v47 = vld [vmem:[#allocation7 + $0x30] sm:$0xf0]  ;;  %v11037_v50 = vld [vmem:[#allocation7 + $0xac] sm:$0xf]  ;;  %v7616_v51 = vld [vmem:[#allocation7 + $0xb8] sm:$0xf0]  ;;  %v496_v63 = vpack.c.b16 %v444_v55, %v444_v55 }
  0x40   :  { %565 = vmatpush.bf16.msrb.mxu2 %v7591_v59  ;;  %607 = vmatpush.bf16.msrb.mxu1 %v7675_v8  ;;  %v7547_v49 = vor.u32 %v11020_v46, %v7544_v47  ;;  %v7619_v52 = vor.u32 %v11037_v50, %v7616_v51  ;;  %v7582_v53 = vld [vmem:[#allocation7 + $0x68] sm:$0xf]  ;;  %v11031_v54 = vld [vmem:[#allocation7 + $0x74] sm:$0xf0]  ;;  %v11016_v60 = vld [vmem:[#allocation7 + $0x4] sm:$0xf] }
  0x41   :  { %582 = vmatpush.bf16.msra.mxu3 %v7655_v12  ;;  %592 = vmatpush.bf16.msra.mxu0 %v7579_v13  ;;  %v557_v48 = vsel %vm549_vm1, %v495_v44, 0  ;;  %v7583_v56 = vor.u32 %v11031_v54, %v7582_v53  ;;  %v7710_v57 = vld [vmem:[#allocation7 + $0x168] sm:$0xf]  ;;  %v11063_v58 = vld [vmem:[#allocation7 + $0x174] sm:$0xf0]  ;;  %v560_v3 = vsel %vm549_vm1, %v496_v63, 0 }
  0x42   :  { %v7711_v59 = vor.u32 %v11063_v58, %v7710_v57  ;;  %v7528_v61 = vld [vmem:[#allocation7 + $0x10] sm:$0xf0]  ;;  %v11033_v62 = vld [vmem:[#allocation7 + $0x8c] sm:$0xf]  ;;  %v7600_v1 = vld [vmem:[#allocation7 + $0x98] sm:$0xf0] }
  0x43   :  { %v7531_v0 = vor.u32 %v11016_v60, %v7528_v61  ;;  %v7603_v2 = vor.u32 %v11033_v62, %v7600_v1  ;;  %v7566_v4 = vld [vmem:[#allocation7 + $0x48] sm:$0xf]  ;;  %v11027_v5 = vld [vmem:[#allocation7 + $0x54] sm:$0xf0]  ;;  %v11029_v10 = vld [vmem:[#allocation7 + $0x6c] sm:$0xf] }
  0x44   :  { %566 = vmatpush.bf16.msrb.mxu2 %v7575_v9  ;;  %608 = vmatpush.bf16.msrb.mxu1 %v7659_v41  ;;  %v7567_v6 = vor.u32 %v11027_v5, %v7566_v4  ;;  %v7694_v7 = vld [vmem:[#allocation7 + $0x148] sm:$0xf]  ;;  %v11059_v8 = vld [vmem:[#allocation7 + $0x154] sm:$0xf0]  ;;  %v7584_v11 = vld [vmem:[#allocation7 + $0x78] sm:$0xf0] }
  0x45   :  { %614 = vmatpush.bf16.msrb.mxu3 %v7647_v14  ;;  %593 = vmatpush.bf16.msra.mxu0 %v7563_v34  ;;  %v7695_v9 = vor.u32 %v11059_v8, %v7694_v7  ;;  %v11061_v12 = vld [vmem:[#allocation7 + $0x16c] sm:$0xf]  ;;  %v7587_v13 = vor.u32 %v11029_v10, %v7584_v11  ;;  %v7712_v14 = vld [vmem:[#allocation7 + $0x178] sm:$0xf0]  ;;  %v7550_v16 = vld [vmem:[#allocation7 + $0x28] sm:$0xf] }
  0x46   :  { %v7715_v15 = vor.u32 %v11061_v12, %v7712_v14  ;;  %v7678_v18 = vld [vmem:[#allocation7 + $0x128] sm:$0xf]  ;;  %v7568_v22 = vld [vmem:[#allocation7 + $0x58] sm:$0xf0]  ;;  %v11057_v25 = vld [vmem:[#allocation7 + $0x14c] sm:$0xf] }
  0x47   :  { %v11019_v29 = vld [vmem:[#allocation7 + $0x14] sm:$0xf0]  ;;  %v11021_v34 = vld [vmem:[#allocation7 + $0x2c] sm:$0xf]  ;;  %v7552_v35 = vld [vmem:[#allocation7 + $0x38] sm:$0xf0] }
  0x48   :  { %567 = vmatpush.bf16.msrb.mxu2 %v7559_v17  ;;  %630 = vmatpush.bf16.msra.mxu1 %v557_v48  ;;  %v11023_v17 = vld [vmem:[#allocation7 + $0x34] sm:$0xf0]  ;;  %v11053_v36 = vld [vmem:[#allocation7 + $0x12c] sm:$0xf]  ;;  %v7680_v37 = vld [vmem:[#allocation7 + $0x138] sm:$0xf0] }
  0x49   :  { %615 = vmatpush.bf16.msrb.mxu3 %v7631_v20  ;;  %594 = vmatpush.bf16.msra.mxu0 %v7547_v49  ;;  %v7551_v19 = vor.u32 %v11023_v17, %v7550_v16  ;;  %v11055_v20 = vld [vmem:[#allocation7 + $0x134] sm:$0xf0]  ;;  %v7683_v39 = vor.u32 %v11053_v36, %v7680_v37  ;;  %v11017_v40 = vld [vmem:[#allocation7 + $0xc] sm:$0xf]  ;;  %v7536_v41 = vld [vmem:[#allocation7 + $0x18] sm:$0xf0] }
  0x4a   :  { %v7679_v23 = vor.u32 %v11055_v20, %v7678_v18  ;;  %v11051_v31 = vld [vmem:[#allocation7 + $0x114] sm:$0xf0]  ;;  %v11049_v42 = vld [vmem:[#allocation7 + $0x10c] sm:$0xf]  ;;  %v7539_v43 = vor.u32 %v11017_v40, %v7536_v41  ;;  %v7664_v44 = vld [vmem:[#allocation7 + $0x118] sm:$0xf0] }
  0x4b   :  { %v168_v46 = vld [vmem:[#allocation14] ss:$8 sm:$0x3]  ;;  %v11116_v51 = vld [vmem:[#allocation8 + $0x1a0] sm:$0xf0]  ;;  %vm1793_vm4 = vcmask 130048  }
  0x4c   :  { %568 = vmatpush.bf16.msrb.mxu2 %v7543_v21  ;;  %631 = vmatpush.bf16.msra.mxu1 %v7711_v59  ;;  %v11025_v21 = vld [vmem:[#allocation7 + $0x4c] sm:$0xf]  ;;  %v172_v47 = vperm.slane %v168_v46, 1  ;;  %v7918_v49 = vld [vmem:[#allocation8 + $0x188] sm:$0xf]  ;;  %v171_v54 = vperm.slane %v168_v46, 0 }
  0x4d   :  { %616 = vmatpush.bf16.msrb.mxu3 %v7615_v30  ;;  %595 = vmatpush.bf16.msra.mxu0 %v7531_v0  ;;  %v7571_v24 = vor.u32 %v11025_v21, %v7568_v22  ;;  %v7662_v30 = vld [vmem:[#allocation7 + $0x108] sm:$0xf]  ;;  %v11172_v53 = vld [vmem:[#allocation8 + $0x360] sm:$0xf0]  ;;  %v7890_v60 = vld [vmem:[#allocation8 + $0x150] sm:$0xf] }
  0x4e   :  { %v7663_v33 = vor.u32 %v11051_v31, %v7662_v30  ;;  %v11109_v62 = vld [vmem:[#allocation8 + $0x168] sm:$0xf0]  ;;  %v8114_v63 = vld [vmem:[#allocation8 + $0x310] sm:$0xf]  ;;  %v7862_v4 = vld [vmem:[#allocation8 + $0x118] sm:$0xf] }
  0x4f   :  { %v11165_v0 = vld [vmem:[#allocation8 + $0x328] sm:$0xf0]  ;;  %v11102_v5 = vld [vmem:[#allocation8 + $0x130] sm:$0xf0]  ;;  %v8086_v8 = vld [vmem:[#allocation8 + $0x2d8] sm:$0xf] }
  0x50   :  { %569 = vmatpush.bf16.msrb.mxu2 %v7527_v26  ;;  %632 = vmatpush.bf16.msra.mxu1 %v7695_v9  ;;  %v7696_v26 = vld [vmem:[#allocation7 + $0x158] sm:$0xf0]  ;;  %v11158_v9 = vld [vmem:[#allocation8 + $0x2f0] sm:$0xf0]  ;;  %v8366_v10 = vld [vmem:[#allocation8 + $0x508] sm:$0xf]  ;;  %v7863_v14 = vor.u32 %v11102_v5, %v7862_v4 }
  0x51   :  { %617 = vmatpush.bf16.msrb.mxu3 %v7599_v45  ;;  %656 = vmatpush.bf16.msrb.mxu0 %v560_v3  ;;  %v7699_v28 = vor.u32 %v11057_v25, %v7696_v26  ;;  %v7667_v45 = vor.u32 %v11049_v42, %v7664_v44  ;;  %v7891_v3 = vor.u32 %v11109_v62, %v7890_v60  ;;  %v11228_v11 = vld [vmem:[#allocation8 + $0x520] sm:$0xf0]  ;;  %v11095_v17 = vld [vmem:[#allocation8 + $0xf8] sm:$0xf0]  ;;  %v8058_v18 = vld [vmem:[#allocation8 + $0x2a0] sm:$0xf] }
  0x52   :  { %v8367_v12 = vor.u32 %v11228_v11, %v8366_v10  ;;  %v8087_v16 = vor.u32 %v11158_v9, %v8086_v8  ;;  %v7806_v21 = vld [vmem:[#allocation8 + $0xa8] sm:$0xf]  ;;  %v11144_v25 = vld [vmem:[#allocation8 + $0x280] sm:$0xf0]  ;;  %v8002_v30 = vld [vmem:[#allocation8 + $0x230] sm:$0xf] }
  0x53   :  { %v11137_v31 = vld [vmem:[#allocation8 + $0x248] sm:$0xf0]  ;;  %v7974_v36 = vld [vmem:[#allocation8 + $0x1f8] sm:$0xf]  ;;  %v11130_v37 = vld [vmem:[#allocation8 + $0x210] sm:$0xf0] }
  0x54   :  { %640 = vmatpush.bf16.msra.mxu2 %v7651_v27  ;;  %v7534_v27 = vld [vmem:[#allocation7 + $0x8] sm:$0xf]  ;;  %633 = vmatpush.bf16.msra.mxu1 %v7679_v23  ;;  %v11088_v23 = vld [vmem:[#allocation8 + $0xc0] sm:$0xf0]  ;;  %v11067_v40 = vld [vmem:[#allocation8 + $0x18] sm:$0xf0]  ;;  %v7975_v41 = vor.u32 %v11130_v37, %v7974_v36 }
  0x55   :  { %618 = vmatpush.bf16.msrb.mxu3 %v7583_v56  ;;  %657 = vmatpush.bf16.msrb.mxu0 %v7715_v15  ;;  %v7535_v32 = vor.u32 %v11019_v29, %v7534_v27  ;;  %v7919_v56 = vor.u32 %v11116_v51, %v7918_v49  ;;  %v7834_v15 = vld [vmem:[#allocation8 + $0xe0] sm:$0xf]  ;;  %v7807_v26 = vor.u32 %v11088_v23, %v7806_v21  ;;  %v7778_v27 = vld [vmem:[#allocation8 + $0x70] sm:$0xf]  ;;  %v11081_v29 = vld [vmem:[#allocation8 + $0x88] sm:$0xf0] }
  0x56   :  { %v7835_v20 = vor.u32 %v11095_v17, %v7834_v15  ;;  %v11113_v42 = vld [vmem:[#allocation8 + $0x18c] sm:$0xf]  ;;  %v11123_v44 = vld [vmem:[#allocation8 + $0x1d8] sm:$0xf0]  ;;  %v11218_v60 = vld [vmem:[#allocation8 + $0x4d4] sm:$0xf] }
  0x57   :  { %v11225_v46 = vld [vmem:[#allocation8 + $0x50c] sm:$0xf]  ;;  %v8340_v62 = vld [vmem:[#allocation8 + $0x4ec] sm:$0xf0]  ;;  %v11214_v4 = vld [vmem:[#allocation8 + $0x4b0] sm:$0xf0] }
  0x58   :  { %641 = vmatpush.bf16.msra.mxu2 %v7635_v38  ;;  %v7555_v38 = vor.u32 %v11021_v34, %v7552_v35  ;;  %634 = vmatpush.bf16.msra.mxu1 %v7663_v33  ;;  %v7750_v33 = vld [vmem:[#allocation8 + $0x38] sm:$0xf]  ;;  %v8003_v34 = vor.u32 %v11137_v31, %v8002_v30  ;;  %v11074_v35 = vld [vmem:[#allocation8 + $0x50] sm:$0xf0]  ;;  %v8394_v5 = vld [vmem:[#allocation8 + $0x540] sm:$0xf] }
  0x59   :  { %619 = vmatpush.bf16.msrb.mxu3 %v7567_v6  ;;  %658 = vmatpush.bf16.msrb.mxu0 %v7699_v28  ;;  %v8115_v6 = vor.u32 %v11165_v0, %v8114_v63  ;;  %v11092_v63 = vld [vmem:[#allocation8 + $0xe4] sm:$0xf]  ;;  %v7836_v0 = vld [vmem:[#allocation8 + $0xfc] sm:$0xf0]  ;;  %v11211_v8 = vld [vmem:[#allocation8 + $0x49c] sm:$0xf] }
  0x5a   :  { %v8312_v9 = vld [vmem:[#allocation8 + $0x4b4] sm:$0xf0]  ;;  %v8282_v17 = vld [vmem:[#allocation8 + $0x460] sm:$0xf]  ;;  %v11204_v21 = vld [vmem:[#allocation8 + $0x464] sm:$0xf] }
  0x5b   :  { %v8315_v11 = vor.u32 %v11211_v8, %v8312_v9  ;;  %v11078_v23 = vld [vmem:[#allocation8 + $0x74] sm:$0xf]  ;;  %v8254_v30 = vld [vmem:[#allocation8 + $0x428] sm:$0xf]  ;;  %v11200_v31 = vld [vmem:[#allocation8 + $0x440] sm:$0xf0] }
  0x5c   :  { %642 = vmatpush.bf16.msra.mxu2 %v7619_v52  ;;  %v8142_v52 = vld [vmem:[#allocation8 + $0x348] sm:$0xf]  ;;  %v7752_v36 = vld [vmem:[#allocation8 + $0x54] sm:$0xf0]  ;;  %v11232_v8 = vld [vmem:[#allocation8 + $0x544] sm:$0xf] }
  0x5d   :  { %620 = vmatpush.bf16.msrb.mxu3 %v7551_v19  ;;  %659 = vmatpush.bf16.msrb.mxu0 %v7683_v39  ;;  %v8143_v57 = vor.u32 %v11172_v53, %v8142_v52  ;;  %v11151_v19 = vld [vmem:[#allocation8 + $0x2b8] sm:$0xf0]  ;;  %v7722_v39 = vld [vmem:[#allocation8] sm:$0xf]  ;;  %v11106_v52 = vld [vmem:[#allocation8 + $0x154] sm:$0xf] }
  0x5e   :  { %v8059_v22 = vor.u32 %v11151_v19, %v8058_v18  ;;  %v7892_v53 = vld [vmem:[#allocation8 + $0x16c] sm:$0xf0]  ;;  %v11207_v18 = vld [vmem:[#allocation8 + $0x478] sm:$0xf0]  ;;  %v8396_v9 = vld [vmem:[#allocation8 + $0x55c] sm:$0xf0] }
  0x5f   :  { %vm4394_vm5 = vcmask 261120   ;;  %vm7467_vm6 = vcmask 1041408   ;;  %vm7463_vm7 = vcmask 818176  }
  0x60   :  { %643 = vmatpush.bf16.msra.mxu2 %v7603_v2 }
  0x61   :  { %621 = vmatpush.bf16.msrb.mxu3 %v7535_v32  ;;  %660 = vmatpush.bf16.msrb.mxu0 %v7667_v45  ;;  %v7779_v32 = vor.u32 %v11081_v29, %v7778_v27  ;;  %v7920_v45 = vld [vmem:[#allocation8 + $0x1a4] sm:$0xf0]  ;;  %v8116_v27 = vld [vmem:[#allocation8 + $0x32c] sm:$0xf0] }
  0x64   :  { %644 = vmatpush.bf16.msra.mxu2 %v7587_v13 }
  0x68   :  { %645 = vmatpush.bf16.msra.mxu2 %v7571_v24  ;;  %v8030_v24 = vld [vmem:[#allocation8 + $0x268] sm:$0xf] }
  0x69   :  { %v8031_v28 = vor.u32 %v11144_v25, %v8030_v24  ;;  %v7780_v25 = vld [vmem:[#allocation8 + $0x8c] sm:$0xf0] }
  0x6c   :  { %646 = vmatpush.bf16.msra.mxu2 %v7555_v38  ;;  %v7751_v38 = vor.u32 %v11074_v35, %v7750_v33  ;;  %v8255_v33 = vor.u32 %v11200_v31, %v8254_v30  ;;  %v11071_v35 = vld [vmem:[#allocation8 + $0x3c] sm:$0xf] }
  0x70   :  { %647 = vmatpush.bf16.msra.mxu2 %v7539_v43  ;;  %v7946_v43 = vld [vmem:[#allocation8 + $0x1c0] sm:$0xf] }
  0x71   :  { %v7947_v49 = vor.u32 %v11123_v44, %v7946_v43  ;;  %v11193_v43 = vld [vmem:[#allocation8 + $0x408] sm:$0xf0]  ;;  %v11190_v44 = vld [vmem:[#allocation8 + $0x3f4] sm:$0xf] }
  0xb0   :  { %v226_v48 = vpop.f32.mrf.mxu1 }
  0xb1   :  { %v227_v50 = vadd.f32 %v226_v48, %v172_v47  ;;  %v8368_v47 = vld [vmem:[#allocation8 + $0x524] sm:$0xf0]  ;;  %v7723_v48 = vor.u32 %v11067_v40, %v7722_v39  ;;  %v11155_v39 = vld [vmem:[#allocation8 + $0x2dc] sm:$0xf]  ;;  %v8088_v40 = vld [vmem:[#allocation8 + $0x2f4] sm:$0xf0] }
  0xb2   :  { %v8371_v51 = vor.u32 %v11225_v46, %v8368_v47  ;;  %v8228_v46 = vld [vmem:[#allocation8 + $0x40c] sm:$0xf0]  ;;  %v11064_v47 = vld [vmem:[#allocation8 + $0x4] sm:$0xf] }
  0xb3   :  { %v231_v55 = vmax.f32 %v227_v50, 0.0  ;;  %v7923_v50 = vor.u32 %v11113_v42, %v7920_v45  ;;  %v8226_v42 = vld [vmem:[#allocation8 + $0x3f0] sm:$0xf] }
  0xb4   :  { %v8227_v45 = vor.u32 %v11193_v43, %v8226_v42  ;;  %v8122_v42 = vld [vmem:[#allocation8 + $0x318] sm:$0xf]  ;;  %v11166_v43 = vld [vmem:[#allocation8 + $0x330] sm:$0xf0] }
  0xb5   :  { %v285_v58 = vpack.c.bf16 %v231_v55, %v231_v55  ;;  %v11099_v55 = vld [vmem:[#allocation8 + $0x11c] sm:$0xf] }
  0xb6   :  { %v213_v59 = vpop.f32.mrf.mxu2 }
  0xb7   :  { %v214_v61 = vadd.f32 %v213_v59, %v171_v54  ;;  %7716 = vmatmul.msk.bf16.vlgmr.msra.gmra.mxu3 %vm545_vm3, %v285_v58  ;;  %7717 = vmatmul.msk.bf16.vlgmr.msrb.gmra.mxu1 %vm545_vm3, %v285_v58  ;;  %v7895_v54 = vor.u32 %v11106_v52, %v7892_v53  ;;  %v11221_v59 = vld [vmem:[#allocation8 + $0x4e8] sm:$0xf0]  ;;  %v8060_v52 = vld [vmem:[#allocation8 + $0x2bc] sm:$0xf0] }
  0xb8   :  { %v228_v2 = vpop.f32.mrf.mxu1  ;;  %1797 = vmatpush.bf16.msrb.mxu1 %v7919_v56  ;;  %1810 = vmatpush.bf16.msra.mxu3 %v8143_v57  ;;  %v7864_v56 = vld [vmem:[#allocation8 + $0x134] sm:$0xf0] }
  0xb9   :  { %v230_v1 = vmax.f32 %v214_v61, 0.0  ;;  %v7867_v57 = vor.u32 %v11099_v55, %v7864_v56  ;;  %v7839_v2 = vor.u32 %v11092_v63, %v7836_v0  ;;  %v11186_v55 = vld [vmem:[#allocation8 + $0x3d0] sm:$0xf0]  ;;  %v11183_v56 = vld [vmem:[#allocation8 + $0x3bc] sm:$0xf] }
  0xba   :  { %v8170_v63 = vld [vmem:[#allocation8 + $0x380] sm:$0xf]  ;;  %v11179_v0 = vld [vmem:[#allocation8 + $0x398] sm:$0xf0] }
  0xbb   :  { %v284_v7 = vpack.c.bf16 %v230_v1, %v230_v1  ;;  %v8343_v1 = vor.u32 %v11218_v60, %v8340_v62 }
  0xbc   :  { %1798 = vmatpush.bf16.msrb.mxu1 %v7891_v3  ;;  %1811 = vmatpush.bf16.msra.mxu3 %v8115_v6  ;;  %v8310_v3 = vld [vmem:[#allocation8 + $0x498] sm:$0xf] }
  0xbd   :  { %570 = vmatmul.bf16.vlgmr.msrb.gmra.mxu2 %v284_v7  ;;  %596 = vmatmul.bf16.vlgmr.msra.gmra.mxu0 %v284_v7  ;;  %v8311_v6 = vor.u32 %v11214_v4, %v8310_v3  ;;  %v8172_v3 = vld [vmem:[#allocation8 + $0x39c] sm:$0xf0]  ;;  %v11134_v4 = vld [vmem:[#allocation8 + $0x234] sm:$0xf] }
  0xbe   :  { %v215_v13 = vpop.f32.mrf.mxu2  ;;  %1823 = vmatpush.bf16.msra.mxu0 %v8367_v12  ;;  %v11085_v12 = vld [vmem:[#allocation8 + $0xac] sm:$0xf] }
  0xbf   :  { %v7808_v13 = vld [vmem:[#allocation8 + $0xc4] sm:$0xf0] }
  0xc0   :  { %1799 = vmatpush.bf16.msrb.mxu1 %v7863_v14  ;;  %1812 = vmatpush.bf16.msra.mxu3 %v8087_v16  ;;  %v11169_v14 = vld [vmem:[#allocation8 + $0x34c] sm:$0xf]  ;;  %v7811_v15 = vor.u32 %v11085_v12, %v7808_v13  ;;  %v8144_v16 = vld [vmem:[#allocation8 + $0x364] sm:$0xf0]  ;;  %v7976_v12 = vld [vmem:[#allocation8 + $0x214] sm:$0xf0] }
  0xc1   :  { %v8147_v19 = vor.u32 %v11169_v14, %v8144_v16  ;;  %v283_v13 = vld [vmem:[#allocation14 + $0x1] ss:$8 sm:$0xf] }
  0xc2   :  { %v288_v16 = vperm.slane %v283_v13, 1 }
  0xc4   :  { %1800 = vmatpush.bf16.msrb.mxu1 %v7835_v20  ;;  %1813 = vmatpush.bf16.msra.mxu3 %v8059_v22  ;;  %v8283_v20 = vor.u32 %v11207_v18, %v8282_v17  ;;  %v8284_v22 = vld [vmem:[#allocation8 + $0x47c] sm:$0xf0]  ;;  %v11120_v17 = vld [vmem:[#allocation8 + $0x1c4] sm:$0xf] }
  0xc5   :  { %v8287_v24 = vor.u32 %v11204_v21, %v8284_v22  ;;  %v7948_v18 = vld [vmem:[#allocation8 + $0x1dc] sm:$0xf0] }
  0xc7   :  { %622 = vmatmul.bf16.vlgmr.msrb.gmra.mxu3 %v284_v7  ;;  %7718 = vmatmul.msk.bf16.vlgmr.msra.gmra.mxu1 %vm545_vm3, %v285_v58 }
  0xc8   :  { %1801 = vmatpush.bf16.msrb.mxu1 %v7807_v26  ;;  %1814 = vmatpush.bf16.msra.mxu3 %v8031_v28  ;;  %v11162_v26 = vld [vmem:[#allocation8 + $0x314] sm:$0xf]  ;;  %v7783_v28 = vor.u32 %v11078_v23, %v7780_v25  ;;  %v287_v25 = vperm.slane %v283_v13, 0 }
  0xc9   :  { %v8119_v29 = vor.u32 %v11162_v26, %v8116_v27  ;;  %v8402_v26 = vld [vmem:[#allocation8 + $0x548] sm:$0xf]  ;;  %v11236_v27 = vld [vmem:[#allocation8 + $0x560] sm:$0xf0] }
  0xca   :  { %v8403_v30 = vor.u32 %v11236_v27, %v8402_v26  ;;  %v8010_v26 = vld [vmem:[#allocation8 + $0x238] sm:$0xf] }
  0xcc   :  { %1802 = vmatpush.bf16.msrb.mxu1 %v7779_v32  ;;  %1815 = vmatpush.bf16.msra.mxu3 %v8003_v34  ;;  %v11197_v32 = vld [vmem:[#allocation8 + $0x42c] sm:$0xf]  ;;  %v8256_v34 = vld [vmem:[#allocation8 + $0x444] sm:$0xf0] }
  0xcd   :  { %648 = vmatmul.bf16.vlgmr.msra.gmra.mxu2 %v284_v7  ;;  %7719 = vmatmul.msk.bf16.vlgmr.msrb.gmra.mxu0 %vm545_vm3, %v285_v58  ;;  %v8338_v58 = vld [vmem:[#allocation8 + $0x4d0] sm:$0xf]  ;;  %v11235_v7 = vld [vmem:[#allocation8 + $0x558] sm:$0xf0]  ;;  %v8259_v37 = vor.u32 %v11197_v32, %v8256_v34 }
  0xce   :  { %v8339_v61 = vor.u32 %v11221_v59, %v8338_v58  ;;  %v8395_v10 = vor.u32 %v11235_v7, %v8394_v5  ;;  %v8200_v58 = vld [vmem:[#allocation8 + $0x3d4] sm:$0xf0]  ;;  %v11141_v59 = vld [vmem:[#allocation8 + $0x26c] sm:$0xf]  ;;  %v8004_v5 = vld [vmem:[#allocation8 + $0x24c] sm:$0xf0] }
  0xcf   :  { %v8203_v60 = vor.u32 %v11183_v56, %v8200_v58  ;;  %v8007_v7 = vor.u32 %v11134_v4, %v8004_v5  ;;  %v11114_v58 = vld [vmem:[#allocation8 + $0x194] sm:$0xf] }
  0xd0   :  { %1803 = vmatpush.bf16.msrb.mxu1 %v7751_v38  ;;  %1816 = vmatpush.bf16.msra.mxu3 %v7975_v41  ;;  %v7755_v38 = vor.u32 %v11071_v35, %v7752_v36  ;;  %v8091_v41 = vor.u32 %v11155_v39, %v8088_v40  ;;  %v8150_v36 = vld [vmem:[#allocation8 + $0x350] sm:$0xf] }
  0xd1   :  { %1824 = vmatpush.bf16.msra.mxu0 %v8339_v61  ;;  %1843 = vmatpush.bf16.msrb.mxu2 %v8395_v10  ;;  %v8032_v61 = vld [vmem:[#allocation8 + $0x284] sm:$0xf0]  ;;  %v8399_v10 = vor.u32 %v11232_v8, %v8396_v9  ;;  %v11107_v8 = vld [vmem:[#allocation8 + $0x15c] sm:$0xf]  ;;  %v7900_v9 = vld [vmem:[#allocation8 + $0x174] sm:$0xf0] }
  0xd2   :  { %v8035_v62 = vor.u32 %v11141_v59, %v8032_v61  ;;  %v7928_v59 = vld [vmem:[#allocation8 + $0x1ac] sm:$0xf0]  ;;  %v11152_v61 = vld [vmem:[#allocation8 + $0x2c0] sm:$0xf0] }
  0xd4   :  { %1804 = vmatpush.bf16.msrb.mxu1 %v7723_v48  ;;  %1817 = vmatpush.bf16.msra.mxu3 %v7947_v49  ;;  %v7724_v48 = vld [vmem:[#allocation8 + $0x1c] sm:$0xf0]  ;;  %v8231_v49 = vor.u32 %v11190_v44, %v8228_v46 }
  0xd5   :  { %1825 = vmatpush.bf16.msra.mxu0 %v8311_v6  ;;  %1862 = vmatpush.bf16.msra.mxu2 %v8147_v19  ;;  %v7951_v19 = vor.u32 %v11120_v17, %v7948_v18  ;;  %v7903_v18 = vor.u32 %v11107_v8, %v7900_v9  ;;  %v11219_v9 = vld [vmem:[#allocation8 + $0x4dc] sm:$0xf] }
  0xd8   :  { %1849 = vmatpush.bf16.msra.mxu1 %v7923_v50  ;;  %1875 = vmatpush.bf16.msrb.mxu3 %v8371_v51  ;;  %v7727_v50 = vor.u32 %v11064_v47, %v7724_v48  ;;  %v11148_v51 = vld [vmem:[#allocation8 + $0x2a4] sm:$0xf]  ;;  %v8123_v47 = vor.u32 %v11166_v43, %v8122_v42  ;;  %v11131_v42 = vld [vmem:[#allocation8 + $0x218] sm:$0xf0]  ;;  %v8318_v43 = vld [vmem:[#allocation8 + $0x4a0] sm:$0xf] }
  0xd9   :  { %1826 = vmatpush.bf16.msra.mxu0 %v8283_v20  ;;  %1863 = vmatpush.bf16.msra.mxu2 %v8119_v29  ;;  %v8063_v53 = vor.u32 %v11148_v51, %v8060_v52 }
  0xdc   :  { %1850 = vmatpush.bf16.msra.mxu1 %v7895_v54  ;;  %1876 = vmatpush.bf16.msrb.mxu3 %v8343_v1  ;;  %v8198_v54 = vld [vmem:[#allocation8 + $0x3b8] sm:$0xf]  ;;  %v11176_v1 = vld [vmem:[#allocation8 + $0x384] sm:$0xf] }
  0xdd   :  { %1827 = vmatpush.bf16.msra.mxu0 %v8255_v33  ;;  %1864 = vmatpush.bf16.msra.mxu2 %v8091_v41  ;;  %v8175_v6 = vor.u32 %v11176_v1, %v8172_v3  ;;  %v7898_v3 = vld [vmem:[#allocation8 + $0x158] sm:$0xf] }
  0xe0   :  { %1851 = vmatpush.bf16.msra.mxu1 %v7867_v57  ;;  %1877 = vmatpush.bf16.msrb.mxu3 %v8315_v11  ;;  %v8199_v57 = vor.u32 %v11186_v55, %v8198_v54  ;;  %v11127_v11 = vld [vmem:[#allocation8 + $0x1fc] sm:$0xf]  ;;  %v7926_v54 = vld [vmem:[#allocation8 + $0x190] sm:$0xf] }
  0xe1   :  { %1828 = vmatpush.bf16.msra.mxu0 %v8227_v45  ;;  %1865 = vmatpush.bf16.msra.mxu2 %v8063_v53  ;;  %v7979_v14 = vor.u32 %v11127_v11, %v7976_v12  ;;  %v289_v45 = vperm.slane %v283_v13, 2  ;;  %v290_v53 = vperm.slane %v283_v13, 3  ;;  %v8038_v12 = vld [vmem:[#allocation8 + $0x270] sm:$0xf]  ;;  %v11145_v13 = vld [vmem:[#allocation8 + $0x288] sm:$0xf0] }
  0xe4   :  { %1852 = vmatpush.bf16.msra.mxu1 %v7839_v2  ;;  %1878 = vmatpush.bf16.msrb.mxu3 %v8287_v24  ;;  %v8171_v2 = vor.u32 %v11179_v0, %v8170_v63 }
  0xe5   :  { %1829 = vmatpush.bf16.msra.mxu0 %v8199_v57  ;;  %1866 = vmatpush.bf16.msra.mxu2 %v8035_v62  ;;  %v11117_v57 = vld [vmem:[#allocation8 + $0x1a8] sm:$0xf0] }
  0xe6   :  { %v7927_v1 = vor.u32 %v11117_v57, %v7926_v54  ;;  %v11124_v54 = vld [vmem:[#allocation8 + $0x1e0] sm:$0xf0] }
  0xe8   :  { %1853 = vmatpush.bf16.msra.mxu1 %v7811_v15  ;;  %1879 = vmatpush.bf16.msrb.mxu3 %v8259_v37  ;;  %v11173_v37 = vld [vmem:[#allocation8 + $0x368] sm:$0xf0] }
  0xe9   :  { %1830 = vmatpush.bf16.msra.mxu0 %v8171_v2  ;;  %1867 = vmatpush.bf16.msra.mxu2 %v8007_v7  ;;  %v8151_v40 = vor.u32 %v11173_v37, %v8150_v36  ;;  %v7931_v2 = vor.u32 %v11114_v58, %v7928_v59  ;;  %v11110_v7 = vld [vmem:[#allocation8 + $0x170] sm:$0xf0]  ;;  %v11093_v36 = vld [vmem:[#allocation8 + $0xec] sm:$0xf]  ;;  %v7844_v37 = vld [vmem:[#allocation8 + $0x104] sm:$0xf0] }
  0xea   :  { %v7899_v17 = vor.u32 %v11110_v7, %v7898_v3  ;;  %v11226_v59 = vld [vmem:[#allocation8 + $0x514] sm:$0xf] }
  0xec   :  { %1854 = vmatpush.bf16.msra.mxu1 %v7783_v28  ;;  %1880 = vmatpush.bf16.msrb.mxu3 %v8231_v49  ;;  %v8094_v49 = vld [vmem:[#allocation8 + $0x2e0] sm:$0xf] }
  0xed   :  { %1895 = vmatpush.bf16.msrb.mxu0 %v8399_v10  ;;  %1868 = vmatpush.bf16.msra.mxu2 %v7979_v14  ;;  %v8374_v14 = vld [vmem:[#allocation8 + $0x510] sm:$0xf] }
  0xf0   :  { %1855 = vmatpush.bf16.msra.mxu1 %v7755_v38  ;;  %1881 = vmatpush.bf16.msrb.mxu3 %v8203_v60  ;;  %v8066_v60 = vld [vmem:[#allocation8 + $0x2a8] sm:$0xf] }
  0xf1   :  { %1869 = vmatpush.bf16.msra.mxu2 %v7951_v19  ;;  %v7870_v19 = vld [vmem:[#allocation8 + $0x120] sm:$0xf] }
  0xf4   :  { %1856 = vmatpush.bf16.msra.mxu1 %v7727_v50  ;;  %1882 = vmatpush.bf16.msrb.mxu3 %v8175_v6  ;;  %v11159_v50 = vld [vmem:[#allocation8 + $0x2f8] sm:$0xf0]  ;;  %v8067_v6 = vor.u32 %v11152_v61, %v8066_v60  ;;  %v8376_v60 = vld [vmem:[#allocation8 + $0x52c] sm:$0xf0]  ;;  %v7786_v61 = vld [vmem:[#allocation8 + $0x78] sm:$0xf] }
  0xf5   :  { %v8095_v56 = vor.u32 %v11159_v50, %v8094_v49  ;;  %v11086_v49 = vld [vmem:[#allocation8 + $0xb4] sm:$0xf]  ;;  %v7816_v50 = vld [vmem:[#allocation8 + $0xcc] sm:$0xf0]  ;;  %v8379_v3 = vor.u32 %v11226_v59, %v8376_v60  ;;  %v8096_v60 = vld [vmem:[#allocation8 + $0x2fc] sm:$0xf0] }
  0xf6   :  { %v7819_v58 = vor.u32 %v11086_v49, %v7816_v50  ;;  %v8178_v50 = vld [vmem:[#allocation8 + $0x388] sm:$0xf] }
 0x134   :  { %v610_v15 = vpop.f32.mrf.mxu1 }
 0x13a   :  { %v597_v20 = vpop.f32.mrf.mxu0  ;;  %v584_v21 = vpop.f32.mrf.mxu3 }
 0x13b   :  { %v598_v22 = vadd.f32 %v597_v20, %v288_v16  ;;  %v11103_v20 = vld [vmem:[#allocation8 + $0x138] sm:$0xf0] }
 0x13c   :  { %v612_v24 = vpop.f32.mrf.mxu1 }
 0x13d   :  { %v611_v23 = vadd.f32 %v610_v15, %v598_v22  ;;  %v11229_v15 = vld [vmem:[#allocation8 + $0x528] sm:$0xf0]  ;;  %v7872_v22 = vld [vmem:[#allocation8 + $0x13c] sm:$0xf0]  ;;  %v8039_v24 = vor.u32 %v11145_v13, %v8038_v12  ;;  %v11075_v12 = vld [vmem:[#allocation8 + $0x58] sm:$0xf0] }
 0x13e   :  { %v11072_v13 = vld [vmem:[#allocation8 + $0x44] sm:$0xf] }
 0x13f   :  { %v667_v28 = vmax.f32 %v611_v23, 0.0 }
 0x140   :  { %v571_v29 = vpop.f32.mrf.mxu2 }
 0x141   :  { %v12256_v31 = vpack.c.bf16 %v667_v28, %v667_v28  ;;  %v572_v32 = vadd.f32 %v571_v29, %v287_v25  ;;  %v8375_v25 = vor.u32 %v11229_v15, %v8374_v14  ;;  %v11138_v28 = vld [vmem:[#allocation8 + $0x250] sm:$0xf0]  ;;  %v8346_v29 = vld [vmem:[#allocation8 + $0x4d8] sm:$0xf]  ;;  %v7760_v14 = vld [vmem:[#allocation8 + $0x5c] sm:$0xf0] }
 0x142   :  { %v599_v33 = vpop.f32.mrf.mxu0  ;;  %v586_v35 = vpop.f32.mrf.mxu3 }
 0x143   :  { %v585_v34 = vadd.f32 %v584_v21, %v572_v32  ;;  %1818 = vmatmul.bf16.vlgmr.msra.gmra.mxu3 %v12256_v31  ;;  %v11100_v21 = vld [vmem:[#allocation8 + $0x124] sm:$0xf]  ;;  %v7871_v32 = vor.u32 %v11103_v20, %v7870_v19 }
 0x144   :  { %1947 = vmatpush.bf16.msra.mxu3 %v8403_v30  ;;  %v636_v39 = vpop.f32.mrf.mxu1  ;;  %v11222_v30 = vld [vmem:[#allocation8 + $0x4f0] sm:$0xf0]  ;;  %v7875_v33 = vor.u32 %v11100_v21, %v7872_v22  ;;  %v11096_v35 = vld [vmem:[#allocation8 + $0x100] sm:$0xf0]  ;;  %v7763_v21 = vor.u32 %v11072_v13, %v7760_v14  ;;  %v8320_v22 = vld [vmem:[#allocation8 + $0x4bc] sm:$0xf0] }
 0x145   :  { %v666_v38 = vmax.f32 %v585_v34, 0.0  ;;  %v7842_v34 = vld [vmem:[#allocation8 + $0xe8] sm:$0xf]  ;;  %v11212_v19 = vld [vmem:[#allocation8 + $0x4a4] sm:$0xf] }
 0x146   :  { %v7906_v14 = vld [vmem:[#allocation8 + $0x160] sm:$0xf] }
 0x147   :  { %v12259_v41 = vpack.c.bf16 %v666_v38, %v666_v38  ;;  %v8011_v38 = vor.u32 %v11138_v28, %v8010_v26  ;;  %v11065_v26 = vld [vmem:[#allocation8 + $0xc] sm:$0xf]  ;;  %v11170_v28 = vld [vmem:[#allocation8 + $0x354] sm:$0xf] }
 0x148   :  { %v573_v44 = vpop.f32.mrf.mxu2 }
 0x149   :  { %1805 = vmatmul.bf16.vlgmr.msrb.gmra.mxu1 %v12259_v41  ;;  %v11215_v44 = vld [vmem:[#allocation8 + $0x4b8] sm:$0xf0] }
 0x14a   :  { %1914 = vmatpush.bf16.msrb.mxu1 %v8151_v40  ;;  %v662_v46 = vpop.f32.mrf.mxu0  ;;  %v623_v48 = vpop.f32.mrf.mxu3  ;;  %v7982_v40 = vld [vmem:[#allocation8 + $0x200] sm:$0xf] }
 0x14b   :  { %v624_v51 = vadd.f32 %v623_v48, %v289_v45  ;;  %v7843_v45 = vor.u32 %v11096_v35, %v7842_v34  ;;  %v11089_v48 = vld [vmem:[#allocation8 + $0xc8] sm:$0xf0]  ;;  %v8323_v34 = vor.u32 %v11212_v19, %v8320_v22  ;;  %v8206_v35 = vld [vmem:[#allocation8 + $0x3c0] sm:$0xf]  ;;  %v8046_v22 = vld [vmem:[#allocation8 + $0x278] sm:$0xf] }
 0x14c   :  { %v638_v52 = vpop.f32.mrf.mxu1 }
 0x14d   :  { %v637_v55 = vadd.f32 %v636_v39, %v624_v51  ;;  %v8347_v39 = vor.u32 %v11222_v30, %v8346_v29  ;;  %v7983_v51 = vor.u32 %v11131_v42, %v7982_v40  ;;  %v8319_v52 = vor.u32 %v11215_v44, %v8318_v43  ;;  %v8152_v30 = vld [vmem:[#allocation8 + $0x36c] sm:$0xf0]  ;;  %v8292_v40 = vld [vmem:[#allocation8 + $0x484] sm:$0xf0]  ;;  %v11163_v44 = vld [vmem:[#allocation8 + $0x31c] sm:$0xf] }
 0x14e   :  { %1915 = vmatpush.bf16.msrb.mxu1 %v8123_v47  ;;  %v7814_v47 = vld [vmem:[#allocation8 + $0xb0] sm:$0xf]  ;;  %v8155_v42 = vor.u32 %v11170_v28, %v8152_v30  ;;  %v11104_v28 = vld [vmem:[#allocation8 + $0x140] sm:$0xf0]  ;;  %v8180_v30 = vld [vmem:[#allocation8 + $0x3a4] sm:$0xf0] }
 0x14f   :  { %v668_v62 = vmax.f32 %v637_v55, 0.0  ;;  %v8290_v55 = vld [vmem:[#allocation8 + $0x468] sm:$0xf]  ;;  %v7815_v57 = vor.u32 %v11089_v48, %v7814_v47  ;;  %v8130_v47 = vld [vmem:[#allocation8 + $0x320] sm:$0xf] }
 0x150   :  { %v649_v63 = vpop.f32.mrf.mxu2  ;;  %v11167_v48 = vld [vmem:[#allocation8 + $0x338] sm:$0xf0] }
 0x151   :  { %v650_v0 = vadd.f32 %v649_v63, %v290_v53  ;;  %v12262_v4 = vpack.c.bf16 %v668_v62, %v668_v62  ;;  %v7954_v53 = vld [vmem:[#allocation8 + $0x1c8] sm:$0xf]  ;;  %v11082_v62 = vld [vmem:[#allocation8 + $0x90] sm:$0xf0]  ;;  %v11079_v63 = vld [vmem:[#allocation8 + $0x7c] sm:$0xf] }
 0x152   :  { %1916 = vmatpush.bf16.msrb.mxu1 %v8095_v56  ;;  %v664_v5 = vpop.f32.mrf.mxu0  ;;  %v625_v11 = vpop.f32.mrf.mxu3  ;;  %v11208_v56 = vld [vmem:[#allocation8 + $0x480] sm:$0xf0]  ;;  %v7787_v7 = vor.u32 %v11082_v62, %v7786_v61  ;;  %v8102_v61 = vld [vmem:[#allocation8 + $0x2e8] sm:$0xf] }
 0x153   :  { %v663_v10 = vadd.f32 %v662_v46, %v650_v0  ;;  %1831 = vmatmul.bf16.vlgmr.msra.gmra.mxu0 %v12262_v4  ;;  %1883 = vmatmul.bf16.vlgmr.msrb.gmra.mxu3 %v12262_v4  ;;  %v7847_v46 = vor.u32 %v11093_v36, %v7844_v37  ;;  %v7788_v0 = vld [vmem:[#allocation8 + $0x94] sm:$0xf0]  ;;  %v8262_v5 = vld [vmem:[#allocation8 + $0x430] sm:$0xf]  ;;  %v7758_v11 = vld [vmem:[#allocation8 + $0x40] sm:$0xf] }
 0x154   :  { %1901 = vmatpush.bf16.msra.mxu0 %v7927_v1  ;;  %1953 = vmatpush.bf16.msrb.mxu3 %v7931_v2  ;;  %v7955_v1 = vor.u32 %v11124_v54, %v7954_v53  ;;  %v8291_v2 = vor.u32 %v11208_v56, %v8290_v55  ;;  %v7791_v8 = vor.u32 %v11079_v63, %v7788_v0  ;;  %v11187_v36 = vld [vmem:[#allocation8 + $0x3d8] sm:$0xf0]  ;;  %v8264_v53 = vld [vmem:[#allocation8 + $0x44c] sm:$0xf0]  ;;  %v11233_v54 = vld [vmem:[#allocation8 + $0x54c] sm:$0xf] }
 0x155   :  { %v669_v16 = vmax.f32 %v663_v10, 0.0  ;;  %v8348_v10 = vld [vmem:[#allocation8 + $0x4f4] sm:$0xf0]  ;;  %v7759_v20 = vor.u32 %v11075_v12, %v7758_v11  ;;  %v8404_v55 = vld [vmem:[#allocation8 + $0x564] sm:$0xf0] }
 0x156   :  { %1917 = vmatpush.bf16.msrb.mxu1 %v8067_v6  ;;  %v11201_v6 = vld [vmem:[#allocation8 + $0x448] sm:$0xf0]  ;;  %v11160_v62 = vld [vmem:[#allocation8 + $0x300] sm:$0xf0]  ;;  %v8407_v0 = vor.u32 %v11233_v54, %v8404_v55 }
 0x157   :  { %v12266_v23 = vpack.c.bf16 %v669_v16, %v669_v16  ;;  %v8263_v15 = vor.u32 %v11201_v6, %v8262_v5  ;;  %v8351_v16 = vor.u32 %v11219_v9, %v8348_v10  ;;  %v8236_v5 = vld [vmem:[#allocation8 + $0x414] sm:$0xf0]  ;;  %v8068_v9 = vld [vmem:[#allocation8 + $0x2c4] sm:$0xf0]  ;;  %v8074_v10 = vld [vmem:[#allocation8 + $0x2b0] sm:$0xf] }
 0x158   :  { %v651_v27 = vpop.f32.mrf.mxu2  ;;  %1902 = vmatpush.bf16.msra.mxu0 %v7899_v17  ;;  %1954 = vmatpush.bf16.msrb.mxu3 %v7903_v18  ;;  %v8234_v17 = vld [vmem:[#allocation8 + $0x3f8] sm:$0xf]  ;;  %v11194_v18 = vld [vmem:[#allocation8 + $0x410] sm:$0xf0]  ;;  %v11153_v11 = vld [vmem:[#allocation8 + $0x2c8] sm:$0xf0] }
 0x159   :  { %8420 = vmatmul.msk.bf16.vlgmr.msrb.gmra.mxu2 %vm1793_vm4, %v12266_v23  ;;  %1857 = vmatmul.bf16.vlgmr.msra.gmra.mxu1 %v12259_v41  ;;  %v7732_v27 = vld [vmem:[#allocation8 + $0x24] sm:$0xf0]  ;;  %v8235_v29 = vor.u32 %v11194_v18, %v8234_v17  ;;  %v8208_v17 = vld [vmem:[#allocation8 + $0x3dc] sm:$0xf0]  ;;  %v8075_v19 = vor.u32 %v11153_v11, %v8074_v10  ;;  %v11083_v10 = vld [vmem:[#allocation8 + $0x98] sm:$0xf0] }
 0x15a   :  { %1918 = vmatpush.bf16.msrb.mxu1 %v8039_v24  ;;  %1927 = vmatpush.bf16.msrb.mxu2 %v8375_v25  ;;  %v7730_v24 = vld [vmem:[#allocation8 + $0x8] sm:$0xf]  ;;  %v11068_v25 = vld [vmem:[#allocation8 + $0x20] sm:$0xf0]  ;;  %v11101_v11 = vld [vmem:[#allocation8 + $0x12c] sm:$0xf] }
 0x15b   :  { %v7731_v37 = vor.u32 %v11068_v25, %v7730_v24  ;;  %v11146_v24 = vld [vmem:[#allocation8 + $0x290] sm:$0xf0] }
 0x15c   :  { %1903 = vmatpush.bf16.msra.mxu0 %v7871_v32  ;;  %1955 = vmatpush.bf16.msrb.mxu3 %v7875_v33  ;;  %v8158_v32 = vld [vmem:[#allocation8 + $0x358] sm:$0xf]  ;;  %v11174_v33 = vld [vmem:[#allocation8 + $0x370] sm:$0xf0] }
 0x15d   :  { %v8159_v43 = vor.u32 %v11174_v33, %v8158_v32  ;;  %v8047_v33 = vor.u32 %v11146_v24, %v8046_v22  ;;  %v11220_v22 = vld [vmem:[#allocation8 + $0x4e4] sm:$0xf]  ;;  %v8356_v24 = vld [vmem:[#allocation8 + $0x4fc] sm:$0xf0] }
 0x15e   :  { %1919 = vmatpush.bf16.msrb.mxu1 %v8011_v38  ;;  %1928 = vmatpush.bf16.msrb.mxu2 %v8347_v39  ;;  %v7735_v38 = vor.u32 %v11065_v26, %v7732_v27  ;;  %v11205_v39 = vld [vmem:[#allocation8 + $0x46c] sm:$0xf]  ;;  %v7878_v27 = vld [vmem:[#allocation8 + $0x128] sm:$0xf] }
 0x15f   :  { %v8295_v49 = vor.u32 %v11205_v39, %v8292_v40  ;;  %v11139_v39 = vld [vmem:[#allocation8 + $0x258] sm:$0xf0]  ;;  %v7879_v40 = vor.u32 %v11104_v28, %v7878_v27  ;;  %v7852_v27 = vld [vmem:[#allocation8 + $0x10c] sm:$0xf0] }
 0x160   :  { %1904 = vmatpush.bf16.msra.mxu0 %v7843_v45  ;;  %1956 = vmatpush.bf16.msrb.mxu3 %v7847_v46  ;;  %v8207_v45 = vor.u32 %v11187_v36, %v8206_v35  ;;  %v8124_v46 = vld [vmem:[#allocation8 + $0x334] sm:$0xf0]  ;;  %v8410_v35 = vld [vmem:[#allocation8 + $0x550] sm:$0xf]  ;;  %v11237_v36 = vld [vmem:[#allocation8 + $0x568] sm:$0xf0] }
 0x161   :  { %v8127_v56 = vor.u32 %v11163_v44, %v8124_v46  ;;  %v11097_v44 = vld [vmem:[#allocation8 + $0x108] sm:$0xf0]  ;;  %v11115_v46 = vld [vmem:[#allocation8 + $0x19c] sm:$0xf] }
 0x162   :  { %1920 = vmatpush.bf16.msrb.mxu1 %v7983_v51  ;;  %1929 = vmatpush.bf16.msrb.mxu2 %v8319_v52  ;;  %v11180_v51 = vld [vmem:[#allocation8 + $0x3a0] sm:$0xf0]  ;;  %v11198_v52 = vld [vmem:[#allocation8 + $0x434] sm:$0xf] }
 0x163   :  { %8421 = vmatmul.msk.bf16.vlgmr.msrb.gmra.mxu0 %vm1793_vm4, %v12266_v23  ;;  %8422 = vmatmul.msk.bf16.vlgmr.msra.gmra.mxu3 %vm1793_vm4, %v12266_v23  ;;  %v8179_v59 = vor.u32 %v11180_v51, %v8178_v50  ;;  %v8267_v63 = vor.u32 %v11198_v52, %v8264_v53  ;;  %v11128_v50 = vld [vmem:[#allocation8 + $0x204] sm:$0xf]  ;;  %v7984_v51 = vld [vmem:[#allocation8 + $0x21c] sm:$0xf0]  ;;  %v7990_v52 = vld [vmem:[#allocation8 + $0x208] sm:$0xf] }
 0x164   :  { %1905 = vmatpush.bf16.msra.mxu0 %v7815_v57  ;;  %1957 = vmatpush.bf16.msrb.mxu3 %v7819_v58  ;;  %v8131_v57 = vor.u32 %v11167_v48, %v8130_v47  ;;  %v11156_v58 = vld [vmem:[#allocation8 + $0x2e4] sm:$0xf]  ;;  %v7936_v47 = vld [vmem:[#allocation8 + $0x1b4] sm:$0xf0] }
 0x165   :  { %v8099_v6 = vor.u32 %v11156_v58, %v8096_v60  ;;  %v11132_v53 = vld [vmem:[#allocation8 + $0x220] sm:$0xf0]  ;;  %v7939_v55 = vor.u32 %v11115_v46, %v7936_v47  ;;  %v7987_v60 = vor.u32 %v11128_v50, %v7984_v51  ;;  %v8298_v47 = vld [vmem:[#allocation8 + $0x470] sm:$0xf]  ;;  %v11206_v51 = vld [vmem:[#allocation8 + $0x474] sm:$0xf] }
 0x166   :  { %1921 = vmatpush.bf16.msrb.mxu1 %v7955_v1  ;;  %1930 = vmatpush.bf16.msrb.mxu2 %v8291_v2  ;;  %v7934_v1 = vld [vmem:[#allocation8 + $0x198] sm:$0xf]  ;;  %v11118_v2 = vld [vmem:[#allocation8 + $0x1b0] sm:$0xf0]  ;;  %v11108_v58 = vld [vmem:[#allocation8 + $0x164] sm:$0xf] }
 0x167   :  { %v7935_v12 = vor.u32 %v11118_v2, %v7934_v1  ;;  %v11125_v1 = vld [vmem:[#allocation8 + $0x1e8] sm:$0xf0]  ;;  %v7794_v2 = vld [vmem:[#allocation8 + $0x80] sm:$0xf] }
 0x168   :  { %1906 = vmatpush.bf16.msra.mxu0 %v7787_v7  ;;  %1958 = vmatpush.bf16.msrb.mxu3 %v7791_v8  ;;  %v8103_v7 = vor.u32 %v11160_v62, %v8102_v61  ;;  %v11149_v8 = vld [vmem:[#allocation8 + $0x2ac] sm:$0xf]  ;;  %v7991_v61 = vor.u32 %v11132_v53, %v7990_v52  ;;  %v8300_v52 = vld [vmem:[#allocation8 + $0x48c] sm:$0xf0]  ;;  %v11080_v53 = vld [vmem:[#allocation8 + $0x84] sm:$0xf] }
 0x169   :  { %1870 = vmatmul.bf16.vlgmr.msra.gmra.mxu2 %v12256_v31  ;;  %1922 = vmatmul.bf16.vlgmr.msrb.gmra.mxu1 %v12256_v31  ;;  %v8071_v18 = vor.u32 %v11149_v8, %v8068_v9  ;;  %v11121_v62 = vld [vmem:[#allocation8 + $0x1cc] sm:$0xf]  ;;  %v11227_v8 = vld [vmem:[#allocation8 + $0x51c] sm:$0xf]  ;;  %v8384_v9 = vld [vmem:[#allocation8 + $0x534] sm:$0xf0] }
 0x16a   :  { %1979 = vmatpush.bf16.msra.mxu1 %v8379_v3  ;;  %1931 = vmatpush.bf16.msrb.mxu2 %v8263_v15  ;;  %v11191_v3 = vld [vmem:[#allocation8 + $0x3fc] sm:$0xf] }
 0x16b   :  { %v8239_v13 = vor.u32 %v11191_v3, %v8236_v5  ;;  %v11111_v15 = vld [vmem:[#allocation8 + $0x178] sm:$0xf0]  ;;  %v8382_v3 = vld [vmem:[#allocation8 + $0x518] sm:$0xf] }
 0x16c   :  { %1907 = vmatpush.bf16.msra.mxu0 %v7759_v20  ;;  %1959 = vmatpush.bf16.msrb.mxu3 %v7763_v21  ;;  %v11142_v20 = vld [vmem:[#allocation8 + $0x274] sm:$0xf]  ;;  %v8040_v21 = vld [vmem:[#allocation8 + $0x28c] sm:$0xf0]  ;;  %v7907_v25 = vor.u32 %v11111_v15, %v7906_v14 }
 0x16d   :  { %v8043_v32 = vor.u32 %v11142_v20, %v8040_v21  ;;  %v11223_v21 = vld [vmem:[#allocation8 + $0x4f8] sm:$0xf0] }
 0x16e   :  { %1980 = vmatpush.bf16.msra.mxu1 %v8351_v16  ;;  %1932 = vmatpush.bf16.msrb.mxu2 %v8235_v29  ;;  %v11184_v16 = vld [vmem:[#allocation8 + $0x3c4] sm:$0xf]  ;;  %v11177_v29 = vld [vmem:[#allocation8 + $0x38c] sm:$0xf] }
 0x16f   :  { %v8211_v26 = vor.u32 %v11184_v16, %v8208_v17  ;;  %v8387_v16 = vor.u32 %v11227_v8, %v8384_v9  ;;  %v7766_v17 = vld [vmem:[#allocation8 + $0x48] sm:$0xf]  ;;  %v8242_v8 = vld [vmem:[#allocation8 + $0x400] sm:$0xf]  ;;  %v11195_v9 = vld [vmem:[#allocation8 + $0x418] sm:$0xf0] }
 0x170   :  { %1908 = vmatpush.bf16.msra.mxu0 %v7731_v37  ;;  %1960 = vmatpush.bf16.msrb.mxu3 %v7735_v38  ;;  %v8012_v37 = vld [vmem:[#allocation8 + $0x254] sm:$0xf0]  ;;  %v8018_v38 = vld [vmem:[#allocation8 + $0x240] sm:$0xf] }
 0x172   :  { %1981 = vmatpush.bf16.msra.mxu1 %v8323_v34  ;;  %1933 = vmatpush.bf16.msrb.mxu2 %v8207_v45  ;;  %v11135_v34 = vld [vmem:[#allocation8 + $0x23c] sm:$0xf]  ;;  %v8411_v45 = vor.u32 %v11237_v36, %v8410_v35  ;;  %v8326_v35 = vld [vmem:[#allocation8 + $0x4a8] sm:$0xf]  ;;  %v11216_v36 = vld [vmem:[#allocation8 + $0x4c0] sm:$0xf0] }
 0x173   :  { %1909 = vmatmul.bf16.vlgmr.msra.gmra.mxu0 %v12259_v41  ;;  %1961 = vmatmul.bf16.vlgmr.msrb.gmra.mxu3 %v12259_v41  ;;  %v8015_v48 = vor.u32 %v11135_v34, %v8012_v37  ;;  %v11069_v34 = vld [vmem:[#allocation8 + $0x28] sm:$0xf0] }
 0x174   :  { %1966 = vmatpush.bf16.msrb.mxu0 %v8155_v42  ;;  %2018 = vmatpush.bf16.msra.mxu3 %v8159_v43  ;;  %v8183_v42 = vor.u32 %v11177_v29, %v8180_v30  ;;  %v7850_v43 = vld [vmem:[#allocation8 + $0xf0] sm:$0xf]  ;;  %v8359_v29 = vor.u32 %v11220_v22, %v8356_v24  ;;  %v11213_v37 = vld [vmem:[#allocation8 + $0x4ac] sm:$0xf]  ;;  %v8214_v22 = vld [vmem:[#allocation8 + $0x3c8] sm:$0xf] }
 0x175   :  { %v7851_v54 = vor.u32 %v11097_v44, %v7850_v43  ;;  %v7738_v30 = vld [vmem:[#allocation8 + $0x10] sm:$0xf]  ;;  %v8160_v43 = vld [vmem:[#allocation8 + $0x374] sm:$0xf0]  ;;  %v8327_v44 = vor.u32 %v11216_v36, %v8326_v35  ;;  %v11188_v24 = vld [vmem:[#allocation8 + $0x3e0] sm:$0xf0] }
 0x176   :  { %1982 = vmatpush.bf16.msra.mxu1 %v8295_v49  ;;  %1934 = vmatpush.bf16.msrb.mxu2 %v8179_v59  ;;  %v8019_v49 = vor.u32 %v11139_v39, %v8018_v38  ;;  %v7908_v59 = vld [vmem:[#allocation8 + $0x17c] sm:$0xf0]  ;;  %v8328_v38 = vld [vmem:[#allocation8 + $0x4c4] sm:$0xf0]  ;;  %v11087_v39 = vld [vmem:[#allocation8 + $0xbc] sm:$0xf] }
 0x177   :  { %v8331_v46 = vor.u32 %v11213_v37, %v8328_v38  ;;  %v11168_v35 = vld [vmem:[#allocation8 + $0x340] sm:$0xf0]  ;;  %v8186_v36 = vld [vmem:[#allocation8 + $0x390] sm:$0xf]  ;;  %v11181_v38 = vld [vmem:[#allocation8 + $0x3a8] sm:$0xf0] }
 0x178   :  { %1967 = vmatpush.bf16.msrb.mxu0 %v8127_v56  ;;  %2019 = vmatpush.bf16.msra.mxu3 %v8131_v57  ;;  %v7822_v56 = vld [vmem:[#allocation8 + $0xb8] sm:$0xf]  ;;  %v11090_v57 = vld [vmem:[#allocation8 + $0xd0] sm:$0xf0] }
 0x179   :  { %1935 = vmatmul.bf16.vlgmr.msrb.gmra.mxu2 %v12262_v4  ;;  %v7823_v5 = vor.u32 %v11090_v57, %v7822_v56  ;;  %v8132_v56 = vld [vmem:[#allocation8 + $0x33c] sm:$0xf0] }
 0x17a   :  { %1983 = vmatpush.bf16.msra.mxu1 %v8267_v63  ;;  %1999 = vmatpush.bf16.msra.mxu2 %v8407_v0  ;;  %v7956_v63 = vld [vmem:[#allocation8 + $0x1e4] sm:$0xf0]  ;;  %v7962_v0 = vld [vmem:[#allocation8 + $0x1d0] sm:$0xf] }
 0x17b   :  { %v7963_v14 = vor.u32 %v11125_v1, %v7962_v0  ;;  %v8272_v0 = vld [vmem:[#allocation8 + $0x454] sm:$0xf0]  ;;  %v11073_v1 = vld [vmem:[#allocation8 + $0x4c] sm:$0xf] }
 0x17c   :  { %1968 = vmatpush.bf16.msrb.mxu0 %v8099_v6  ;;  %2020 = vmatpush.bf16.msra.mxu3 %v8103_v7  ;;  %v7911_v6 = vor.u32 %v11108_v58, %v7908_v59  ;;  %v11230_v7 = vld [vmem:[#allocation8 + $0x530] sm:$0xf0]  ;;  %v8303_v58 = vor.u32 %v11206_v51, %v8300_v52  ;;  %v8270_v59 = vld [vmem:[#allocation8 + $0x438] sm:$0xf]  ;;  %v8110_v51 = vld [vmem:[#allocation8 + $0x2f0] sm:$0xf] }
 0x17d   :  { %v8383_v15 = vor.u32 %v11230_v7, %v8382_v3  ;;  %v11157_v3 = vld [vmem:[#allocation8 + $0x2ec] sm:$0xf] }
 0x17e   :  { %2005 = vmatpush.bf16.msrb.mxu2 %v7935_v12  ;;  %1984 = vmatpush.bf16.msra.mxu1 %v8239_v13  ;;  %v7880_v12 = vld [vmem:[#allocation8 + $0x144] sm:$0xf0]  ;;  %v7959_v13 = vor.u32 %v11121_v62, %v7956_v63  ;;  %v11199_v63 = vld [vmem:[#allocation8 + $0x43c] sm:$0xf]  ;;  %v11161_v52 = vld [vmem:[#allocation8 + $0x308] sm:$0xf0] }
 0x17f   :  { %v7883_v20 = vor.u32 %v11101_v11, %v7880_v12  ;;  %v8275_v7 = vor.u32 %v11199_v63, %v8272_v0  ;;  %v11192_v12 = vld [vmem:[#allocation8 + $0x404] sm:$0xf]  ;;  %v7992_v63 = vld [vmem:[#allocation8 + $0x224] sm:$0xf0] }
 0x180   :  { %1969 = vmatpush.bf16.msrb.mxu0 %v8071_v18  ;;  %2021 = vmatpush.bf16.msra.mxu3 %v8075_v19  ;;  %v8354_v18 = vld [vmem:[#allocation8 + $0x4e0] sm:$0xf]  ;;  %v7795_v19 = vor.u32 %v11083_v10, %v7794_v2  ;;  %v7768_v2 = vld [vmem:[#allocation8 + $0x64] sm:$0xf0] }
 0x181   :  { %v8355_v28 = vor.u32 %v11223_v21, %v8354_v18  ;;  %v7771_v10 = vor.u32 %v11073_v1, %v7768_v2  ;;  %v8243_v18 = vor.u32 %v11195_v9, %v8242_v8  ;;  %v8082_v1 = vld [vmem:[#allocation8 + $0x2b8] sm:$0xf]  ;;  %v11154_v2 = vld [vmem:[#allocation8 + $0x2d0] sm:$0xf0] }
 0x182   :  { %2006 = vmatpush.bf16.msrb.mxu2 %v7907_v25  ;;  %1985 = vmatpush.bf16.msra.mxu1 %v8211_v26  ;;  %v11076_v25 = vld [vmem:[#allocation8 + $0x60] sm:$0xf0]  ;;  %v11094_v26 = vld [vmem:[#allocation8 + $0xf4] sm:$0xf]  ;;  %v8597_v8 = vld [vmem:[%s16130_s4 + $0x150] sm:$0xf] }
 0x183   :  { %v11284_v9 = vld [vmem:[%s16130_s4 + $0x168] sm:$0xf0] }
 0x184   :  { %1970 = vmatpush.bf16.msrb.mxu0 %v8043_v32  ;;  %2022 = vmatpush.bf16.msra.mxu3 %v8047_v33  ;;  %v7767_v32 = vor.u32 %v11076_v25, %v7766_v17  ;;  %v7855_v33 = vor.u32 %v11094_v26, %v7852_v27  ;;  %v8076_v17 = vld [vmem:[#allocation8 + $0x2cc] sm:$0xf0]  ;;  %v11185_v27 = vld [vmem:[#allocation8 + $0x3cc] sm:$0xf] }
 0x186   :  { %2007 = vmatpush.bf16.msrb.mxu2 %v7879_v40  ;;  %1986 = vmatpush.bf16.msra.mxu1 %v8183_v42  ;;  %v7824_v40 = vld [vmem:[#allocation8 + $0xd4] sm:$0xf0]  ;;  %v11171_v42 = vld [vmem:[#allocation8 + $0x35c] sm:$0xf] }
 0x187   :  { %v8163_v50 = vor.u32 %v11171_v42, %v8160_v43  ;;  %v11136_v43 = vld [vmem:[#allocation8 + $0x244] sm:$0xf] }
 0x188   :  { %1971 = vmatpush.bf16.msrb.mxu0 %v8015_v48  ;;  %2023 = vmatpush.bf16.msra.mxu3 %v8019_v49  ;;  %v11209_v48 = vld [vmem:[#allocation8 + $0x488] sm:$0xf0]  ;;  %v7827_v49 = vor.u32 %v11087_v39, %v7824_v40  ;;  %v11178_v39 = vld [vmem:[#allocation8 + $0x394] sm:$0xf]  ;;  %v8188_v40 = vld [vmem:[#allocation8 + $0x3ac] sm:$0xf0] }
 0x189   :  { %1987 = vmatmul.bf16.vlgmr.msra.gmra.mxu1 %v12262_v4  ;;  %8423 = vmatmul.msk.bf16.vlgmr.msra.gmra.mxu2 %vm1793_vm4, %v12266_v23  ;;  %v8299_v57 = vor.u32 %v11209_v48, %v8298_v47  ;;  %v8020_v47 = vld [vmem:[#allocation8 + $0x25c] sm:$0xf0]  ;;  %v8418_v48 = vld [vmem:[#allocation8 + $0x558] sm:$0xf] }
 0x18a   :  { %2051 = vmatpush.bf16.msrb.mxu1 %v8411_v45  ;;  %2008 = vmatpush.bf16.msrb.mxu2 %v7851_v54  ;;  %v7739_v45 = vor.u32 %v11069_v34, %v7738_v30  ;;  %v7796_v54 = vld [vmem:[#allocation8 + $0x9c] sm:$0xf0]  ;;  %v11143_v30 = vld [vmem:[#allocation8 + $0x27c] sm:$0xf]  ;;  %v8138_v34 = vld [vmem:[#allocation8 + $0x328] sm:$0xf] }
 0x18c   :  { %1972 = vmatpush.bf16.msrb.mxu0 %v7987_v60  ;;  %2024 = vmatpush.bf16.msra.mxu3 %v7991_v61  ;;  %v11202_v60 = vld [vmem:[#allocation8 + $0x450] sm:$0xf0]  ;;  %v7799_v61 = vor.u32 %v11080_v53, %v7796_v54  ;;  %v8191_v53 = vor.u32 %v11178_v39, %v8188_v40  ;;  %v7998_v40 = vld [vmem:[#allocation8 + $0x210] sm:$0xf] }
 0x18e   :  { %2057 = vmatpush.bf16.msra.mxu1 %v7939_v55  ;;  %2009 = vmatpush.bf16.msrb.mxu2 %v7823_v5  ;;  %v11164_v55 = vld [vmem:[#allocation8 + $0x324] sm:$0xf]  ;;  %v8104_v5 = vld [vmem:[#allocation8 + $0x304] sm:$0xf0] }
 0x18f   :  { %v8135_v62 = vor.u32 %v11164_v55, %v8132_v56  ;;  %v8107_v11 = vor.u32 %v11157_v3, %v8104_v5  ;;  %v7942_v55 = vld [vmem:[#allocation8 + $0x1a0] sm:$0xf]  ;;  %v11119_v56 = vld [vmem:[#allocation8 + $0x1b8] sm:$0xf0]  ;;  %v7914_v3 = vld [vmem:[#allocation8 + $0x168] sm:$0xf] }
 0x190   :  { %1973 = vmatpush.bf16.msrb.mxu0 %v7959_v13  ;;  %2025 = vmatpush.bf16.msra.mxu3 %v7963_v14  ;;  %v8244_v13 = vld [vmem:[#allocation8 + $0x41c] sm:$0xf0]  ;;  %v11066_v14 = vld [vmem:[#allocation8 + $0x14] sm:$0xf]  ;;  %v7943_v0 = vor.u32 %v11119_v56, %v7942_v55  ;;  %v11112_v5 = vld [vmem:[#allocation8 + $0x180] sm:$0xf0] }
 0x191   :  { %v8247_v21 = vor.u32 %v11192_v12, %v8244_v13  ;;  %v7964_v12 = vld [vmem:[#allocation8 + $0x1ec] sm:$0xf0]  ;;  %v8054_v13 = vld [vmem:[#allocation8 + $0x280] sm:$0xf]  ;;  %v8306_v55 = vld [vmem:[#allocation8 + $0x478] sm:$0xf] }
 0x192   :  { %2058 = vmatpush.bf16.msra.mxu1 %v7911_v6  ;;  %2010 = vmatpush.bf16.msrb.mxu2 %v7795_v19  ;;  %v8271_v6 = vor.u32 %v11202_v60, %v8270_v59  ;;  %v8166_v19 = vld [vmem:[#allocation8 + $0x360] sm:$0xf]  ;;  %v8625_v59 = vld [vmem:[%s16130_s4 + $0x188] sm:$0xf]  ;;  %v11291_v60 = vld [vmem:[%s16130_s4 + $0x1a0] sm:$0xf0] }
 0x193   :  { %1974 = vmatmul.bf16.vlgmr.msrb.gmra.mxu0 %v12256_v31  ;;  %2026 = vmatmul.bf16.vlgmr.msra.gmra.mxu3 %v12256_v31  ;;  %v11210_v56 = vld [vmem:[#allocation8 + $0x490] sm:$0xf0] }
 0x194   :  { %2031 = vmatpush.bf16.msra.mxu0 %v8383_v15  ;;  %2083 = vmatpush.bf16.msrb.mxu3 %v8387_v16  ;;  %v7740_v15 = vld [vmem:[#allocation8 + $0x2c] sm:$0xf0]  ;;  %v11150_v16 = vld [vmem:[#allocation8 + $0x2b4] sm:$0xf] }
 0x195   :  { %v7743_v25 = vor.u32 %v11066_v14, %v7740_v15  ;;  %v8079_v26 = vor.u32 %v11150_v16, %v8076_v17  ;;  %v7915_v14 = vor.u32 %v11112_v5, %v7914_v3  ;;  %v11147_v15 = vld [vmem:[#allocation8 + $0x298] sm:$0xf0]  ;;  %v8390_v16 = vld [vmem:[#allocation8 + $0x520] sm:$0xf]  ;;  %v7774_v5 = vld [vmem:[#allocation8 + $0x50] sm:$0xf] }
 0x196   :  { %2059 = vmatpush.bf16.msra.mxu1 %v7883_v20  ;;  %2011 = vmatpush.bf16.msrb.mxu2 %v7767_v32  ;;  %v11175_v20 = vld [vmem:[#allocation8 + $0x378] sm:$0xf0]  ;;  %v8048_v32 = vld [vmem:[#allocation8 + $0x294] sm:$0xf0] }
 0x197   :  { %v8051_v42 = vor.u32 %v11143_v30, %v8048_v32  ;;  %v11231_v17 = vld [vmem:[#allocation8 + $0x538] sm:$0xf0]  ;;  %v8362_v30 = vld [vmem:[#allocation8 + $0x4e8] sm:$0xf]  ;;  %v11224_v32 = vld [vmem:[#allocation8 + $0x500] sm:$0xf0] }
 0x198   :  { %2032 = vmatpush.bf16.msra.mxu0 %v8355_v28  ;;  %2084 = vmatpush.bf16.msrb.mxu3 %v8359_v29  ;;  %v8216_v28 = vld [vmem:[#allocation8 + $0x3e4] sm:$0xf0]  ;;  %v8167_v29 = vor.u32 %v11175_v20, %v8166_v19  ;;  %v11105_v19 = vld [vmem:[#allocation8 + $0x148] sm:$0xf0]  ;;  %v8598_v20 = vor.u32 %v11284_v9, %v8597_v8  ;;  %v8363_v39 = vor.u32 %v11224_v32, %v8362_v30  ;;  %v8457_v8 = vld [vmem:[%s16130_s4 + $0x38] sm:$0xf] }
 0x199   :  { %8424 = vmatmul.msk.bf16.vlgmr.msrb.gmra.mxu1 %vm1793_vm4, %v12266_v23  ;;  %v8219_v37 = vor.u32 %v11185_v27, %v8216_v28  ;;  %v8026_v27 = vld [vmem:[#allocation8 + $0x248] sm:$0xf]  ;;  %v11249_v9 = vld [vmem:[%s16130_s4 + $0x50] sm:$0xf0] }
 0x19a   :  { %2060 = vmatpush.bf16.msra.mxu1 %v7855_v33  ;;  %2012 = vmatpush.bf16.msrb.mxu2 %v7739_v45  ;;  %v8215_v33 = vor.u32 %v11188_v24, %v8214_v22  ;;  %v8412_v45 = vld [vmem:[#allocation8 + $0x56c] sm:$0xf0]  ;;  %v8569_v22 = vld [vmem:[%s16130_s4 + $0x118] sm:$0xf]  ;;  %v11277_v24 = vld [vmem:[%s16130_s4 + $0x130] sm:$0xf0] }
 0x19b   :  { %v872_v32 = vld [vmem:[#allocation14 + $0x2] ss:$8 sm:$0x70] }
 0x19c   :  { %2033 = vmatpush.bf16.msra.mxu0 %v8327_v44  ;;  %2085 = vmatpush.bf16.msrb.mxu3 %v8331_v46  ;;  %v11234_v44 = vld [vmem:[#allocation8 + $0x554] sm:$0xf]  ;;  %v8139_v46 = vor.u32 %v11168_v35, %v8138_v34  ;;  %v8570_v35 = vor.u32 %v11277_v24, %v8569_v22  ;;  %v9073_v22 = vld [vmem:[%s16130_s4 + $0x508] sm:$0xf]  ;;  %v11403_v24 = vld [vmem:[%s16130_s4 + $0x520] sm:$0xf0] }
 0x19d   :  { %2013 = vmatmul.bf16.vlgmr.msrb.gmra.mxu2 %v12259_v41  ;;  %v8415_v54 = vor.u32 %v11234_v44, %v8412_v45  ;;  %v11098_v34 = vld [vmem:[#allocation8 + $0x110] sm:$0xf0]  ;;  %v8334_v44 = vld [vmem:[#allocation8 + $0x4b0] sm:$0xf]  ;;  %v11217_v45 = vld [vmem:[#allocation8 + $0x4c8] sm:$0xf0] }
 0x19e   :  { %2061 = vmatpush.bf16.msra.mxu1 %v7827_v49  ;;  %2070 = vmatpush.bf16.msra.mxu2 %v8163_v50  ;;  %v11238_v49 = vld [vmem:[#allocation8 + $0x570] sm:$0xf0]  ;;  %v8187_v50 = vor.u32 %v11181_v38, %v8186_v36  ;;  %v8541_v36 = vld [vmem:[%s16130_s4 + $0xe0] sm:$0xf] }
 0x1a0   :  { %2034 = vmatpush.bf16.msra.mxu0 %v8299_v57  ;;  %2086 = vmatpush.bf16.msrb.mxu3 %v8303_v58  ;;  %v8023_v57 = vor.u32 %v11136_v43, %v8020_v47  ;;  %v8419_v58 = vor.u32 %v11238_v49, %v8418_v48  ;;  %v11133_v43 = vld [vmem:[#allocation8 + $0x228] sm:$0xf0]  ;;  %v11091_v48 = vld [vmem:[#allocation8 + $0xd8] sm:$0xf0]  ;;  %v8513_v49 = vld [vmem:[%s16130_s4 + $0xa8] sm:$0xf] }
 0x1a2   :  { %2062 = vmatpush.bf16.msra.mxu1 %v7799_v61  ;;  %2071 = vmatpush.bf16.msra.mxu2 %v8135_v62  ;;  %v8111_v61 = vor.u32 %v11161_v52, %v8110_v51  ;;  %v11129_v62 = vld [vmem:[#allocation8 + $0x20c] sm:$0xf]  ;;  %v7999_v51 = vor.u32 %v11133_v43, %v7998_v40  ;;  %v8335_v52 = vor.u32 %v11217_v45, %v8334_v44  ;;  %v11182_v40 = vld [vmem:[#allocation8 + $0x3b0] sm:$0xf0]  ;;  %v9297_v43 = vld [vmem:[%s16130_s4 + $0x6c8] sm:$0xf] }
 0x1a3   :  { %v11459_v44 = vld [vmem:[%s16130_s4 + $0x6e0] sm:$0xf0] }
 0x1a4   :  { %2035 = vmatpush.bf16.msra.mxu0 %v8271_v6  ;;  %2087 = vmatpush.bf16.msrb.mxu3 %v8275_v7  ;;  %v8626_v6 = vor.u32 %v11291_v60, %v8625_v59  ;;  %v7995_v7 = vor.u32 %v11129_v62, %v7992_v63  ;;  %v11084_v60 = vld [vmem:[#allocation8 + $0xa0] sm:$0xf0]  ;;  %v11256_v62 = vld [vmem:[%s16130_s4 + $0x88] sm:$0xf0] }
 0x1a6   :  { %2063 = vmatpush.bf16.msra.mxu1 %v7771_v10  ;;  %2072 = vmatpush.bf16.msra.mxu2 %v8107_v11  ;;  %v8083_v10 = vor.u32 %v11154_v2, %v8082_v1  ;;  %v11122_v11 = vld [vmem:[#allocation8 + $0x1d4] sm:$0xf]  ;;  %v8278_v1 = vld [vmem:[#allocation8 + $0x440] sm:$0xf]  ;;  %v11203_v2 = vld [vmem:[#allocation8 + $0x458] sm:$0xf0] }
 0x1a8   :  { %2036 = vmatpush.bf16.msra.mxu0 %v8243_v18  ;;  %2088 = vmatpush.bf16.msrb.mxu3 %v8247_v21  ;;  %v7886_v18 = vld [vmem:[#allocation8 + $0x130] sm:$0xf]  ;;  %v7967_v21 = vor.u32 %v11122_v11, %v7964_v12  ;;  %v11196_v11 = vld [vmem:[#allocation8 + $0x420] sm:$0xf0] }
 0x1a9   :  { %v7887_v28 = vor.u32 %v11105_v19, %v7886_v18  ;;  %v11242_v18 = vld [vmem:[%s16130_s4 + $0x18] sm:$0xf0] }
 0x1aa   :  { %2064 = vmatpush.bf16.msra.mxu1 %v7743_v25  ;;  %2073 = vmatpush.bf16.msra.mxu2 %v8079_v26  ;;  %v8055_v25 = vor.u32 %v11147_v15, %v8054_v13  ;;  %v8391_v26 = vor.u32 %v11231_v17, %v8390_v16  ;;  %v7746_v13 = vld [vmem:[#allocation8 + $0x18] sm:$0xf]  ;;  %v8458_v15 = vor.u32 %v11249_v9, %v8457_v8  ;;  %v8849_v16 = vld [vmem:[%s16130_s4 + $0x348] sm:$0xf]  ;;  %v8429_v17 = vld [vmem:[%s16130_s4] sm:$0xf] }
 0x1ab   :  { %v8430_v30 = vor.u32 %v11242_v18, %v8429_v17  ;;  %v11319_v8 = vld [vmem:[%s16130_s4 + $0x280] sm:$0xf0]  ;;  %v8961_v9 = vld [vmem:[%s16130_s4 + $0x428] sm:$0xf]  ;;  %v8933_v17 = vld [vmem:[%s16130_s4 + $0x3f0] sm:$0xf] }
 0x1ac   :  { %2037 = vmatpush.bf16.msra.mxu0 %v8215_v33  ;;  %2089 = vmatpush.bf16.msrb.mxu3 %v8219_v37  ;;  %v7858_v33 = vld [vmem:[#allocation8 + $0xf8] sm:$0xf]  ;;  %v11270_v37 = vld [vmem:[%s16130_s4 + $0xf8] sm:$0xf0] }
 0x1ad   :  { %2065 = vmatmul.bf16.vlgmr.msra.gmra.mxu1 %v12259_v41  ;;  %v8542_v47 = vor.u32 %v11270_v37, %v8541_v36  ;;  %v8821_v36 = vld [vmem:[%s16130_s4 + $0x310] sm:$0xf]  ;;  %v11340_v37 = vld [vmem:[%s16130_s4 + $0x328] sm:$0xf0] }
 0x1ae   :  { %2122 = vmatpush.bf16.msrb.mxu1 %v8167_v29  ;;  %2074 = vmatpush.bf16.msra.mxu2 %v8051_v42  ;;  %v11140_v29 = vld [vmem:[#allocation8 + $0x260] sm:$0xf0]  ;;  %v7859_v42 = vor.u32 %v11098_v34, %v7858_v33  ;;  %v9045_v34 = vld [vmem:[%s16130_s4 + $0x4d0] sm:$0xf] }
 0x1af   :  { %v8027_v38 = vor.u32 %v11140_v29, %v8026_v27  ;;  %v9074_v27 = vor.u32 %v11403_v24, %v9073_v22 }
 0x1b0   :  { %2038 = vmatpush.bf16.msra.mxu0 %v8187_v50  ;;  %2090 = vmatpush.bf16.msrb.mxu3 %v8191_v53  ;;  %v11263_v50 = vld [vmem:[%s16130_s4 + $0xc0] sm:$0xf0]  ;;  %v7970_v53 = vld [vmem:[#allocation8 + $0x1d8] sm:$0xf] }
 0x1b1   :  { %v8514_v59 = vor.u32 %v11263_v50, %v8513_v49 }
 0x1b2   :  { %2123 = vmatpush.bf16.msrb.mxu1 %v8139_v46  ;;  %2075 = vmatpush.bf16.msra.mxu2 %v8023_v57  ;;  %v7830_v46 = vld [vmem:[#allocation8 + $0xc0] sm:$0xf] }
 0x1b3   :  { %2039 = vmatmul.bf16.vlgmr.msra.gmra.mxu0 %v12262_v4  ;;  %2091 = vmatmul.bf16.vlgmr.msrb.gmra.mxu3 %v12262_v4  ;;  %v7831_v57 = vor.u32 %v11091_v48, %v7830_v46  ;;  %v8822_v46 = vor.u32 %v11340_v37, %v8821_v36 }
 0x1b4   :  { %2103 = vmatpush.bf16.msrb.mxu0 %v8415_v54  ;;  %2155 = vmatpush.bf16.msra.mxu3 %v8419_v58  ;;  %v11126_v54 = vld [vmem:[#allocation8 + $0x1f0] sm:$0xf0]  ;;  %v7802_v58 = vld [vmem:[#allocation8 + $0x88] sm:$0xf] }
 0x1b5   :  { %v7971_v63 = vor.u32 %v11126_v54, %v7970_v53  ;;  %v7803_v3 = vor.u32 %v11084_v60, %v7802_v58  ;;  %v11389_v53 = vld [vmem:[%s16130_s4 + $0x4b0] sm:$0xf0]  ;;  %v9298_v54 = vor.u32 %v11459_v44, %v9297_v43 }
 0x1b6   :  { %2124 = vmatpush.bf16.msrb.mxu1 %v8111_v61  ;;  %2076 = vmatpush.bf16.msra.mxu2 %v7995_v7  ;;  %v8485_v61 = vld [vmem:[%s16130_s4 + $0x70] sm:$0xf]  ;;  %v11077_v7 = vld [vmem:[#allocation8 + $0x68] sm:$0xf0] }
 0x1b7   :  { %v7775_v12 = vor.u32 %v11077_v7, %v7774_v5 }
 0x1b8   :  { %2109 = vmatpush.bf16.msra.mxu0 %v7943_v0  ;;  %4398 = vmatpush.bf16.msrb.mxu3 %v8626_v6  ;;  %v8307_v0 = vor.u32 %v11210_v56, %v8306_v55  ;;  %v8486_v6 = vor.u32 %v11256_v62, %v8485_v61  ;;  %v9269_v56 = vld [vmem:[%s16130_s4 + $0x690] sm:$0xf]  ;;  %v8765_v61 = vld [vmem:[%s16130_s4 + $0x2a0] sm:$0xf] }
 0x1b9   :  { %v8989_v62 = vld [vmem:[%s16130_s4 + $0x460] sm:$0xf] }
 0x1ba   :  { %2125 = vmatpush.bf16.msrb.mxu1 %v8083_v10  ;;  %2077 = vmatpush.bf16.msra.mxu2 %v7967_v21  ;;  %v8279_v10 = vor.u32 %v11203_v2, %v8278_v1  ;;  %v9241_v2 = vld [vmem:[%s16130_s4 + $0x658] sm:$0xf] }
 0x1bc   :  { %2110 = vmatpush.bf16.msra.mxu0 %v7915_v14  ;;  %4399 = vmatpush.bf16.msrb.mxu3 %v8598_v20  ;;  %v11070_v14 = vld [vmem:[#allocation8 + $0x30] sm:$0xf0] }
 0x1bd   :  { %2078 = vmatmul.bf16.vlgmr.msra.gmra.mxu2 %v12256_v31  ;;  %v7747_v29 = vor.u32 %v11070_v14, %v7746_v13  ;;  %v9213_v13 = vld [vmem:[%s16130_s4 + $0x620] sm:$0xf]  ;;  %v11438_v14 = vld [vmem:[%s16130_s4 + $0x638] sm:$0xf0] }
 0x1be   :  { %2126 = vmatpush.bf16.msrb.mxu1 %v8055_v25  ;;  %2135 = vmatpush.bf16.msrb.mxu2 %v8391_v26  ;;  %v8222_v25 = vld [vmem:[#allocation8 + $0x3d0] sm:$0xf]  ;;  %v11189_v26 = vld [vmem:[#allocation8 + $0x3e8] sm:$0xf0]  ;;  %v9214_v22 = vor.u32 %v11438_v14, %v9213_v13  ;;  %v11281_v14 = vld [vmem:[%s16130_s4 + $0x154] sm:$0xf] }
 0x1c0   :  { %2111 = vmatpush.bf16.msra.mxu0 %v7887_v28  ;;  %4400 = vmatpush.bf16.msrb.mxu3 %v8570_v35  ;;  %v871_v28 = vld [vmem:[#allocation14 + $0x2] ss:$8 sm:$0xf]  ;;  %v8223_v35 = vor.u32 %v11189_v26, %v8222_v25  ;;  %v11431_v26 = vld [vmem:[%s16130_s4 + $0x600] sm:$0xf0] }
 0x1c1   :  { %v12379_v45 = vor.u32 %v872_v32, %v871_v28  ;;  %v11305_v32 = vld [vmem:[%s16130_s4 + $0x210] sm:$0xf0] }
 0x1c2   :  { %2127 = vmatpush.bf16.msrb.mxu1 %v8027_v38  ;;  %2136 = vmatpush.bf16.msrb.mxu2 %v8363_v39  ;;  %v11396_v38 = vld [vmem:[%s16130_s4 + $0x4e8] sm:$0xf0]  ;;  %v8194_v39 = vld [vmem:[#allocation8 + $0x398] sm:$0xf] }
 0x1c3   :  { %8425 = vmatmul.msk.bf16.vlgmr.msrb.gmra.mxu0 %vm1793_vm4, %v12266_v23  ;;  %8426 = vmatmul.msk.bf16.vlgmr.msra.gmra.mxu3 %vm1793_vm4, %v12266_v23  ;;  %v8250_v23 = vld [vmem:[#allocation8 + $0x408] sm:$0xf]  ;;  %v8195_v50 = vor.u32 %v11182_v40, %v8194_v39  ;;  %v879_v58 = vperm.slane %v12379_v45, 0  ;;  %v9157_v40 = vld [vmem:[%s16130_s4 + $0x5b0] sm:$0xf] }
 0x1c4   :  { %2112 = vmatpush.bf16.msra.mxu0 %v7859_v42  ;;  %4401 = vmatpush.bf16.msrb.mxu3 %v8542_v47  ;;  %v8251_v21 = vor.u32 %v11196_v11, %v8250_v23  ;;  %v9046_v42 = vor.u32 %v11396_v38, %v9045_v34  ;;  %v8793_v47 = vld [vmem:[%s16130_s4 + $0x2d8] sm:$0xf]  ;;  %v11361_v34 = vld [vmem:[%s16130_s4 + $0x3d0] sm:$0xf0] }
 0x1c6   :  { %2128 = vmatpush.bf16.msrb.mxu1 %v7999_v51  ;;  %2137 = vmatpush.bf16.msrb.mxu2 %v8335_v52  ;;  %v12348_v19 = vpop.f32.mrf.mxu1  ;;  %v12350_v20 = vpop.f32.mrf.mxu3  ;;  %v11333_v51 = vld [vmem:[%s16130_s4 + $0x2f0] sm:$0xf0]  ;;  %v9017_v52 = vld [vmem:[%s16130_s4 + $0x498] sm:$0xf] }
 0x1c7   :  { %v9018_v55 = vor.u32 %v11389_v53, %v9017_v52  ;;  %v8794_v60 = vor.u32 %v11333_v51, %v8793_v47  ;;  %v1807_v7 = vadd.f32 %v12348_v19, %v879_v58  ;;  %v8709_v19 = vld [vmem:[%s16130_s4 + $0x230] sm:$0xf]  ;;  %v9129_v53 = vld [vmem:[%s16130_s4 + $0x578] sm:$0xf]  ;;  %v11515_v58 = vld [vmem:[%s16130_s4 + $0x8a0] sm:$0xf0] }
 0x1c8   :  { %2113 = vmatpush.bf16.msra.mxu0 %v7831_v57  ;;  %4402 = vmatpush.bf16.msrb.mxu3 %v8514_v59  ;;  %v11452_v57 = vld [vmem:[%s16130_s4 + $0x6a8] sm:$0xf0] }
 0x1c9   :  { %v1820_v18 = vadd.f32 %v12350_v20, %v1807_v7  ;;  %v9185_v20 = vld [vmem:[%s16130_s4 + $0x5e8] sm:$0xf] }
 0x1ca   :  { %2129 = vmatpush.bf16.msrb.mxu1 %v7971_v63  ;;  %2138 = vmatpush.bf16.msrb.mxu2 %v8307_v0  ;;  %v11382_v63 = vld [vmem:[%s16130_s4 + $0x478] sm:$0xf0]  ;;  %v9270_v0 = vor.u32 %v11452_v57, %v9269_v56  ;;  %v9186_v37 = vor.u32 %v11431_v26, %v9185_v20  ;;  %v9521_v57 = vld [vmem:[%s16130_s4 + $0x888] sm:$0xf] }
 0x1cb   :  { %v8990_v1 = vor.u32 %v11382_v63, %v8989_v62  ;;  %v9745_v62 = vld [vmem:[%s16130_s4 + $0xa48] sm:$0xf]  ;;  %v11571_v63 = vld [vmem:[%s16130_s4 + $0xa60] sm:$0xf0] }
 0x1cc   :  { %2114 = vmatpush.bf16.msra.mxu0 %v7803_v3  ;;  %4403 = vmatpush.bf16.msrb.mxu3 %v8486_v6  ;;  %v11445_v3 = vld [vmem:[%s16130_s4 + $0x670] sm:$0xf0]  ;;  %v8737_v6 = vld [vmem:[%s16130_s4 + $0x268] sm:$0xf] }
 0x1cd   :  { %2130 = vmatmul.bf16.vlgmr.msrb.gmra.mxu1 %v12256_v31  ;;  %v11347_v31 = vld [vmem:[%s16130_s4 + $0x360] sm:$0xf0]  ;;  %v9242_v11 = vor.u32 %v11445_v3, %v9241_v2  ;;  %v11410_v2 = vld [vmem:[%s16130_s4 + $0x558] sm:$0xf0]  ;;  %v9746_v3 = vor.u32 %v11571_v63, %v9745_v62  ;;  %v8627_v7 = vld [vmem:[%s16130_s4 + $0x1a4] sm:$0xf0] }
 0x1ce   :  { %2139 = vmatpush.bf16.msrb.mxu2 %v8279_v10  ;;  %v8850_v33 = vor.u32 %v11347_v31, %v8849_v16  ;;  %4424 = vmatpush.bf16.msra.mxu1 %v9074_v27  ;;  %v1808_v48 = vpop.f32.mrf.mxu1  ;;  %v1821_v49 = vpop.f32.mrf.mxu3  ;;  %v8738_v16 = vor.u32 %v11319_v8, %v8737_v6  ;;  %v11368_v31 = vld [vmem:[%s16130_s4 + $0x408] sm:$0xf0]  ;;  %v9493_v8 = vld [vmem:[%s16130_s4 + $0x850] sm:$0xf] }
 0x1cf   :  { %v8934_v24 = vor.u32 %v11368_v31, %v8933_v17  ;;  %v11298_v48 = vld [vmem:[%s16130_s4 + $0x1d8] sm:$0xf0]  ;;  %v8877_v49 = vld [vmem:[%s16130_s4 + $0x380] sm:$0xf]  ;;  %v11288_v6 = vld [vmem:[%s16130_s4 + $0x18c] sm:$0xf] }
 0x1d0   :  { %2115 = vmatpush.bf16.msra.mxu0 %v7775_v12  ;;  %4404 = vmatpush.bf16.msrb.mxu3 %v8458_v15  ;;  %v1832_v59 = vpop.f32.mrf.mxu0  ;;  %v8630_v13 = vor.u32 %v11288_v6, %v8627_v7  ;;  %v9717_v17 = vld [vmem:[%s16130_s4 + $0xa10] sm:$0xf]  ;;  %v11501_v31 = vld [vmem:[%s16130_s4 + $0x830] sm:$0xf0] }
 0x1d1   :  { %v1833_v25 = vadd.f32 %v1832_v59, %v1820_v18  ;;  %v11564_v18 = vld [vmem:[%s16130_s4 + $0xa28] sm:$0xf0]  ;;  %v9381_v63 = vld [vmem:[%s16130_s4 + $0x770] sm:$0xf] }
 0x1d2   :  { %2140 = vmatpush.bf16.msrb.mxu2 %v8251_v21  ;;  %4425 = vmatpush.bf16.msra.mxu1 %v9046_v42  ;;  %v11312_v21 = vld [vmem:[%s16130_s4 + $0x248] sm:$0xf0]  ;;  %v8487_v6 = vld [vmem:[%s16130_s4 + $0x8c] sm:$0xf0] }
 0x1d3   :  { %v8710_v28 = vor.u32 %v11312_v21, %v8709_v19  ;;  %v11424_v42 = vld [vmem:[%s16130_s4 + $0x5c8] sm:$0xf0]  ;;  %v9718_v19 = vor.u32 %v11564_v18, %v9717_v17  ;;  %v9465_v21 = vld [vmem:[%s16130_s4 + $0x818] sm:$0xf]  ;;  %v9605_v7 = vld [vmem:[%s16130_s4 + $0x930] sm:$0xf] }
 0x1d4   :  { %2116 = vmatpush.bf16.msra.mxu0 %v7747_v29  ;;  %4405 = vmatpush.bf16.msrb.mxu3 %v8430_v30  ;;  %v8681_v29 = vld [vmem:[%s16130_s4 + $0x1f8] sm:$0xf]  ;;  %v9158_v51 = vor.u32 %v11424_v42, %v9157_v40  ;;  %v11267_v40 = vld [vmem:[%s16130_s4 + $0xe4] sm:$0xf] }
 0x1d5   :  { %v8682_v44 = vor.u32 %v11305_v32, %v8681_v29  ;;  %v8571_v29 = vld [vmem:[%s16130_s4 + $0x134] sm:$0xf0] }
 0x1d6   :  { %2141 = vmatpush.bf16.msrb.mxu2 %v8223_v35  ;;  %4426 = vmatpush.bf16.msra.mxu1 %v9018_v55  ;;  %v12433_v10 = vpop.f32.mrf.mxu1  ;;  %v12435_v23 = vpop.f32.mrf.mxu3  ;;  %v8459_v18 = vld [vmem:[%s16130_s4 + $0x54] sm:$0xf0] }
 0x1d7   :  { %2117 = vmatmul.bf16.vlgmr.msra.gmra.mxu0 %v12259_v41  ;;  %v11326_v41 = vld [vmem:[%s16130_s4 + $0x2b8] sm:$0xf0] }
 0x1d8   :  { %4411 = vmatpush.bf16.msrb.mxu0 %v8850_v33  ;;  %v8766_v5 = vor.u32 %v11326_v41, %v8765_v61  ;;  %v1834_v15 = vpop.f32.mrf.mxu0  ;;  %v8905_v33 = vld [vmem:[%s16130_s4 + $0x3b8] sm:$0xf]  ;;  %v9522_v41 = vor.u32 %v11515_v58, %v9521_v57  ;;  %v8515_v58 = vld [vmem:[%s16130_s4 + $0xc4] sm:$0xf0] }
 0x1d9   :  { %v8906_v38 = vor.u32 %v11361_v34, %v8905_v33  ;;  %v9437_v34 = vld [vmem:[%s16130_s4 + $0x7e0] sm:$0xf] }
 0x1da   :  { %2142 = vmatpush.bf16.msrb.mxu2 %v8195_v50  ;;  %4427 = vmatpush.bf16.msra.mxu1 %v8990_v1  ;;  %v11354_v50 = vld [vmem:[%s16130_s4 + $0x398] sm:$0xf0]  ;;  %v9101_v1 = vld [vmem:[%s16130_s4 + $0x540] sm:$0xf] }
 0x1db   :  { %v8878_v52 = vor.u32 %v11354_v50, %v8877_v49  ;;  %4450 = vmatpush.bf16.msra.mxu3 %v9522_v41  ;;  %v9409_v50 = vld [vmem:[%s16130_s4 + $0x7a8] sm:$0xf]  ;;  %v11543_v41 = vld [vmem:[%s16130_s4 + $0x980] sm:$0xf0] }
 0x1dc   :  { %4412 = vmatpush.bf16.msrb.mxu0 %v8822_v46  ;;  %v1845_v27 = vpop.f32.mrf.mxu2  ;;  %v8653_v46 = vld [vmem:[%s16130_s4 + $0x1c0] sm:$0xf] }
 0x1dd   :  { %2143 = vmatmul.bf16.vlgmr.msrb.gmra.mxu2 %v12262_v4  ;;  %v11375_v4 = vld [vmem:[%s16130_s4 + $0x440] sm:$0xf0]  ;;  %v1846_v30 = vadd.f32 %v1845_v27, %v1833_v25  ;;  %v8654_v56 = vor.u32 %v11298_v48, %v8653_v46  ;;  %v9466_v25 = vor.u32 %v11501_v31, %v9465_v21  ;;  %v11274_v27 = vld [vmem:[%s16130_s4 + $0x11c] sm:$0xf]  ;;  %v9325_v31 = vld [vmem:[%s16130_s4 + $0x700] sm:$0xf] }
 0x1de   :  { %4437 = vmatpush.bf16.msra.mxu2 %v9298_v54  ;;  %v8962_v12 = vor.u32 %v11375_v4, %v8961_v9  ;;  %v1860_v35 = vpop.f32.mrf.mxu1  ;;  %v1886_v36 = vpop.f32.mrf.mxu3  ;;  %v11417_v54 = vld [vmem:[%s16130_s4 + $0x590] sm:$0xf0]  ;;  %v11508_v9 = vld [vmem:[%s16130_s4 + $0x868] sm:$0xf0]  ;;  %v9102_v4 = vor.u32 %v11410_v2, %v9101_v1  ;;  %v11550_v46 = vld [vmem:[%s16130_s4 + $0x9b8] sm:$0xf0] }
 0x1df   :  { %v2161_v39 = vmax.f32 %v1846_v30, 0.0  ;;  %v9130_v61 = vor.u32 %v11417_v54, %v9129_v53  ;;  %v9689_v30 = vld [vmem:[%s16130_s4 + $0x9d8] sm:$0xf]  ;;  %v11494_v35 = vld [vmem:[%s16130_s4 + $0x7f8] sm:$0xf0] }
 0x1e0   :  { %4413 = vmatpush.bf16.msrb.mxu0 %v8794_v60  ;;  %4428 = vmatpush.bf16.msra.mxu1 %v8962_v12  ;;  %v12480_v43 = vpop.f32.mrf.mxu0  ;;  %v9438_v36 = vor.u32 %v11494_v35, %v9437_v34 }
 0x1e1   :  { %v12485_v47 = vpack.c.bf16 %v2161_v39, %v2161_v39  ;;  %v8574_v39 = vor.u32 %v11274_v27, %v8571_v29 }
 0x1e2   :  { %4438 = vmatpush.bf16.msra.mxu2 %v9270_v0  ;;  %v880_v0 = vperm.slane %v12379_v45, 1 }
 0x1e3   :  { %4406 = vmatmul.bf16.vlgmr.msrb.gmra.mxu3 %v12485_v47 }
 0x1e4   :  { %4414 = vmatpush.bf16.msrb.mxu0 %v8766_v5  ;;  %4429 = vmatpush.bf16.msra.mxu1 %v8934_v24  ;;  %v1847_v55 = vpop.f32.mrf.mxu2  ;;  %v1859_v12 = vadd.f32 %v12433_v10, %v880_v0  ;;  %v11480_v0 = vld [vmem:[%s16130_s4 + $0x788] sm:$0xf0] }
 0x1e5   :  { %v11260_v55 = vld [vmem:[%s16130_s4 + $0xac] sm:$0xf]  ;;  %v9382_v1 = vor.u32 %v11480_v0, %v9381_v63  ;;  %v11379_v0 = vld [vmem:[%s16130_s4 + $0x464] sm:$0xf] }
 0x1e6   :  { %4439 = vmatpush.bf16.msra.mxu2 %v9242_v11  ;;  %v12509_v59 = vpop.f32.mrf.mxu1  ;;  %v12511_v60 = vpop.f32.mrf.mxu3  ;;  %v9494_v11 = vor.u32 %v11508_v9, %v9493_v8  ;;  %v8518_v2 = vor.u32 %v11260_v55, %v8515_v58  ;;  %v11536_v8 = vld [vmem:[%s16130_s4 + $0x948] sm:$0xf0] }
 0x1e8   :  { %4415 = vmatpush.bf16.msrb.mxu0 %v8738_v16  ;;  %4430 = vmatpush.bf16.msra.mxu1 %v8906_v38  ;;  %v1899_v5 = vpop.f32.mrf.mxu0  ;;  %v8599_v16 = vld [vmem:[%s16130_s4 + $0x16c] sm:$0xf0]  ;;  %v881_v38 = vperm.slane %v12379_v45, 2 }
 0x1e9   :  { %4451 = vmatpush.bf16.msra.mxu3 %v9494_v11  ;;  %v8602_v26 = vor.u32 %v11281_v14, %v8599_v16  ;;  %v11473_v11 = vld [vmem:[%s16130_s4 + $0x750] sm:$0xf0]  ;;  %v11246_v16 = vld [vmem:[%s16130_s4 + $0x3c] sm:$0xf] }
 0x1ea   :  { %4440 = vmatpush.bf16.msra.mxu2 %v9214_v22  ;;  %v8462_v27 = vor.u32 %v11246_v16, %v8459_v18  ;;  %v11505_v18 = vld [vmem:[%s16130_s4 + $0x854] sm:$0xf] }
 0x1ec   :  { %4416 = vmatpush.bf16.msrb.mxu0 %v8710_v28  ;;  %4431 = vmatpush.bf16.msra.mxu1 %v8878_v52  ;;  %v1871_v15 = vpop.f32.mrf.mxu2 }
 0x1ed   :  { %v1872_v10 = vadd.f32 %v1871_v15, %v1859_v12  ;;  %4452 = vmatpush.bf16.msra.mxu3 %v9466_v25  ;;  %v11400_v25 = vld [vmem:[%s16130_s4 + $0x50c] sm:$0xf] }
 0x1ee   :  { %4441 = vmatpush.bf16.msra.mxu2 %v9186_v37  ;;  %v1925_v22 = vpop.f32.mrf.mxu1  ;;  %v1951_v24 = vpop.f32.mrf.mxu3 }
 0x1ef   :  { %v1885_v20 = vadd.f32 %v12435_v23, %v1872_v10  ;;  %v11557_v23 = vld [vmem:[%s16130_s4 + $0x9f0] sm:$0xf0]  ;;  %v9577_v10 = vld [vmem:[%s16130_s4 + $0x8f8] sm:$0xf] }
 0x1f0   :  { %4417 = vmatpush.bf16.msrb.mxu0 %v8682_v44  ;;  %v1910_v28 = vpop.f32.mrf.mxu0  ;;  %v9690_v33 = vor.u32 %v11557_v23, %v9689_v30  ;;  %v9661_v44 = vld [vmem:[%s16130_s4 + $0x9a0] sm:$0xf] }
 0x1f1   :  { %v1898_v32 = vadd.f32 %v12480_v43, %v1885_v20  ;;  %v8543_v43 = vld [vmem:[%s16130_s4 + $0xfc] sm:$0xf0]  ;;  %4453 = vmatpush.bf16.msra.mxu3 %v9438_v36  ;;  %v9662_v49 = vor.u32 %v11550_v46, %v9661_v44  ;;  %v9075_v20 = vld [vmem:[%s16130_s4 + $0x524] sm:$0xf0]  ;;  %v11456_v36 = vld [vmem:[%s16130_s4 + $0x6cc] sm:$0xf] }
 0x1f2   :  { %4442 = vmatpush.bf16.msra.mxu2 %v9158_v51  ;;  %v11487_v51 = vld [vmem:[%s16130_s4 + $0x7c0] sm:$0xf0]  ;;  %v8546_v54 = vor.u32 %v11267_v40, %v8543_v43  ;;  %v9078_v29 = vor.u32 %v11400_v25, %v9075_v20  ;;  %v8431_v23 = vld [vmem:[%s16130_s4 + $0x1c] sm:$0xf0]  ;;  %v9047_v40 = vld [vmem:[%s16130_s4 + $0x4ec] sm:$0xf0] }
 0x1f3   :  { %v2162_v37 = vmax.f32 %v1898_v32, 0.0  ;;  %v9410_v52 = vor.u32 %v11487_v51, %v9409_v50  ;;  %v9549_v32 = vld [vmem:[%s16130_s4 + $0x8c0] sm:$0xf]  ;;  %v882_v44 = vperm.slane %v12379_v45, 3  ;;  %v11449_v46 = vld [vmem:[%s16130_s4 + $0x694] sm:$0xf] }
 0x1f4   :  { %4418 = vmatpush.bf16.msrb.mxu0 %v8654_v56  ;;  %v1873_v42 = vpop.f32.mrf.mxu2  ;;  %v1911_v56 = vadd.f32 %v1910_v28, %v881_v38  ;;  %v11239_v28 = vld [vmem:[%s16130_s4 + $0x4] sm:$0xf]  ;;  %v11386_v51 = vld [vmem:[%s16130_s4 + $0x49c] sm:$0xf] }
 0x1f5   :  { %v12590_v48 = vpack.c.bf16 %v2162_v37, %v2162_v37  ;;  %4454 = vmatpush.bf16.msra.mxu3 %v9410_v52  ;;  %v9299_v37 = vld [vmem:[%s16130_s4 + $0x6e4] sm:$0xf0]  ;;  %v8434_v42 = vor.u32 %v11239_v28, %v8431_v23  ;;  %v9019_v52 = vld [vmem:[%s16130_s4 + $0x4b4] sm:$0xf0]  ;;  %v9159_v28 = vld [vmem:[%s16130_s4 + $0x5cc] sm:$0xf0] }
 0x1f6   :  { %4443 = vmatpush.bf16.msra.mxu2 %v9130_v61  ;;  %v12598_v53 = vpop.f32.mrf.mxu3  ;;  %v9633_v61 = vld [vmem:[%s16130_s4 + $0x968] sm:$0xf]  ;;  %v1924_v5 = vadd.f32 %v12509_v59, %v1911_v56  ;;  %v9353_v59 = vld [vmem:[%s16130_s4 + $0x738] sm:$0xf]  ;;  %v9302_v38 = vor.u32 %v11456_v36, %v9299_v37  ;;  %v9022_v55 = vor.u32 %v11386_v51, %v9019_v52  ;;  %v11351_v51 = vld [vmem:[%s16130_s4 + $0x384] sm:$0xf] }
 0x1f7   :  { %4419 = vmatmul.bf16.vlgmr.msrb.gmra.mxu0 %v12590_v48  ;;  %v9634_v62 = vor.u32 %v11543_v41, %v9633_v61  ;;  %v1963_v56 = vadd.f32 %v12598_v53, %v882_v44  ;;  %v11442_v61 = vld [vmem:[%s16130_s4 + $0x65c] sm:$0xf]  ;;  %v9243_v41 = vld [vmem:[%s16130_s4 + $0x674] sm:$0xf0]  ;;  %v8991_v53 = vld [vmem:[%s16130_s4 + $0x47c] sm:$0xf0] }
 0x1f8   :  { %4463 = vmatpush.bf16.msra.mxu0 %v9746_v3  ;;  %v1912_v57 = vpop.f32.mrf.mxu0  ;;  %v11253_v3 = vld [vmem:[%s16130_s4 + $0x74] sm:$0xf]  ;;  %v9246_v63 = vor.u32 %v11442_v61, %v9243_v41  ;;  %v9801_v37 = vld [vmem:[%s16130_s4 + $0xab8] sm:$0xf]  ;;  %v11414_v44 = vld [vmem:[%s16130_s4 + $0x57c] sm:$0xf] }
 0x1f9   :  { %4455 = vmatpush.bf16.msra.mxu3 %v9382_v1  ;;  %v8490_v15 = vor.u32 %v11253_v3, %v8487_v6  ;;  %v8994_v1 = vor.u32 %v11379_v0, %v8991_v53  ;;  %v11512_v3 = vld [vmem:[%s16130_s4 + $0x88c] sm:$0xf]  ;;  %v9215_v6 = vld [vmem:[%s16130_s4 + $0x63c] sm:$0xf0]  ;;  %v8851_v61 = vld [vmem:[%s16130_s4 + $0x364] sm:$0xf0] }
 0x1fa   :  { %4444 = vmatpush.bf16.msra.mxu2 %v9102_v4  ;;  %v9606_v4 = vor.u32 %v11536_v8, %v9605_v7  ;;  %v9523_v8 = vld [vmem:[%s16130_s4 + $0x8a4] sm:$0xf0]  ;;  %v8879_v52 = vld [vmem:[%s16130_s4 + $0x39c] sm:$0xf0]  ;;  %v883_v41 = vperm.slane %v12379_v45, 4 }
 0x1fb   :  { %v11407_v0 = vld [vmem:[%s16130_s4 + $0x544] sm:$0xf]  ;;  %v9103_v53 = vld [vmem:[%s16130_s4 + $0x55c] sm:$0xf0] }
 0x1fc   :  { %4464 = vmatpush.bf16.msra.mxu0 %v9718_v19  ;;  %v1936_v9 = vpop.f32.mrf.mxu2  ;;  %v11529_v19 = vld [vmem:[%s16130_s4 + $0x910] sm:$0xf0] }
 0x1fd   :  { %v1937_v12 = vadd.f32 %v1936_v9, %v1924_v5  ;;  %v9578_v21 = vor.u32 %v11529_v19, %v9577_v10  ;;  %v11435_v5 = vld [vmem:[%s16130_s4 + $0x624] sm:$0xf]  ;;  %v11428_v10 = vld [vmem:[%s16130_s4 + $0x5ec] sm:$0xf]  ;;  %v9187_v19 = vld [vmem:[%s16130_s4 + $0x604] sm:$0xf0] }
 0x1fe   :  { %4489 = vmatpush.bf16.msrb.mxu2 %v8630_v13  ;;  %v9354_v13 = vor.u32 %v11473_v11, %v9353_v59  ;;  %v1964_v14 = vpop.f32.mrf.mxu3  ;;  %v9218_v9 = vor.u32 %v11435_v5, %v9215_v6  ;;  %v8963_v59 = vld [vmem:[%s16130_s4 + $0x444] sm:$0xf0] }
 0x1ff   :  { %v1950_v17 = vadd.f32 %v12511_v60, %v1937_v12  ;;  %v11466_v60 = vld [vmem:[%s16130_s4 + $0x718] sm:$0xf0] }
 0x200   :  { %4465 = vmatpush.bf16.msra.mxu0 %v9690_v33  ;;  %4456 = vmatpush.bf16.msra.mxu3 %v9354_v13  ;;  %v9326_v24 = vor.u32 %v11466_v60, %v9325_v31  ;;  %v11522_v33 = vld [vmem:[%s16130_s4 + $0x8d8] sm:$0xf0]  ;;  %v9495_v31 = vld [vmem:[%s16130_s4 + $0x86c] sm:$0xf0]  ;;  %v9190_v60 = vor.u32 %v11428_v10, %v9187_v19 }
 0x201   :  { %v2163_v22 = vmax.f32 %v1950_v17, 0.0  ;;  %v9550_v35 = vor.u32 %v11522_v33, %v9549_v32  ;;  %v9526_v17 = vor.u32 %v11512_v3, %v9523_v8  ;;  %v9498_v20 = vor.u32 %v11505_v18, %v9495_v31  ;;  %v11358_v32 = vld [vmem:[%s16130_s4 + $0x3bc] sm:$0xf]  ;;  %v8907_v33 = vld [vmem:[%s16130_s4 + $0x3d4] sm:$0xf0] }
 0x202   :  { %4490 = vmatpush.bf16.msrb.mxu2 %v8602_v26  ;;  %v8910_v36 = vor.u32 %v11358_v32, %v8907_v33  ;;  %v9106_v3 = vor.u32 %v11407_v0, %v9103_v53  ;;  %v8795_v18 = vld [vmem:[%s16130_s4 + $0x2f4] sm:$0xf0]  ;;  %v11470_v19 = vld [vmem:[%s16130_s4 + $0x73c] sm:$0xf]  ;;  %v8857_v32 = vld [vmem:[%s16130_s4 + $0x350] sm:$0xf] }
 0x203   :  { %v12666_v30 = vpack.c.bf16 %v2163_v22, %v2163_v22  ;;  %v11365_v22 = vld [vmem:[%s16130_s4 + $0x3f4] sm:$0xf]  ;;  %v9355_v31 = vld [vmem:[%s16130_s4 + $0x754] sm:$0xf0]  ;;  %v11348_v33 = vld [vmem:[%s16130_s4 + $0x368] sm:$0xf0] }
 0x204   :  { %4466 = vmatpush.bf16.msra.mxu0 %v9662_v49  ;;  %4457 = vmatpush.bf16.msra.mxu3 %v9326_v24  ;;  %v1938_v34 = vpop.f32.mrf.mxu2  ;;  %v9271_v49 = vld [vmem:[%s16130_s4 + $0x6ac] sm:$0xf0]  ;;  %v11302_v0 = vld [vmem:[%s16130_s4 + $0x1fc] sm:$0xf]  ;;  %v8683_v53 = vld [vmem:[%s16130_s4 + $0x214] sm:$0xf0] }
 0x205   :  { %4432 = vmatmul.bf16.vlgmr.msra.gmra.mxu1 %v12666_v30  ;;  %v9274_v50 = vor.u32 %v11449_v46, %v9271_v49  ;;  %v8935_v24 = vld [vmem:[%s16130_s4 + $0x40c] sm:$0xf0]  ;;  %v9131_v46 = vld [vmem:[%s16130_s4 + $0x594] sm:$0xf0]  ;;  %v9439_v49 = vld [vmem:[%s16130_s4 + $0x7fc] sm:$0xf0] }
 0x206   :  { %4491 = vmatpush.bf16.msrb.mxu2 %v8574_v39  ;;  %v1988_v26 = vpop.f32.mrf.mxu1  ;;  %v11393_v39 = vld [vmem:[%s16130_s4 + $0x4d4] sm:$0xf]  ;;  %v8938_v25 = vor.u32 %v11365_v22, %v8935_v24 }
 0x207   :  { %v9050_v43 = vor.u32 %v11393_v39, %v9047_v40 }
 0x208   :  { %4467 = vmatpush.bf16.msra.mxu0 %v9634_v62  ;;  %4515 = vmatpush.bf16.msrb.mxu3 %v9078_v29  ;;  %v9467_v29 = vld [vmem:[%s16130_s4 + $0x834] sm:$0xf0] }
 0x20a   :  { %4492 = vmatpush.bf16.msrb.mxu2 %v8546_v54 }
 0x20c   :  { %4468 = vmatpush.bf16.msra.mxu0 %v9606_v4  ;;  %4516 = vmatpush.bf16.msrb.mxu3 %v9050_v43  ;;  %v2001_v58 = vpop.f32.mrf.mxu2  ;;  %v11372_v4 = vld [vmem:[%s16130_s4 + $0x42c] sm:$0xf]  ;;  %v11491_v43 = vld [vmem:[%s16130_s4 + $0x7e4] sm:$0xf] }
 0x20d   :  { %v8966_v13 = vor.u32 %v11372_v4, %v8963_v59  ;;  %v8823_v4 = vld [vmem:[%s16130_s4 + $0x32c] sm:$0xf0]  ;;  %v11477_v59 = vld [vmem:[%s16130_s4 + $0x774] sm:$0xf] }
 0x20e   :  { %4493 = vmatpush.bf16.msrb.mxu2 %v8518_v2  ;;  %v1990_v54 = vpop.f32.mrf.mxu1 }
 0x20f   :  { %v8882_v54 = vor.u32 %v11351_v51, %v8879_v52  ;;  %v11341_v51 = vld [vmem:[%s16130_s4 + $0x330] sm:$0xf0] }
 0x210   :  { %4469 = vmatpush.bf16.msra.mxu0 %v9578_v21  ;;  %v1975_v57 = vpop.f32.mrf.mxu0  ;;  %4517 = vmatpush.bf16.msrb.mxu3 %v9022_v55  ;;  %v9773_v55 = vld [vmem:[%s16130_s4 + $0xa80] sm:$0xf] }
 0x211   :  { %v1976_v62 = vadd.f32 %v1975_v57, %v1963_v56  ;;  %v11578_v56 = vld [vmem:[%s16130_s4 + $0xa98] sm:$0xf0] }
 0x212   :  { %4494 = vmatpush.bf16.msrb.mxu2 %v8490_v15  ;;  %v9774_v57 = vor.u32 %v11578_v56, %v9773_v55  ;;  %v11309_v55 = vld [vmem:[%s16130_s4 + $0x234] sm:$0xf]  ;;  %v8711_v56 = vld [vmem:[%s16130_s4 + $0x24c] sm:$0xf0] }
 0x213   :  { %v1989_v2 = vadd.f32 %v1988_v26, %v1976_v62  ;;  %v11498_v26 = vld [vmem:[%s16130_s4 + $0x81c] sm:$0xf]  ;;  %v9442_v62 = vor.u32 %v11491_v43, %v9439_v49  ;;  %v8739_v43 = vld [vmem:[%s16130_s4 + $0x284] sm:$0xf0] }
 0x214   :  { %4470 = vmatpush.bf16.msra.mxu0 %v9550_v35  ;;  %4518 = vmatpush.bf16.msrb.mxu3 %v8994_v1  ;;  %v2003_v16 = vpop.f32.mrf.mxu2  ;;  %v11484_v1 = vld [vmem:[%s16130_s4 + $0x7ac] sm:$0xf] }
 0x215   :  { %v2002_v7 = vadd.f32 %v2001_v58, %v1989_v2  ;;  %v11344_v58 = vld [vmem:[%s16130_s4 + $0x34c] sm:$0xf]  ;;  %v9411_v2 = vld [vmem:[%s16130_s4 + $0x7c4] sm:$0xf0] }
 0x216   :  { %4495 = vmatpush.bf16.msrb.mxu2 %v8462_v27  ;;  %v12734_v11 = vpop.f32.mrf.mxu3  ;;  %v12736_v12 = vpop.f32.mrf.mxu1  ;;  %v11421_v27 = vld [vmem:[%s16130_s4 + $0x5b4] sm:$0xf]  ;;  %v9414_v8 = vor.u32 %v11484_v1, %v9411_v2 }
 0x217   :  { %v2164_v14 = vmax.f32 %v2002_v7, 0.0  ;;  %v9162_v23 = vor.u32 %v11421_v27, %v9159_v28  ;;  %v11323_v27 = vld [vmem:[%s16130_s4 + $0x2a4] sm:$0xf] }
 0x218   :  { %4528 = vmatpush.bf16.msrb.mxu0 %v9302_v38  ;;  %v1977_v15 = vpop.f32.mrf.mxu0  ;;  %4519 = vmatpush.bf16.msrb.mxu3 %v8966_v13  ;;  %v11585_v38 = vld [vmem:[%s16130_s4 + $0xad0] sm:$0xf0]  ;;  %v9383_v13 = vld [vmem:[%s16130_s4 + $0x78c] sm:$0xf0]  ;;  %v11463_v28 = vld [vmem:[%s16130_s4 + $0x704] sm:$0xf] }
 0x219   :  { %v12747_v21 = vpack.c.bf16 %v2164_v14, %v2164_v14  ;;  %v9802_v39 = vor.u32 %v11585_v38, %v9801_v37  ;;  %v9386_v16 = vor.u32 %v11477_v59, %v9383_v13  ;;  %v11404_v59 = vld [vmem:[%s16130_s4 + $0x528] sm:$0xf0]  ;;  %v11295_v13 = vld [vmem:[%s16130_s4 + $0x1c4] sm:$0xf] }
 0x21a   :  { %4496 = vmatpush.bf16.msrb.mxu2 %v8434_v42  ;;  %v9470_v42 = vor.u32 %v11498_v26, %v9467_v29  ;;  %v9803_v26 = vld [vmem:[%s16130_s4 + $0xad4] sm:$0xf0]  ;;  %v8767_v29 = vld [vmem:[%s16130_s4 + $0x2bc] sm:$0xf0] }
 0x21b   :  { %4445 = vmatmul.bf16.vlgmr.msra.gmra.mxu2 %v12747_v21  ;;  %4482 = vmatpush.bf16.msrb.mxu1 %v9802_v39 }
 0x21c   :  { %4529 = vmatpush.bf16.msrb.mxu0 %v9274_v50  ;;  %4520 = vmatpush.bf16.msrb.mxu3 %v8938_v25  ;;  %v9134_v50 = vor.u32 %v11414_v44, %v9131_v46  ;;  %v9358_v25 = vor.u32 %v11470_v19, %v9355_v31  ;;  %v8858_v46 = vor.u32 %v11348_v33, %v8857_v32  ;;  %v8745_v19 = vld [vmem:[%s16130_s4 + $0x270] sm:$0xf]  ;;  %v11320_v31 = vld [vmem:[%s16130_s4 + $0x288] sm:$0xf0]  ;;  %v11285_v32 = vld [vmem:[%s16130_s4 + $0x170] sm:$0xf0] }
 0x21d   :  { %v8717_v33 = vld [vmem:[%s16130_s4 + $0x238] sm:$0xf] }
 0x21e   :  { %4541 = vmatpush.bf16.msra.mxu2 %v9526_v17  ;;  %v2029_v34 = vpop.f32.mrf.mxu3  ;;  %v2055_v35 = vpop.f32.mrf.mxu1  ;;  %v11330_v17 = vld [vmem:[%s16130_s4 + $0x2dc] sm:$0xf] }
 0x21f   :  { %4483 = vmatpush.bf16.msrb.mxu1 %v9774_v57  ;;  %v8770_v34 = vor.u32 %v11323_v27, %v8767_v29 }
 0x220   :  { %4530 = vmatpush.bf16.msrb.mxu0 %v9246_v63  ;;  %v2014_v40 = vpop.f32.mrf.mxu2  ;;  %4521 = vmatpush.bf16.msrb.mxu3 %v8910_v36  ;;  %v8854_v63 = vor.u32 %v11344_v58, %v8851_v61  ;;  %v11575_v36 = vld [vmem:[%s16130_s4 + $0xa84] sm:$0xf]  ;;  %v8714_v58 = vor.u32 %v11309_v55, %v8711_v56  ;;  %v8801_v61 = vld [vmem:[%s16130_s4 + $0x2e0] sm:$0xf] }
 0x221   :  { %v2015_v6 = vadd.f32 %v2014_v40, %v883_v41  ;;  %v9775_v40 = vld [vmem:[%s16130_s4 + $0xa9c] sm:$0xf0]  ;;  %v11334_v41 = vld [vmem:[%s16130_s4 + $0x2f8] sm:$0xf0] }
 0x222   :  { %4542 = vmatpush.bf16.msra.mxu2 %v9498_v20  ;;  %v11582_v20 = vld [vmem:[%s16130_s4 + $0xabc] sm:$0xf]  ;;  %v9778_v52 = vor.u32 %v11575_v36, %v9775_v40  ;;  %v8802_v2 = vor.u32 %v11334_v41, %v8801_v61  ;;  %v9025_v36 = vld [vmem:[%s16130_s4 + $0x4a0] sm:$0xf]  ;;  %v11271_v61 = vld [vmem:[%s16130_s4 + $0x100] sm:$0xf0] }
 0x223   :  { %4502 = vmatpush.bf16.msra.mxu1 %v8854_v63  ;;  %v2028_v15 = vadd.f32 %v12734_v11, %v2015_v6  ;;  %v9806_v35 = vor.u32 %v11582_v20, %v9803_v26  ;;  %v11397_v20 = vld [vmem:[%s16130_s4 + $0x4f0] sm:$0xf0]  ;;  %v8661_v41 = vld [vmem:[%s16130_s4 + $0x1c8] sm:$0xf] }
 0x224   :  { %4531 = vmatpush.bf16.msrb.mxu0 %v9218_v9  ;;  %4522 = vmatpush.bf16.msrb.mxu3 %v8882_v54  ;;  %v11337_v9 = vld [vmem:[%s16130_s4 + $0x314] sm:$0xf]  ;;  %v884_v54 = vperm.slane %v12379_v45, 5 }
 0x225   :  { %v8826_v14 = vor.u32 %v11337_v9, %v8823_v4  ;;  %v9081_v9 = vld [vmem:[%s16130_s4 + $0x510] sm:$0xf] }
 0x226   :  { %4543 = vmatpush.bf16.msra.mxu2 %v9470_v42  ;;  %v11316_v42 = vld [vmem:[%s16130_s4 + $0x26c] sm:$0xf] }
 0x227   :  { %4503 = vmatpush.bf16.msra.mxu1 %v8826_v14  ;;  %v8742_v49 = vor.u32 %v11316_v42, %v8739_v43  ;;  %v8655_v14 = vld [vmem:[%s16130_s4 + $0x1dc] sm:$0xf0]  ;;  %v11278_v43 = vld [vmem:[%s16130_s4 + $0x138] sm:$0xf0] }
 0x228   :  { %4532 = vmatpush.bf16.msrb.mxu0 %v9190_v60  ;;  %v2016_v7 = vpop.f32.mrf.mxu2  ;;  %v8798_v60 = vor.u32 %v11330_v17, %v8795_v18  ;;  %v8658_v17 = vor.u32 %v11295_v13, %v8655_v14  ;;  %v8577_v42 = vld [vmem:[%s16130_s4 + $0x120] sm:$0xf]  ;;  %v8941_v13 = vld [vmem:[%s16130_s4 + $0x3f8] sm:$0xf]  ;;  %v11369_v14 = vld [vmem:[%s16130_s4 + $0x410] sm:$0xf0] }
 0x229   :  { %v8578_v55 = vor.u32 %v11278_v43, %v8577_v42 }
 0x22a   :  { %v12826_v5 = vpop.f32.mrf.mxu1  ;;  %4544 = vmatpush.bf16.msra.mxu2 %v9442_v62 }
 0x22b   :  { %4497 = vmatmul.bf16.vlgmr.msrb.gmra.mxu2 %v12485_v47  ;;  %4504 = vmatpush.bf16.msra.mxu1 %v8798_v60  ;;  %v2067_v62 = vadd.f32 %v12826_v5, %v884_v54  ;;  %v8773_v5 = vld [vmem:[%s16130_s4 + $0x2a8] sm:$0xf]  ;;  %v9082_v60 = vor.u32 %v11404_v59, %v9081_v9  ;;  %v11383_v54 = vld [vmem:[%s16130_s4 + $0x480] sm:$0xf0]  ;;  %v11264_v9 = vld [vmem:[%s16130_s4 + $0xc8] sm:$0xf0] }
 0x22c   :  { %4533 = vmatpush.bf16.msrb.mxu0 %v9162_v23 }
 0x22e   :  { %4545 = vmatpush.bf16.msra.mxu2 %v9414_v8  ;;  %v11327_v8 = vld [vmem:[%s16130_s4 + $0x2c0] sm:$0xf0] }
 0x22f   :  { %4505 = vmatpush.bf16.msra.mxu1 %v8770_v34  ;;  %v11313_v34 = vld [vmem:[%s16130_s4 + $0x250] sm:$0xf0] }
 0x230   :  { %4534 = vmatpush.bf16.msrb.mxu0 %v9134_v50  ;;  %v2040_v10 = vpop.f32.mrf.mxu0  ;;  %v8829_v50 = vld [vmem:[%s16130_s4 + $0x318] sm:$0xf]  ;;  %v8718_v40 = vor.u32 %v11313_v34, %v8717_v33  ;;  %v9669_v34 = vld [vmem:[%s16130_s4 + $0x9a8] sm:$0xf] }
 0x231   :  { %v2041_v11 = vadd.f32 %v2040_v10, %v2028_v15  ;;  %v8830_v57 = vor.u32 %v11341_v51, %v8829_v50  ;;  %v8774_v15 = vor.u32 %v11327_v8, %v8773_v5  ;;  %v11292_v10 = vld [vmem:[%s16130_s4 + $0x1a8] sm:$0xf0]  ;;  %v8521_v8 = vld [vmem:[%s16130_s4 + $0xb0] sm:$0xf] }
 0x232   :  { %v2068_v22 = vpop.f32.mrf.mxu1  ;;  %4546 = vmatpush.bf16.msra.mxu2 %v9386_v16  ;;  %v8633_v16 = vld [vmem:[%s16130_s4 + $0x190] sm:$0xf] }
 0x233   :  { %v2054_v24 = vadd.f32 %v12736_v12, %v2041_v11  ;;  %v9327_v12 = vld [vmem:[%s16130_s4 + $0x71c] sm:$0xf0]  ;;  %4506 = vmatpush.bf16.msra.mxu1 %v8742_v49  ;;  %v8634_v27 = vor.u32 %v11292_v10, %v8633_v16  ;;  %v8522_v16 = vor.u32 %v11264_v9, %v8521_v8  ;;  %v8493_v10 = vld [vmem:[%s16130_s4 + $0x78] sm:$0xf]  ;;  %v11537_v9 = vld [vmem:[%s16130_s4 + $0x950] sm:$0xf0] }
 0x234   :  { %4535 = vmatpush.bf16.msrb.mxu0 %v9106_v3  ;;  %v9330_v39 = vor.u32 %v11463_v28, %v9327_v12  ;;  %v8686_v3 = vor.u32 %v11302_v0, %v8683_v53  ;;  %v8746_v28 = vor.u32 %v11320_v31, %v8745_v19  ;;  %v8605_v12 = vld [vmem:[%s16130_s4 + $0x158] sm:$0xf]  ;;  %v11572_v0 = vld [vmem:[%s16130_s4 + $0xa68] sm:$0xf0]  ;;  %v11257_v19 = vld [vmem:[%s16130_s4 + $0x90] sm:$0xf0] }
 0x235   :  { %v2165_v23 = vmax.f32 %v2054_v24, 0.0  ;;  %v9697_v31 = vld [vmem:[%s16130_s4 + $0x9e0] sm:$0xf]  ;;  %v9613_v8 = vld [vmem:[%s16130_s4 + $0x938] sm:$0xf] }
 0x236   :  { %v2092_v38 = vpop.f32.mrf.mxu3  ;;  %4547 = vmatpush.bf16.msra.mxu2 %v9358_v25  ;;  %v9053_v25 = vld [vmem:[%s16130_s4 + $0x4d8] sm:$0xf] }
 0x237   :  { %v12882_v37 = vpack.c.bf16 %v2165_v23, %v2165_v23  ;;  %4507 = vmatpush.bf16.msra.mxu1 %v8714_v58 }
 0x238   :  { %v2042_v44 = vpop.f32.mrf.mxu0 }
 0x239   :  { %4458 = vmatmul.bf16.vlgmr.msra.gmra.mxu3 %v12882_v37  ;;  %v8689_v44 = vld [vmem:[%s16130_s4 + $0x200] sm:$0xf] }
 0x23a   :  { %4573 = vmatpush.bf16.msra.mxu3 %v9806_v35  ;;  %4548 = vmatpush.bf16.msra.mxu2 %v9330_v39  ;;  %v9054_v35 = vor.u32 %v11397_v20, %v9053_v25  ;;  %v8606_v39 = vor.u32 %v11285_v32, %v8605_v12  ;;  %v8913_v25 = vld [vmem:[%s16130_s4 + $0x3c0] sm:$0xf]  ;;  %v11362_v20 = vld [vmem:[%s16130_s4 + $0x3d8] sm:$0xf0] }
 0x23b   :  { %4508 = vmatpush.bf16.msra.mxu1 %v8686_v3  ;;  %v885_v3 = vperm.slane %v12379_v45, 6  ;;  %v11565_v45 = vld [vmem:[%s16130_s4 + $0xa30] sm:$0xf0]  ;;  %v11250_v32 = vld [vmem:[%s16130_s4 + $0x58] sm:$0xf0] }
 0x23d   :  { %4549 = vmatmul.bf16.vlgmr.msra.gmra.mxu2 %v12882_v37 }
 0x23e   :  { %4593 = vmatpush.bf16.msrb.mxu2 %v8858_v46  ;;  %4574 = vmatpush.bf16.msra.mxu3 %v9778_v52  ;;  %v2094_v63 = vpop.f32.mrf.mxu3  ;;  %v11306_v46 = vld [vmem:[%s16130_s4 + $0x218] sm:$0xf0]  ;;  %v8997_v52 = vld [vmem:[%s16130_s4 + $0x468] sm:$0xf] }
 0x23f   :  { %4509 = vmatpush.bf16.msra.mxu1 %v8658_v17  ;;  %v8690_v56 = vor.u32 %v11306_v46, %v8689_v44  ;;  %v9753_v63 = vld [vmem:[%s16130_s4 + $0xa50] sm:$0xf]  ;;  %v8998_v53 = vor.u32 %v11383_v54, %v8997_v52  ;;  %v8885_v46 = vld [vmem:[%s16130_s4 + $0x388] sm:$0xf]  ;;  %v11586_v52 = vld [vmem:[%s16130_s4 + $0xad8] sm:$0xf0] }
 0x240   :  { %v2079_v1 = vpop.f32.mrf.mxu2  ;;  %v2105_v7 = vpop.f32.mrf.mxu0  ;;  %v9754_v5 = vor.u32 %v11572_v0, %v9753_v63  ;;  %v9529_v44 = vld [vmem:[%s16130_s4 + $0x890] sm:$0xf] }
 0x241   :  { %v2080_v6 = vadd.f32 %v2079_v1, %v2067_v62  ;;  %v11299_v62 = vld [vmem:[%s16130_s4 + $0x1e0] sm:$0xf0]  ;;  %v8969_v1 = vld [vmem:[%s16130_s4 + $0x430] sm:$0xf] }
 0x242   :  { %4594 = vmatpush.bf16.msrb.mxu2 %v8830_v57  ;;  %v8549_v57 = vld [vmem:[%s16130_s4 + $0xe8] sm:$0xf]  ;;  %v9719_v63 = vld [vmem:[%s16130_s4 + $0xa2c] sm:$0xf0] }
 0x243   :  { %v2093_v4 = vadd.f32 %v2092_v38, %v2080_v6  ;;  %v11390_v38 = vld [vmem:[%s16130_s4 + $0x4b8] sm:$0xf0]  ;;  %v8550_v6 = vor.u32 %v11271_v61, %v8549_v57 }
 0x244   :  { %v9026_v49 = vor.u32 %v11390_v38, %v9025_v36  ;;  %v8914_v36 = vor.u32 %v11362_v20, %v8913_v25  ;;  %v9747_v38 = vld [vmem:[%s16130_s4 + $0xa64] sm:$0xf0]  ;;  %v9663_v25 = vld [vmem:[%s16130_s4 + $0x9bc] sm:$0xf0] }
 0x245   :  { %v2106_v18 = vadd.f32 %v2105_v7, %v2093_v4  ;;  %v8662_v7 = vor.u32 %v11299_v62, %v8661_v41  ;;  %v9725_v4 = vld [vmem:[%s16130_s4 + $0xa18] sm:$0xf]  ;;  %v11561_v62 = vld [vmem:[%s16130_s4 + $0xa14] sm:$0xf] }
 0x246   :  { %4595 = vmatpush.bf16.msrb.mxu2 %v8802_v2  ;;  %v12953_v24 = vpop.f32.mrf.mxu3  ;;  %v11376_v2 = vld [vmem:[%s16130_s4 + $0x448] sm:$0xf0]  ;;  %v2570_v20 = vld [vmem:[#allocation14 + $0x3] ss:$8 sm:$0x70] }
 0x247   :  { %v2166_v11 = vmax.f32 %v2106_v18, 0.0  ;;  %v8970_v59 = vor.u32 %v11376_v2, %v8969_v1  ;;  %v9726_v18 = vor.u32 %v11565_v45, %v9725_v4  ;;  %v9722_v4 = vor.u32 %v11561_v62, %v9719_v63  ;;  %v11554_v45 = vld [vmem:[%s16130_s4 + $0x9dc] sm:$0xf]  ;;  %v9279_v62 = vld [vmem:[%s16130_s4 + $0x6b4] sm:$0xf0] }
 0x248   :  { %v2081_v26 = vpop.f32.mrf.mxu2  ;;  %v2107_v23 = vpop.f32.mrf.mxu0  ;;  %v9389_v63 = vld [vmem:[%s16130_s4 + $0x778] sm:$0xf] }
 0x249   :  { %v12964_v29 = vpack.c.bf16 %v2166_v11, %v2166_v11  ;;  %4523 = vmatmul.bf16.vlgmr.msrb.gmra.mxu3 %v12666_v30  ;;  %v8942_v11 = vor.u32 %v11369_v14, %v8941_v13  ;;  %v8465_v23 = vld [vmem:[%s16130_s4 + $0x40] sm:$0xf] }
 0x24a   :  { %v12951_v22 = vpop.f32.mrf.mxu1  ;;  %4596 = vmatpush.bf16.msrb.mxu2 %v8774_v15  ;;  %4606 = vmatpush.bf16.msrb.mxu3 %v9082_v60  ;;  %v11558_v60 = vld [vmem:[%s16130_s4 + $0x9f8] sm:$0xf0]  ;;  %v8466_v43 = vor.u32 %v11250_v32, %v8465_v23  ;;  %v9557_v23 = vld [vmem:[%s16130_s4 + $0x8c8] sm:$0xf]  ;;  %v11523_v32 = vld [vmem:[%s16130_s4 + $0x8e0] sm:$0xf0] }
 0x24b   :  { %4471 = vmatmul.bf16.vlgmr.msra.gmra.mxu0 %v12964_v29  ;;  %v9698_v12 = vor.u32 %v11558_v60, %v9697_v31  ;;  %v2569_v31 = vld [vmem:[#allocation14 + $0x3] ss:$8 sm:$0xf] }
 0x24c   :  { %4580 = vmatpush.bf16.msra.mxu0 %v8634_v27  ;;  %v8494_v27 = vor.u32 %v11257_v19, %v8493_v10  ;;  %v11530_v10 = vld [vmem:[%s16130_s4 + $0x918] sm:$0xf0] }
 0x24e   :  { %4597 = vmatpush.bf16.msrb.mxu2 %v8746_v28  ;;  %4607 = vmatpush.bf16.msrb.mxu3 %v9054_v35  ;;  %v2159_v51 = vpop.f32.mrf.mxu3  ;;  %v11568_v35 = vld [vmem:[%s16130_s4 + $0xa4c] sm:$0xf] }
 0x24f   :  { %v9809_v51 = vld [vmem:[%s16130_s4 + $0xac0] sm:$0xf]  ;;  %v9750_v57 = vor.u32 %v11568_v35, %v9747_v38  ;;  %v11345_v35 = vld [vmem:[%s16130_s4 + $0x354] sm:$0xf]  ;;  %v13193_v38 = vor.u32 %v2570_v20, %v2569_v31  ;;  %v11324_v31 = vld [vmem:[%s16130_s4 + $0x2ac] sm:$0xf] }
 0x250   :  { %4581 = vmatpush.bf16.msra.mxu0 %v8606_v39  ;;  %v8437_v39 = vld [vmem:[%s16130_s4 + $0x8] sm:$0xf]  ;;  %v9810_v0 = vor.u32 %v11586_v52, %v9809_v51 }
 0x251   :  { %v9223_v20 = vld [vmem:[%s16130_s4 + $0x644] sm:$0xf0] }
 0x252   :  { %v2133_v50 = vpop.f32.mrf.mxu1  ;;  %4598 = vmatpush.bf16.msrb.mxu2 %v8718_v40  ;;  %4608 = vmatpush.bf16.msrb.mxu3 %v9026_v49  ;;  %v11243_v40 = vld [vmem:[%s16130_s4 + $0x20] sm:$0xf0] }
 0x253   :  { %v11355_v49 = vld [vmem:[%s16130_s4 + $0x3a0] sm:$0xf0]  ;;  %v8438_v41 = vor.u32 %v11243_v40, %v8437_v39  ;;  %v9558_v40 = vor.u32 %v11523_v32, %v9557_v23 }
 0x254   :  { %v2118_v58 = vpop.f32.mrf.mxu0  ;;  %4582 = vmatpush.bf16.msra.mxu0 %v8578_v55  ;;  %v9641_v55 = vld [vmem:[%s16130_s4 + $0x970] sm:$0xf] }
 0x255   :  { %v2119_v15 = vadd.f32 %v2118_v58, %v885_v3  ;;  %v8886_v58 = vor.u32 %v11355_v49, %v8885_v46  ;;  %v9501_v3 = vld [vmem:[%s16130_s4 + $0x858] sm:$0xf]  ;;  %v11488_v46 = vld [vmem:[%s16130_s4 + $0x7c8] sm:$0xf0] }
 0x256   :  { %4599 = vmatpush.bf16.msrb.mxu2 %v8690_v56  ;;  %4609 = vmatpush.bf16.msrb.mxu3 %v8998_v53  ;;  %v11544_v56 = vld [vmem:[%s16130_s4 + $0x988] sm:$0xf0] }
 0x257   :  { %v2132_v26 = vadd.f32 %v12951_v22, %v2119_v15  ;;  %v11551_v22 = vld [vmem:[%s16130_s4 + $0x9c0] sm:$0xf0]  ;;  %v9642_v2 = vor.u32 %v11544_v56, %v9641_v55  ;;  %v9614_v15 = vor.u32 %v11537_v9, %v9613_v8  ;;  %v11338_v55 = vld [vmem:[%s16130_s4 + $0x31c] sm:$0xf]  ;;  %v8831_v56 = vld [vmem:[%s16130_s4 + $0x334] sm:$0xf0] }
 0x258   :  { %4583 = vmatpush.bf16.msra.mxu0 %v8550_v6  ;;  %v9670_v50 = vor.u32 %v11551_v22, %v9669_v34  ;;  %v9781_v6 = vld [vmem:[%s16130_s4 + $0xa88] sm:$0xf]  ;;  %v11540_v34 = vld [vmem:[%s16130_s4 + $0x96c] sm:$0xf] }
 0x259   :  { %v9635_v22 = vld [vmem:[%s16130_s4 + $0x984] sm:$0xf0] }
 0x25a   :  { %4600 = vmatpush.bf16.msrb.mxu2 %v8662_v7  ;;  %4610 = vmatpush.bf16.msrb.mxu3 %v8970_v59  ;;  %v11579_v7 = vld [vmem:[%s16130_s4 + $0xaa0] sm:$0xf0]  ;;  %v9691_v59 = vld [vmem:[%s16130_s4 + $0x9f4] sm:$0xf0]  ;;  %v9638_v49 = vor.u32 %v11540_v34, %v9635_v22  ;;  %v9083_v34 = vld [vmem:[%s16130_s4 + $0x52c] sm:$0xf0] }
 0x25b   :  { %4536 = vmatmul.bf16.vlgmr.msrb.gmra.mxu0 %v12747_v21  ;;  %v9782_v13 = vor.u32 %v11579_v7, %v9781_v6  ;;  %v9694_v19 = vor.u32 %v11554_v45, %v9691_v59  ;;  %v9579_v6 = vld [vmem:[%s16130_s4 + $0x914] sm:$0xf0]  ;;  %v11331_v7 = vld [vmem:[%s16130_s4 + $0x2e4] sm:$0xf]  ;;  %v9251_v45 = vld [vmem:[%s16130_s4 + $0x67c] sm:$0xf0] }
 0x25c   :  { %v2120_v17 = vpop.f32.mrf.mxu0  ;;  %4584 = vmatpush.bf16.msra.mxu0 %v8522_v16  ;;  %v9473_v16 = vld [vmem:[%s16130_s4 + $0x820] sm:$0xf] }
 0x25d   :  { %4601 = vmatmul.bf16.vlgmr.msrb.gmra.mxu2 %v12590_v48  ;;  %v11502_v17 = vld [vmem:[%s16130_s4 + $0x838] sm:$0xf0] }
 0x25e   :  { %4645 = vmatpush.bf16.msra.mxu2 %v9754_v5  ;;  %4611 = vmatpush.bf16.msrb.mxu3 %v8942_v11  ;;  %v11509_v5 = vld [vmem:[%s16130_s4 + $0x870] sm:$0xf0]  ;;  %v11547_v11 = vld [vmem:[%s16130_s4 + $0x9a4] sm:$0xf] }
 0x25f   :  { %v9502_v14 = vor.u32 %v11509_v5, %v9501_v3  ;;  %v8803_v5 = vld [vmem:[%s16130_s4 + $0x2fc] sm:$0xf0] }
 0x260   :  { %v2144_v28 = vpop.f32.mrf.mxu2  ;;  %4585 = vmatpush.bf16.msra.mxu0 %v8494_v27 }
 0x261   :  { %v2145_v33 = vadd.f32 %v2144_v28, %v2132_v26  ;;  %v9474_v26 = vor.u32 %v11502_v17, %v9473_v16  ;;  %v9445_v28 = vld [vmem:[%s16130_s4 + $0x7e8] sm:$0xf]  ;;  %v8806_v17 = vor.u32 %v11331_v7, %v8803_v5 }
 0x262   :  { %4646 = vmatpush.bf16.msra.mxu2 %v9726_v18  ;;  %4612 = vmatpush.bf16.msrb.mxu3 %v8914_v36  ;;  %v9585_v18 = vld [vmem:[%s16130_s4 + $0x900] sm:$0xf]  ;;  %v8859_v36 = vld [vmem:[%s16130_s4 + $0x36c] sm:$0xf0] }
 0x263   :  { %v2158_v42 = vadd.f32 %v12953_v24, %v2145_v33  ;;  %v11516_v24 = vld [vmem:[%s16130_s4 + $0x8a8] sm:$0xf0]  ;;  %v9586_v27 = vor.u32 %v11530_v10, %v9585_v18  ;;  %v9666_v33 = vor.u32 %v11547_v11, %v9663_v25  ;;  %v11519_v18 = vld [vmem:[%s16130_s4 + $0x8c4] sm:$0xf]  ;;  %v9551_v10 = vld [vmem:[%s16130_s4 + $0x8dc] sm:$0xf0] }
 0x264   :  { %4586 = vmatpush.bf16.msra.mxu0 %v8466_v43  ;;  %v9530_v1 = vor.u32 %v11516_v24, %v9529_v44  ;;  %v9307_v43 = vld [vmem:[%s16130_s4 + $0x6ec] sm:$0xf0]  ;;  %v11533_v24 = vld [vmem:[%s16130_s4 + $0x934] sm:$0xf]  ;;  %v11436_v11 = vld [vmem:[%s16130_s4 + $0x62c] sm:$0xf]  ;;  %v9554_v23 = vor.u32 %v11519_v18, %v9551_v10 }
 0x265   :  { %v2167_v54 = vmax.f32 %v2158_v42, 0.0  ;;  %v11457_v42 = vld [vmem:[%s16130_s4 + $0x6d4] sm:$0xf]  ;;  %v9417_v44 = vld [vmem:[%s16130_s4 + $0x7b0] sm:$0xf]  ;;  %v9226_v22 = vor.u32 %v11436_v11, %v9223_v20 }
 0x266   :  { %4647 = vmatpush.bf16.msra.mxu2 %v9698_v12  ;;  %4613 = vmatpush.bf16.msrb.mxu3 %v8886_v58  ;;  %v4407_v60 = vpop.f32.mrf.mxu3  ;;  %v11495_v12 = vld [vmem:[%s16130_s4 + $0x800] sm:$0xf0]  ;;  %v9310_v52 = vor.u32 %v11457_v42, %v9307_v43  ;;  %v9418_v58 = vor.u32 %v11488_v46, %v9417_v44  ;;  %v11429_v42 = vld [vmem:[%s16130_s4 + $0x5f4] sm:$0xf]  ;;  %v9195_v43 = vld [vmem:[%s16130_s4 + $0x60c] sm:$0xf0] }
 0x267   :  { %v13114_v61 = vpack.c.bf16 %v2167_v54, %v2167_v54  ;;  %v9446_v39 = vor.u32 %v11495_v12, %v9445_v28  ;;  %v9607_v54 = vld [vmem:[%s16130_s4 + $0x94c] sm:$0xf0]  ;;  %v9333_v28 = vld [vmem:[%s16130_s4 + $0x708] sm:$0xf]  ;;  %v11467_v12 = vld [vmem:[%s16130_s4 + $0x720] sm:$0xf0] }
 0x268   :  { %v2146_v53 = vpop.f32.mrf.mxu2  ;;  %4587 = vmatpush.bf16.msra.mxu0 %v8438_v41  ;;  %v11450_v41 = vld [vmem:[%s16130_s4 + $0x69c] sm:$0xf]  ;;  %v11296_v10 = vld [vmem:[%s16130_s4 + $0x1cc] sm:$0xf]  ;;  %v9111_v11 = vld [vmem:[%s16130_s4 + $0x564] sm:$0xf0] }
 0x269   :  { %9827 = vmatmul.msk.bf16.vlgmr.msrb.gmra.mxu1 %vm4394_vm5, %v13114_v61  ;;  %9828 = vmatmul.msk.bf16.vlgmr.msra.gmra.mxu3 %vm4394_vm5, %v13114_v61  ;;  %v9610_v53 = vor.u32 %v11533_v24, %v9607_v54  ;;  %v9282_v3 = vor.u32 %v11450_v41, %v9279_v62  ;;  %v11394_v24 = vld [vmem:[%s16130_s4 + $0x4dc] sm:$0xf]  ;;  %v9198_v54 = vor.u32 %v11429_v42, %v9195_v43  ;;  %v9167_v41 = vld [vmem:[%s16130_s4 + $0x5d4] sm:$0xf0]  ;;  %v11432_v20 = vld [vmem:[%s16130_s4 + $0x608] sm:$0xf0] }
 0x26a   :  { %4648 = vmatpush.bf16.msra.mxu2 %v9670_v50  ;;  %4554 = vmatpush.bf16.msrb.mxu1 %v9750_v57  ;;  %v8862_v50 = vor.u32 %v11345_v35, %v8859_v36  ;;  %v2580_v57 = vperm.slane %v13193_v38, 0  ;;  %v11317_v36 = vld [vmem:[%s16130_s4 + $0x274] sm:$0xf] }
 0x26b   :  { %4664 = vmatpush.bf16.msra.mxu3 %v9810_v0  ;;  %4588 = vmatmul.bf16.vlgmr.msra.gmra.mxu0 %v12485_v47  ;;  %v11481_v0 = vld [vmem:[%s16130_s4 + $0x790] sm:$0xf0] }
 0x26c   :  { %4632 = vmatpush.bf16.msrb.mxu0 %v9530_v1  ;;  %v8834_v1 = vor.u32 %v11338_v55, %v8831_v56  ;;  %v4408_v8 = vadd.f32 %v4407_v60, %v2580_v57  ;;  %v9390_v9 = vor.u32 %v11481_v0, %v9389_v63  ;;  %v8775_v60 = vld [vmem:[%s16130_s4 + $0x2c4] sm:$0xf0]  ;;  %v11310_v55 = vld [vmem:[%s16130_s4 + $0x23c] sm:$0xf]  ;;  %v8719_v57 = vld [vmem:[%s16130_s4 + $0x254] sm:$0xf0] }
 0x26d   :  { %v8778_v32 = vor.u32 %v11324_v31, %v8775_v60  ;;  %v9249_v63 = vld [vmem:[%s16130_s4 + $0x660] sm:$0xf]  ;;  %v11446_v0 = vld [vmem:[%s16130_s4 + $0x678] sm:$0xf0]  ;;  %v11408_v31 = vld [vmem:[%s16130_s4 + $0x54c] sm:$0xf] }
 0x26e   :  { %4649 = vmatpush.bf16.msra.mxu2 %v9642_v2  ;;  %4555 = vmatpush.bf16.msrb.mxu1 %v9722_v4  ;;  %v4409_v51 = vpop.f32.mrf.mxu3  ;;  %v11526_v2 = vld [vmem:[%s16130_s4 + $0x8fc] sm:$0xf]  ;;  %v11443_v4 = vld [vmem:[%s16130_s4 + $0x664] sm:$0xf]  ;;  %v9250_v5 = vor.u32 %v11446_v0, %v9249_v63  ;;  %v11425_v42 = vld [vmem:[%s16130_s4 + $0x5d0] sm:$0xf0] }
 0x26f   :  { %4665 = vmatpush.bf16.msra.mxu3 %v9782_v13  ;;  %v9361_v13 = vld [vmem:[%s16130_s4 + $0x740] sm:$0xf]  ;;  %v9582_v16 = vor.u32 %v11526_v2, %v9579_v6  ;;  %v9055_v51 = vld [vmem:[%s16130_s4 + $0x4f4] sm:$0xf0]  ;;  %v8722_v2 = vor.u32 %v11310_v55, %v8719_v57  ;;  %v11303_v6 = vld [vmem:[%s16130_s4 + $0x204] sm:$0xf] }
 0x270   :  { %4633 = vmatpush.bf16.msrb.mxu0 %v9502_v14  ;;  %v11474_v14 = vld [vmem:[%s16130_s4 + $0x758] sm:$0xf0]  ;;  %v9058_v62 = vor.u32 %v11394_v24, %v9055_v51  ;;  %v9699_v63 = vld [vmem:[%s16130_s4 + $0x9fc] sm:$0xf0]  ;;  %v8585_v0 = vld [vmem:[%s16130_s4 + $0x128] sm:$0xf] }
 0x271   :  { %v9362_v25 = vor.u32 %v11474_v14, %v9361_v13  ;;  %v9221_v13 = vld [vmem:[%s16130_s4 + $0x628] sm:$0xf]  ;;  %v11439_v14 = vld [vmem:[%s16130_s4 + $0x640] sm:$0xf0]  ;;  %v11286_v24 = vld [vmem:[%s16130_s4 + $0x178] sm:$0xf0] }
 0x272   :  { %4650 = vmatpush.bf16.msra.mxu2 %v9614_v15  ;;  %4556 = vmatpush.bf16.msrb.mxu1 %v9694_v19  ;;  %v9254_v19 = vor.u32 %v11443_v4, %v9251_v45  ;;  %v9139_v4 = vld [vmem:[%s16130_s4 + $0x59c] sm:$0xf0]  ;;  %v9222_v60 = vor.u32 %v11439_v14, %v9221_v13  ;;  %v11366_v51 = vld [vmem:[%s16130_s4 + $0x3fc] sm:$0xf]  ;;  %v8557_v13 = vld [vmem:[%s16130_s4 + $0xf0] sm:$0xf] }
 0x273   :  { %v11418_v57 = vld [vmem:[%s16130_s4 + $0x598] sm:$0xf0]  ;;  %v11272_v14 = vld [vmem:[%s16130_s4 + $0x108] sm:$0xf0] }
 0x274   :  { %4634 = vmatpush.bf16.msrb.mxu0 %v9474_v26  ;;  %v4420_v59 = vpop.f32.mrf.mxu0  ;;  %v9305_v26 = vld [vmem:[%s16130_s4 + $0x6d0] sm:$0xf] }
 0x275   :  { %v13259_v15 = vadd.f32 %v4420_v59, %v4408_v8  ;;  %v8691_v8 = vld [vmem:[%s16130_s4 + $0x21c] sm:$0xf0] }
 0x276   :  { %4651 = vmatpush.bf16.msra.mxu2 %v9586_v27  ;;  %4557 = vmatpush.bf16.msrb.mxu1 %v9666_v33  ;;  %v11460_v27 = vld [vmem:[%s16130_s4 + $0x6e8] sm:$0xf0]  ;;  %v11401_v33 = vld [vmem:[%s16130_s4 + $0x514] sm:$0xf] }
 0x277   :  { %v9306_v35 = vor.u32 %v11460_v27, %v9305_v26  ;;  %v9086_v46 = vor.u32 %v11401_v33, %v9083_v34  ;;  %v11569_v27 = vld [vmem:[%s16130_s4 + $0xa54] sm:$0xf]  ;;  %v8971_v33 = vld [vmem:[%s16130_s4 + $0x44c] sm:$0xf0] }
 0x278   :  { %4635 = vmatpush.bf16.msrb.mxu0 %v9446_v39  ;;  %v9334_v39 = vor.u32 %v11467_v12, %v9333_v28  ;;  %v9755_v28 = vld [vmem:[%s16130_s4 + $0xa6c] sm:$0xf0]  ;;  %v8641_v12 = vld [vmem:[%s16130_s4 + $0x198] sm:$0xf] }
 0x279   :  { %4510 = vmatmul.bf16.vlgmr.msra.gmra.mxu1 %v12590_v48  ;;  %4614 = vmatmul.bf16.vlgmr.msrb.gmra.mxu3 %v12666_v30 }
 0x27a   :  { %4652 = vmatpush.bf16.msra.mxu2 %v9558_v40  ;;  %4558 = vmatpush.bf16.msrb.mxu1 %v9638_v49  ;;  %v8747_v40 = vld [vmem:[%s16130_s4 + $0x28c] sm:$0xf0]  ;;  %v9277_v49 = vld [vmem:[%s16130_s4 + $0x698] sm:$0xf] }
 0x27b   :  { %4684 = vmatpush.bf16.msrb.mxu3 %v8862_v50  ;;  %v11453_v50 = vld [vmem:[%s16130_s4 + $0x6b0] sm:$0xf0] }
 0x27c   :  { %4636 = vmatpush.bf16.msrb.mxu0 %v9418_v58  ;;  %v4422_v44 = vpop.f32.mrf.mxu0  ;;  %v9278_v56 = vor.u32 %v11453_v50, %v9277_v49  ;;  %v11422_v58 = vld [vmem:[%s16130_s4 + $0x5bc] sm:$0xf]  ;;  %v9727_v49 = vld [vmem:[%s16130_s4 + $0xa34] sm:$0xf0]  ;;  %v8613_v50 = vld [vmem:[%s16130_s4 + $0x160] sm:$0xf] }
 0x27d   :  { %4653 = vmatmul.bf16.vlgmr.msra.gmra.mxu2 %v12964_v29 }
 0x27e   :  { %4710 = vmatpush.bf16.msrb.mxu2 %v9310_v52  ;;  %4559 = vmatpush.bf16.msrb.mxu1 %v9610_v53  ;;  %v8750_v52 = vor.u32 %v11317_v36, %v8747_v40  ;;  %v11387_v53 = vld [vmem:[%s16130_s4 + $0x4a4] sm:$0xf]  ;;  %v9165_v40 = vld [vmem:[%s16130_s4 + $0x5b8] sm:$0xf] }
 0x27f   :  { %4685 = vmatpush.bf16.msrb.mxu3 %v8834_v1  ;;  %v9027_v1 = vld [vmem:[%s16130_s4 + $0x4bc] sm:$0xf0] }
 0x280   :  { %4637 = vmatpush.bf16.msrb.mxu0 %v9390_v9  ;;  %v11415_v9 = vld [vmem:[%s16130_s4 + $0x584] sm:$0xf]  ;;  %v9030_v59 = vor.u32 %v11387_v53, %v9027_v1 }
 0x281   :  { %v9142_v18 = vor.u32 %v11415_v9, %v9139_v4  ;;  %v11279_v53 = vld [vmem:[%s16130_s4 + $0x140] sm:$0xf0]  ;;  %v11548_v4 = vld [vmem:[%s16130_s4 + $0x9ac] sm:$0xf] }
 0x282   :  { %4711 = vmatpush.bf16.msrb.mxu2 %v9282_v3  ;;  %4560 = vmatpush.bf16.msrb.mxu1 %v9582_v16  ;;  %v9170_v3 = vor.u32 %v11422_v58, %v9167_v41  ;;  %v4433_v7 = vpop.f32.mrf.mxu1  ;;  %v11380_v16 = vld [vmem:[%s16130_s4 + $0x46c] sm:$0xf]  ;;  %v8614_v58 = vor.u32 %v11286_v24, %v8613_v50  ;;  %v11359_v1 = vld [vmem:[%s16130_s4 + $0x3c4] sm:$0xf]  ;;  %v11349_v50 = vld [vmem:[%s16130_s4 + $0x370] sm:$0xf0] }
 0x283   :  { %4686 = vmatpush.bf16.msrb.mxu3 %v8806_v17  ;;  %v13362_v45 = vadd.f32 %v4433_v7, %v13259_v15  ;;  %v8999_v17 = vld [vmem:[%s16130_s4 + $0x484] sm:$0xf0]  ;;  %v8694_v15 = vor.u32 %v11303_v6, %v8691_v8  ;;  %v8586_v8 = vor.u32 %v11279_v53, %v8585_v0  ;;  %v11275_v24 = vld [vmem:[%s16130_s4 + $0x124] sm:$0xf]  ;;  %v11342_v0 = vld [vmem:[%s16130_s4 + $0x338] sm:$0xf0] }
 0x284   :  { %4638 = vmatpush.bf16.msrb.mxu0 %v9362_v25  ;;  %v9193_v25 = vld [vmem:[%s16130_s4 + $0x5f0] sm:$0xf]  ;;  %v9002_v26 = vor.u32 %v11380_v16, %v8999_v17  ;;  %v9109_v7 = vld [vmem:[%s16130_s4 + $0x548] sm:$0xf]  ;;  %v11289_v16 = vld [vmem:[%s16130_s4 + $0x194] sm:$0xf] }
 0x285   :  { %v9194_v36 = vor.u32 %v11432_v20, %v9193_v25  ;;  %v8635_v17 = vld [vmem:[%s16130_s4 + $0x1ac] sm:$0xf0]  ;;  %v11541_v20 = vld [vmem:[%s16130_s4 + $0x974] sm:$0xf]  ;;  %v11251_v53 = vld [vmem:[%s16130_s4 + $0x60] sm:$0xf0] }
 0x286   :  { %4712 = vmatpush.bf16.msrb.mxu2 %v9254_v19  ;;  %4561 = vmatpush.bf16.msrb.mxu1 %v9554_v23  ;;  %v8663_v19 = vld [vmem:[%s16130_s4 + $0x1e4] sm:$0xf0]  ;;  %v11293_v23 = vld [vmem:[%s16130_s4 + $0x1b0] sm:$0xf0]  ;;  %v8638_v25 = vor.u32 %v11289_v16, %v8635_v17  ;;  %v11335_v16 = vld [vmem:[%s16130_s4 + $0x300] sm:$0xf0] }
 0x287   :  { %4687 = vmatpush.bf16.msrb.mxu3 %v8778_v32  ;;  %v11373_v32 = vld [vmem:[%s16130_s4 + $0x434] sm:$0xf]  ;;  %v8666_v34 = vor.u32 %v11296_v10, %v8663_v19  ;;  %v8642_v43 = vor.u32 %v11293_v23, %v8641_v12  ;;  %v11282_v23 = vld [vmem:[%s16130_s4 + $0x15c] sm:$0xf] }
 0x288   :  { %4639 = vmatpush.bf16.msrb.mxu0 %v9334_v39  ;;  %v9758_v39 = vor.u32 %v11569_v27, %v9755_v28  ;;  %v8974_v44 = vor.u32 %v11373_v32, %v8971_v33  ;;  %v8529_v27 = vld [vmem:[%s16130_s4 + $0xb8] sm:$0xf]  ;;  %v11265_v12 = vld [vmem:[%s16130_s4 + $0xd0] sm:$0xf0] }
 0x289   :  { %4562 = vmatmul.bf16.vlgmr.msrb.gmra.mxu1 %v12964_v29  ;;  %9829 = vmatmul.msk.bf16.vlgmr.msra.gmra.mxu3 %vm4394_vm5, %v13114_v61  ;;  %v8607_v32 = vld [vmem:[%s16130_s4 + $0x174] sm:$0xf0]  ;;  %v11261_v17 = vld [vmem:[%s16130_s4 + $0xb4] sm:$0xf] }
 0x28a   :  { %4713 = vmatpush.bf16.msrb.mxu2 %v9226_v22  ;;  %4619 = vmatpush.bf16.msra.mxu1 %v9306_v35  ;;  %v9114_v22 = vor.u32 %v11408_v31, %v9111_v11  ;;  %v4435_v35 = vpop.f32.mrf.mxu1  ;;  %v11583_v31 = vld [vmem:[%s16130_s4 + $0xac4] sm:$0xf]  ;;  %v8558_v11 = vor.u32 %v11272_v14, %v8557_v13  ;;  %v11244_v13 = vld [vmem:[%s16130_s4 + $0x28] sm:$0xf0]  ;;  %v8809_v14 = vld [vmem:[%s16130_s4 + $0x2e8] sm:$0xf] }
 0x28b   :  { %4688 = vmatpush.bf16.msrb.mxu3 %v8750_v52  ;;  %4640 = vmatmul.bf16.vlgmr.msrb.gmra.mxu0 %v12882_v37  ;;  %v8943_v52 = vld [vmem:[%s16130_s4 + $0x414] sm:$0xf0] }
 0x28c   :  { %4697 = vmatpush.bf16.msra.mxu0 %v9086_v46  ;;  %v11562_v46 = vld [vmem:[%s16130_s4 + $0xa1c] sm:$0xf]  ;;  %v8946_v41 = vor.u32 %v11366_v51, %v8943_v52  ;;  %v8579_v51 = vld [vmem:[%s16130_s4 + $0x13c] sm:$0xf0] }
 0x28d   :  { %v9730_v55 = vor.u32 %v11562_v46, %v9727_v49  ;;  %v8501_v46 = vld [vmem:[%s16130_s4 + $0x80] sm:$0xf]  ;;  %v8865_v49 = vld [vmem:[%s16130_s4 + $0x358] sm:$0xf] }
 0x28e   :  { %4714 = vmatpush.bf16.msrb.mxu2 %v9198_v54  ;;  %4620 = vmatpush.bf16.msra.mxu1 %v9278_v56  ;;  %v9166_v54 = vor.u32 %v11425_v42, %v9165_v40  ;;  %v9137_v56 = vld [vmem:[%s16130_s4 + $0x580] sm:$0xf]  ;;  %v9615_v40 = vld [vmem:[%s16130_s4 + $0x954] sm:$0xf0] }
 0x28f   :  { %4689 = vmatpush.bf16.msrb.mxu3 %v8722_v2  ;;  %v8915_v2 = vld [vmem:[%s16130_s4 + $0x3dc] sm:$0xf0] }
 0x290   :  { %4698 = vmatpush.bf16.msra.mxu0 %v9058_v62  ;;  %v11555_v62 = vld [vmem:[%s16130_s4 + $0x9e4] sm:$0xf]  ;;  %v8918_v9 = vor.u32 %v11359_v1, %v8915_v2  ;;  %v11268_v1 = vld [vmem:[%s16130_s4 + $0xec] sm:$0xf]  ;;  %v8551_v2 = vld [vmem:[%s16130_s4 + $0x104] sm:$0xf0] }
 0x291   :  { %v9702_v6 = vor.u32 %v11555_v62, %v9699_v63  ;;  %v8473_v62 = vld [vmem:[%s16130_s4 + $0x48] sm:$0xf]  ;;  %v8837_v63 = vld [vmem:[%s16130_s4 + $0x320] sm:$0xf] }
 0x292   :  { %4715 = vmatpush.bf16.msrb.mxu2 %v9170_v3  ;;  %4621 = vmatpush.bf16.msra.mxu1 %v9250_v5  ;;  %v9138_v3 = vor.u32 %v11418_v57, %v9137_v56  ;;  %v11411_v5 = vld [vmem:[%s16130_s4 + $0x560] sm:$0xf0]  ;;  %v9587_v57 = vld [vmem:[%s16130_s4 + $0x91c] sm:$0xf0] }
 0x293   :  { %4690 = vmatpush.bf16.msrb.mxu3 %v8694_v15  ;;  %v11352_v15 = vld [vmem:[%s16130_s4 + $0x38c] sm:$0xf]  ;;  %v9110_v10 = vor.u32 %v11411_v5, %v9109_v7  ;;  %v11527_v56 = vld [vmem:[%s16130_s4 + $0x904] sm:$0xf]  ;;  %v8838_v7 = vor.u32 %v11342_v0, %v8837_v63  ;;  %v8439_v63 = vld [vmem:[%s16130_s4 + $0x24] sm:$0xf0] }
 0x294   :  { %4699 = vmatpush.bf16.msra.mxu0 %v9030_v59  ;;  %v9671_v59 = vld [vmem:[%s16130_s4 + $0x9c4] sm:$0xf0]  ;;  %v11520_v5 = vld [vmem:[%s16130_s4 + $0x8cc] sm:$0xf]  ;;  %v9229_v0 = vld [vmem:[%s16130_s4 + $0x630] sm:$0xf] }
 0x295   :  { %v9674_v19 = vor.u32 %v11548_v4, %v9671_v59  ;;  %v8474_v4 = vor.u32 %v11251_v53, %v8473_v62  ;;  %v8554_v59 = vor.u32 %v11268_v1, %v8551_v2  ;;  %v11240_v62 = vld [vmem:[%s16130_s4 + $0xc] sm:$0xf]  ;;  %v11513_v2 = vld [vmem:[%s16130_s4 + $0x894] sm:$0xf] }
 0x296   :  { %4716 = vmatpush.bf16.msrb.mxu2 %v9142_v18  ;;  %4622 = vmatpush.bf16.msra.mxu1 %v9222_v60  ;;  %v8887_v18 = vld [vmem:[%s16130_s4 + $0x3a4] sm:$0xf0]  ;;  %v9811_v60 = vld [vmem:[%s16130_s4 + $0xadc] sm:$0xf0]  ;;  %v11440_v1 = vld [vmem:[%s16130_s4 + $0x648] sm:$0xf0] }
 0x297   :  { %4691 = vmatpush.bf16.msrb.mxu3 %v8666_v34  ;;  %v8890_v28 = vor.u32 %v11352_v15, %v8887_v18  ;;  %v9814_v33 = vor.u32 %v11583_v31, %v9811_v60  ;;  %v11576_v34 = vld [vmem:[%s16130_s4 + $0xa8c] sm:$0xf]  ;;  %v8523_v15 = vld [vmem:[%s16130_s4 + $0xcc] sm:$0xf0]  ;;  %v9313_v18 = vld [vmem:[%s16130_s4 + $0x6d8] sm:$0xf] }
 0x298   :  { %4700 = vmatpush.bf16.msra.mxu0 %v9002_v26  ;;  %v9643_v26 = vld [vmem:[%s16130_s4 + $0x98c] sm:$0xf0]  ;;  %v11517_v31 = vld [vmem:[%s16130_s4 + $0x8b0] sm:$0xf0] }
 0x299   :  { %v9646_v35 = vor.u32 %v11541_v20, %v9643_v26  ;;  %v8526_v20 = vor.u32 %v11261_v17, %v8523_v15  ;;  %v8781_v26 = vld [vmem:[%s16130_s4 + $0x2b0] sm:$0xf] }
 0x29a   :  { %4717 = vmatpush.bf16.msrb.mxu2 %v9114_v22  ;;  %4623 = vmatpush.bf16.msra.mxu1 %v9194_v36  ;;  %v9783_v36 = vld [vmem:[%s16130_s4 + $0xaa4] sm:$0xf0] }
 0x29b   :  { %4736 = vmatpush.bf16.msra.mxu3 %v9758_v39  ;;  %v11534_v39 = vld [vmem:[%s16130_s4 + $0x93c] sm:$0xf]  ;;  %v9786_v52 = vor.u32 %v11576_v34, %v9783_v36  ;;  %v9509_v36 = vld [vmem:[%s16130_s4 + $0x860] sm:$0xf] }
 0x29c   :  { %4701 = vmatpush.bf16.msra.mxu0 %v8974_v44  ;;  %4692 = vmatmul.bf16.vlgmr.msrb.gmra.mxu3 %v12590_v48  ;;  %v8610_v44 = vor.u32 %v11282_v23, %v8607_v32  ;;  %v11254_v23 = vld [vmem:[%s16130_s4 + $0x7c] sm:$0xf]  ;;  %v8495_v32 = vld [vmem:[%s16130_s4 + $0x94] sm:$0xf0] }
 0x29d   :  { %4718 = vmatmul.bf16.vlgmr.msrb.gmra.mxu2 %v12747_v21  ;;  %v11454_v34 = vld [vmem:[%s16130_s4 + $0x6b8] sm:$0xf0] }
 0x29e   :  { %4762 = vmatpush.bf16.msra.mxu2 %v8642_v43  ;;  %4624 = vmatpush.bf16.msra.mxu1 %v9166_v54  ;;  %v4446_v22 = vpop.f32.mrf.mxu2  ;;  %v8530_v43 = vor.u32 %v11265_v12, %v8529_v27  ;;  %v9618_v54 = vor.u32 %v11534_v39, %v9615_v40  ;;  %v11328_v27 = vld [vmem:[%s16130_s4 + $0x2c8] sm:$0xf0]  ;;  %v11510_v39 = vld [vmem:[%s16130_s4 + $0x878] sm:$0xf0]  ;;  %v8498_v40 = vor.u32 %v11254_v23, %v8495_v32  ;;  %v11573_v23 = vld [vmem:[%s16130_s4 + $0xa70] sm:$0xf0] }
 0x29f   :  { %4737 = vmatpush.bf16.msra.mxu3 %v9730_v55  ;;  %v13529_v42 = vadd.f32 %v4446_v22, %v13362_v45  ;;  %v11258_v45 = vld [vmem:[%s16130_s4 + $0x98] sm:$0xf0]  ;;  %v8866_v55 = vor.u32 %v11349_v50, %v8865_v49  ;;  %v11247_v49 = vld [vmem:[%s16130_s4 + $0x44] sm:$0xf]  ;;  %v8467_v50 = vld [vmem:[%s16130_s4 + $0x5c] sm:$0xf0] }
 0x2a0   :  { %4702 = vmatpush.bf16.msra.mxu0 %v8946_v41  ;;  %v8582_v41 = vor.u32 %v11275_v24, %v8579_v51  ;;  %v9257_v24 = vld [vmem:[%s16130_s4 + $0x668] sm:$0xf]  ;;  %v11447_v51 = vld [vmem:[%s16130_s4 + $0x680] sm:$0xf0] }
 0x2a2   :  { %4763 = vmatpush.bf16.msra.mxu2 %v8614_v58  ;;  %4625 = vmatpush.bf16.msra.mxu1 %v9138_v3  ;;  %v8502_v58 = vor.u32 %v11258_v45, %v8501_v46  ;;  %v9510_v45 = vor.u32 %v11510_v39, %v9509_v36 }
 0x2a3   :  { %4738 = vmatpush.bf16.msra.mxu3 %v9702_v6  ;;  %v9590_v6 = vor.u32 %v11527_v56, %v9587_v57  ;;  %v8470_v56 = vor.u32 %v11247_v49, %v8467_v50  ;;  %v8725_v57 = vld [vmem:[%s16130_s4 + $0x240] sm:$0xf]  ;;  %v9145_v50 = vld [vmem:[%s16130_s4 + $0x588] sm:$0xf] }
 0x2a4   :  { %4703 = vmatpush.bf16.msra.mxu0 %v8918_v9  ;;  %v8445_v9 = vld [vmem:[%s16130_s4 + $0x10] sm:$0xf] }
 0x2a6   :  { %4764 = vmatpush.bf16.msra.mxu2 %v8586_v8  ;;  %4626 = vmatpush.bf16.msra.mxu1 %v9110_v10  ;;  %v4448_v3 = vpop.f32.mrf.mxu2  ;;  %v9559_v8 = vld [vmem:[%s16130_s4 + $0x8e4] sm:$0xf0]  ;;  %v11461_v10 = vld [vmem:[%s16130_s4 + $0x6f0] sm:$0xf0] }
 0x2a7   :  { %4739 = vmatpush.bf16.msra.mxu3 %v9674_v19  ;;  %v9537_v19 = vld [vmem:[%s16130_s4 + $0x898] sm:$0xf]  ;;  %v9562_v60 = vor.u32 %v11520_v5, %v9559_v8  ;;  %v9531_v3 = vld [vmem:[%s16130_s4 + $0x8ac] sm:$0xf0]  ;;  %v11496_v8 = vld [vmem:[%s16130_s4 + $0x808] sm:$0xf0] }
 0x2a8   :  { %4704 = vmatpush.bf16.msra.mxu0 %v8890_v28  ;;  %v9314_v28 = vor.u32 %v11461_v10, %v9313_v18  ;;  %v9538_v12 = vor.u32 %v11517_v31, %v9537_v19  ;;  %v9453_v5 = vld [vmem:[%s16130_s4 + $0x7f0] sm:$0xf]  ;;  %v11433_v18 = vld [vmem:[%s16130_s4 + $0x610] sm:$0xf0]  ;;  %v11506_v10 = vld [vmem:[%s16130_s4 + $0x85c] sm:$0xf] }
 0x2a9   :  { %4627 = vmatmul.bf16.vlgmr.msra.gmra.mxu1 %v12747_v21  ;;  %v9454_v17 = vor.u32 %v11496_v8, %v9453_v5  ;;  %v9503_v19 = vld [vmem:[%s16130_s4 + $0x874] sm:$0xf0]  ;;  %v11485_v5 = vld [vmem:[%s16130_s4 + $0x7b4] sm:$0xf]  ;;  %v9419_v8 = vld [vmem:[%s16130_s4 + $0x7cc] sm:$0xf0] }
 0x2aa   :  { %4765 = vmatpush.bf16.msra.mxu2 %v8558_v11  ;;  %4671 = vmatpush.bf16.msrb.mxu1 %v8638_v25  ;;  %v8810_v11 = vor.u32 %v11335_v16, %v8809_v14  ;;  %v8446_v25 = vor.u32 %v11244_v13, %v8445_v9  ;;  %v8442_v9 = vor.u32 %v11240_v62, %v8439_v63  ;;  %v9201_v16 = vld [vmem:[%s16130_s4 + $0x5f8] sm:$0xf]  ;;  %v9117_v62 = vld [vmem:[%s16130_s4 + $0x550] sm:$0xf] }
 0x2ab   :  { %4740 = vmatpush.bf16.msra.mxu3 %v9646_v35  ;;  %4705 = vmatmul.bf16.vlgmr.msra.gmra.mxu0 %v12666_v30  ;;  %v8782_v35 = vor.u32 %v11328_v27, %v8781_v26  ;;  %v9230_v13 = vor.u32 %v11440_v1, %v9229_v0  ;;  %v9534_v14 = vor.u32 %v11513_v2, %v9531_v3  ;;  %v11300_v26 = vld [vmem:[%s16130_s4 + $0x1e8] sm:$0xf0]  ;;  %v9705_v1 = vld [vmem:[%s16130_s4 + $0x9e8] sm:$0xf]  ;;  %v11559_v2 = vld [vmem:[%s16130_s4 + $0xa00] sm:$0xf0] }
 0x2ac   :  { %4755 = vmatpush.bf16.msrb.mxu0 %v9814_v33  ;;  %v9285_v33 = vld [vmem:[%s16130_s4 + $0x6a0] sm:$0xf]  ;;  %v9506_v27 = vor.u32 %v11506_v10, %v9503_v19  ;;  %v9422_v10 = vor.u32 %v11485_v5, %v9419_v8  ;;  %v9677_v19 = vld [vmem:[%s16130_s4 + $0x9b0] sm:$0xf]  ;;  %v9593_v5 = vld [vmem:[%s16130_s4 + $0x908] sm:$0xf] }
 0x2ad   :  { %v9286_v46 = vor.u32 %v11454_v34, %v9285_v33  ;;  %v11426_v33 = vld [vmem:[%s16130_s4 + $0x5d8] sm:$0xf0]  ;;  %v11499_v34 = vld [vmem:[%s16130_s4 + $0x824] sm:$0xf] }
 0x2ae   :  { %4766 = vmatpush.bf16.msra.mxu2 %v8530_v43  ;;  %4672 = vmatpush.bf16.msrb.mxu1 %v8610_v44  ;;  %v13629_v22 = vpop.f32.mrf.mxu2  ;;  %v8753_v43 = vld [vmem:[%s16130_s4 + $0x278] sm:$0xf]  ;;  %v11321_v44 = vld [vmem:[%s16130_s4 + $0x290] sm:$0xf0]  ;;  %v11531_v8 = vld [vmem:[%s16130_s4 + $0x920] sm:$0xf0] }
 0x2af   :  { %4741 = vmatpush.bf16.msra.mxu3 %v9618_v54  ;;  %v9481_v54 = vld [vmem:[%s16130_s4 + $0x828] sm:$0xf] }
 0x2b0   :  { %4756 = vmatpush.bf16.msrb.mxu0 %v9786_v52  ;;  %v8754_v52 = vor.u32 %v11321_v44, %v8753_v43  ;;  %v11482_v43 = vld [vmem:[%s16130_s4 + $0x798] sm:$0xf0] }
 0x2b2   :  { %4767 = vmatpush.bf16.msra.mxu2 %v8502_v58  ;;  %4673 = vmatpush.bf16.msrb.mxu1 %v8582_v41  ;;  %v11314_v58 = vld [vmem:[%s16130_s4 + $0x258] sm:$0xf0]  ;;  %v9258_v41 = vor.u32 %v11447_v51, %v9257_v24 }
 0x2b3   :  { %4742 = vmatpush.bf16.msra.mxu3 %v9590_v6  ;;  %v11566_v24 = vld [vmem:[%s16130_s4 + $0xa38] sm:$0xf0] }
 0x2b4   :  { %4775 = vmatpush.bf16.msra.mxu0 %v8866_v55  ;;  %v11503_v55 = vld [vmem:[%s16130_s4 + $0x840] sm:$0xf0] }
 0x2b5   :  { %v9482_v53 = vor.u32 %v11503_v55, %v9481_v54  ;;  %v11419_v54 = vld [vmem:[%s16130_s4 + $0x5a0] sm:$0xf0]  ;;  %v11492_v55 = vld [vmem:[%s16130_s4 + $0x7ec] sm:$0xf] }
 0x2b6   :  { %4768 = vmatpush.bf16.msra.mxu2 %v8474_v4  ;;  %4674 = vmatpush.bf16.msrb.mxu1 %v8554_v59  ;;  %v4500_v6 = vpop.f32.mrf.mxu2  ;;  %v8697_v4 = vld [vmem:[%s16130_s4 + $0x208] sm:$0xf]  ;;  %v11307_v59 = vld [vmem:[%s16130_s4 + $0x220] sm:$0xf0]  ;;  %v9146_v63 = vor.u32 %v11419_v54, %v9145_v50  ;;  %v9621_v54 = vld [vmem:[%s16130_s4 + $0x940] sm:$0xf] }
 0x2b7   :  { %4743 = vmatpush.bf16.msra.mxu3 %v9562_v60  ;;  %v8698_v60 = vor.u32 %v11307_v59, %v8697_v4  ;;  %v11468_v59 = vld [vmem:[%s16130_s4 + $0x728] sm:$0xf0]  ;;  %v8587_v50 = vld [vmem:[%s16130_s4 + $0x144] sm:$0xf0] }
 0x2b8   :  { %4776 = vmatpush.bf16.msra.mxu0 %v8838_v7  ;;  %v8726_v7 = vor.u32 %v11314_v58, %v8725_v57  ;;  %v9369_v57 = vld [vmem:[%s16130_s4 + $0x748] sm:$0xf]  ;;  %v11475_v58 = vld [vmem:[%s16130_s4 + $0x760] sm:$0xf0] }
 0x2b9   :  { %v9370_v6 = vor.u32 %v11475_v58, %v9369_v57  ;;  %v11464_v58 = vld [vmem:[%s16130_s4 + $0x70c] sm:$0xf] }
 0x2ba   :  { %4769 = vmatpush.bf16.msra.mxu2 %v8446_v25  ;;  %4675 = vmatpush.bf16.msrb.mxu1 %v8526_v20  ;;  %v11489_v25 = vld [vmem:[%s16130_s4 + $0x7d0] sm:$0xf0]  ;;  %v8669_v20 = vld [vmem:[%s16130_s4 + $0x1d0] sm:$0xf] }
 0x2bb   :  { %4801 = vmatpush.bf16.msrb.mxu3 %v9314_v28  ;;  %9830 = vmatmul.msk.bf16.vlgmr.msrb.gmra.mxu0 %vm4394_vm5, %v13114_v61  ;;  %v9173_v28 = vld [vmem:[%s16130_s4 + $0x5c0] sm:$0xf]  ;;  %v8670_v39 = vor.u32 %v11300_v26, %v8669_v20  ;;  %v11478_v20 = vld [vmem:[%s16130_s4 + $0x77c] sm:$0xf]  ;;  %v9391_v26 = vld [vmem:[%s16130_s4 + $0x794] sm:$0xf0] }
 0x2bc   :  { %4777 = vmatpush.bf16.msra.mxu0 %v8810_v11  ;;  %4744 = vmatmul.bf16.vlgmr.msra.gmra.mxu3 %v12964_v29  ;;  %v4459_v15 = vpop.f32.mrf.mxu3  ;;  %v9425_v11 = vld [vmem:[%s16130_s4 + $0x7b8] sm:$0xf] }
 0x2bd   :  { %4770 = vmatmul.bf16.vlgmr.msra.gmra.mxu2 %v12485_v47  ;;  %v4460_v31 = vadd.f32 %v4459_v15, %v13529_v42  ;;  %v9202_v42 = vor.u32 %v11433_v18, %v9201_v16  ;;  %v9426_v32 = vor.u32 %v11489_v25, %v9425_v11  ;;  %v9706_v16 = vor.u32 %v11559_v2, %v9705_v1  ;;  %v9091_v15 = vld [vmem:[%s16130_s4 + $0x534] sm:$0xf0]  ;;  %v11405_v1 = vld [vmem:[%s16130_s4 + $0x530] sm:$0xf0] }
 0x2be   :  { %4814 = vmatpush.bf16.msrb.mxu2 %v9538_v12  ;;  %4676 = vmatpush.bf16.msrb.mxu1 %v8498_v40  ;;  %v9761_v12 = vld [vmem:[%s16130_s4 + $0xa58] sm:$0xf]  ;;  %v9397_v40 = vld [vmem:[%s16130_s4 + $0x780] sm:$0xf] }
 0x2bf   :  { %4802 = vmatpush.bf16.msrb.mxu3 %v9286_v46  ;;  %v9762_v44 = vor.u32 %v11573_v23, %v9761_v12  ;;  %v9174_v46 = vor.u32 %v11426_v33, %v9173_v28  ;;  %v9398_v51 = vor.u32 %v11482_v43, %v9397_v40  ;;  %v8615_v28 = vld [vmem:[%s16130_s4 + $0x17c] sm:$0xf0]  ;;  %v11395_v23 = vld [vmem:[%s16130_s4 + $0x4e4] sm:$0xf]  ;;  %v9394_v33 = vor.u32 %v11478_v20, %v9391_v26 }
 0x2c0   :  { %4778 = vmatpush.bf16.msra.mxu0 %v8782_v35  ;;  %v9475_v35 = vld [vmem:[%s16130_s4 + $0x83c] sm:$0xf0]  ;;  %v13745_v36 = vpop.f32.mrf.mxu2  ;;  %v11471_v43 = vld [vmem:[%s16130_s4 + $0x744] sm:$0xf] }
 0x2c1   :  { %v9478_v49 = vor.u32 %v11499_v34, %v9475_v35  ;;  %v9649_v34 = vld [vmem:[%s16130_s4 + $0x978] sm:$0xf]  ;;  %v11545_v35 = vld [vmem:[%s16130_s4 + $0x990] sm:$0xf0] }
 0x2c2   :  { %4815 = vmatpush.bf16.msrb.mxu2 %v9510_v45  ;;  %4677 = vmatpush.bf16.msrb.mxu1 %v8470_v56  ;;  %v9733_v45 = vld [vmem:[%s16130_s4 + $0xa20] sm:$0xf]  ;;  %v9447_v56 = vld [vmem:[%s16130_s4 + $0x804] sm:$0xf0] }
 0x2c3   :  { %4803 = vmatpush.bf16.msrb.mxu3 %v9258_v41  ;;  %v9734_v41 = vor.u32 %v11566_v24, %v9733_v45  ;;  %v9450_v0 = vor.u32 %v11492_v55, %v9447_v56  ;;  %v9650_v45 = vor.u32 %v11545_v35, %v9649_v34  ;;  %v11388_v24 = vld [vmem:[%s16130_s4 + $0x4ac] sm:$0xf]  ;;  %v11538_v55 = vld [vmem:[%s16130_s4 + $0x958] sm:$0xf0] }
 0x2c4   :  { %4779 = vmatpush.bf16.msra.mxu0 %v8754_v52  ;;  %v4461_v52 = vpop.f32.mrf.mxu3  ;;  %v9622_v2 = vor.u32 %v11538_v55, %v9621_v54  ;;  %v9005_v54 = vld [vmem:[%s16130_s4 + $0x470] sm:$0xf]  ;;  %v11384_v55 = vld [vmem:[%s16130_s4 + $0x488] sm:$0xf0] }
 0x2c6   :  { %4816 = vmatpush.bf16.msrb.mxu2 %v9482_v53  ;;  %4678 = vmatpush.bf16.msrb.mxu1 %v8442_v9  ;;  %v11412_v53 = vld [vmem:[%s16130_s4 + $0x568] sm:$0xf0] }
 0x2c7   :  { %4804 = vmatpush.bf16.msrb.mxu3 %v9230_v13  ;;  %v11290_v13 = vld [vmem:[%s16130_s4 + $0x19c] sm:$0xf]  ;;  %v9118_v18 = vor.u32 %v11412_v53, %v9117_v62  ;;  %v11269_v62 = vld [vmem:[%s16130_s4 + $0xf4] sm:$0xf]  ;;  %v9089_v53 = vld [vmem:[%s16130_s4 + $0x518] sm:$0xf] }
 0x2c8   :  { %4780 = vmatpush.bf16.msra.mxu0 %v8726_v7  ;;  %v4472_v3 = vpop.f32.mrf.mxu0  ;;  %v9341_v7 = vld [vmem:[%s16130_s4 + $0x710] sm:$0xf]  ;;  %v4552_v4 = vpop.f32.mrf.mxu2 }
 0x2c9   :  { %4679 = vmatmul.bf16.vlgmr.msrb.gmra.mxu1 %v12485_v47  ;;  %v13799_v9 = vadd.f32 %v4472_v3, %v4460_v31  ;;  %v11552_v31 = vld [vmem:[%s16130_s4 + $0x9c8] sm:$0xf0]  ;;  %v11381_v3 = vld [vmem:[%s16130_s4 + $0x474] sm:$0xf] }
 0x2ca   :  { %4723 = vmatpush.bf16.msra.mxu1 %v9534_v14  ;;  %4817 = vmatpush.bf16.msrb.mxu2 %v9454_v17  ;;  %v8643_v14 = vld [vmem:[%s16130_s4 + $0x1b4] sm:$0xf0]  ;;  %v11402_v17 = vld [vmem:[%s16130_s4 + $0x51c] sm:$0xf]  ;;  %v9678_v12 = vor.u32 %v11552_v31, %v9677_v19 }
 0x2cb   :  { %4805 = vmatpush.bf16.msrb.mxu3 %v9202_v42  ;;  %v8646_v25 = vor.u32 %v11290_v13, %v8643_v14  ;;  %v9094_v42 = vor.u32 %v11402_v17, %v9091_v15  ;;  %v9090_v13 = vor.u32 %v11405_v1, %v9089_v53  ;;  %v11262_v14 = vld [vmem:[%s16130_s4 + $0xbc] sm:$0xf]  ;;  %v8531_v17 = vld [vmem:[%s16130_s4 + $0xd4] sm:$0xf0]  ;;  %v9061_v15 = vld [vmem:[%s16130_s4 + $0x4e0] sm:$0xf]  ;;  %v9006_v1 = vor.u32 %v11384_v55, %v9005_v54 }
 0x2cc   :  { %4781 = vmatpush.bf16.msra.mxu0 %v8698_v60  ;;  %v9342_v60 = vor.u32 %v11468_v59, %v9341_v7  ;;  %v13822_v11 = vpop.f32.mrf.mxu3  ;;  %v11374_v19 = vld [vmem:[%s16130_s4 + $0x43c] sm:$0xf]  ;;  %v8979_v31 = vld [vmem:[%s16130_s4 + $0x454] sm:$0xf0]  ;;  %v8534_v20 = vor.u32 %v11262_v14, %v8531_v17  ;;  %v2581_v54 = vperm.slane %v13193_v38, 1 }
 0x2cd   :  { %v11514_v14 = vld [vmem:[%s16130_s4 + $0x89c] sm:$0xf] }
 0x2ce   :  { %4724 = vmatpush.bf16.msra.mxu1 %v9506_v27  ;;  %4818 = vmatpush.bf16.msrb.mxu2 %v9426_v32  ;;  %v11283_v27 = vld [vmem:[%s16130_s4 + $0x164] sm:$0xf]  ;;  %v9063_v32 = vld [vmem:[%s16130_s4 + $0x4fc] sm:$0xf0] }
 0x2cf   :  { %4806 = vmatpush.bf16.msrb.mxu3 %v9174_v46  ;;  %v8618_v40 = vor.u32 %v11283_v27, %v8615_v28  ;;  %v9066_v46 = vor.u32 %v11395_v23, %v9063_v32  ;;  %v11458_v27 = vld [vmem:[%s16130_s4 + $0x6dc] sm:$0xf]  ;;  %v9315_v28 = vld [vmem:[%s16130_s4 + $0x6f4] sm:$0xf0]  ;;  %v8503_v23 = vld [vmem:[%s16130_s4 + $0x9c] sm:$0xf0] }
 0x2d0   :  { %4782 = vmatpush.bf16.msra.mxu0 %v8670_v39  ;;  %v4474_v39 = vpop.f32.mrf.mxu0  ;;  %v9033_v32 = vld [vmem:[%s16130_s4 + $0x4a8] sm:$0xf] }
 0x2d1   :  { %v11367_v39 = vld [vmem:[%s16130_s4 + $0x404] sm:$0xf] }
 0x2d2   :  { %4725 = vmatpush.bf16.msra.mxu1 %v9478_v49  ;;  %4819 = vmatpush.bf16.msrb.mxu2 %v9398_v51  ;;  %v11276_v49 = vld [vmem:[%s16130_s4 + $0x12c] sm:$0xf]  ;;  %v9035_v51 = vld [vmem:[%s16130_s4 + $0x4c4] sm:$0xf0] }
 0x2d3   :  { %4783 = vmatmul.bf16.vlgmr.msra.gmra.mxu0 %v12590_v48  ;;  %4807 = vmatpush.bf16.msrb.mxu3 %v9146_v63  ;;  %v8590_v57 = vor.u32 %v11276_v49, %v8587_v50  ;;  %v9038_v63 = vor.u32 %v11388_v24, %v9035_v51  ;;  %v11248_v50 = vld [vmem:[%s16130_s4 + $0x4c] sm:$0xf]  ;;  %v9287_v24 = vld [vmem:[%s16130_s4 + $0x6bc] sm:$0xf0] }
 0x2d4   :  { %4827 = vmatpush.bf16.msrb.mxu0 %v9762_v44  ;;  %v9363_v44 = vld [vmem:[%s16130_s4 + $0x75c] sm:$0xf0]  ;;  %v4526_v56 = vpop.f32.mrf.mxu3 }
 0x2d5   :  { %v9366_v52 = vor.u32 %v11471_v43, %v9363_v44  ;;  %v9318_v43 = vor.u32 %v11458_v27, %v9315_v28  ;;  %v11360_v56 = vld [vmem:[%s16130_s4 + $0x3cc] sm:$0xf]  ;;  %v8949_v28 = vld [vmem:[%s16130_s4 + $0x400] sm:$0xf] }
 0x2d6   :  { %4726 = vmatpush.bf16.msra.mxu1 %v9450_v0  ;;  %4820 = vmatpush.bf16.msrb.mxu2 %v9370_v6  ;;  %v8559_v0 = vld [vmem:[%s16130_s4 + $0x10c] sm:$0xf0] }
 0x2d7   :  { %4808 = vmatpush.bf16.msrb.mxu3 %v9118_v18  ;;  %v9007_v6 = vld [vmem:[%s16130_s4 + $0x48c] sm:$0xf0]  ;;  %v8562_v59 = vor.u32 %v11269_v62, %v8559_v0  ;;  %v11398_v18 = vld [vmem:[%s16130_s4 + $0x4f8] sm:$0xf0]  ;;  %v2582_v62 = vperm.slane %v13193_v38, 2 }
 0x2d8   :  { %4828 = vmatpush.bf16.msrb.mxu0 %v9734_v41  ;;  %v9335_v41 = vld [vmem:[%s16130_s4 + $0x724] sm:$0xf0]  ;;  %v13904_v4 = vpop.f32.mrf.mxu0  ;;  %v9062_v26 = vor.u32 %v11398_v18, %v9061_v15  ;;  %v11584_v15 = vld [vmem:[%s16130_s4 + $0xacc] sm:$0xf] }
 0x2d9   :  { %v9338_v7 = vor.u32 %v11464_v58, %v9335_v41  ;;  %v9819_v18 = vld [vmem:[%s16130_s4 + $0xae4] sm:$0xf0] }
 0x2da   :  { %4727 = vmatpush.bf16.msra.mxu1 %v9422_v10  ;;  %4821 = vmatpush.bf16.msrb.mxu2 %v9342_v60  ;;  %v9594_v10 = vor.u32 %v11531_v8, %v9593_v5  ;;  %v9565_v60 = vld [vmem:[%s16130_s4 + $0x8d0] sm:$0xf]  ;;  %v8977_v5 = vld [vmem:[%s16130_s4 + $0x438] sm:$0xf]  ;;  %v11377_v8 = vld [vmem:[%s16130_s4 + $0x450] sm:$0xf0] }
 0x2db   :  { %4853 = vmatpush.bf16.msra.mxu3 %v8646_v25  ;;  %v11524_v25 = vld [vmem:[%s16130_s4 + $0x8e8] sm:$0xf0] }
 0x2dc   :  { %4829 = vmatpush.bf16.msrb.mxu0 %v9706_v16  ;;  %4809 = vmatmul.bf16.vlgmr.msrb.gmra.mxu3 %v12747_v21  ;;  %v9010_v16 = vor.u32 %v11381_v3, %v9007_v6  ;;  %v9566_v35 = vor.u32 %v11524_v25, %v9565_v60  ;;  %v11444_v3 = vld [vmem:[%s16130_s4 + $0x66c] sm:$0xf]  ;;  %v9259_v6 = vld [vmem:[%s16130_s4 + $0x684] sm:$0xf0]  ;;  %v11437_v60 = vld [vmem:[%s16130_s4 + $0x634] sm:$0xf] }
 0x2dd   :  { %4822 = vmatmul.bf16.vlgmr.msrb.gmra.mxu2 %v12882_v37  ;;  %v9262_v17 = vor.u32 %v11444_v3, %v9259_v6  ;;  %v9231_v25 = vld [vmem:[%s16130_s4 + $0x64c] sm:$0xf0]  ;;  %v9175_v3 = vld [vmem:[%s16130_s4 + $0x5dc] sm:$0xf0] }
 0x2de   :  { %4879 = vmatpush.bf16.msra.mxu2 %v9094_v42  ;;  %4728 = vmatpush.bf16.msra.mxu1 %v9394_v33  ;;  %v11255_v42 = vld [vmem:[%s16130_s4 + $0x84] sm:$0xf] }
 0x2df   :  { %4854 = vmatpush.bf16.msra.mxu3 %v8618_v40  ;;  %v11391_v33 = vld [vmem:[%s16130_s4 + $0x4c0] sm:$0xf0]  ;;  %v8951_v40 = vld [vmem:[%s16130_s4 + $0x41c] sm:$0xf0] }
 0x2e0   :  { %4830 = vmatpush.bf16.msrb.mxu0 %v9678_v12  ;;  %v8982_v12 = vor.u32 %v11374_v19, %v8979_v31  ;;  %v13949_v34 = vpop.f32.mrf.mxu2  ;;  %v4539_v44 = vpop.f32.mrf.mxu0  ;;  %v9034_v49 = vor.u32 %v11391_v33, %v9033_v32  ;;  %v8954_v51 = vor.u32 %v11367_v39, %v8951_v40  ;;  %v8978_v31 = vor.u32 %v11377_v8, %v8977_v5  ;;  %v11507_v32 = vld [vmem:[%s16130_s4 + $0x864] sm:$0xf]  ;;  %v9511_v33 = vld [vmem:[%s16130_s4 + $0x87c] sm:$0xf0]  ;;  %v11577_v40 = vld [vmem:[%s16130_s4 + $0xa94] sm:$0xf] }
 0x2e1   :  { %v9234_v39 = vor.u32 %v11437_v60, %v9231_v25  ;;  %v8873_v44 = vld [vmem:[%s16130_s4 + $0x360] sm:$0xf]  ;;  %v11356_v5 = vld [vmem:[%s16130_s4 + $0x3a8] sm:$0xf0]  ;;  %v11493_v8 = vld [vmem:[%s16130_s4 + $0x7f4] sm:$0xf] }
 0x2e2   :  { %4880 = vmatpush.bf16.msra.mxu2 %v9066_v46  ;;  %4729 = vmatpush.bf16.msra.mxu1 %v9366_v52  ;;  %v8506_v46 = vor.u32 %v11255_v42, %v8503_v23  ;;  %v8475_v52 = vld [vmem:[%s16130_s4 + $0x64] sm:$0xf0]  ;;  %v9822_v23 = vor.u32 %v11584_v15, %v9819_v18 }
 0x2e3   :  { %4855 = vmatpush.bf16.msra.mxu3 %v8590_v57  ;;  %v8923_v57 = vld [vmem:[%s16130_s4 + $0x3e4] sm:$0xf0]  ;;  %v8478_v53 = vor.u32 %v11248_v50, %v8475_v52  ;;  %v11350_v50 = vld [vmem:[%s16130_s4 + $0x378] sm:$0xf0]  ;;  %v11363_v52 = vld [vmem:[%s16130_s4 + $0x3e0] sm:$0xf0] }
 0x2e4   :  { %4831 = vmatpush.bf16.msrb.mxu0 %v9650_v45  ;;  %v11451_v45 = vld [vmem:[%s16130_s4 + $0x6a4] sm:$0xf] }
 0x2e5   :  { %v9290_v41 = vor.u32 %v11451_v45, %v9287_v24  ;;  %v11430_v45 = vld [vmem:[%s16130_s4 + $0x5fc] sm:$0xf]  ;;  %v9203_v24 = vld [vmem:[%s16130_s4 + $0x614] sm:$0xf0] }
 0x2e6   :  { %4881 = vmatpush.bf16.msra.mxu2 %v9038_v63  ;;  %4730 = vmatpush.bf16.msra.mxu1 %v9338_v7  ;;  %v4485_v58 = vpop.f32.mrf.mxu1  ;;  %v11241_v63 = vld [vmem:[%s16130_s4 + $0x14] sm:$0xf]  ;;  %v8926_v7 = vor.u32 %v11360_v56, %v8923_v57  ;;  %v11500_v56 = vld [vmem:[%s16130_s4 + $0x82c] sm:$0xf]  ;;  %v9483_v57 = vld [vmem:[%s16130_s4 + $0x844] sm:$0xf0] }
 0x2e7   :  { %4856 = vmatpush.bf16.msra.mxu3 %v8562_v59  ;;  %v13986_v0 = vadd.f32 %v4485_v58, %v13799_v9  ;;  %v11353_v9 = vld [vmem:[%s16130_s4 + $0x394] sm:$0xf]  ;;  %v8874_v58 = vor.u32 %v11350_v50, %v8873_v44 }
 0x2e8   :  { %4832 = vmatpush.bf16.msrb.mxu0 %v9622_v2  ;;  %v8447_v2 = vld [vmem:[%s16130_s4 + $0x2c] sm:$0xf0]  ;;  %v4604_v59 = vpop.f32.mrf.mxu2 }
 0x2e9   :  { %4731 = vmatmul.bf16.vlgmr.msra.gmra.mxu1 %v12882_v37  ;;  %v8450_v19 = vor.u32 %v11241_v63, %v8447_v2  ;;  %v11423_v2 = vld [vmem:[%s16130_s4 + $0x5c4] sm:$0xf]  ;;  %v4499_v59 = vadd.f32 %v13629_v22, %v2581_v54  ;;  %v9399_v54 = vld [vmem:[%s16130_s4 + $0x79c] sm:$0xf0] }
 0x2ea   :  { %4788 = vmatpush.bf16.msrb.mxu1 %v9090_v13  ;;  %4882 = vmatpush.bf16.msra.mxu2 %v9010_v16  ;;  %v8895_v13 = vld [vmem:[%s16130_s4 + $0x3ac] sm:$0xf0]  ;;  %v9539_v16 = vld [vmem:[%s16130_s4 + $0x8b4] sm:$0xf0]  ;;  %v9178_v18 = vor.u32 %v11423_v2, %v9175_v3 }
 0x2eb   :  { %4857 = vmatpush.bf16.msra.mxu3 %v8534_v20  ;;  %v8898_v42 = vor.u32 %v11353_v9, %v8895_v13  ;;  %v9542_v27 = vor.u32 %v11514_v14, %v9539_v16  ;;  %v8893_v9 = vld [vmem:[%s16130_s4 + $0x390] sm:$0xf]  ;;  %v9817_v14 = vld [vmem:[%s16130_s4 + $0xac8] sm:$0xf]  ;;  %v11587_v16 = vld [vmem:[%s16130_s4 + $0xae0] sm:$0xf0] }
 0x2ec   :  { %4833 = vmatpush.bf16.msrb.mxu0 %v9594_v10  ;;  %v4589_v10 = vpop.f32.mrf.mxu0  ;;  %v9455_v13 = vld [vmem:[%s16130_s4 + $0x80c] sm:$0xf0]  ;;  %v9818_v25 = vor.u32 %v11587_v16, %v9817_v14  ;;  %v8811_v14 = vld [vmem:[%s16130_s4 + $0x304] sm:$0xf0] }
 0x2ed   :  { %v4590_v20 = vadd.f32 %v4589_v10, %v2582_v62  ;;  %v8845_v62 = vld [vmem:[%s16130_s4 + $0x328] sm:$0xf]  ;;  %v8894_v10 = vor.u32 %v11356_v5, %v8893_v9  ;;  %v9458_v60 = vor.u32 %v11493_v8, %v9455_v13  ;;  %v11287_v8 = vld [vmem:[%s16130_s4 + $0x180] sm:$0xf0]  ;;  %v11332_v13 = vld [vmem:[%s16130_s4 + $0x2ec] sm:$0xf] }
 0x2ee   :  { %4789 = vmatpush.bf16.msrb.mxu1 %v9062_v26  ;;  %4883 = vmatpush.bf16.msra.mxu2 %v8982_v12  ;;  %v14028_v26 = vpop.f32.mrf.mxu3  ;;  %v11370_v12 = vld [vmem:[%s16130_s4 + $0x418] sm:$0xf0]  ;;  %v9371_v9 = vld [vmem:[%s16130_s4 + $0x764] sm:$0xf0] }
 0x2ef   :  { %4858 = vmatpush.bf16.msra.mxu3 %v8506_v46  ;;  %v14052_v46 = vadd.f32 %v13949_v34, %v4590_v20  ;;  %v8921_v34 = vld [vmem:[%s16130_s4 + $0x3c8] sm:$0xf]  ;;  %v11416_v20 = vld [vmem:[%s16130_s4 + $0x58c] sm:$0xf] }
 0x2f0   :  { %4834 = vmatpush.bf16.msrb.mxu0 %v9566_v35  ;;  %v4487_v35 = vpop.f32.mrf.mxu1  ;;  %v8621_v5 = vld [vmem:[%s16130_s4 + $0x168] sm:$0xf] }
 0x2f1   :  { %v11346_v35 = vld [vmem:[%s16130_s4 + $0x35c] sm:$0xf]  ;;  %v8733_v16 = vld [vmem:[%s16130_s4 + $0x248] sm:$0xf] }
 0x2f2   :  { %4790 = vmatpush.bf16.msrb.mxu1 %v9034_v49  ;;  %4884 = vmatpush.bf16.msra.mxu2 %v8954_v51  ;;  %v8950_v49 = vor.u32 %v11370_v12, %v8949_v28  ;;  %v9514_v51 = vor.u32 %v11507_v32, %v9511_v33  ;;  %v9427_v12 = vld [vmem:[%s16130_s4 + $0x7d4] sm:$0xf0]  ;;  %v11580_v32 = vld [vmem:[%s16130_s4 + $0xaa8] sm:$0xf0] }
 0x2f3   :  { %4835 = vmatmul.bf16.vlgmr.msrb.gmra.mxu0 %v12964_v29  ;;  %4859 = vmatpush.bf16.msra.mxu3 %v8478_v53  ;;  %v8922_v53 = vor.u32 %v11363_v52, %v8921_v34  ;;  %v11479_v34 = vld [vmem:[%s16130_s4 + $0x784] sm:$0xf] }
 0x2f4   :  { %4892 = vmatpush.bf16.msra.mxu0 %v9318_v43  ;;  %v9791_v43 = vld [vmem:[%s16130_s4 + $0xaac] sm:$0xf0]  ;;  %v4591_v63 = vpop.f32.mrf.mxu0  ;;  %v9402_v2 = vor.u32 %v11479_v34, %v9399_v54  ;;  %v11399_v34 = vld [vmem:[%s16130_s4 + $0x500] sm:$0xf0]  ;;  %v8755_v54 = vld [vmem:[%s16130_s4 + $0x294] sm:$0xf0] }
 0x2f5   :  { %v9794_v55 = vor.u32 %v11577_v40, %v9791_v43  ;;  %v8789_v40 = vld [vmem:[%s16130_s4 + $0x2b8] sm:$0xf]  ;;  %v11329_v43 = vld [vmem:[%s16130_s4 + $0x2d0] sm:$0xf0] }
 0x2f6   :  { %4791 = vmatpush.bf16.msrb.mxu1 %v9006_v1  ;;  %4885 = vmatpush.bf16.msra.mxu2 %v8926_v7  ;;  %v11343_v1 = vld [vmem:[%s16130_s4 + $0x340] sm:$0xf0]  ;;  %v4578_v6 = vpop.f32.mrf.mxu3  ;;  %v9486_v7 = vor.u32 %v11500_v56, %v9483_v57  ;;  %v11294_v56 = vld [vmem:[%s16130_s4 + $0x1b8] sm:$0xf0] }
 0x2f7   :  { %4860 = vmatpush.bf16.msra.mxu3 %v8450_v19  ;;  %v8846_v15 = vor.u32 %v11343_v1, %v8845_v62  ;;  %v8817_v19 = vld [vmem:[%s16130_s4 + $0x2f0] sm:$0xf]  ;;  %v8839_v62 = vld [vmem:[%s16130_s4 + $0x33c] sm:$0xf0]  ;;  %v11322_v1 = vld [vmem:[%s16130_s4 + $0x298] sm:$0xf0] }
 0x2f8   :  { %4893 = vmatpush.bf16.msra.mxu0 %v9290_v41  ;;  %v9206_v41 = vor.u32 %v11430_v45, %v9203_v24  ;;  %v11409_v24 = vld [vmem:[%s16130_s4 + $0x554] sm:$0xf]  ;;  %v11472_v6 = vld [vmem:[%s16130_s4 + $0x74c] sm:$0xf] }
 0x2fa   :  { %4792 = vmatpush.bf16.msrb.mxu1 %v8978_v31  ;;  %4886 = vmatpush.bf16.msra.mxu2 %v8898_v42  ;;  %v11336_v31 = vld [vmem:[%s16130_s4 + $0x308] sm:$0xf0]  ;;  %v9147_v42 = vld [vmem:[%s16130_s4 + $0x5a4] sm:$0xf0] }
 0x2fb   :  { %4905 = vmatpush.bf16.msrb.mxu3 %v9542_v27  ;;  %v11486_v27 = vld [vmem:[%s16130_s4 + $0x7bc] sm:$0xf]  ;;  %v8818_v33 = vor.u32 %v11336_v31, %v8817_v19  ;;  %v9343_v19 = vld [vmem:[%s16130_s4 + $0x72c] sm:$0xf0]  ;;  %v8814_v31 = vor.u32 %v11332_v13, %v8811_v14  ;;  %v9741_v13 = vld [vmem:[%s16130_s4 + $0xa28] sm:$0xf] }
 0x2fc   :  { %4894 = vmatpush.bf16.msra.mxu0 %v9262_v17  ;;  %4861 = vmatmul.bf16.vlgmr.msra.gmra.mxu3 %v12485_v47  ;;  %v4511_v17 = vpop.f32.mrf.mxu1  ;;  %v9430_v50 = vor.u32 %v11486_v27, %v9427_v12  ;;  %v11325_v12 = vld [vmem:[%s16130_s4 + $0x2b4] sm:$0xf]  ;;  %v11567_v14 = vld [vmem:[%s16130_s4 + $0xa40] sm:$0xf0] }
 0x2fd   :  { %4887 = vmatmul.bf16.vlgmr.msra.gmra.mxu2 %v12666_v30  ;;  %v4512_v22 = vadd.f32 %v4511_v17, %v4499_v59  ;;  %v11315_v17 = vld [vmem:[%s16130_s4 + $0x260] sm:$0xf0] }
 0x2fe   :  { %4937 = vmatpush.bf16.msrb.mxu2 %v9822_v23  ;;  %4793 = vmatpush.bf16.msrb.mxu1 %v8950_v49  ;;  %v9789_v23 = vld [vmem:[%s16130_s4 + $0xa90] sm:$0xf]  ;;  %v4615_v49 = vpop.f32.mrf.mxu3  ;;  %v8734_v27 = vor.u32 %v11315_v17, %v8733_v16 }
 0x2ff   :  { %4906 = vmatpush.bf16.msrb.mxu3 %v9514_v51  ;;  %v4525_v28 = vadd.f32 %v13822_v11, %v4512_v22  ;;  %v8867_v11 = vld [vmem:[%s16130_s4 + $0x374] sm:$0xf0]  ;;  %v9790_v45 = vor.u32 %v11580_v32, %v9789_v23  ;;  %v9119_v51 = vld [vmem:[%s16130_s4 + $0x56c] sm:$0xf0]  ;;  %v14157_v52 = vadd.f32 %v4615_v49, %v14052_v46  ;;  %v8622_v22 = vor.u32 %v11287_v8, %v8621_v5  ;;  %v11311_v5 = vld [vmem:[%s16130_s4 + $0x244] sm:$0xf] }
 0x300   :  { %4895 = vmatpush.bf16.msra.mxu0 %v9234_v39  ;;  %v9150_v39 = vor.u32 %v11416_v20, %v9147_v42  ;;  %v14176_v63 = vpop.f32.mrf.mxu2  ;;  %v9097_v20 = vld [vmem:[%s16130_s4 + $0x520] sm:$0xf]  ;;  %v8783_v23 = vld [vmem:[%s16130_s4 + $0x2cc] sm:$0xf0] }
 0x301   :  { %v4538_v44 = vadd.f32 %v13904_v4, %v4525_v28  ;;  %v8870_v4 = vor.u32 %v11346_v35, %v8867_v11  ;;  %v11406_v28 = vld [vmem:[%s16130_s4 + $0x538] sm:$0xf0]  ;;  %v8705_v35 = vld [vmem:[%s16130_s4 + $0x210] sm:$0xf]  ;;  %v11308_v11 = vld [vmem:[%s16130_s4 + $0x228] sm:$0xf0] }
 0x302   :  { %4938 = vmatpush.bf16.msrb.mxu2 %v9794_v55  ;;  %4794 = vmatpush.bf16.msrb.mxu1 %v8922_v53  ;;  %v8649_v55 = vld [vmem:[%s16130_s4 + $0x1a0] sm:$0xf]  ;;  %v9122_v53 = vor.u32 %v11409_v24, %v9119_v51  ;;  %v9098_v49 = vor.u32 %v11406_v28, %v9097_v20  ;;  %v11273_v24 = vld [vmem:[%s16130_s4 + $0x110] sm:$0xf0]  ;;  %v9069_v51 = vld [vmem:[%s16130_s4 + $0x4e8] sm:$0xf] }
 0x303   :  { %4907 = vmatpush.bf16.msrb.mxu3 %v9486_v7  ;;  %v4551_v57 = vadd.f32 %v13745_v36, %v4538_v44  ;;  %v8761_v36 = vld [vmem:[%s16130_s4 + $0x280] sm:$0xf]  ;;  %v8650_v3 = vor.u32 %v11294_v56, %v8649_v55  ;;  %v8677_v55 = vld [vmem:[%s16130_s4 + $0x1d8] sm:$0xf]  ;;  %v11301_v56 = vld [vmem:[%s16130_s4 + $0x1f0] sm:$0xf0] }
 0x304   :  { %4896 = vmatpush.bf16.msra.mxu0 %v9206_v41  ;;  %v4513_v46 = vpop.f32.mrf.mxu1  ;;  %v11339_v41 = vld [vmem:[%s16130_s4 + $0x324] sm:$0xf]  ;;  %v8762_v59 = vor.u32 %v11322_v1, %v8761_v36  ;;  %v8537_v36 = vld [vmem:[%s16130_s4 + $0xc0] sm:$0xf]  ;;  %v11266_v1 = vld [vmem:[%s16130_s4 + $0xd8] sm:$0xf0] }
 0x305   :  { %v8842_v7 = vor.u32 %v11339_v41, %v8839_v62  ;;  %v9769_v46 = vld [vmem:[%s16130_s4 + $0xa60] sm:$0xf]  ;;  %v9070_v62 = vor.u32 %v11399_v34, %v9069_v51  ;;  %v11570_v51 = vld [vmem:[%s16130_s4 + $0xa5c] sm:$0xf] }
 0x306   :  { %4957 = vmatpush.bf16.msra.mxu2 %v8874_v58  ;;  %4795 = vmatpush.bf16.msrb.mxu1 %v8894_v10  ;;  %v8790_v58 = vor.u32 %v11329_v43, %v8789_v40  ;;  %v11465_v10 = vld [vmem:[%s16130_s4 + $0x714] sm:$0xf]  ;;  %v8727_v8 = vld [vmem:[%s16130_s4 + $0x25c] sm:$0xf0] }
 0x307   :  { %4908 = vmatpush.bf16.msrb.mxu3 %v9458_v60  ;;  %v8593_v60 = vld [vmem:[%s16130_s4 + $0x130] sm:$0xf] }
 0x308   :  { %4897 = vmatpush.bf16.msra.mxu0 %v9178_v18  ;;  %v9374_v18 = vor.u32 %v11472_v6, %v9371_v9  ;;  %v14244_v44 = vpop.f32.mrf.mxu0  ;;  %v9041_v6 = vld [vmem:[%s16130_s4 + $0x4b0] sm:$0xf] }
 0x309   :  { %4796 = vmatmul.bf16.vlgmr.msrb.gmra.mxu1 %v12666_v30 }
 0x30a   :  { %4958 = vmatpush.bf16.msra.mxu2 %v8846_v15  ;;  %4846 = vmatpush.bf16.msra.mxu1 %v9818_v25  ;;  %v4617_v15 = vpop.f32.mrf.mxu3  ;;  %v11280_v25 = vld [vmem:[%s16130_s4 + $0x148] sm:$0xf0] }
 0x30b   :  { %4909 = vmatpush.bf16.msrb.mxu3 %v9430_v50  ;;  %v8594_v40 = vor.u32 %v11280_v25, %v8593_v60  ;;  %v8786_v50 = vor.u32 %v11325_v12, %v8783_v23  ;;  %v8509_v15 = vld [vmem:[%s16130_s4 + $0x88] sm:$0xf]  ;;  %v11304_v60 = vld [vmem:[%s16130_s4 + $0x20c] sm:$0xf]  ;;  %v8481_v23 = vld [vmem:[%s16130_s4 + $0x50] sm:$0xf] }
 0x30c   :  { %4898 = vmatpush.bf16.msra.mxu0 %v9150_v39  ;;  %v4563_v42 = vpop.f32.mrf.mxu1  ;;  %v9346_v39 = vor.u32 %v11465_v10, %v9343_v19  ;;  %v9013_v10 = vld [vmem:[%s16130_s4 + $0x478] sm:$0xf]  ;;  %v11385_v19 = vld [vmem:[%s16130_s4 + $0x490] sm:$0xf0]  ;;  %v8699_v25 = vld [vmem:[%s16130_s4 + $0x224] sm:$0xf0] }
 0x30d   :  { %9832 = vmatmul.msk.bf16.vlgmr.msrb.gmra.mxu2 %vm4394_vm5, %v13114_v61  ;;  %v4564_v32 = vadd.f32 %v4563_v42, %v4551_v57  ;;  %v9713_v42 = vld [vmem:[%s16130_s4 + $0x9f0] sm:$0xf]  ;;  %v9014_v12 = vor.u32 %v11385_v19, %v9013_v10  ;;  %v11556_v10 = vld [vmem:[%s16130_s4 + $0x9ec] sm:$0xf]  ;;  %v9707_v19 = vld [vmem:[%s16130_s4 + $0xa04] sm:$0xf0] }
 0x30e   :  { %4959 = vmatpush.bf16.msra.mxu2 %v8818_v33  ;;  %4847 = vmatpush.bf16.msra.mxu1 %v9790_v45  ;;  %v4656_v33 = vpop.f32.mrf.mxu2  ;;  %v8565_v45 = vld [vmem:[%s16130_s4 + $0xf8] sm:$0xf] }
 0x30f   :  { %4910 = vmatpush.bf16.msrb.mxu3 %v9402_v2  ;;  %v14242_v43 = vadd.f32 %v14028_v26, %v4564_v32  ;;  %v8706_v26 = vor.u32 %v11308_v11, %v8705_v35  ;;  %v8566_v57 = vor.u32 %v11273_v24, %v8565_v45  ;;  %v11252_v32 = vld [vmem:[%s16130_s4 + $0x68] sm:$0xf0]  ;;  %v8702_v33 = vor.u32 %v11304_v60, %v8699_v25  ;;  %v8985_v35 = vld [vmem:[%s16130_s4 + $0x440] sm:$0xf]  ;;  %v11378_v11 = vld [vmem:[%s16130_s4 + $0x458] sm:$0xf0] }
 0x310   :  { %4899 = vmatpush.bf16.msra.mxu0 %v9122_v53  ;;  %v4643_v16 = vpop.f32.mrf.mxu0  ;;  %v8482_v45 = vor.u32 %v11252_v32, %v8481_v23  ;;  %v11553_v24 = vld [vmem:[%s16130_s4 + $0x9d0] sm:$0xf0]  ;;  %v8986_v34 = vor.u32 %v11378_v11, %v8985_v35  ;;  %v8901_v60 = vld [vmem:[%s16130_s4 + $0x398] sm:$0xf]  ;;  %v9825_v23 = vld [vmem:[%s16130_s4 + $0xad0] sm:$0xf] }
 0x311   :  { %v11588_v32 = vld [vmem:[%s16130_s4 + $0xae8] sm:$0xf0]  ;;  %v11549_v11 = vld [vmem:[%s16130_s4 + $0x9b4] sm:$0xf] }
 0x312   :  { %4866 = vmatpush.bf16.msrb.mxu1 %v8870_v4  ;;  %4960 = vmatpush.bf16.msra.mxu2 %v8790_v58  ;;  %v11318_v4 = vld [vmem:[%s16130_s4 + $0x27c] sm:$0xf]  ;;  %v14276_v41 = vpop.f32.mrf.mxu3  ;;  %v11532_v35 = vld [vmem:[%s16130_s4 + $0x928] sm:$0xf0] }
 0x313   :  { %4900 = vmatmul.bf16.vlgmr.msra.gmra.mxu0 %v12747_v21  ;;  %4911 = vmatpush.bf16.msrb.mxu3 %v9374_v18  ;;  %v11574_v58 = vld [vmem:[%s16130_s4 + $0xa78] sm:$0xf0]  ;;  %v8758_v53 = vor.u32 %v11318_v4, %v8755_v54  ;;  %v11259_v18 = vld [vmem:[%s16130_s4 + $0xa0] sm:$0xf0]  ;;  %v8453_v4 = vld [vmem:[%s16130_s4 + $0x18] sm:$0xf] }
 0x314   :  { %4944 = vmatpush.bf16.msrb.mxu0 %v8650_v3  ;;  %v4565_v2 = vpop.f32.mrf.mxu1  ;;  %v8678_v3 = vor.u32 %v11301_v56, %v8677_v55  ;;  %v9770_v9 = vor.u32 %v11574_v58, %v9769_v46  ;;  %v8510_v20 = vor.u32 %v11259_v18, %v8509_v15  ;;  %v11245_v54 = vld [vmem:[%s16130_s4 + $0x30] sm:$0xf0]  ;;  %v8957_v56 = vld [vmem:[%s16130_s4 + $0x408] sm:$0xf]  ;;  %v11511_v15 = vld [vmem:[%s16130_s4 + $0x880] sm:$0xf0] }
 0x315   :  { %v11546_v2 = vld [vmem:[%s16130_s4 + $0x998] sm:$0xf0]  ;;  %v9629_v18 = vld [vmem:[%s16130_s4 + $0x948] sm:$0xf] }
 0x316   :  { %4867 = vmatpush.bf16.msrb.mxu1 %v8842_v7  ;;  %4961 = vmatpush.bf16.msra.mxu2 %v8762_v59  ;;  %v11392_v7 = vld [vmem:[%s16130_s4 + $0x4c8] sm:$0xf0]  ;;  %v8538_v59 = vor.u32 %v11266_v1, %v8537_v36  ;;  %v9657_v36 = vld [vmem:[%s16130_s4 + $0x980] sm:$0xf]  ;;  %v8454_v1 = vor.u32 %v11245_v54, %v8453_v4 }
 0x317   :  { %4912 = vmatpush.bf16.msrb.mxu3 %v9346_v39  ;;  %v9042_v17 = vor.u32 %v11392_v7, %v9041_v6  ;;  %v9735_v6 = vld [vmem:[%s16130_s4 + $0xa3c] sm:$0xf0] }
 0x318   :  { %4945 = vmatpush.bf16.msrb.mxu0 %v8622_v22  ;;  %v8730_v22 = vor.u32 %v11311_v5, %v8727_v8 }
 0x319   :  { %9831 = vmatmul.msk.bf16.vlgmr.msra.gmra.mxu1 %vm4394_vm5, %v13114_v61 }
 0x31a   :  { %4868 = vmatpush.bf16.msrb.mxu1 %v8814_v31  ;;  %4962 = vmatpush.bf16.msra.mxu2 %v8734_v27  ;;  %v9742_v31 = vor.u32 %v11567_v14, %v9741_v13  ;;  %v11560_v27 = vld [vmem:[%s16130_s4 + $0xa08] sm:$0xf0]  ;;  %v4669_v28 = vpop.f32.mrf.mxu3  ;;  %v9658_v14 = vor.u32 %v11546_v2, %v9657_v36  ;;  %v11651_v36 = vld [vmem:[%s16131_s5 + $0x1ec] sm:$0xf0] }
 0x31b   :  { %4970 = vmatpush.bf16.msra.mxu3 %v9098_v49  ;;  %v9714_v39 = vor.u32 %v11560_v27, %v9713_v42  ;;  %v8671_v49 = vld [vmem:[%s16130_s4 + $0x1ec] sm:$0xf0]  ;;  %v11364_v13 = vld [vmem:[%s16130_s4 + $0x3e8] sm:$0xf0]  ;;  %v9710_v28 = vor.u32 %v11556_v10, %v9707_v19 }
 0x31c   :  { %4946 = vmatpush.bf16.msrb.mxu0 %v8594_v40  ;;  %4913 = vmatmul.bf16.vlgmr.msrb.gmra.mxu3 %v12882_v37  ;;  %v11297_v40 = vld [vmem:[%s16130_s4 + $0x1d4] sm:$0xf]  ;;  %v9489_v42 = vld [vmem:[%s16130_s4 + $0x830] sm:$0xf] }
 0x31d   :  { %v8674_v55 = vor.u32 %v11297_v40, %v8671_v49  ;;  %v11715_v2 = vld [vmem:[%s16131_s5 + $0x3ec] sm:$0xf0] }
 0x31e   :  { %4869 = vmatpush.bf16.msrb.mxu1 %v8786_v50  ;;  %4963 = vmatpush.bf16.msra.mxu2 %v8706_v26  ;;  %v9685_v50 = vld [vmem:[%s16130_s4 + $0x9b8] sm:$0xf]  ;;  %v11711_v10 = vld [vmem:[%s16131_s5 + $0x3cc] sm:$0xf0] }
 0x31f   :  { %4971 = vmatpush.bf16.msra.mxu3 %v9070_v62  ;;  %v9763_v26 = vld [vmem:[%s16130_s4 + $0xa74] sm:$0xf0]  ;;  %v9686_v46 = vor.u32 %v11553_v24, %v9685_v50  ;;  %v9545_v62 = vld [vmem:[%s16130_s4 + $0x8a0] sm:$0xf]  ;;  %v9826_v24 = vor.u32 %v11588_v32, %v9825_v23  ;;  %v11643_v23 = vld [vmem:[%s16131_s5 + $0x1ac] sm:$0xf0] }
 0x320   :  { %4947 = vmatpush.bf16.msrb.mxu0 %v8566_v57  ;;  %v11371_v57 = vld [vmem:[%s16130_s4 + $0x420] sm:$0xf0]  ;;  %v9766_v58 = vor.u32 %v11570_v51, %v9763_v26  ;;  %v14390_v7 = vpop.f32.mrf.mxu2  ;;  %v9461_v51 = vld [vmem:[%s16130_s4 + $0x7f8] sm:$0xf]  ;;  %v11497_v26 = vld [vmem:[%s16130_s4 + $0x810] sm:$0xf0] }
 0x321   :  { %v8958_v5 = vor.u32 %v11371_v57, %v8957_v56  ;;  %v11525_v56 = vld [vmem:[%s16130_s4 + $0x8f0] sm:$0xf0]  ;;  %v9797_v57 = vld [vmem:[%s16130_s4 + $0xa98] sm:$0xf]  ;;  %v10300_v32 = vld [vmem:[%s16131_s5 + $0x3a0] sm:$0xf] }
 0x322   :  { %4870 = vmatpush.bf16.msrb.mxu1 %v8758_v53  ;;  %4964 = vmatpush.bf16.msra.mxu2 %v8678_v3  ;;  %v11518_v53 = vld [vmem:[%s16130_s4 + $0x8b8] sm:$0xf0]  ;;  %v11563_v3 = vld [vmem:[%s16130_s4 + $0xa24] sm:$0xf] }
 0x323   :  { %4972 = vmatpush.bf16.msra.mxu3 %v9042_v17  ;;  %v9546_v8 = vor.u32 %v11518_v53, %v9545_v62  ;;  %v9738_v16 = vor.u32 %v11563_v3, %v9735_v6  ;;  %v9517_v17 = vld [vmem:[%s16130_s4 + $0x868] sm:$0xf]  ;;  %v10076_v62 = vld [vmem:[%s16131_s5 + $0x1e0] sm:$0xf]  ;;  %v9462_v3 = vor.u32 %v11497_v26, %v9461_v51  ;;  %v11639_v51 = vld [vmem:[%s16131_s5 + $0x18c] sm:$0xf0] }
 0x324   :  { %4948 = vmatpush.bf16.msrb.mxu0 %v8538_v59  ;;  %v8929_v59 = vld [vmem:[%s16130_s4 + $0x3d0] sm:$0xf]  ;;  %v9518_v25 = vor.u32 %v11511_v15, %v9517_v17  ;;  %v9623_v15 = vld [vmem:[%s16130_s4 + $0x95c] sm:$0xf0] }
 0x325   :  { %4965 = vmatmul.bf16.vlgmr.msra.gmra.mxu2 %v12590_v48  ;;  %v9321_v26 = vld [vmem:[%s16130_s4 + $0x6e0] sm:$0xf] }
 0x326   :  { %5009 = vmatpush.bf16.msrb.mxu2 %v9770_v9  ;;  %4871 = vmatpush.bf16.msrb.mxu1 %v8730_v22  ;;  %v14392_v9 = vpop.f32.mrf.mxu3  ;;  %v11539_v22 = vld [vmem:[%s16130_s4 + $0x960] sm:$0xf0] }
 0x327   :  { %4973 = vmatpush.bf16.msra.mxu3 %v9014_v12  ;;  %v9630_v27 = vor.u32 %v11539_v22, %v9629_v18  ;;  %v9601_v12 = vld [vmem:[%s16130_s4 + $0x910] sm:$0xf]  ;;  %v10060_v18 = vld [vmem:[%s16131_s5 + $0x1c0] sm:$0xf] }
 0x328   :  { %4949 = vmatpush.bf16.msrb.mxu0 %v8510_v20  ;;  %v11357_v20 = vld [vmem:[%s16130_s4 + $0x3b0] sm:$0xf0]  ;;  %v4721_v49 = vpop.f32.mrf.mxu2  ;;  %v14461_v4 = vpop.f32.mrf.mxu0  ;;  %v9602_v54 = vor.u32 %v11532_v35, %v9601_v12  ;;  %v11647_v22 = vld [vmem:[%s16131_s5 + $0x1cc] sm:$0xf0]  ;;  %v10044_v12 = vld [vmem:[%s16131_s5 + $0x1a0] sm:$0xf] }
 0x329   :  { %v10045_v49 = vor.u32 %v11643_v23, %v10044_v12  ;;  %v9980_v12 = vld [vmem:[%s16131_s5 + $0x120] sm:$0xf] }
 0x32a   :  { %5010 = vmatpush.bf16.msrb.mxu2 %v9742_v31  ;;  %4872 = vmatpush.bf16.msrb.mxu1 %v8702_v33  ;;  %v8930_v31 = vor.u32 %v11364_v13, %v8929_v59  ;;  %v4628_v33 = vpop.f32.mrf.mxu1  ;;  %v9433_v59 = vld [vmem:[%s16130_s4 + $0x7c0] sm:$0xf]  ;;  %v11490_v13 = vld [vmem:[%s16130_s4 + $0x7d8] sm:$0xf0] }
 0x32b   :  { %4974 = vmatpush.bf16.msra.mxu3 %v8986_v34  ;;  %v4629_v40 = vadd.f32 %v4628_v33, %v14157_v52  ;;  %v9573_v34 = vld [vmem:[%s16130_s4 + $0x8d8] sm:$0xf]  ;;  %v9434_v19 = vor.u32 %v11490_v13, %v9433_v59  ;;  %v11707_v33 = vld [vmem:[%s16131_s5 + $0x3ac] sm:$0xf0]  ;;  %v10268_v13 = vld [vmem:[%s16131_s5 + $0x360] sm:$0xf] }
 0x32c   :  { %4950 = vmatpush.bf16.msrb.mxu0 %v8482_v45  ;;  %v8902_v45 = vor.u32 %v11357_v20, %v8901_v60  ;;  %v11483_v20 = vld [vmem:[%s16130_s4 + $0x7a0] sm:$0xf0] }
 0x32d   :  { %v4642_v52 = vadd.f32 %v14244_v44, %v4629_v40  ;;  %v11542_v44 = vld [vmem:[%s16130_s4 + $0x97c] sm:$0xf]  ;;  %v11476_v40 = vld [vmem:[%s16130_s4 + $0x768] sm:$0xf0] }
 0x32e   :  { %5011 = vmatpush.bf16.msrb.mxu2 %v9714_v39  ;;  %4873 = vmatpush.bf16.msrb.mxu1 %v8674_v55  ;;  %v9679_v39 = vld [vmem:[%s16130_s4 + $0x9cc] sm:$0xf0]  ;;  %v4695_v50 = vpop.f32.mrf.mxu3 }
 0x32f   :  { %4975 = vmatpush.bf16.msra.mxu3 %v8958_v5  ;;  %v9682_v55 = vor.u32 %v11549_v11, %v9679_v39  ;;  %v4655_v53 = vadd.f32 %v14176_v63, %v4642_v52  ;;  %v9574_v63 = vor.u32 %v11525_v56, %v9573_v34  ;;  %v9377_v39 = vld [vmem:[%s16130_s4 + $0x750] sm:$0xf]  ;;  %v10301_v50 = vor.u32 %v11707_v33, %v10300_v32  ;;  %v11462_v34 = vld [vmem:[%s16130_s4 + $0x6f8] sm:$0xf0] }
 0x330   :  { %4951 = vmatpush.bf16.msrb.mxu0 %v8454_v1  ;;  %v10332_v1 = vld [vmem:[%s16131_s5 + $0x3e0] sm:$0xf]  ;;  %v9378_v52 = vor.u32 %v11476_v40, %v9377_v39  ;;  %v11627_v33 = vld [vmem:[%s16131_s5 + $0x12c] sm:$0xf0] }
 0x331   :  { %4874 = vmatmul.bf16.vlgmr.msrb.gmra.mxu1 %v12590_v48  ;;  %v11504_v48 = vld [vmem:[%s16130_s4 + $0x848] sm:$0xf0]  ;;  %v14492_v5 = vadd.f32 %v14276_v41, %v4655_v53  ;;  %v10333_v17 = vor.u32 %v11715_v2, %v10332_v1  ;;  %v11535_v41 = vld [vmem:[%s16130_s4 + $0x944] sm:$0xf]  ;;  %v10204_v53 = vld [vmem:[%s16131_s5 + $0x2e0] sm:$0xf] }
 0x332   :  { %5012 = vmatpush.bf16.msrb.mxu2 %v9686_v46  ;;  %4918 = vmatpush.bf16.msra.mxu1 %v9766_v58  ;;  %v11581_v46 = vld [vmem:[%s16130_s4 + $0xab0] sm:$0xf0]  ;;  %v9651_v58 = vld [vmem:[%s16130_s4 + $0x994] sm:$0xf0]  ;;  %v9626_v60 = vor.u32 %v11535_v41, %v9623_v15  ;;  %v10012_v1 = vld [vmem:[%s16131_s5 + $0x160] sm:$0xf] }
 0x333   :  { %4952 = vmatmul.bf16.vlgmr.msrb.gmra.mxu0 %v12485_v47  ;;  %4976 = vmatpush.bf16.msra.mxu3 %v8930_v31  ;;  %v9490_v47 = vor.u32 %v11504_v48, %v9489_v42  ;;  %v9798_v6 = vor.u32 %v11581_v46, %v9797_v57  ;;  %v4708_v31 = vpop.f32.mrf.mxu0  ;;  %v10061_v42 = vor.u32 %v11647_v22, %v10060_v18  ;;  %v9349_v46 = vld [vmem:[%s16130_s4 + $0x718] sm:$0xf]  ;;  %v10188_v18 = vld [vmem:[%s16131_s5 + $0x2c0] sm:$0xf]  ;;  %v11679_v22 = vld [vmem:[%s16131_s5 + $0x2cc] sm:$0xf0] }
 0x334   :  { %4996 = vmatpush.bf16.msra.mxu0 %v9546_v8  ;;  %v9654_v8 = vor.u32 %v11542_v44, %v9651_v58  ;;  %v11469_v44 = vld [vmem:[%s16130_s4 + $0x730] sm:$0xf0]  ;;  %v9265_v31 = vld [vmem:[%s16130_s4 + $0x670] sm:$0xf] }
 0x335   :  { %v9350_v59 = vor.u32 %v11469_v44, %v9349_v46  ;;  %v11691_v40 = vld [vmem:[%s16131_s5 + $0x32c] sm:$0xf0] }
 0x336   :  { %5013 = vmatpush.bf16.msrb.mxu2 %v9658_v14  ;;  %4919 = vmatpush.bf16.msra.mxu1 %v9738_v16  ;;  %v4630_v14 = vpop.f32.mrf.mxu1  ;;  %v10077_v16 = vor.u32 %v11651_v36, %v10076_v62  ;;  %v9322_v62 = vor.u32 %v11462_v34, %v9321_v26  ;;  %v11683_v36 = vld [vmem:[%s16131_s5 + $0x2ec] sm:$0xf0]  ;;  %v9964_v26 = vld [vmem:[%s16131_s5 + $0x100] sm:$0xf] }
 0x337   :  { %4977 = vmatpush.bf16.msra.mxu3 %v8902_v45  ;;  %v11521_v45 = vld [vmem:[%s16130_s4 + $0x8d4] sm:$0xf]  ;;  %v11699_v14 = vld [vmem:[%s16131_s5 + $0x36c] sm:$0xf0] }
 0x338   :  { %4997 = vmatpush.bf16.msra.mxu0 %v9518_v25  ;;  %v9405_v25 = vld [vmem:[%s16130_s4 + $0x788] sm:$0xf]  ;;  %v11687_v46 = vld [vmem:[%s16131_s5 + $0x30c] sm:$0xf0] }
 0x339   :  { %v9406_v35 = vor.u32 %v11483_v20, %v9405_v25  ;;  %v11695_v25 = vld [vmem:[%s16131_s5 + $0x34c] sm:$0xf0] }
 0x33a   :  { %5014 = vmatpush.bf16.msrb.mxu2 %v9630_v27  ;;  %4920 = vmatpush.bf16.msra.mxu1 %v9710_v28  ;;  %v11528_v27 = vld [vmem:[%s16130_s4 + $0x90c] sm:$0xf]  ;;  %v9595_v28 = vld [vmem:[%s16130_s4 + $0x924] sm:$0xf0] }
 0x33b   :  { %5028 = vmatpush.bf16.msrb.mxu3 %v9826_v24  ;;  %v9598_v11 = vor.u32 %v11528_v27, %v9595_v28  ;;  %v10028_v24 = vld [vmem:[%s16131_s5 + $0x180] sm:$0xf]  ;;  %v14574_v56 = vpop.f32.mrf.mxu0 }
 0x33c   :  { %4998 = vmatpush.bf16.msra.mxu0 %v9490_v47  ;;  %4978 = vmatmul.bf16.vlgmr.msra.gmra.mxu3 %v12666_v30  ;;  %v10316_v30 = vld [vmem:[%s16131_s5 + $0x3c0] sm:$0xf]  ;;  %v9567_v47 = vld [vmem:[%s16130_s4 + $0x8ec] sm:$0xf0]  ;;  %v10029_v58 = vor.u32 %v11639_v51, %v10028_v24 }
 0x33d   :  { %v10317_v48 = vor.u32 %v11711_v10, %v10316_v30  ;;  %v9570_v57 = vor.u32 %v11521_v45, %v9567_v47  ;;  %v9996_v30 = vld [vmem:[%s16131_s5 + $0x140] sm:$0xf]  ;;  %v10269_v10 = vor.u32 %v11699_v14, %v10268_v13  ;;  %v9981_v45 = vor.u32 %v11627_v33, %v9980_v12  ;;  %v11671_v51 = vld [vmem:[%s16131_s5 + $0x28c] sm:$0xf0]  ;;  %v9181_v13 = vld [vmem:[%s16130_s4 + $0x5c8] sm:$0xf] }
 0x33e   :  { %5015 = vmatpush.bf16.msrb.mxu2 %v9602_v54  ;;  %4921 = vmatpush.bf16.msra.mxu1 %v9682_v55  ;;  %v10284_v54 = vld [vmem:[%s16131_s5 + $0x380] sm:$0xf]  ;;  %v11703_v55 = vld [vmem:[%s16131_s5 + $0x38c] sm:$0xf0]  ;;  %v11427_v14 = vld [vmem:[%s16130_s4 + $0x5e0] sm:$0xf0] }
 0x33f   :  { %5029 = vmatpush.bf16.msrb.mxu3 %v9798_v6  ;;  %v10285_v2 = vor.u32 %v11703_v55, %v10284_v54  ;;  %v9293_v6 = vld [vmem:[%s16130_s4 + $0x6a8] sm:$0xf]  ;;  %v10172_v28 = vld [vmem:[%s16131_s5 + $0x2a0] sm:$0xf]  ;;  %v11434_v55 = vld [vmem:[%s16130_s4 + $0x618] sm:$0xf0] }
 0x340   :  { %4999 = vmatpush.bf16.msra.mxu0 %v9462_v3  ;;  %v11635_v3 = vld [vmem:[%s16131_s5 + $0x16c] sm:$0xf0]  ;;  %v10156_v24 = vld [vmem:[%s16131_s5 + $0x280] sm:$0xf]  ;;  %v11413_v33 = vld [vmem:[%s16130_s4 + $0x570] sm:$0xf0] }
 0x341   :  { %v10013_v41 = vor.u32 %v11635_v3, %v10012_v1  ;;  %v9209_v54 = vld [vmem:[%s16130_s4 + $0x600] sm:$0xf]  ;;  %v10157_v44 = vor.u32 %v11671_v51, %v10156_v24  ;;  %v11667_v3 = vld [vmem:[%s16131_s5 + $0x26c] sm:$0xf0] }
 0x342   :  { %5016 = vmatpush.bf16.msrb.mxu2 %v9574_v63  ;;  %4922 = vmatpush.bf16.msra.mxu1 %v9654_v8  ;;  %v11455_v63 = vld [vmem:[%s16130_s4 + $0x6c0] sm:$0xf0]  ;;  %v14600_v8 = vpop.f32.mrf.mxu3  ;;  %v9210_v1 = vor.u32 %v11434_v55, %v9209_v54  ;;  %v5037_v55 = vmax.f32 %v14492_v5, 0.0 }
 0x343   :  { %6276 = vmatpush.bf16.msra.mxu3 %v10077_v16  ;;  %v14608_v16 = vpop.f32.mrf.mxu2  ;;  %v9294_v15 = vor.u32 %v11455_v63, %v9293_v6  ;;  %v4760_v20 = vpop.f32.mrf.mxu0  ;;  %v5036_v6 = vmax.f32 %v14242_v43, 0.0  ;;  %v9934_v43 = vld [vmem:[%s16131_s5 + $0xd0] sm:$0xf0]  ;;  %v11601_v54 = vld [vmem:[%s16131_s5 + $0x64] sm:$0xf] }
 0x344   :  { %5000 = vmatpush.bf16.msra.mxu0 %v9434_v19  ;;  %v11631_v19 = vld [vmem:[%s16131_s5 + $0x14c] sm:$0xf0]  ;;  %v11609_v20 = vld [vmem:[%s16131_s5 + $0xa4] sm:$0xf] }
 0x345   :  { %5017 = vmatmul.bf16.vlgmr.msrb.gmra.mxu2 %v12964_v29  ;;  %v11597_v5 = vld [vmem:[%s16131_s5 + $0x44] sm:$0xf] }
 0x346   :  { %6302 = vmatpush.bf16.msra.mxu2 %v10333_v17  ;;  %4923 = vmatpush.bf16.msra.mxu1 %v9626_v60  ;;  %v10205_v17 = vor.u32 %v11683_v36, %v10204_v53  ;;  %v11448_v60 = vld [vmem:[%s16130_s4 + $0x688] sm:$0xf0]  ;;  %v14647_v23 = vpop.f32.mrf.mxu1 }
 0x347   :  { %6277 = vmatpush.bf16.msra.mxu3 %v10061_v42  ;;  %v10189_v42 = vor.u32 %v11679_v22, %v10188_v18  ;;  %v9266_v27 = vor.u32 %v11448_v60, %v9265_v31  ;;  %v9182_v18 = vor.u32 %v11427_v14, %v9181_v13  ;;  %v10124_v22 = vld [vmem:[%s16131_s5 + $0x240] sm:$0xf]  ;;  %v9153_v31 = vld [vmem:[%s16130_s4 + $0x590] sm:$0xf]  ;;  %v11420_v60 = vld [vmem:[%s16130_s4 + $0x5a8] sm:$0xf0] }
 0x348   :  { %5001 = vmatpush.bf16.msra.mxu0 %v9406_v35  ;;  %v9237_v35 = vld [vmem:[%s16130_s4 + $0x638] sm:$0xf]  ;;  %v11607_v13 = vld [vmem:[%s16131_s5 + $0x8c] sm:$0xf0] }
 0x34a   :  { %6303 = vmatpush.bf16.msra.mxu2 %v10317_v48  ;;  %4924 = vmatpush.bf16.msra.mxu1 %v9598_v11  ;;  %v9997_v48 = vor.u32 %v11631_v19, %v9996_v30  ;;  %v11441_v11 = vld [vmem:[%s16130_s4 + $0x650] sm:$0xf0]  ;;  %v4747_v39 = vpop.f32.mrf.mxu3  ;;  %v11663_v30 = vld [vmem:[%s16131_s5 + $0x24c] sm:$0xf0]  ;;  %v2583_v19 = vperm.slane %v13193_v38, 3 }
 0x34b   :  { %6278 = vmatpush.bf16.msra.mxu3 %v10045_v49  ;;  %v4773_v49 = vpop.f32.mrf.mxu2  ;;  %v9238_v47 = vor.u32 %v11441_v11, %v9237_v35  ;;  %v9948_v11 = vld [vmem:[%s16131_s5 + $0xe0] sm:$0xf]  ;;  %v11619_v39 = vld [vmem:[%s16131_s5 + $0xec] sm:$0xf0] }
 0x34c   :  { %5002 = vmatpush.bf16.msra.mxu0 %v9378_v52  ;;  %9833 = vmatmul.msk.bf16.vlgmr.msrb.gmra.mxu3 %vm4394_vm5, %v13114_v61  ;;  %v10252_v61 = vld [vmem:[%s16131_s5 + $0x340] sm:$0xf]  ;;  %v11623_v52 = vld [vmem:[%s16131_s5 + $0x10c] sm:$0xf0]  ;;  %v4681_v12 = vadd.f32 %v14647_v23, %v2583_v19  ;;  %v9949_v24 = vor.u32 %v11619_v39, %v9948_v11 }
 0x34d   :  { %v10253_v32 = vor.u32 %v11695_v25, %v10252_v61  ;;  %v9965_v36 = vor.u32 %v11623_v52, %v9964_v26  ;;  %v10125_v25 = vor.u32 %v11663_v30, %v10124_v22  ;;  %v9932_v26 = vld [vmem:[%s16131_s5 + $0xc0] sm:$0xf]  ;;  %v11603_v19 = vld [vmem:[%s16131_s5 + $0x6c] sm:$0xf0] }
 0x34e   :  { %6304 = vmatpush.bf16.msra.mxu2 %v10301_v50  ;;  %4925 = vmatpush.bf16.msra.mxu1 %v9570_v57  ;;  %v10220_v57 = vld [vmem:[%s16131_s5 + $0x300] sm:$0xf]  ;;  %v4682_v63 = vpop.f32.mrf.mxu1 }
 0x34f   :  { %6279 = vmatpush.bf16.msra.mxu3 %v10029_v58  ;;  %v11617_v58 = vld [vmem:[%s16131_s5 + $0xe4] sm:$0xf]  ;;  %v9884_v30 = vld [vmem:[%s16131_s5 + $0x60] sm:$0xf] }
 0x350   :  { %5003 = vmatpush.bf16.msra.mxu0 %v9350_v59  ;;  %v14694_v53 = vpop.f32.mrf.mxu0  ;;  %v10221_v59 = vor.u32 %v11687_v46, %v10220_v57  ;;  %v10588_v11 = vld [vmem:[%s16131_s5 + $0x5e0] sm:$0xf] }
 0x351   :  { %4926 = vmatmul.bf16.vlgmr.msra.gmra.mxu1 %v12964_v29  ;;  %v11675_v29 = vld [vmem:[%s16131_s5 + $0x2ac] sm:$0xf0] }
 0x352   :  { %4983 = vmatpush.bf16.msrb.mxu1 %v9322_v62  ;;  %6305 = vmatpush.bf16.msra.mxu2 %v10285_v2  ;;  %v10173_v50 = vor.u32 %v11675_v29, %v10172_v28  ;;  %v9950_v62 = vld [vmem:[%s16131_s5 + $0xf0] sm:$0xf0]  ;;  %v10140_v2 = vld [vmem:[%s16131_s5 + $0x260] sm:$0xf]  ;;  %v11659_v29 = vld [vmem:[%s16131_s5 + $0x22c] sm:$0xf0] }
 0x353   :  { %6280 = vmatpush.bf16.msra.mxu3 %v10013_v41  ;;  %5004 = vmatmul.bf16.vlgmr.msra.gmra.mxu0 %v12882_v37  ;;  %v10236_v37 = vld [vmem:[%s16131_s5 + $0x320] sm:$0xf]  ;;  %v10141_v41 = vor.u32 %v11667_v3, %v10140_v2  ;;  %v14800_v2 = vpack.c.bf16 %v5037_v55, %v5037_v55 }
 0x354   :  { %6289 = vmatpush.bf16.msrb.mxu0 %v10205_v17  ;;  %v10237_v34 = vor.u32 %v11691_v40, %v10236_v37  ;;  %v9953_v17 = vor.u32 %v11617_v58, %v9950_v62  ;;  %v10108_v28 = vld [vmem:[%s16131_s5 + $0x220] sm:$0xf]  ;;  %v11605_v37 = vld [vmem:[%s16131_s5 + $0x84] sm:$0xf]  ;;  %v9902_v40 = vld [vmem:[%s16131_s5 + $0x90] sm:$0xf0] }
 0x355   :  { %v10109_v23 = vor.u32 %v11659_v29, %v10108_v28  ;;  %v9905_v51 = vor.u32 %v11605_v37, %v9902_v40  ;;  %v9868_v28 = vld [vmem:[%s16131_s5 + $0x40] sm:$0xf]  ;;  %v11599_v29 = vld [vmem:[%s16131_s5 + $0x4c] sm:$0xf0] }
 0x356   :  { %4984 = vmatpush.bf16.msrb.mxu1 %v9294_v15  ;;  %6306 = vmatpush.bf16.msra.mxu2 %v10269_v10  ;;  %v11613_v15 = vld [vmem:[%s16131_s5 + $0xc4] sm:$0xf]  ;;  %v14721_v10 = vpack.c.bf16 %v5036_v6, %v5036_v6  ;;  %v9869_v39 = vor.u32 %v11599_v29, %v9868_v28  ;;  %v9852_v37 = vld [vmem:[%s16131_s5 + $0x20] sm:$0xf]  ;;  %v11595_v40 = vld [vmem:[%s16131_s5 + $0x2c] sm:$0xf0] }
 0x357   :  { %6281 = vmatpush.bf16.msra.mxu3 %v9997_v48  ;;  %v9937_v61 = vor.u32 %v11613_v15, %v9934_v43 }
 0x358   :  { %6290 = vmatpush.bf16.msrb.mxu0 %v10189_v42  ;;  %v9918_v42 = vld [vmem:[%s16131_s5 + $0xb0] sm:$0xf0]  ;;  %v4786_v48 = vpop.f32.mrf.mxu0 }
 0x359   :  { %v9921_v35 = vor.u32 %v11609_v20, %v9918_v42 }
 0x35a   :  { %4985 = vmatpush.bf16.msrb.mxu1 %v9266_v27  ;;  %6307 = vmatpush.bf16.msra.mxu2 %v10253_v32  ;;  %v9154_v27 = vor.u32 %v11420_v60, %v9153_v31  ;;  %v9125_v32 = vld [vmem:[%s16130_s4 + $0x558] sm:$0xf]  ;;  %v11589_v60 = vld [vmem:[%s16131_s5 + $0x4] sm:$0xf] }
 0x35b   :  { %6282 = vmatpush.bf16.msra.mxu3 %v9981_v45  ;;  %v9126_v49 = vor.u32 %v11413_v33, %v9125_v32  ;;  %v11655_v45 = vld [vmem:[%s16131_s5 + $0x20c] sm:$0xf0]  ;;  %v11741_v33 = vld [vmem:[%s16131_s5 + $0x4c4] sm:$0xf] }
 0x35c   :  { %6291 = vmatpush.bf16.msrb.mxu0 %v10173_v50  ;;  %v10092_v50 = vld [vmem:[%s16131_s5 + $0x200] sm:$0xf] }
 0x35d   :  { %v10093_v52 = vor.u32 %v11655_v45, %v10092_v50  ;;  %v11737_v45 = vld [vmem:[%s16131_s5 + $0x4a4] sm:$0xf] }
 0x35e   :  { %4986 = vmatpush.bf16.msrb.mxu1 %v9238_v47  ;;  %6308 = vmatpush.bf16.msra.mxu2 %v10237_v34  ;;  %v4694_v47 = vadd.f32 %v14392_v9, %v4681_v12  ;;  %v11615_v34 = vld [vmem:[%s16131_s5 + $0xcc] sm:$0xf0]  ;;  %v9886_v9 = vld [vmem:[%s16131_s5 + $0x70] sm:$0xf0] }
 0x35f   :  { %6283 = vmatpush.bf16.msra.mxu3 %v9965_v36  ;;  %v14782_v57 = vpop.f32.mrf.mxu3  ;;  %v9889_v62 = vor.u32 %v11601_v54, %v9886_v9  ;;  %v9916_v36 = vld [vmem:[%s16131_s5 + $0xa0] sm:$0xf]  ;;  %v11591_v54 = vld [vmem:[%s16131_s5 + $0xc] sm:$0xf0] }
 0x360   :  { %6292 = vmatpush.bf16.msrb.mxu0 %v10157_v44  ;;  %v14784_v46 = vpop.f32.mrf.mxu2  ;;  %v9933_v44 = vor.u32 %v11615_v34, %v9932_v26  ;;  %v4707_v58 = vadd.f32 %v14461_v4, %v4694_v47  ;;  %v9870_v4 = vld [vmem:[%s16131_s5 + $0x50] sm:$0xf0]  ;;  %v9853_v26 = vor.u32 %v11595_v40, %v9852_v37  ;;  %v11775_v34 = vld [vmem:[%s16131_s5 + $0x5cc] sm:$0xf0] }
 0x361   :  { %v10430_v47 = vld [vmem:[%s16131_s5 + $0x4b0] sm:$0xf0] }
 0x362   :  { %4987 = vmatpush.bf16.msrb.mxu1 %v9210_v1  ;;  %6309 = vmatpush.bf16.msra.mxu2 %v10221_v59  ;;  %v11611_v1 = vld [vmem:[%s16131_s5 + $0xac] sm:$0xf0]  ;;  %v4720_v3 = vadd.f32 %v14390_v7, %v4707_v58  ;;  %v9873_v59 = vor.u32 %v11597_v5, %v9870_v4  ;;  %v9854_v7 = vld [vmem:[%s16131_s5 + $0x30] sm:$0xf0]  ;;  %v10433_v55 = vor.u32 %v11737_v45, %v10430_v47  ;;  %v10396_v47 = vld [vmem:[%s16131_s5 + $0x460] sm:$0xf] }
 0x363   :  { %6284 = vmatmul.bf16.vlgmr.msra.gmra.mxu3 %v14721_v10  ;;  %v9917_v6 = vor.u32 %v11611_v1, %v9916_v36  ;;  %v11747_v58 = vld [vmem:[%s16131_s5 + $0x4ec] sm:$0xf0]  ;;  %v10414_v36 = vld [vmem:[%s16131_s5 + $0x490] sm:$0xf0]  ;;  %v10556_v1 = vld [vmem:[%s16131_s5 + $0x5a0] sm:$0xf] }
 0x364   :  { %6293 = vmatpush.bf16.msrb.mxu0 %v10141_v41  ;;  %v11771_v4 = vld [vmem:[%s16131_s5 + $0x5ac] sm:$0xf0] }
 0x366   :  { %6354 = vmatpush.bf16.msrb.mxu2 %v9953_v17  ;;  %4988 = vmatpush.bf16.msrb.mxu1 %v9182_v18  ;;  %v4732_v63 = vpop.f32.mrf.mxu1  ;;  %v11593_v17 = vld [vmem:[%s16131_s5 + $0x24] sm:$0xf] }
 0x367   :  { %v4733_v14 = vadd.f32 %v4732_v63, %v4720_v3  ;;  %v4812_v41 = vpop.f32.mrf.mxu3  ;;  %v9857_v22 = vor.u32 %v11593_v17, %v9854_v7  ;;  %v5035_v3 = vmax.f32 %v13986_v0, 0.0  ;;  %v10557_v63 = vor.u32 %v11771_v4, %v10556_v1  ;;  %v10398_v0 = vld [vmem:[%s16131_s5 + $0x470] sm:$0xf0]  ;;  %v10540_v17 = vld [vmem:[%s16131_s5 + $0x580] sm:$0xf] }
 0x368   :  { %6294 = vmatpush.bf16.msrb.mxu0 %v10125_v25  ;;  %v4825_v43 = vpop.f32.mrf.mxu2  ;;  %v10462_v25 = vld [vmem:[%s16131_s5 + $0x4f0] sm:$0xf0]  ;;  %v11767_v7 = vld [vmem:[%s16131_s5 + $0x58c] sm:$0xf0] }
 0x369   :  { %v4746_v15 = vadd.f32 %v14600_v8, %v4733_v14  ;;  %v9838_v8 = vld [vmem:[%s16131_s5 + $0x10] sm:$0xf0]  ;;  %v11729_v14 = vld [vmem:[%s16131_s5 + $0x464] sm:$0xf]  ;;  %v14922_v43 = vpack.c.bf16 %v5035_v3, %v5035_v3  ;;  %v11727_v4 = vld [vmem:[%s16131_s5 + $0x44c] sm:$0xf0] }
 0x36a   :  { %6355 = vmatpush.bf16.msrb.mxu2 %v9937_v61  ;;  %4989 = vmatpush.bf16.msrb.mxu1 %v9154_v27  ;;  %v11745_v61 = vld [vmem:[%s16131_s5 + $0x4e4] sm:$0xf]  ;;  %v9841_v27 = vor.u32 %v11589_v60, %v9838_v8  ;;  %v11739_v60 = vld [vmem:[%s16131_s5 + $0x4ac] sm:$0xf0] }
 0x36b   :  { %v4759_v31 = vadd.f32 %v14574_v56, %v4746_v15  ;;  %v9885_v56 = vor.u32 %v11603_v19, %v9884_v30  ;;  %v10465_v32 = vor.u32 %v11745_v61, %v10462_v25  ;;  %v10541_v15 = vor.u32 %v11767_v7, %v10540_v17  ;;  %v11725_v8 = vld [vmem:[%s16131_s5 + $0x444] sm:$0xf]  ;;  %v10382_v61 = vld [vmem:[%s16131_s5 + $0x450] sm:$0xf0]  ;;  %v10524_v25 = vld [vmem:[%s16131_s5 + $0x560] sm:$0xf] }
 0x36c   :  { %6295 = vmatpush.bf16.msrb.mxu0 %v10109_v23  ;;  %v11779_v23 = vld [vmem:[%s16131_s5 + $0x5ec] sm:$0xf0]  ;;  %v10401_v19 = vor.u32 %v11729_v14, %v10398_v0  ;;  %v10385_v29 = vor.u32 %v11725_v8, %v10382_v61  ;;  %v10334_v7 = vld [vmem:[%s16131_s5 + $0x3f0] sm:$0xf0] }
 0x36d   :  { %v5038_v20 = vmax.f32 %v4759_v31, 0.0  ;;  %v10428_v31 = vld [vmem:[%s16131_s5 + $0x4a0] sm:$0xf] }
 0x36e   :  { %6356 = vmatpush.bf16.msrb.mxu2 %v9921_v35  ;;  %4990 = vmatpush.bf16.msrb.mxu1 %v9126_v49  ;;  %v4734_v48 = vpop.f32.mrf.mxu1  ;;  %v10446_v35 = vld [vmem:[%s16131_s5 + $0x4d0] sm:$0xf0]  ;;  %v10589_v49 = vor.u32 %v11779_v23, %v10588_v11  ;;  %v11759_v23 = vld [vmem:[%s16131_s5 + $0x54c] sm:$0xf0] }
 0x36f   :  { %v14844_v12 = vpack.c.bf16 %v5038_v20, %v5038_v20  ;;  %v10449_v50 = vor.u32 %v11741_v33, %v10446_v35  ;;  %v11763_v20 = vld [vmem:[%s16131_s5 + $0x56c] sm:$0xf0]  ;;  %v11721_v35 = vld [vmem:[%s16131_s5 + $0x424] sm:$0xf] }
 0x370   :  { %6296 = vmatpush.bf16.msrb.mxu0 %v10093_v52  ;;  %v14836_v42 = vpop.f32.mrf.mxu0  ;;  %6328 = vmatpush.bf16.msrb.mxu3 %v10589_v49  ;;  %v9836_v52 = vld [vmem:[%s16131_s5] sm:$0xf]  ;;  %v11735_v33 = vld [vmem:[%s16131_s5 + $0x48c] sm:$0xf0] }
 0x371   :  { %4991 = vmatmul.bf16.vlgmr.msrb.gmra.mxu1 %v12747_v21  ;;  %v9900_v21 = vld [vmem:[%s16131_s5 + $0x80] sm:$0xf]  ;;  %6310 = vmatmul.bf16.vlgmr.msra.gmra.mxu2 %v14844_v12  ;;  %v9837_v5 = vor.u32 %v11591_v54, %v9836_v52  ;;  %v11755_v52 = vld [vmem:[%s16131_s5 + $0x52c] sm:$0xf0]  ;;  %v10212_v54 = vld [vmem:[%s16131_s5 + $0x2e8] sm:$0xf] }
 0x372   :  { %6263 = vmatpush.bf16.msra.mxu1 %v9949_v24  ;;  %6357 = vmatpush.bf16.msrb.mxu2 %v9905_v51  ;;  %v9901_v18 = vor.u32 %v11607_v13, %v9900_v21  ;;  %v10572_v24 = vld [vmem:[%s16131_s5 + $0x5c0] sm:$0xf]  ;;  %v11743_v13 = vld [vmem:[%s16131_s5 + $0x4cc] sm:$0xf0] }
 0x373   :  { %6297 = vmatmul.bf16.vlgmr.msrb.gmra.mxu0 %v14800_v2  ;;  %v10573_v9 = vor.u32 %v11775_v34, %v10572_v24  ;;  %v10444_v21 = vld [vmem:[%s16131_s5 + $0x4c0] sm:$0xf]  ;;  %v11731_v24 = vld [vmem:[%s16131_s5 + $0x46c] sm:$0xf0] }
 0x374   :  { %v10445_v30 = vor.u32 %v11743_v13, %v10444_v21  ;;  %v10492_v34 = vld [vmem:[%s16131_s5 + $0x520] sm:$0xf]  ;;  %v11713_v13 = vld [vmem:[%s16131_s5 + $0x3e4] sm:$0xf] }
 0x375   :  { %6329 = vmatpush.bf16.msrb.mxu3 %v10573_v9  ;;  %v11684_v9 = vld [vmem:[%s16131_s5 + $0x2f4] sm:$0xf0] }
 0x376   :  { %6264 = vmatpush.bf16.msra.mxu1 %v9933_v44  ;;  %6358 = vmatpush.bf16.msrb.mxu2 %v9889_v62  ;;  %v10460_v44 = vld [vmem:[%s16131_s5 + $0x4e0] sm:$0xf]  ;;  %v11733_v62 = vld [vmem:[%s16131_s5 + $0x484] sm:$0xf]  ;;  %v10213_v3 = vor.u32 %v11684_v9, %v10212_v54 }
 0x378   :  { %v4838_v51 = vpop.f32.mrf.mxu0 }
 0x379   :  { %6330 = vmatpush.bf16.msrb.mxu3 %v10557_v63  ;;  %v11717_v51 = vld [vmem:[%s16131_s5 + $0x404] sm:$0xf]  ;;  %v10196_v63 = vld [vmem:[%s16131_s5 + $0x2c8] sm:$0xf] }
 0x37a   :  { %6265 = vmatpush.bf16.msra.mxu1 %v9917_v6  ;;  %6359 = vmatpush.bf16.msrb.mxu2 %v9873_v59  ;;  %v10461_v6 = vor.u32 %v11747_v58, %v10460_v44  ;;  %v10417_v59 = vor.u32 %v11733_v62, %v10414_v36  ;;  %v10397_v58 = vor.u32 %v11731_v24, %v10396_v47  ;;  %v11677_v47 = vld [vmem:[%s16131_s5 + $0x2c4] sm:$0xf]  ;;  %v10190_v24 = vld [vmem:[%s16131_s5 + $0x2d0] sm:$0xf0] }
 0x37d   :  { %6331 = vmatpush.bf16.msrb.mxu3 %v10541_v15  ;;  %v10364_v15 = vld [vmem:[%s16131_s5 + $0x420] sm:$0xf] }
 0x37e   :  { %6266 = vmatpush.bf16.msra.mxu1 %v9901_v18  ;;  %6360 = vmatpush.bf16.msrb.mxu2 %v9857_v22  ;;  %v2584_v18 = vperm.slane %v13193_v38, 4 }
 0x37f   :  { %v14920_v41 = vpop.f32.mrf.mxu3 }
 0x380   :  { %v14925_v22 = vpop.f32.mrf.mxu2  ;;  %v4772_v48 = vadd.f32 %v14608_v16, %v2584_v18  ;;  %v10366_v16 = vld [vmem:[%s16131_s5 + $0x430] sm:$0xf0]  ;;  %v11723_v18 = vld [vmem:[%s16131_s5 + $0x42c] sm:$0xf0] }
 0x381   :  { %v10365_v61 = vor.u32 %v11723_v18, %v10364_v15  ;;  %v11693_v15 = vld [vmem:[%s16131_s5 + $0x344] sm:$0xf]  ;;  %v10254_v18 = vld [vmem:[%s16131_s5 + $0x350] sm:$0xf0] }
 0x382   :  { %6267 = vmatpush.bf16.msra.mxu1 %v9885_v56  ;;  %6361 = vmatpush.bf16.msrb.mxu2 %v9841_v27  ;;  %v10525_v56 = vor.u32 %v11763_v20, %v10524_v25  ;;  %v10429_v27 = vor.u32 %v11739_v60, %v10428_v31  ;;  %v4785_v11 = vadd.f32 %v14694_v53, %v4772_v48  ;;  %v11676_v31 = vld [vmem:[%s16131_s5 + $0x2b4] sm:$0xf0]  ;;  %v11709_v60 = vld [vmem:[%s16131_s5 + $0x3c4] sm:$0xf]  ;;  %v10318_v25 = vld [vmem:[%s16131_s5 + $0x3d0] sm:$0xf0] }
 0x383   :  { %v10369_v53 = vor.u32 %v11721_v35, %v10366_v16  ;;  %v10348_v48 = vld [vmem:[%s16131_s5 + $0x400] sm:$0xf]  ;;  %v10164_v35 = vld [vmem:[%s16131_s5 + $0x288] sm:$0xf]  ;;  %v11705_v16 = vld [vmem:[%s16131_s5 + $0x3a4] sm:$0xf] }
 0x384   :  { %6332 = vmatpush.bf16.msrb.mxu3 %v10525_v56 }
 0x385   :  { %6362 = vmatmul.bf16.vlgmr.msrb.gmra.mxu2 %v14922_v43 }
 0x386   :  { %6406 = vmatpush.bf16.msra.mxu2 %v10465_v32  ;;  %6268 = vmatpush.bf16.msra.mxu1 %v9869_v39  ;;  %v4797_v28 = vpop.f32.mrf.mxu1  ;;  %v10412_v32 = vld [vmem:[%s16131_s5 + $0x480] sm:$0xf] }
 0x387   :  { %v10508_v39 = vld [vmem:[%s16131_s5 + $0x540] sm:$0xf]  ;;  %v4864_v37 = vpop.f32.mrf.mxu3  ;;  %v4798_v49 = vadd.f32 %v4797_v28, %v4785_v11  ;;  %v10413_v45 = vor.u32 %v11735_v33, %v10412_v32  ;;  %v10321_v28 = vor.u32 %v11709_v60, %v10318_v25  ;;  %v10206_v33 = vld [vmem:[%s16131_s5 + $0x2f0] sm:$0xf0]  ;;  %v11672_v11 = vld [vmem:[%s16131_s5 + $0x294] sm:$0xf0] }
 0x388   :  { %v10509_v40 = vor.u32 %v11759_v23, %v10508_v39  ;;  %v11665_v60 = vld [vmem:[%s16131_s5 + $0x264] sm:$0xf]  ;;  %v11656_v25 = vld [vmem:[%s16131_s5 + $0x214] sm:$0xf0] }
 0x389   :  { %v4811_v44 = vadd.f32 %v14782_v57, %v4798_v49  ;;  %v10476_v57 = vld [vmem:[%s16131_s5 + $0x500] sm:$0xf] }
 0x38a   :  { %6407 = vmatpush.bf16.msra.mxu2 %v10449_v50  ;;  %6269 = vmatpush.bf16.msra.mxu1 %v9853_v26  ;;  %v4890_v50 = vpop.f32.mrf.mxu2  ;;  %v10350_v26 = vld [vmem:[%s16131_s5 + $0x410] sm:$0xf0] }
 0x38b   :  { %6333 = vmatpush.bf16.msrb.mxu3 %v10509_v40  ;;  %v10353_v1 = vor.u32 %v11717_v51, %v10350_v26  ;;  %v4824_v17 = vadd.f32 %v14784_v46, %v4811_v44  ;;  %v10180_v46 = vld [vmem:[%s16131_s5 + $0x2a8] sm:$0xf]  ;;  %v10302_v40 = vld [vmem:[%s16131_s5 + $0x3b0] sm:$0xf0]  ;;  %v11668_v26 = vld [vmem:[%s16131_s5 + $0x274] sm:$0xf0]  ;;  %v10193_v44 = vor.u32 %v11677_v47, %v10190_v24 }
 0x38c   :  { %v10181_v32 = vor.u32 %v11676_v31, %v10180_v46  ;;  %v10305_v50 = vor.u32 %v11705_v16, %v10302_v40  ;;  %v10148_v51 = vld [vmem:[%s16131_s5 + $0x268] sm:$0xf]  ;;  %v11787_v16 = vld [vmem:[%s16131_s5 + $0x62c] sm:$0xf0]  ;;  %v10110_v47 = vld [vmem:[%s16131_s5 + $0x230] sm:$0xf0] }
 0x38d   :  { %v4837_v8 = vadd.f32 %v14836_v42, %v4824_v17  ;;  %v11681_v42 = vld [vmem:[%s16131_s5 + $0x2e4] sm:$0xf]  ;;  %v10116_v17 = vld [vmem:[%s16131_s5 + $0x228] sm:$0xf]  ;;  %v11788_v24 = vld [vmem:[%s16131_s5 + $0x634] sm:$0xf0] }
 0x38e   :  { %6408 = vmatpush.bf16.msra.mxu2 %v10433_v55  ;;  %6270 = vmatpush.bf16.msra.mxu1 %v9837_v5  ;;  %v10493_v55 = vor.u32 %v11755_v52, %v10492_v34  ;;  %v4799_v36 = vpop.f32.mrf.mxu1  ;;  %v10380_v5 = vld [vmem:[%s16131_s5 + $0x440] sm:$0xf]  ;;  %v10209_v49 = vor.u32 %v11681_v42, %v10206_v33  ;;  %v11701_v34 = vld [vmem:[%s16131_s5 + $0x384] sm:$0xf]  ;;  %v10286_v52 = vld [vmem:[%s16131_s5 + $0x390] sm:$0xf0] }
 0x38f   :  { %v10381_v0 = vor.u32 %v11727_v4, %v10380_v5  ;;  %v10289_v9 = vor.u32 %v11701_v34, %v10286_v52  ;;  %v11673_v36 = vld [vmem:[%s16131_s5 + $0x2a4] sm:$0xf]  ;;  %v10132_v5 = vld [vmem:[%s16131_s5 + $0x248] sm:$0xf]  ;;  %v11664_v4 = vld [vmem:[%s16131_s5 + $0x254] sm:$0xf0] }
 0x390   :  { %v14992_v62 = vpop.f32.mrf.mxu0  ;;  %6334 = vmatpush.bf16.msrb.mxu3 %v10493_v55  ;;  %v11661_v42 = vld [vmem:[%s16131_s5 + $0x244] sm:$0xf]  ;;  %v10126_v33 = vld [vmem:[%s16131_s5 + $0x250] sm:$0xf0]  ;;  %v11783_v34 = vld [vmem:[%s16131_s5 + $0x60c] sm:$0xf0] }
 0x391   :  { %6271 = vmatmul.bf16.vlgmr.msra.gmra.mxu1 %v14922_v43  ;;  %v10129_v40 = vor.u32 %v11661_v42, %v10126_v33  ;;  %v2585_v52 = vperm.slane %v13193_v38, 5  ;;  %v11642_v33 = vld [vmem:[%s16131_s5 + $0x1ac] sm:$0xf] }
 0x392   :  { %6315 = vmatpush.bf16.msrb.mxu1 %v10461_v6  ;;  %6409 = vmatpush.bf16.msra.mxu2 %v10417_v59  ;;  %v11751_v6 = vld [vmem:[%s16131_s5 + $0x50c] sm:$0xf0]  ;;  %v11680_v59 = vld [vmem:[%s16131_s5 + $0x2d4] sm:$0xf0]  ;;  %v15015_v14 = vpop.f32.mrf.mxu2 }
 0x393   :  { %v10477_v21 = vor.u32 %v11751_v6, %v10476_v57  ;;  %v10270_v57 = vld [vmem:[%s16131_s5 + $0x370] sm:$0xf0] }
 0x395   :  { %6335 = vmatpush.bf16.msrb.mxu3 %v10477_v21  ;;  %v10133_v21 = vor.u32 %v11664_v4, %v10132_v5  ;;  %v10094_v5 = vld [vmem:[%s16131_s5 + $0x210] sm:$0xf0]  ;;  %v11785_v4 = vld [vmem:[%s16131_s5 + $0x624] sm:$0xf] }
 0x396   :  { %6316 = vmatpush.bf16.msrb.mxu1 %v10445_v30  ;;  %6410 = vmatpush.bf16.msra.mxu2 %v10401_v19  ;;  %v10337_v30 = vor.u32 %v11713_v13, %v10334_v7  ;;  %v10197_v19 = vor.u32 %v11680_v59, %v10196_v63  ;;  %v4849_v56 = vpop.f32.mrf.mxu1  ;;  %v11669_v13 = vld [vmem:[%s16131_s5 + $0x284] sm:$0xf]  ;;  %v11660_v7 = vld [vmem:[%s16131_s5 + $0x234] sm:$0xf0] }
 0x397   :  { %v10117_v31 = vor.u32 %v11660_v7, %v10116_v17  ;;  %v10086_v17 = vld [vmem:[%s16131_s5 + $0x1f8] sm:$0xf0]  ;;  %v11645_v7 = vld [vmem:[%s16131_s5 + $0x1c4] sm:$0xf] }
 0x398   :  { %v4903_v20 = vpop.f32.mrf.mxu0 }
 0x399   :  { %6393 = vmatpush.bf16.msra.mxu3 %v10337_v30  ;;  %v11689_v20 = vld [vmem:[%s16131_s5 + $0x324] sm:$0xf] }
 0x39a   :  { %6317 = vmatpush.bf16.msrb.mxu1 %v10429_v27  ;;  %6411 = vmatpush.bf16.msra.mxu2 %v10385_v29  ;;  %v11719_v27 = vld [vmem:[%s16131_s5 + $0x40c] sm:$0xf0]  ;;  %v4850_v29 = vadd.f32 %v4849_v56, %v4837_v8  ;;  %v4942_v23 = vpop.f32.mrf.mxu2  ;;  %v10142_v8 = vld [vmem:[%s16131_s5 + $0x270] sm:$0xf0] }
 0x39b   :  { %v10349_v37 = vor.u32 %v11719_v27, %v10348_v48  ;;  %v10238_v56 = vld [vmem:[%s16131_s5 + $0x330] sm:$0xf0] }
 0x39c   :  { %v5039_v39 = vmax.f32 %v4850_v29, 0.0  ;;  %v10241_v27 = vor.u32 %v11689_v20, %v10238_v56  ;;  %v10046_v56 = vld [vmem:[%s16131_s5 + $0x1b0] sm:$0xf0] }
 0x39d   :  { %6394 = vmatpush.bf16.msra.mxu3 %v10321_v28  ;;  %v10145_v28 = vor.u32 %v11665_v60, %v10142_v8  ;;  %v11781_v8 = vld [vmem:[%s16131_s5 + $0x604] sm:$0xf] }
 0x39e   :  { %6318 = vmatpush.bf16.msrb.mxu1 %v10413_v45  ;;  %6412 = vmatpush.bf16.msra.mxu2 %v10369_v53  ;;  %v15064_v45 = vpack.c.bf16 %v5039_v39, %v5039_v39  ;;  %v10165_v53 = vor.u32 %v11672_v11, %v10164_v35  ;;  %v4851_v55 = vpop.f32.mrf.mxu1  ;;  %v10620_v11 = vld [vmem:[%s16131_s5 + $0x620] sm:$0xf]  ;;  %v11685_v39 = vld [vmem:[%s16131_s5 + $0x304] sm:$0xf] }
 0x39f   :  { %v15084_v54 = vpop.f32.mrf.mxu3  ;;  %v10621_v23 = vor.u32 %v11787_v16, %v10620_v11 }
 0x3a1   :  { %6395 = vmatpush.bf16.msra.mxu3 %v10305_v50  ;;  %v10628_v50 = vld [vmem:[%s16131_s5 + $0x628] sm:$0xf]  ;;  %6347 = vmatpush.bf16.msra.mxu0 %v10621_v23 }
 0x3a2   :  { %6319 = vmatpush.bf16.msrb.mxu1 %v10397_v58  ;;  %6413 = vmatpush.bf16.msra.mxu2 %v10353_v1  ;;  %v10149_v58 = vor.u32 %v11668_v26, %v10148_v51  ;;  %v10174_v1 = vld [vmem:[%s16131_s5 + $0x2b0] sm:$0xf0]  ;;  %v10629_v51 = vor.u32 %v11788_v24, %v10628_v50  ;;  %v10604_v26 = vld [vmem:[%s16131_s5 + $0x600] sm:$0xf] }
 0x3a3   :  { %v10177_v63 = vor.u32 %v11673_v36, %v10174_v1  ;;  %v10605_v55 = vor.u32 %v11783_v34, %v10604_v26  ;;  %v11653_v1 = vld [vmem:[%s16131_s5 + $0x204] sm:$0xf]  ;;  %v10030_v50 = vld [vmem:[%s16131_s5 + $0x190] sm:$0xf0]  ;;  %v10052_v26 = vld [vmem:[%s16131_s5 + $0x1a8] sm:$0xf] }
 0x3a5   :  { %6414 = vmatmul.bf16.vlgmr.msra.gmra.mxu2 %v15064_v45  ;;  %6396 = vmatpush.bf16.msra.mxu3 %v10289_v9 }
 0x3a6   :  { %6471 = vmatpush.bf16.msrb.mxu2 %v10213_v3  ;;  %6320 = vmatpush.bf16.msrb.mxu1 %v10381_v0  ;;  %v11697_v3 = vld [vmem:[%s16131_s5 + $0x364] sm:$0xf]  ;;  %v10158_v0 = vld [vmem:[%s16131_s5 + $0x290] sm:$0xf0] }
 0x3a7   :  { %v10273_v6 = vor.u32 %v11697_v3, %v10270_v57  ;;  %v4916_v30 = vpop.f32.mrf.mxu3  ;;  %v10161_v46 = vor.u32 %v11669_v13, %v10158_v0  ;;  %v10622_v57 = vld [vmem:[%s16131_s5 + $0x630] sm:$0xf0]  ;;  %6348 = vmatpush.bf16.msra.mxu0 %v10605_v55  ;;  %v11650_v0 = vld [vmem:[%s16131_s5 + $0x1ec] sm:$0xf]  ;;  %v11633_v55 = vld [vmem:[%s16131_s5 + $0x164] sm:$0xf] }
 0x3a8   :  { %v15106_v59 = vpop.f32.mrf.mxu2  ;;  %v10097_v30 = vor.u32 %v11653_v1, %v10094_v5  ;;  %v10625_v60 = vor.u32 %v11785_v4, %v10622_v57  ;;  %v11634_v1 = vld [vmem:[%s16131_s5 + $0x16c] sm:$0xf]  ;;  %v10036_v4 = vld [vmem:[%s16131_s5 + $0x188] sm:$0xf] }
 0x3a9   :  { %6397 = vmatpush.bf16.msra.mxu3 %v10273_v6  ;;  %v10612_v6 = vld [vmem:[%s16131_s5 + $0x608] sm:$0xf] }
 0x3aa   :  { %6472 = vmatpush.bf16.msrb.mxu2 %v10197_v19  ;;  %6321 = vmatpush.bf16.msrb.mxu1 %v10365_v61  ;;  %v10257_v19 = vor.u32 %v11693_v15, %v10254_v18  ;;  %v10100_v61 = vld [vmem:[%s16131_s5 + $0x208] sm:$0xf]  ;;  %v10089_v15 = vor.u32 %v11650_v0, %v10086_v17  ;;  %v10062_v18 = vld [vmem:[%s16131_s5 + $0x1d0] sm:$0xf0] }
 0x3ad   :  { %6398 = vmatpush.bf16.msra.mxu3 %v10257_v19  ;;  %v10065_v19 = vor.u32 %v11645_v7, %v10062_v18  ;;  %v10006_v7 = vld [vmem:[%s16131_s5 + $0x158] sm:$0xf0]  ;;  %v9956_v18 = vld [vmem:[%s16131_s5 + $0xe8] sm:$0xf] }
 0x3ae   :  { %6473 = vmatpush.bf16.msrb.mxu2 %v10181_v32  ;;  %6322 = vmatpush.bf16.msrb.mxu1 %v10349_v37  ;;  %v15144_v48 = vpop.f32.mrf.mxu1  ;;  %v10101_v32 = vor.u32 %v11656_v25, %v10100_v61  ;;  %v10222_v37 = vld [vmem:[%s16131_s5 + $0x310] sm:$0xf0]  ;;  %v10070_v61 = vld [vmem:[%s16131_s5 + $0x1d8] sm:$0xf0] }
 0x3af   :  { %v10606_v25 = vld [vmem:[%s16131_s5 + $0x610] sm:$0xf0] }
 0x3b0   :  { %v4968_v29 = vpop.f32.mrf.mxu2  ;;  %v15152_v35 = vpop.f32.mrf.mxu0  ;;  %v10609_v11 = vor.u32 %v11781_v8, %v10606_v25  ;;  %v11625_v25 = vld [vmem:[%s16131_s5 + $0x124] sm:$0xf] }
 0x3b1   :  { %6323 = vmatmul.bf16.vlgmr.msrb.gmra.mxu1 %v15064_v45  ;;  %6399 = vmatpush.bf16.msra.mxu3 %v10241_v27  ;;  %v11652_v29 = vld [vmem:[%s16131_s5 + $0x1f4] sm:$0xf0] }
 0x3b2   :  { %6380 = vmatpush.bf16.msra.mxu1 %v10209_v49  ;;  %6474 = vmatpush.bf16.msrb.mxu2 %v10165_v53  ;;  %v10225_v49 = vor.u32 %v11685_v39, %v10222_v37  ;;  %v11657_v53 = vld [vmem:[%s16131_s5 + $0x224] sm:$0xf]  ;;  %v10068_v39 = vld [vmem:[%s16131_s5 + $0x1c8] sm:$0xf] }
 0x3b3   :  { %v10113_v36 = vor.u32 %v11657_v53, %v10110_v47  ;;  %v10038_v47 = vld [vmem:[%s16131_s5 + $0x198] sm:$0xf0] }
 0x3b5   :  { %6400 = vmatpush.bf16.msra.mxu3 %v10225_v49  ;;  %v11637_v49 = vld [vmem:[%s16131_s5 + $0x184] sm:$0xf] }
 0x3b6   :  { %6381 = vmatpush.bf16.msra.mxu1 %v10193_v44  ;;  %6475 = vmatpush.bf16.msrb.mxu2 %v10149_v58  ;;  %v4877_v9 = vpop.f32.mrf.mxu1  ;;  %v11649_v44 = vld [vmem:[%s16131_s5 + $0x1e4] sm:$0xf]  ;;  %v10078_v58 = vld [vmem:[%s16131_s5 + $0x1f0] sm:$0xf0]  ;;  %v10033_v53 = vor.u32 %v11637_v49, %v10030_v50 }
 0x3b7   :  { %v10081_v3 = vor.u32 %v11649_v44, %v10078_v58  ;;  %v11644_v9 = vld [vmem:[%s16131_s5 + $0x1b4] sm:$0xf0]  ;;  %v10014_v44 = vld [vmem:[%s16131_s5 + $0x170] sm:$0xf0] }
 0x3b8   :  { %v10053_v5 = vor.u32 %v11644_v9, %v10052_v26  ;;  %v9974_v26 = vld [vmem:[%s16131_s5 + $0x118] sm:$0xf0]  ;;  %v9988_v9 = vld [vmem:[%s16131_s5 + $0x128] sm:$0xf] }
 0x3b9   :  { %6367 = vmatpush.bf16.msrb.mxu0 %v10081_v3 }
 0x3ba   :  { %6382 = vmatpush.bf16.msra.mxu1 %v10177_v63  ;;  %6476 = vmatpush.bf16.msrb.mxu2 %v10133_v21  ;;  %v11784_v63 = vld [vmem:[%s16131_s5 + $0x614] sm:$0xf0]  ;;  %v4955_v21 = vpop.f32.mrf.mxu0 }
 0x3bb   :  { %v10613_v13 = vor.u32 %v11784_v63, %v10612_v6  ;;  %v11640_v6 = vld [vmem:[%s16131_s5 + $0x194] sm:$0xf0]  ;;  %v11629_v63 = vld [vmem:[%s16131_s5 + $0x144] sm:$0xf]  ;;  %v9998_v21 = vld [vmem:[%s16131_s5 + $0x150] sm:$0xf0] }
 0x3bc   :  { %v10001_v0 = vor.u32 %v11629_v63, %v9998_v21  ;;  %v9892_v21 = vld [vmem:[%s16131_s5 + $0x68] sm:$0xf] }
 0x3bd   :  { %6368 = vmatpush.bf16.msrb.mxu0 %v10065_v19  ;;  %v10037_v19 = vor.u32 %v11640_v6, %v10036_v4  ;;  %v9972_v4 = vld [vmem:[%s16131_s5 + $0x108] sm:$0xf] }
 0x3be   :  { %6383 = vmatpush.bf16.msra.mxu1 %v10161_v46  ;;  %6477 = vmatpush.bf16.msrb.mxu2 %v10117_v31  ;;  %v11646_v46 = vld [vmem:[%s16131_s5 + $0x1cc] sm:$0xf]  ;;  %v4863_v31 = vadd.f32 %v14920_v41, %v2585_v52  ;;  %v11641_v41 = vld [vmem:[%s16131_s5 + $0x1a4] sm:$0xf] }
 0x3bf   :  { %v10073_v20 = vor.u32 %v11646_v46, %v10070_v61  ;;  %v15248_v42 = vpop.f32.mrf.mxu3  ;;  %v10020_v46 = vld [vmem:[%s16131_s5 + $0x168] sm:$0xf]  ;;  %v11636_v61 = vld [vmem:[%s16131_s5 + $0x174] sm:$0xf0] }
 0x3c0   :  { %v4876_v27 = vadd.f32 %v15144_v48, %v4863_v31  ;;  %v10054_v48 = vld [vmem:[%s16131_s5 + $0x1b8] sm:$0xf0] }
 0x3c1   :  { %v10057_v23 = vor.u32 %v11642_v33, %v10054_v48  ;;  %v10004_v33 = vld [vmem:[%s16131_s5 + $0x148] sm:$0xf]  ;;  %v11626_v48 = vld [vmem:[%s16131_s5 + $0x12c] sm:$0xf] }
 0x3c2   :  { %6384 = vmatpush.bf16.msra.mxu1 %v10145_v28  ;;  %6478 = vmatpush.bf16.msrb.mxu2 %v10101_v32  ;;  %v10084_v28 = vld [vmem:[%s16131_s5 + $0x1e8] sm:$0xf]  ;;  %v10049_v32 = vor.u32 %v11641_v41, %v10046_v56  ;;  %v4889_v37 = vadd.f32 %v14925_v22, %v4876_v27  ;;  %v11638_v22 = vld [vmem:[%s16131_s5 + $0x18c] sm:$0xf] }
 0x3c3   :  { %v10085_v16 = vor.u32 %v11652_v29, %v10084_v28  ;;  %v10041_v34 = vor.u32 %v11638_v22, %v10038_v47  ;;  %v11616_v28 = vld [vmem:[%s16131_s5 + $0xd4] sm:$0xf0]  ;;  %v9924_v22 = vld [vmem:[%s16131_s5 + $0xa8] sm:$0xf] }
 0x3c4   :  { %6369 = vmatpush.bf16.msrb.mxu0 %v10049_v32  ;;  %v4902_v52 = vadd.f32 %v14992_v62, %v4889_v37  ;;  %v10022_v62 = vld [vmem:[%s16131_s5 + $0x178] sm:$0xf0]  ;;  %v10021_v32 = vor.u32 %v11636_v61, %v10020_v46  ;;  %v11621_v37 = vld [vmem:[%s16131_s5 + $0x104] sm:$0xf] }
 0x3c5   :  { %6479 = vmatmul.bf16.vlgmr.msrb.gmra.mxu2 %v14800_v2  ;;  %v10025_v3 = vor.u32 %v11634_v1, %v10022_v62  ;;  %v9908_v1 = vld [vmem:[%s16131_s5 + $0x88] sm:$0xf] }
 0x3c6   :  { %6385 = vmatpush.bf16.msra.mxu1 %v10129_v40  ;;  %6529 = vmatpush.bf16.msra.mxu2 %v10629_v51  ;;  %v11648_v40 = vld [vmem:[%s16131_s5 + $0x1d4] sm:$0xf0]  ;;  %v4915_v57 = vadd.f32 %v15084_v54, %v4902_v52  ;;  %v11630_v54 = vld [vmem:[%s16131_s5 + $0x14c] sm:$0xf] }
 0x3c7   :  { %v10069_v51 = vor.u32 %v11648_v40, %v10068_v39  ;;  %v4981_v58 = vpop.f32.mrf.mxu3  ;;  %v10009_v31 = vor.u32 %v11630_v54, %v10006_v7  ;;  %v11632_v39 = vld [vmem:[%s16131_s5 + $0x154] sm:$0xf0]  ;;  %v9966_v40 = vld [vmem:[%s16131_s5 + $0x110] sm:$0xf0] }
 0x3c8   :  { %v15276_v24 = vpop.f32.mrf.mxu2  ;;  %6370 = vmatpush.bf16.msrb.mxu0 %v10033_v53  ;;  %v9969_v50 = vor.u32 %v11621_v37, %v9966_v40  ;;  %v10005_v47 = vor.u32 %v11632_v39, %v10004_v33  ;;  %v11612_v52 = vld [vmem:[%s16131_s5 + $0xb4] sm:$0xf0]  ;;  %v10590_v33 = vld [vmem:[%s16131_s5 + $0x5f0] sm:$0xf0]  ;;  %v10596_v39 = vld [vmem:[%s16131_s5 + $0x5e8] sm:$0xf] }
 0x3c9   :  { %v11600_v7 = vld [vmem:[%s16131_s5 + $0x54] sm:$0xf0]  ;;  %v11778_v37 = vld [vmem:[%s16131_s5 + $0x5ec] sm:$0xf]  ;;  %v10598_v40 = vld [vmem:[%s16131_s5 + $0x5f8] sm:$0xf0] }
 0x3ca   :  { %6386 = vmatpush.bf16.msra.mxu1 %v10113_v36  ;;  %6530 = vmatpush.bf16.msra.mxu2 %v10613_v13  ;;  %v10017_v36 = vor.u32 %v11633_v55, %v10014_v44  ;;  %v11628_v55 = vld [vmem:[%s16131_s5 + $0x134] sm:$0xf0] }
 0x3cb   :  { %v9989_v62 = vor.u32 %v11628_v55, %v9988_v9  ;;  %v10601_v9 = vor.u32 %v11778_v37, %v10598_v40  ;;  %v10580_v55 = vld [vmem:[%s16131_s5 + $0x5c8] sm:$0xf]  ;;  %v11757_v40 = vld [vmem:[%s16131_s5 + $0x544] sm:$0xf] }
 0x3cc   :  { %6371 = vmatpush.bf16.msrb.mxu0 %v10017_v36  ;;  %v9925_v36 = vor.u32 %v11612_v52, %v9924_v22  ;;  %v11740_v52 = vld [vmem:[%s16131_s5 + $0x4b4] sm:$0xf0] }
 0x3ce   :  { %6549 = vmatpush.bf16.msrb.mxu2 %v10089_v15  ;;  %6387 = vmatpush.bf16.msra.mxu1 %v10097_v30  ;;  %v4927_v13 = vpop.f32.mrf.mxu1  ;;  %v11620_v30 = vld [vmem:[%s16131_s5 + $0xf4] sm:$0xf0] }
 0x3cf   :  { %v4928_v17 = vadd.f32 %v4927_v13, %v4915_v57  ;;  %v15337_v27 = vpop.f32.mrf.mxu3  ;;  %v9957_v29 = vor.u32 %v11620_v30, %v9956_v18  ;;  %v2586_v57 = vperm.slane %v13193_v38, 6  ;;  %v11604_v13 = vld [vmem:[%s16131_s5 + $0x74] sm:$0xf0]  ;;  %v9876_v38 = vld [vmem:[%s16131_s5 + $0x48] sm:$0xf] }
 0x3d0   :  { %v5020_v15 = vpop.f32.mrf.mxu2  ;;  %v15326_v8 = vpop.f32.mrf.mxu0  ;;  %6372 = vmatpush.bf16.msrb.mxu0 %v10001_v0  ;;  %v9877_v18 = vor.u32 %v11600_v7, %v9876_v38  ;;  %v11596_v30 = vld [vmem:[%s16131_s5 + $0x34] sm:$0xf0] }
 0x3d1   :  { %6388 = vmatmul.bf16.vlgmr.msra.gmra.mxu1 %v14800_v2  ;;  %v4954_v0 = vadd.f32 %v15152_v35, %v2586_v57  ;;  %v9860_v35 = vld [vmem:[%s16131_s5 + $0x28] sm:$0xf] }
 0x3d2   :  { %6438 = vmatpush.bf16.msrb.mxu1 %v10625_v60  ;;  %6550 = vmatpush.bf16.msrb.mxu2 %v10073_v20  ;;  %v4941_v60 = vadd.f32 %v15015_v14, %v4928_v17  ;;  %v9982_v20 = vld [vmem:[%s16131_s5 + $0x130] sm:$0xf0]  ;;  %v9940_v14 = vld [vmem:[%s16131_s5 + $0xc8] sm:$0xf]  ;;  %v9893_v17 = vor.u32 %v11604_v13, %v9892_v21  ;;  %v11772_v13 = vld [vmem:[%s16131_s5 + $0x5b4] sm:$0xf0] }
 0x3d3   :  { %v9985_v41 = vor.u32 %v11625_v25, %v9982_v20  ;;  %v9941_v53 = vor.u32 %v11616_v28, %v9940_v14  ;;  %v4967_v15 = vadd.f32 %v15106_v59, %v4954_v0  ;;  %v9844_v59 = vld [vmem:[%s16131_s5 + $0x8] sm:$0xf]  ;;  %v11592_v25 = vld [vmem:[%s16131_s5 + $0x14] sm:$0xf0]  ;;  %v11770_v0 = vld [vmem:[%s16131_s5 + $0x5ac] sm:$0xf] }
 0x3d4   :  { %v5040_v56 = vmax.f32 %v4941_v60, 0.0  ;;  %v9861_v60 = vor.u32 %v11596_v30, %v9860_v35  ;;  %v9845_v28 = vor.u32 %v11592_v25, %v9844_v59  ;;  %v10420_v57 = vld [vmem:[%s16131_s5 + $0x488] sm:$0xf]  ;;  %v10542_v35 = vld [vmem:[%s16131_s5 + $0x590] sm:$0xf0] }
 0x3d5   :  { %6373 = vmatpush.bf16.msrb.mxu0 %v9985_v41  ;;  %v10564_v21 = vld [vmem:[%s16131_s5 + $0x5a8] sm:$0xf]  ;;  %v11766_v59 = vld [vmem:[%s16131_s5 + $0x58c] sm:$0xf]  ;;  %v10550_v25 = vld [vmem:[%s16131_s5 + $0x598] sm:$0xf0] }
 0x3d6   :  { %6439 = vmatpush.bf16.msrb.mxu1 %v10609_v11  ;;  %6551 = vmatpush.bf16.msrb.mxu2 %v10057_v23  ;;  %v9990_v11 = vld [vmem:[%s16131_s5 + $0x138] sm:$0xf0]  ;;  %v4929_v49 = vpop.f32.mrf.mxu1  ;;  %v10404_v30 = vld [vmem:[%s16131_s5 + $0x468] sm:$0xf] }
 0x3d7   :  { %v9993_v23 = vor.u32 %v11626_v48, %v9990_v11  ;;  %v5033_v58 = vpop.f32.mrf.mxu3  ;;  %v10452_v48 = vld [vmem:[%s16131_s5 + $0x4c8] sm:$0xf] }
 0x3d8   :  { %v11774_v58 = vld [vmem:[%s16131_s5 + $0x5cc] sm:$0xf] }
 0x3d9   :  { %6374 = vmatpush.bf16.msrb.mxu0 %v9969_v50 }
 0x3da   :  { %6458 = vmatpush.bf16.msra.mxu1 %v10085_v16  ;;  %6552 = vmatpush.bf16.msrb.mxu2 %v10041_v34  ;;  %v15354_v16 = vpack.c.bf16 %v5040_v56, %v5040_v56  ;;  %v5007_v34 = vpop.f32.mrf.mxu0  ;;  %v11748_v56 = vld [vmem:[%s16131_s5 + $0x4f4] sm:$0xf0] }
 0x3db   :  { %v10436_v34 = vld [vmem:[%s16131_s5 + $0x4a8] sm:$0xf] }
 0x3dc   :  { %6336 = vmatmul.bf16.vlgmr.msrb.gmra.mxu3 %v15354_v16 }
 0x3dd   :  { %6445 = vmatpush.bf16.msrb.mxu3 %v9957_v29 }
 0x3de   :  { %6459 = vmatpush.bf16.msra.mxu1 %v10069_v51  ;;  %6553 = vmatpush.bf16.msrb.mxu2 %v10025_v3  ;;  %v11622_v51 = vld [vmem:[%s16131_s5 + $0x10c] sm:$0xf]  ;;  %v11624_v3 = vld [vmem:[%s16131_s5 + $0x114] sm:$0xf0] }
 0x3df   :  { %v9977_v44 = vor.u32 %v11622_v51, %v9974_v26  ;;  %v9973_v63 = vor.u32 %v11624_v3, %v9972_v4  ;;  %v10574_v26 = vld [vmem:[%s16131_s5 + $0x5d0] sm:$0xf0] }
 0x3e0   :  { %v10558_v3 = vld [vmem:[%s16131_s5 + $0x5b0] sm:$0xf0] }
 0x3e1   :  { %6446 = vmatpush.bf16.msrb.mxu3 %v9941_v53  ;;  %v11773_v53 = vld [vmem:[%s16131_s5 + $0x5c4] sm:$0xf] }
 0x3e2   :  { %6460 = vmatpush.bf16.msra.mxu1 %v10053_v5  ;;  %6554 = vmatpush.bf16.msrb.mxu2 %v10009_v31  ;;  %v11608_v5 = vld [vmem:[%s16131_s5 + $0x94] sm:$0xf0] }
 0x3e3   :  { %v9909_v6 = vor.u32 %v11608_v5, %v9908_v1  ;;  %v10577_v1 = vor.u32 %v11773_v53, %v10574_v26  ;;  %v11769_v5 = vld [vmem:[%s16131_s5 + $0x5a4] sm:$0xf]  ;;  %v10372_v53 = vld [vmem:[%s16131_s5 + $0x428] sm:$0xf] }
 0x3e4   :  { %v10561_v38 = vor.u32 %v11769_v5, %v10558_v3  ;;  %v10494_v5 = vld [vmem:[%s16131_s5 + $0x530] sm:$0xf0]  ;;  %v10356_v3 = vld [vmem:[%s16131_s5 + $0x408] sm:$0xf] }
 0x3e5   :  { %6447 = vmatpush.bf16.msrb.mxu3 %v9925_v36  ;;  %v10582_v36 = vld [vmem:[%s16131_s5 + $0x5d8] sm:$0xf0] }
 0x3e6   :  { %6461 = vmatpush.bf16.msra.mxu1 %v10037_v19  ;;  %6555 = vmatpush.bf16.msrb.mxu2 %v9993_v23  ;;  %v15404_v54 = vpop.f32.mrf.mxu3  ;;  %v4980_v19 = vadd.f32 %v15248_v42, %v4967_v15  ;;  %v10468_v42 = vld [vmem:[%s16131_s5 + $0x4e8] sm:$0xf]  ;;  %v11765_v15 = vld [vmem:[%s16131_s5 + $0x584] sm:$0xf] }
 0x3e7   :  { %v10469_v29 = vor.u32 %v11748_v56, %v10468_v42  ;;  %v15545_v56 = vld [vmem:[#allocation14 + $0x4] ss:$8 sm:$0xf] }
 0x3e9   :  { %6448 = vmatpush.bf16.msrb.mxu3 %v9909_v6  ;;  %v11736_v6 = vld [vmem:[%s16131_s5 + $0x494] sm:$0xf0] }
 0x3ea   :  { %6462 = vmatpush.bf16.msra.mxu1 %v10021_v32  ;;  %6556 = vmatpush.bf16.msrb.mxu2 %v9977_v44  ;;  %v11777_v32 = vld [vmem:[%s16131_s5 + $0x5e4] sm:$0xf]  ;;  %v11776_v44 = vld [vmem:[%s16131_s5 + $0x5d4] sm:$0xf0]  ;;  %v10421_v7 = vor.u32 %v11736_v6, %v10420_v57  ;;  %v10500_v6 = vld [vmem:[%s16131_s5 + $0x528] sm:$0xf] }
 0x3eb   :  { %v10593_v49 = vor.u32 %v11777_v32, %v10590_v33  ;;  %v10581_v4 = vor.u32 %v11776_v44, %v10580_v55  ;;  %v10388_v32 = vld [vmem:[%s16131_s5 + $0x448] sm:$0xf]  ;;  %v10553_v33 = vor.u32 %v11766_v59, %v10550_v25  ;;  %v11758_v55 = vld [vmem:[%s16131_s5 + $0x54c] sm:$0xf]  ;;  %v10518_v44 = vld [vmem:[%s16131_s5 + $0x558] sm:$0xf0] }
 0x3ec   :  { %6401 = vmatmul.bf16.vlgmr.msra.gmra.mxu3 %v14844_v12  ;;  %v11720_v57 = vld [vmem:[%s16131_s5 + $0x414] sm:$0xf0] }
 0x3ed   :  { %6449 = vmatpush.bf16.msrb.mxu3 %v9893_v17  ;;  %v10566_v17 = vld [vmem:[%s16131_s5 + $0x5b8] sm:$0xf0]  ;;  %v11716_v25 = vld [vmem:[%s16131_s5 + $0x3f4] sm:$0xf0] }
 0x3ee   :  { %6463 = vmatpush.bf16.msra.mxu1 %v10005_v47  ;;  %v4992_v46 = vpop.f32.mrf.mxu1  ;;  %v6287_v61 = vpop.f32.mrf.mxu3 }
 0x3ef   :  { %v4993_v31 = vadd.f32 %v4992_v46, %v4980_v19  ;;  %v11732_v19 = vld [vmem:[%s16131_s5 + $0x474] sm:$0xf0] }
 0x3f0   :  { %v15428_v41 = vpop.f32.mrf.mxu0  ;;  %v11768_v61 = vld [vmem:[%s16131_s5 + $0x594] sm:$0xf0]  ;;  %v10405_v42 = vor.u32 %v11732_v19, %v10404_v30  ;;  %v10478_v19 = vld [vmem:[%s16131_s5 + $0x510] sm:$0xf0] }
 0x3f1   :  { %6450 = vmatpush.bf16.msrb.mxu3 %v9877_v18  ;;  %v5006_v20 = vadd.f32 %v15326_v8, %v4993_v31  ;;  %v10565_v18 = vor.u32 %v11772_v13, %v10564_v21  ;;  %v10569_v31 = vor.u32 %v11770_v0, %v10566_v17  ;;  %v10521_v21 = vor.u32 %v11758_v55, %v10518_v44  ;;  %v11682_v13 = vld [vmem:[%s16131_s5 + $0x2ec] sm:$0xf]  ;;  %v10214_v0 = vld [vmem:[%s16131_s5 + $0x2f8] sm:$0xf0] }
 0x3f2   :  { %6464 = vmatpush.bf16.msra.mxu1 %v9989_v62  ;;  %v10437_v62 = vor.u32 %v11740_v52, %v10436_v34  ;;  %v10516_v34 = vld [vmem:[%s16131_s5 + $0x548] sm:$0xf]  ;;  %v11760_v52 = vld [vmem:[%s16131_s5 + $0x554] sm:$0xf0]  ;;  %v11754_v17 = vld [vmem:[%s16131_s5 + $0x52c] sm:$0xf]  ;;  %v10217_v30 = vor.u32 %v11682_v13, %v10214_v0 }
 0x3f3   :  { %v5019_v14 = vadd.f32 %v15276_v24, %v5006_v20  ;;  %v11744_v24 = vld [vmem:[%s16131_s5 + $0x4d4] sm:$0xf0]  ;;  %v10545_v20 = vor.u32 %v11765_v15, %v10542_v35  ;;  %v11749_v15 = vld [vmem:[%s16131_s5 + $0x504] sm:$0xf]  ;;  %v11670_v55 = vld [vmem:[%s16131_s5 + $0x28c] sm:$0xf] }
 0x3f4   :  { %v10453_v50 = vor.u32 %v11744_v24, %v10452_v48  ;;  %v15531_v46 = vpop.f32.mrf.mxu2  ;;  %v10532_v48 = vld [vmem:[%s16131_s5 + $0x568] sm:$0xf]  ;;  %v11764_v24 = vld [vmem:[%s16131_s5 + $0x574] sm:$0xf0]  ;;  %v10166_v44 = vld [vmem:[%s16131_s5 + $0x298] sm:$0xf0] }
 0x3f5   :  { %6451 = vmatpush.bf16.msrb.mxu3 %v9861_v60  ;;  %v5032_v8 = vadd.f32 %v15337_v27, %v5019_v14  ;;  %v11780_v27 = vld [vmem:[%s16131_s5 + $0x5f4] sm:$0xf0]  ;;  %v10548_v60 = vld [vmem:[%s16131_s5 + $0x588] sm:$0xf]  ;;  %v11761_v14 = vld [vmem:[%s16131_s5 + $0x564] sm:$0xf] }
 0x3f6   :  { %6465 = vmatpush.bf16.msra.mxu1 %v9973_v63  ;;  %v4994_v11 = vpop.f32.mrf.mxu1  ;;  %v10597_v51 = vor.u32 %v11780_v27, %v10596_v39  ;;  %v10585_v63 = vor.u32 %v11774_v58, %v10582_v36  ;;  %v10534_v39 = vld [vmem:[%s16131_s5 + $0x578] sm:$0xf0]  ;;  %v5252_v27 = vperm.slane %v15545_v56, 0  ;;  %v10276_v13 = vld [vmem:[%s16131_s5 + $0x368] sm:$0xf] }
 0x3f7   :  { %v5041_v23 = vmax.f32 %v5032_v8, 0.0  ;;  %v11728_v8 = vld [vmem:[%s16131_s5 + $0x454] sm:$0xf0]  ;;  %v11762_v11 = vld [vmem:[%s16131_s5 + $0x56c] sm:$0xf] }
 0x3f8   :  { %v6300_v47 = vpop.f32.mrf.mxu0  ;;  %v10389_v37 = vor.u32 %v11728_v8, %v10388_v32  ;;  %v10537_v26 = vor.u32 %v11762_v11, %v10534_v39  ;;  %v10342_v32 = vld [vmem:[%s16131_s5 + $0x3f8] sm:$0xf0]  ;;  %v10481_v8 = vor.u32 %v11749_v15, %v10478_v19  ;;  %v11700_v0 = vld [vmem:[%s16131_s5 + $0x374] sm:$0xf0] }
 0x3f9   :  { %6452 = vmatpush.bf16.msrb.mxu3 %v9845_v28  ;;  %v15465_v22 = vpack.c.bf16 %v5041_v23, %v5041_v23  ;;  %v10549_v28 = vor.u32 %v11768_v61, %v10548_v60  ;;  %v11724_v47 = vld [vmem:[%s16131_s5 + $0x434] sm:$0xf0]  ;;  %v10278_v15 = vld [vmem:[%s16131_s5 + $0x378] sm:$0xf0] }
 0x3fa   :  { %v11752_v60 = vld [vmem:[%s16131_s5 + $0x514] sm:$0xf0] }
 0x3fb   :  { %10634 = vmatmul.msk.bf16.vlgmr.msra.gmra.mxu0 %vm4394_vm5, %v15465_v22  ;;  %10635 = vmatmul.msk.bf16.vlgmr.msrb.gmra.mxu1 %vm4394_vm5, %v15465_v22  ;;  %v11696_v19 = vld [vmem:[%s16131_s5 + $0x354] sm:$0xf0] }
 0x3fc   :  { %6453 = vmatmul.bf16.vlgmr.msrb.gmra.mxu3 %v14922_v43  ;;  %6419 = vmatpush.bf16.msra.mxu0 %v10593_v49  ;;  %v10533_v49 = vor.u32 %v11764_v24, %v10532_v48 }
 0x3fd   :  { %6497 = vmatpush.bf16.msra.mxu3 %v10469_v29  ;;  %6510 = vmatpush.bf16.msrb.mxu1 %v10597_v51  ;;  %v10526_v29 = vld [vmem:[%s16131_s5 + $0x570] sm:$0xf0]  ;;  %v6313_v51 = vpop.f32.mrf.mxu2 }
 0x3fe   :  { %10636 = vmatmul.msk.bf16.vlgmr.msra.gmra.mxu2 %vm4394_vm5, %v15465_v22  ;;  %v10529_v23 = vor.u32 %v11761_v14, %v10526_v29  ;;  %v11714_v29 = vld [vmem:[%s16131_s5 + $0x3ec] sm:$0xf] }
 0x3ff   :  { %6601 = vmatpush.bf16.msra.mxu2 %v10601_v9  ;;  %v10345_v39 = vor.u32 %v11714_v29, %v10342_v32  ;;  %v10244_v32 = vld [vmem:[%s16131_s5 + $0x328] sm:$0xf] }
 0x400   :  { %6420 = vmatpush.bf16.msra.mxu0 %v10577_v1  ;;  %v10373_v1 = vor.u32 %v11724_v47, %v10372_v53  ;;  %v10326_v53 = vld [vmem:[%s16131_s5 + $0x3d8] sm:$0xf0] }
 0x401   :  { %6498 = vmatpush.bf16.msra.mxu3 %v10453_v50  ;;  %6511 = vmatpush.bf16.msrb.mxu1 %v10581_v4  ;;  %v10510_v50 = vld [vmem:[%s16131_s5 + $0x550] sm:$0xf0]  ;;  %v10517_v4 = vor.u32 %v11760_v52, %v10516_v34  ;;  %v10308_v34 = vld [vmem:[%s16131_s5 + $0x3a8] sm:$0xf]  ;;  %v11708_v52 = vld [vmem:[%s16131_s5 + $0x3b4] sm:$0xf0] }
 0x402   :  { %v10513_v36 = vor.u32 %v11757_v40, %v10510_v50  ;;  %v11674_v40 = vld [vmem:[%s16131_s5 + $0x2ac] sm:$0xf] }
 0x403   :  { %6602 = vmatpush.bf16.msra.mxu2 %v10585_v63  ;;  %v11710_v50 = vld [vmem:[%s16131_s5 + $0x3cc] sm:$0xf] }
 0x404   :  { %6421 = vmatpush.bf16.msra.mxu0 %v10561_v38 }
 0x405   :  { %6499 = vmatpush.bf16.msra.mxu3 %v10437_v62  ;;  %6512 = vmatpush.bf16.msrb.mxu1 %v10565_v18  ;;  %v11753_v62 = vld [vmem:[%s16131_s5 + $0x524] sm:$0xf] }
 0x406   :  { %v10497_v38 = vor.u32 %v11753_v62, %v10494_v5  ;;  %v10169_v62 = vor.u32 %v11670_v55, %v10166_v44  ;;  %v10292_v5 = vld [vmem:[%s16131_s5 + $0x388] sm:$0xf]  ;;  %v10614_v55 = vld [vmem:[%s16131_s5 + $0x618] sm:$0xf0] }
 0x407   :  { %6603 = vmatpush.bf16.msra.mxu2 %v10569_v31  ;;  %v10484_v31 = vld [vmem:[%s16131_s5 + $0x508] sm:$0xf] }
 0x408   :  { %6422 = vmatpush.bf16.msra.mxu0 %v10545_v20  ;;  %v15643_v61 = vpop.f32.mrf.mxu2  ;;  %v11678_v20 = vld [vmem:[%s16131_s5 + $0x2cc] sm:$0xf]  ;;  %v10485_v48 = vor.u32 %v11752_v60, %v10484_v31 }
 0x409   :  { %6500 = vmatpush.bf16.msra.mxu3 %v10421_v7  ;;  %6513 = vmatpush.bf16.msrb.mxu1 %v10549_v28  ;;  %v10357_v7 = vor.u32 %v11720_v57, %v10356_v3  ;;  %v10198_v28 = vld [vmem:[%s16131_s5 + $0x2d8] sm:$0xf0]  ;;  %v11666_v57 = vld [vmem:[%s16131_s5 + $0x26c] sm:$0xf] }
 0x40a   :  { %v10201_v11 = vor.u32 %v11678_v20, %v10198_v28  ;;  %v11658_v60 = vld [vmem:[%s16131_s5 + $0x22c] sm:$0xf]  ;;  %v10262_v20 = vld [vmem:[%s16131_s5 + $0x358] sm:$0xf0] }
 0x40b   :  { %6604 = vmatpush.bf16.msra.mxu2 %v10553_v33  ;;  %6375 = vmatmul.bf16.vlgmr.msrb.gmra.mxu0 %v14721_v10  ;;  %v10486_v33 = vld [vmem:[%s16131_s5 + $0x518] sm:$0xf0] }
 0x40c   :  { %6466 = vmatmul.bf16.vlgmr.msra.gmra.mxu1 %v14721_v10  ;;  %6423 = vmatpush.bf16.msra.mxu0 %v10529_v23  ;;  %v11712_v23 = vld [vmem:[%s16131_s5 + $0x3d4] sm:$0xf0] }
 0x40d   :  { %6501 = vmatpush.bf16.msra.mxu3 %v10405_v42  ;;  %6514 = vmatpush.bf16.msrb.mxu1 %v10533_v49  ;;  %v10182_v49 = vld [vmem:[%s16131_s5 + $0x2b8] sm:$0xf0] }
 0x40e   :  { %v6272_v9 = vpop.f32.mrf.mxu1  ;;  %6557 = vmatmul.bf16.vlgmr.msrb.gmra.mxu2 %v14721_v10  ;;  %v11756_v10 = vld [vmem:[%s16131_s5 + $0x534] sm:$0xf0] }
 0x40f   :  { %v6273_v58 = vadd.f32 %v6272_v9, %v5252_v27  ;;  %6605 = vmatpush.bf16.msra.mxu2 %v10537_v26  ;;  %v10501_v35 = vor.u32 %v11756_v10, %v10500_v6  ;;  %v10324_v27 = vld [vmem:[%s16131_s5 + $0x3c8] sm:$0xf]  ;;  %v10185_v26 = vor.u32 %v11674_v40, %v10182_v49  ;;  %v10329_v9 = vor.u32 %v11710_v50, %v10326_v53  ;;  %v11702_v6 = vld [vmem:[%s16131_s5 + $0x38c] sm:$0xf]  ;;  %v11688_v49 = vld [vmem:[%s16131_s5 + $0x314] sm:$0xf0] }
 0x410   :  { %6424 = vmatpush.bf16.msra.mxu0 %v10513_v36  ;;  %v10325_v47 = vor.u32 %v11712_v23, %v10324_v27  ;;  %v6365_v51 = vpop.f32.mrf.mxu2  ;;  %v10310_v36 = vld [vmem:[%s16131_s5 + $0x3b8] sm:$0xf0]  ;;  %v10228_v40 = vld [vmem:[%s16131_s5 + $0x308] sm:$0xf]  ;;  %v11686_v53 = vld [vmem:[%s16131_s5 + $0x30c] sm:$0xf] }
 0x411   :  { %6502 = vmatpush.bf16.msra.mxu3 %v10389_v37  ;;  %v6286_v63 = vadd.f32 %v15404_v54, %v6273_v58  ;;  %v10502_v54 = vld [vmem:[%s16131_s5 + $0x538] sm:$0xf0]  ;;  %6515 = vmatpush.bf16.msrb.mxu1 %v10517_v4  ;;  %v11706_v58 = vld [vmem:[%s16131_s5 + $0x3ac] sm:$0xf]  ;;  %v11704_v4 = vld [vmem:[%s16131_s5 + $0x394] sm:$0xf0]  ;;  %v10229_v44 = vor.u32 %v11688_v49, %v10228_v40 }
 0x412   :  { %v10505_v59 = vor.u32 %v11754_v17, %v10502_v54  ;;  %v10313_v3 = vor.u32 %v11706_v58, %v10310_v36  ;;  %v11662_v54 = vld [vmem:[%s16131_s5 + $0x24c] sm:$0xf]  ;;  %v10630_v27 = vld [vmem:[%s16131_s5 + $0x638] sm:$0xf0]  ;;  %v11792_v40 = vld [vmem:[#allocation10 + $0x14] sm:$0xf0] }
 0x413   :  { %v6299_v18 = vadd.f32 %v15428_v41, %v6286_v63  ;;  %6606 = vmatpush.bf16.msra.mxu2 %v10521_v21  ;;  %v10340_v41 = vld [vmem:[%s16131_s5 + $0x3e8] sm:$0xf]  ;;  %v10294_v63 = vld [vmem:[%s16131_s5 + $0x398] sm:$0xf0]  ;;  %v10293_v21 = vor.u32 %v11704_v4, %v10292_v5  ;;  %v11614_v36 = vld [vmem:[%s16131_s5 + $0xcc] sm:$0xf] }
 0x414   :  { %6425 = vmatpush.bf16.msra.mxu0 %v10497_v38  ;;  %v10341_v24 = vor.u32 %v11716_v25, %v10340_v41  ;;  %v10297_v17 = vor.u32 %v11702_v6, %v10294_v63  ;;  %v10134_v38 = vld [vmem:[%s16131_s5 + $0x258] sm:$0xf0]  ;;  %v11694_v25 = vld [vmem:[%s16131_s5 + $0x34c] sm:$0xf] }
 0x415   :  { %6503 = vmatpush.bf16.msra.mxu3 %v10373_v1  ;;  %v15655_v42 = vadd.f32 %v15531_v46, %v6299_v18  ;;  %v11750_v46 = vld [vmem:[%s16131_s5 + $0x50c] sm:$0xf]  ;;  %6516 = vmatpush.bf16.msrb.mxu1 %v10501_v35  ;;  %v10309_v1 = vor.u32 %v11708_v52, %v10308_v34  ;;  %v10277_v18 = vor.u32 %v11700_v0, %v10276_v13  ;;  %v9958_v51 = vld [vmem:[%s16131_s5 + $0xf8] sm:$0xf0]  ;;  %v11802_v13 = vld [vmem:[#allocation10 + $0x64] sm:$0xf0] }
 0x416   :  { %v6274_v14 = vpop.f32.mrf.mxu1  ;;  %v10489_v37 = vor.u32 %v11750_v46, %v10486_v33  ;;  %v10137_v35 = vor.u32 %v11662_v54, %v10134_v38  ;;  %v10265_v33 = vor.u32 %v11694_v25, %v10262_v20  ;;  %v10230_v52 = vld [vmem:[%s16131_s5 + $0x318] sm:$0xf0]  ;;  %v11610_v63 = vld [vmem:[%s16131_s5 + $0xac] sm:$0xf]  ;;  %v10680_v38 = vld [vmem:[#allocation10 + $0x50] sm:$0xf] }
 0x417   :  { %6607 = vmatpush.bf16.msra.mxu2 %v10505_v59  ;;  %v10118_v59 = vld [vmem:[%s16131_s5 + $0x238] sm:$0xf0]  ;;  %v10664_v20 = vld [vmem:[#allocation10 + $0x30] sm:$0xf]  ;;  %v11746_v49 = vld [vmem:[%s16131_s5 + $0x4ec] sm:$0xf] }
 0x418   :  { %6426 = vmatpush.bf16.msra.mxu0 %v10481_v8  ;;  %v10121_v29 = vor.u32 %v11658_v60, %v10118_v59  ;;  %v11692_v8 = vld [vmem:[%s16131_s5 + $0x334] sm:$0xf0]  ;;  %v9942_v5 = vld [vmem:[%s16131_s5 + $0xd8] sm:$0xf0] }
 0x419   :  { %6504 = vmatpush.bf16.msra.mxu3 %v10357_v7  ;;  %6517 = vmatpush.bf16.msrb.mxu1 %v10485_v48  ;;  %v11698_v7 = vld [vmem:[%s16131_s5 + $0x36c] sm:$0xf]  ;;  %v10102_v48 = vld [vmem:[%s16131_s5 + $0x218] sm:$0xf0]  ;;  %v10245_v23 = vor.u32 %v11692_v8, %v10244_v32  ;;  %v9945_v6 = vor.u32 %v11614_v36, %v9942_v5 }
 0x41a   :  { %v10281_v31 = vor.u32 %v11698_v7, %v10278_v15  ;;  %v9910_v54 = vld [vmem:[%s16131_s5 + $0x98] sm:$0xf0]  ;;  %v11800_v7 = vld [vmem:[#allocation10 + $0x54] sm:$0xf0]  ;;  %v10698_v36 = vld [vmem:[#allocation10 + $0x78] sm:$0xf0] }
 0x41b   :  { %6608 = vmatpush.bf16.msra.mxu2 %v10489_v37  ;;  %6427 = vmatmul.bf16.vlgmr.msra.gmra.mxu0 %v15354_v16  ;;  %v10681_v15 = vor.u32 %v11800_v7, %v10680_v38  ;;  %v9878_v25 = vld [vmem:[%s16131_s5 + $0x58] sm:$0xf0] }
 0x41c   :  { %6505 = vmatmul.bf16.vlgmr.msra.gmra.mxu3 %v15064_v45  ;;  %6484 = vmatpush.bf16.msrb.mxu0 %v10341_v24  ;;  %v11690_v24 = vld [vmem:[%s16131_s5 + $0x32c] sm:$0xf]  ;;  %v10690_v5 = vld [vmem:[#allocation10 + $0x68] sm:$0xf0] }
 0x41d   :  { %6562 = vmatpush.bf16.msrb.mxu3 %v10217_v30  ;;  %6575 = vmatpush.bf16.msra.mxu1 %v10345_v39  ;;  %v10260_v30 = vld [vmem:[%s16131_s5 + $0x348] sm:$0xf]  ;;  %v11786_v39 = vld [vmem:[%s16131_s5 + $0x62c] sm:$0xf]  ;;  %v10674_v38 = vld [vmem:[#allocation10 + $0x48] sm:$0xf0] }
 0x41e   :  { %6518 = vmatmul.bf16.vlgmr.msrb.gmra.mxu1 %v15354_v16  ;;  %6609 = vmatmul.bf16.vlgmr.msra.gmra.mxu2 %v15354_v16  ;;  %v10150_v16 = vld [vmem:[%s16131_s5 + $0x278] sm:$0xf0]  ;;  %v10261_v28 = vor.u32 %v11696_v19, %v10260_v30  ;;  %v10672_v30 = vld [vmem:[#allocation10 + $0x40] sm:$0xf]  ;;  %v11798_v19 = vld [vmem:[#allocation10 + $0x44] sm:$0xf0] }
 0x41f   :  { %v10153_v10 = vor.u32 %v11666_v57, %v10150_v16  ;;  %v11804_v57 = vld [vmem:[#allocation10 + $0x74] sm:$0xf0]  ;;  %v10673_v60 = vor.u32 %v11798_v19, %v10672_v30  ;;  %v11795_v30 = vld [vmem:[#allocation10 + $0x34] sm:$0xf]  ;;  %v10666_v19 = vld [vmem:[#allocation10 + $0x38] sm:$0xf0] }
 0x420   :  { %6485 = vmatpush.bf16.msrb.mxu0 %v10325_v47  ;;  %v11618_v47 = vld [vmem:[%s16131_s5 + $0xec] sm:$0xf] }
 0x421   :  { %6563 = vmatpush.bf16.msrb.mxu3 %v10201_v11  ;;  %6576 = vmatpush.bf16.msra.mxu1 %v10329_v9  ;;  %v10246_v11 = vld [vmem:[%s16131_s5 + $0x338] sm:$0xf0]  ;;  %v11782_v9 = vld [vmem:[%s16131_s5 + $0x60c] sm:$0xf]  ;;  %v9961_v58 = vor.u32 %v11618_v47, %v9958_v51 }
 0x422   :  { %v10249_v50 = vor.u32 %v11690_v24, %v10246_v11  ;;  %v10617_v4 = vor.u32 %v11782_v9, %v10614_v55  ;;  %v11794_v24 = vld [vmem:[#allocation10 + $0x24] sm:$0xf0]  ;;  %v11803_v9 = vld [vmem:[#allocation10 + $0x74] sm:$0xf]  ;;  %v11742_v55 = vld [vmem:[%s16131_s5 + $0x4cc] sm:$0xf] }
 0x424   :  { %6486 = vmatpush.bf16.msrb.mxu0 %v10309_v1 }
 0x425   :  { %6564 = vmatpush.bf16.msrb.mxu3 %v10185_v26  ;;  %6577 = vmatpush.bf16.msra.mxu1 %v10313_v3  ;;  %v10633_v26 = vor.u32 %v11786_v39, %v10630_v27  ;;  %v10696_v3 = vld [vmem:[#allocation10 + $0x70] sm:$0xf] }
 0x426   :  { %v10697_v16 = vor.u32 %v11804_v57, %v10696_v3  ;;  %v11738_v3 = vld [vmem:[%s16131_s5 + $0x4ac] sm:$0xf]  ;;  %v10438_v57 = vld [vmem:[%s16131_s5 + $0x4b8] sm:$0xf0] }
 0x428   :  { %6487 = vmatpush.bf16.msrb.mxu0 %v10293_v21  ;;  %v15775_v46 = vpop.f32.mrf.mxu2  ;;  %v9926_v21 = vld [vmem:[%s16131_s5 + $0xb8] sm:$0xf0] }
 0x429   :  { %6565 = vmatpush.bf16.msrb.mxu3 %v10169_v62  ;;  %6578 = vmatpush.bf16.msra.mxu1 %v10297_v17  ;;  %v10233_v62 = vor.u32 %v11686_v53, %v10230_v52  ;;  %v11606_v17 = vld [vmem:[%s16131_s5 + $0x8c] sm:$0xf]  ;;  %v11790_v52 = vld [vmem:[#allocation10 + $0x4] sm:$0xf0] }
 0x42c   :  { %6488 = vmatpush.bf16.msrb.mxu0 %v10277_v18  ;;  %v9913_v18 = vor.u32 %v11606_v17, %v9910_v54  ;;  %v10406_v17 = vld [vmem:[%s16131_s5 + $0x478] sm:$0xf0]  ;;  %v11797_v54 = vld [vmem:[#allocation10 + $0x44] sm:$0xf] }
 0x42d   :  { %6566 = vmatpush.bf16.msrb.mxu3 %v10153_v10  ;;  %6579 = vmatpush.bf16.msra.mxu1 %v10281_v31  ;;  %v10688_v10 = vld [vmem:[#allocation10 + $0x60] sm:$0xf] }
 0x42e   :  { %v6324_v41 = vpop.f32.mrf.mxu1  ;;  %v10689_v0 = vor.u32 %v11802_v13, %v10688_v10  ;;  %v11799_v10 = vld [vmem:[#allocation10 + $0x54] sm:$0xf]  ;;  %v10682_v13 = vld [vmem:[#allocation10 + $0x58] sm:$0xf0] }
 0x42f   :  { %v15767_v14 = vadd.f32 %v6324_v41, %v15655_v42  ;;  %v11654_v42 = vld [vmem:[%s16131_s5 + $0x20c] sm:$0xf] }
 0x430   :  { %6489 = vmatpush.bf16.msrb.mxu0 %v10261_v28  ;;  %v10105_v37 = vor.u32 %v11654_v42, %v10102_v48  ;;  %v6417_v1 = vpop.f32.mrf.mxu2  ;;  %v11598_v41 = vld [vmem:[%s16131_s5 + $0x4c] sm:$0xf]  ;;  %v11796_v28 = vld [vmem:[#allocation10 + $0x34] sm:$0xf0]  ;;  %v9862_v42 = vld [vmem:[%s16131_s5 + $0x38] sm:$0xf0] }
 0x431   :  { %6567 = vmatpush.bf16.msrb.mxu3 %v10137_v35  ;;  %6580 = vmatpush.bf16.msra.mxu1 %v10265_v33  ;;  %v9894_v35 = vld [vmem:[%s16131_s5 + $0x78] sm:$0xf0]  ;;  %v9881_v8 = vor.u32 %v11598_v41, %v9878_v25  ;;  %v11594_v33 = vld [vmem:[%s16131_s5 + $0x2c] sm:$0xf]  ;;  %v10656_v48 = vld [vmem:[#allocation10 + $0x20] sm:$0xf]  ;;  %v10701_v1 = vor.u32 %v11803_v9, %v10698_v36 }
 0x432   :  { %v10657_v39 = vor.u32 %v11794_v24, %v10656_v48  ;;  %v9865_v27 = vor.u32 %v11594_v33, %v9862_v42  ;;  %v11820_v41 = vld [vmem:[#allocation10 + $0xf4] sm:$0xf0]  ;;  %v10374_v33 = vld [vmem:[%s16131_s5 + $0x438] sm:$0xf0]  ;;  %v10752_v24 = vld [vmem:[#allocation10 + $0xe0] sm:$0xf] }
 0x433   :  { %v10728_v36 = vld [vmem:[#allocation10 + $0xb0] sm:$0xf] }
 0x434   :  { %6490 = vmatpush.bf16.msrb.mxu0 %v10245_v23  ;;  %v9846_v23 = vld [vmem:[%s16131_s5 + $0x18] sm:$0xf0] }
 0x435   :  { %6568 = vmatpush.bf16.msrb.mxu3 %v10121_v29  ;;  %6581 = vmatpush.bf16.msra.mxu1 %v10249_v50  ;;  %v10665_v29 = vor.u32 %v11796_v28, %v10664_v20  ;;  %v10470_v50 = vld [vmem:[%s16131_s5 + $0x4f8] sm:$0xf0]  ;;  %v11793_v20 = vld [vmem:[#allocation10 + $0x24] sm:$0xf] }
 0x436   :  { %v6326_v34 = vpop.f32.mrf.mxu1  ;;  %v10658_v28 = vld [vmem:[#allocation10 + $0x28] sm:$0xf0] }
 0x437   :  { %v10640_v34 = vld [vmem:[#allocation10] sm:$0xf]  ;;  %v10661_v48 = vor.u32 %v11793_v20, %v10658_v28  ;;  %v11834_v20 = vld [vmem:[#allocation10 + $0x164] sm:$0xf0]  ;;  %v11833_v28 = vld [vmem:[#allocation10 + $0x164] sm:$0xf] }
 0x438   :  { %6491 = vmatpush.bf16.msrb.mxu0 %v10229_v44  ;;  %v10454_v44 = vld [vmem:[%s16131_s5 + $0x4d8] sm:$0xf0] }
 0x439   :  { %6569 = vmatpush.bf16.msrb.mxu3 %v10105_v37  ;;  %6582 = vmatpush.bf16.msra.mxu1 %v10233_v62  ;;  %v10648_v37 = vld [vmem:[#allocation10 + $0x10] sm:$0xf]  ;;  %v11801_v62 = vld [vmem:[#allocation10 + $0x64] sm:$0xf] }
 0x43a   :  { %v10649_v53 = vor.u32 %v11792_v40, %v10648_v37  ;;  %v11791_v37 = vld [vmem:[#allocation10 + $0x14] sm:$0xf]  ;;  %v10650_v40 = vld [vmem:[#allocation10 + $0x18] sm:$0xf0] }
 0x43b   :  { %6492 = vmatmul.bf16.vlgmr.msrb.gmra.mxu0 %v14844_v12 }
 0x43c   :  { %6570 = vmatmul.bf16.vlgmr.msrb.gmra.mxu3 %v14800_v2  ;;  %6536 = vmatpush.bf16.msra.mxu0 %v9961_v58  ;;  %v9929_v2 = vor.u32 %v11610_v63, %v9926_v21  ;;  %v10641_v58 = vor.u32 %v11790_v52, %v10640_v34  ;;  %v11734_v63 = vld [vmem:[%s16131_s5 + $0x48c] sm:$0xf]  ;;  %v10422_v21 = vld [vmem:[%s16131_s5 + $0x498] sm:$0xf0] }
 0x43d   :  { %6620 = vmatpush.bf16.msra.mxu3 %v10633_v26  ;;  %6945 = vmatpush.bf16.msrb.mxu1 %v10697_v16  ;;  %v10473_v26 = vor.u32 %v11746_v49, %v10470_v50  ;;  %v10693_v16 = vor.u32 %v11801_v62, %v10690_v5  ;;  %v10653_v49 = vor.u32 %v11791_v37, %v10650_v40  ;;  %v10744_v50 = vld [vmem:[#allocation10 + $0xd0] sm:$0xf]  ;;  %v10642_v34 = vld [vmem:[#allocation10 + $0x8] sm:$0xf0]  ;;  %v10810_v40 = vld [vmem:[#allocation10 + $0x158] sm:$0xf0] }
 0x43e   :  { %6583 = vmatmul.bf16.vlgmr.msra.gmra.mxu1 %v14844_v12  ;;  %v11602_v12 = vld [vmem:[%s16131_s5 + $0x6c] sm:$0xf] }
 0x43f   :  { %v9897_v59 = vor.u32 %v11602_v12, %v9894_v35  ;;  %v11726_v12 = vld [vmem:[%s16131_s5 + $0x44c] sm:$0xf]  ;;  %v10390_v35 = vld [vmem:[%s16131_s5 + $0x458] sm:$0xf0] }
 0x440   :  { %6537 = vmatpush.bf16.msra.mxu0 %v9945_v6  ;;  %v10441_v6 = vor.u32 %v11738_v3, %v10438_v57  ;;  %v11810_v3 = vld [vmem:[#allocation10 + $0xa4] sm:$0xf0] }
 0x441   :  { %6621 = vmatpush.bf16.msra.mxu3 %v10617_v4  ;;  %6946 = vmatpush.bf16.msrb.mxu1 %v10689_v0  ;;  %v10457_v4 = vor.u32 %v11742_v55, %v10454_v44  ;;  %v10685_v0 = vor.u32 %v11799_v10, %v10682_v13  ;;  %v10736_v55 = vld [vmem:[#allocation10 + $0xc0] sm:$0xf]  ;;  %v11814_v44 = vld [vmem:[#allocation10 + $0xc4] sm:$0xf0]  ;;  %v10712_v10 = vld [vmem:[#allocation10 + $0x90] sm:$0xf] }
 0x442   :  { %v11808_v13 = vld [vmem:[#allocation10 + $0x94] sm:$0xf0] }
 0x444   :  { %6538 = vmatpush.bf16.msra.mxu0 %v9929_v2  ;;  %v10425_v2 = vor.u32 %v11734_v63, %v10422_v21 }
 0x445   :  { %6947 = vmatpush.bf16.msrb.mxu1 %v10681_v15  ;;  %v10677_v15 = vor.u32 %v11797_v54, %v10674_v38  ;;  %v11806_v54 = vld [vmem:[#allocation10 + $0x84] sm:$0xf0] }
 0x448   :  { %v15846_v31 = vpop.f32.mrf.mxu2  ;;  %6539 = vmatpush.bf16.msra.mxu0 %v9913_v18 }
 0x449   :  { %6948 = vmatpush.bf16.msrb.mxu1 %v10673_v60  ;;  %v10669_v60 = vor.u32 %v11795_v30, %v10666_v19  ;;  %v5253_v30 = vperm.slane %v15545_v56, 1 }
 0x44c   :  { %10637 = vmatmul.msk.bf16.vlgmr.msra.gmra.mxu3 %vm4394_vm5, %v15465_v22  ;;  %6540 = vmatpush.bf16.msra.mxu0 %v9897_v59  ;;  %v11590_v22 = vld [vmem:[%s16131_s5 + $0xc] sm:$0xf]  ;;  %v10760_v59 = vld [vmem:[#allocation10 + $0xf0] sm:$0xf] }
 0x44d   :  { %6949 = vmatpush.bf16.msrb.mxu1 %v10665_v29  ;;  %v9849_v51 = vor.u32 %v11590_v22, %v9846_v23  ;;  %v10761_v25 = vor.u32 %v11820_v41, %v10760_v59  ;;  %v10393_v29 = vor.u32 %v11726_v12, %v10390_v35  ;;  %v10358_v23 = vld [vmem:[%s16131_s5 + $0x418] sm:$0xf0]  ;;  %v11836_v12 = vld [vmem:[#allocation10 + $0x174] sm:$0xf0]  ;;  %v11835_v35 = vld [vmem:[#allocation10 + $0x174] sm:$0xf] }
 0x44e   :  { %v15856_v32 = vpop.f32.mrf.mxu1 }
 0x44f   :  { %6958 = vmatpush.bf16.msrb.mxu3 %v10761_v25  ;;  %v10816_v25 = vld [vmem:[#allocation10 + $0x160] sm:$0xf] }
 0x450   :  { %v6482_v11 = vpop.f32.mrf.mxu2  ;;  %6541 = vmatpush.bf16.msra.mxu0 %v9881_v8  ;;  %v11722_v8 = vld [vmem:[%s16131_s5 + $0x42c] sm:$0xf] }
 0x451   :  { %6950 = vmatpush.bf16.msrb.mxu1 %v10657_v39  ;;  %v11818_v11 = vld [vmem:[#allocation10 + $0xe4] sm:$0xf0]  ;;  %v10377_v39 = vor.u32 %v11722_v8, %v10374_v33  ;;  %v10817_v8 = vor.u32 %v11834_v20, %v10816_v25  ;;  %v10818_v33 = vld [vmem:[#allocation10 + $0x168] sm:$0xf0] }
 0x452   :  { %v10753_v22 = vor.u32 %v11818_v11, %v10752_v24  ;;  %v10821_v24 = vor.u32 %v11833_v28, %v10818_v33  ;;  %v10770_v25 = vld [vmem:[#allocation10 + $0x108] sm:$0xf0] }
 0x454   :  { %6542 = vmatpush.bf16.msra.mxu0 %v9865_v27  ;;  %v11718_v27 = vld [vmem:[%s16131_s5 + $0x40c] sm:$0xf]  ;;  %6959 = vmatpush.bf16.msrb.mxu3 %v10753_v22  ;;  %v11832_v22 = vld [vmem:[#allocation10 + $0x154] sm:$0xf0] }
 0x455   :  { %6951 = vmatpush.bf16.msrb.mxu1 %v10649_v53  ;;  %v11816_v53 = vld [vmem:[#allocation10 + $0xd4] sm:$0xf0] }
 0x456   :  { %v6391_v47 = vpop.f32.mrf.mxu1 }
 0x457   :  { %v10361_v47 = vor.u32 %v11718_v27, %v10358_v23  ;;  %v10808_v27 = vld [vmem:[#allocation10 + $0x150] sm:$0xf]  ;;  %v11831_v23 = vld [vmem:[#allocation10 + $0x154] sm:$0xf] }
 0x458   :  { %6543 = vmatpush.bf16.msra.mxu0 %v9849_v51  ;;  %v10745_v51 = vor.u32 %v11816_v53, %v10744_v50  ;;  %v10809_v37 = vor.u32 %v11832_v22, %v10808_v27  ;;  %v11830_v50 = vld [vmem:[#allocation10 + $0x144] sm:$0xf0] }
 0x459   :  { %6952 = vmatpush.bf16.msrb.mxu1 %v10641_v58  ;;  %v10737_v58 = vor.u32 %v11814_v44, %v10736_v55  ;;  %v11828_v55 = vld [vmem:[#allocation10 + $0x134] sm:$0xf0]  ;;  %v11827_v44 = vld [vmem:[#allocation10 + $0x134] sm:$0xf] }
 0x45a   :  { %6960 = vmatpush.bf16.msrb.mxu3 %v10745_v51  ;;  %v10802_v51 = vld [vmem:[#allocation10 + $0x148] sm:$0xf0] }
 0x45b   :  { %6544 = vmatmul.bf16.vlgmr.msra.gmra.mxu0 %v14922_v43  ;;  %v11730_v43 = vld [vmem:[%s16131_s5 + $0x46c] sm:$0xf] }
 0x45c   :  { %6588 = vmatpush.bf16.msrb.mxu0 %v10473_v26  ;;  %v10409_v18 = vor.u32 %v11730_v43, %v10406_v17  ;;  %v11789_v26 = vld [vmem:[#allocation10 + $0x4] sm:$0xf] }
 0x45d   :  { %6997 = vmatpush.bf16.msra.mxu1 %v10701_v1  ;;  %v10645_v9 = vor.u32 %v11789_v26, %v10642_v34  ;;  %v11812_v1 = vld [vmem:[#allocation10 + $0xb4] sm:$0xf0] }
 0x45e   :  { %6961 = vmatpush.bf16.msrb.mxu3 %v10737_v58  ;;  %v10729_v62 = vor.u32 %v11812_v1, %v10728_v36  ;;  %v10794_v58 = vld [vmem:[#allocation10 + $0x138] sm:$0xf0] }
 0x45f   :  { %v6337_v7 = vpop.f32.mrf.mxu3 }
 0x460   :  { %6589 = vmatpush.bf16.msrb.mxu0 %v10457_v4  ;;  %v10720_v4 = vld [vmem:[#allocation10 + $0xa0] sm:$0xf]  ;;  %v6338_v57 = vadd.f32 %v6337_v7, %v15767_v14 }
 0x461   :  { %6998 = vmatpush.bf16.msra.mxu1 %v10693_v16  ;;  %v10721_v16 = vor.u32 %v11810_v3, %v10720_v4  ;;  %v10784_v3 = vld [vmem:[#allocation10 + $0x120] sm:$0xf] }
 0x462   :  { %6962 = vmatpush.bf16.msrb.mxu3 %v10729_v62 }
 0x464   :  { %6590 = vmatpush.bf16.msrb.mxu0 %v10441_v6 }
 0x465   :  { %6999 = vmatpush.bf16.msra.mxu1 %v10685_v0 }
 0x466   :  { %6963 = vmatpush.bf16.msrb.mxu3 %v10721_v16  ;;  %v11825_v16 = vld [vmem:[#allocation10 + $0x124] sm:$0xf] }
 0x467   :  { %v6339_v42 = vpop.f32.mrf.mxu3 }
 0x468   :  { %6591 = vmatpush.bf16.msrb.mxu0 %v10425_v2  ;;  %v10713_v2 = vor.u32 %v11808_v13, %v10712_v10  ;;  %v10786_v10 = vld [vmem:[#allocation10 + $0x128] sm:$0xf0] }
 0x469   :  { %7000 = vmatpush.bf16.msra.mxu1 %v10677_v15 }
 0x46a   :  { %6964 = vmatpush.bf16.msrb.mxu3 %v10713_v2  ;;  %v10789_v2 = vor.u32 %v11825_v16, %v10786_v10  ;;  %v11837_v16 = vld [vmem:[#allocation10 + $0x184] sm:$0xf] }
 0x46c   :  { %6592 = vmatpush.bf16.msrb.mxu0 %v10409_v18  ;;  %v10824_v18 = vld [vmem:[#allocation10 + $0x170] sm:$0xf] }
 0x46d   :  { %7001 = vmatpush.bf16.msra.mxu1 %v10669_v60  ;;  %v10825_v19 = vor.u32 %v11836_v12, %v10824_v18  ;;  %v10826_v60 = vld [vmem:[#allocation10 + $0x178] sm:$0xf0] }
 0x46e   :  { %v10829_v59 = vor.u32 %v11835_v35, %v10826_v60  ;;  %v10778_v12 = vld [vmem:[#allocation10 + $0x118] sm:$0xf0]  ;;  %v11821_v60 = vld [vmem:[#allocation10 + $0x104] sm:$0xf] }
 0x46f   :  { %v15919_v52 = vpop.f32.mrf.mxu3  ;;  %v10773_v28 = vor.u32 %v11821_v60, %v10770_v25 }
 0x470   :  { %6593 = vmatpush.bf16.msrb.mxu0 %v10393_v29  ;;  %v6364_v29 = vadd.f32 %v15643_v61, %v5253_v30  ;;  %v10813_v61 = vor.u32 %v11831_v23, %v10810_v40 }
 0x471   :  { %7002 = vmatpush.bf16.msra.mxu1 %v10661_v48 }
 0x474   :  { %6594 = vmatpush.bf16.msrb.mxu0 %v10377_v39 }
 0x475   :  { %7003 = vmatpush.bf16.msra.mxu1 %v10653_v49  ;;  %v10800_v49 = vld [vmem:[#allocation10 + $0x140] sm:$0xf] }
 0x476   :  { %v10801_v26 = vor.u32 %v11830_v50, %v10800_v49  ;;  %v10832_v50 = vld [vmem:[#allocation10 + $0x180] sm:$0xf] }
 0x477   :  { %v6404_v5 = vpop.f32.mrf.mxu3 }
 0x478   :  { %6595 = vmatpush.bf16.msrb.mxu0 %v10361_v47  ;;  %v6350_v6 = vpop.f32.mrf.mxu0  ;;  %v15923_v63 = vpop.f32.mrf.mxu1  ;;  %v11829_v47 = vld [vmem:[#allocation10 + $0x144] sm:$0xf] }
 0x479   :  { %7004 = vmatpush.bf16.msra.mxu1 %v10645_v9  ;;  %v6351_v21 = vadd.f32 %v6350_v6, %v6338_v57  ;;  %v10805_v34 = vor.u32 %v11829_v47, %v10802_v51  ;;  %v10792_v9 = vld [vmem:[#allocation10 + $0x130] sm:$0xf]  ;;  %v11826_v57 = vld [vmem:[#allocation10 + $0x124] sm:$0xf0]  ;;  %v10762_v51 = vld [vmem:[#allocation10 + $0xf8] sm:$0xf0] }
 0x47a   :  { %v10793_v5 = vor.u32 %v11828_v55, %v10792_v9 }
 0x47b   :  { %6596 = vmatmul.bf16.vlgmr.msrb.gmra.mxu0 %v15064_v45  ;;  %v6627_v0 = vmax.f32 %v6351_v21, 0.0  ;;  %v10704_v45 = vld [vmem:[#allocation10 + $0x80] sm:$0xf]  ;;  %v10785_v21 = vor.u32 %v11826_v57, %v10784_v3  ;;  %v11813_v3 = vld [vmem:[#allocation10 + $0xc4] sm:$0xf] }
 0x47c   :  { %v10705_v38 = vor.u32 %v11806_v54, %v10704_v45  ;;  %6971 = vmatpush.bf16.msra.mxu0 %v10825_v19  ;;  %v11822_v19 = vld [vmem:[#allocation10 + $0x104] sm:$0xf0]  ;;  %v10738_v57 = vld [vmem:[#allocation10 + $0xc8] sm:$0xf0] }
 0x47d   :  { %v6683_v43 = vpack.c.bf16 %v6627_v0, %v6627_v0 }
 0x47e   :  { %6965 = vmatpush.bf16.msrb.mxu3 %v10705_v38  ;;  %v10776_v38 = vld [vmem:[#allocation10 + $0x110] sm:$0xf] }
 0x47f   :  { %v15925_v17 = vpop.f32.mrf.mxu3  ;;  %6953 = vmatmul.bf16.vlgmr.msrb.gmra.mxu1 %v6683_v43 }
 0x480   :  { %v6352_v14 = vpop.f32.mrf.mxu0  ;;  %v6443_v7 = vpop.f32.mrf.mxu1  ;;  %6972 = vmatpush.bf16.msra.mxu0 %v10817_v8 }
 0x481   :  { %v15927_v15 = vpop.f32.mrf.mxu2  ;;  %v11824_v14 = vld [vmem:[#allocation10 + $0x114] sm:$0xf0] }
 0x482   :  { %7023 = vmatpush.bf16.msra.mxu3 %v10829_v59  ;;  %v10777_v18 = vor.u32 %v11824_v14, %v10776_v38  ;;  %v11900_v38 = vld [vmem:[#allocation14 + $0x4] ss:$8 sm:$0xf] }
 0x483   :  { %v5255_v14 = vperm.slane %v11900_v38, 3  ;;  %v10858_v38 = vld [vmem:[%s16133_s7 + $0x20] sm:$0xf] }
 0x484   :  { %6973 = vmatpush.bf16.msra.mxu0 %v10809_v37 }
 0x486   :  { %7024 = vmatpush.bf16.msra.mxu3 %v10821_v24 }
 0x487   :  { %v6456_v41 = vpop.f32.mrf.mxu3 }
 0x488   :  { %v6376_v48 = vpop.f32.mrf.mxu0  ;;  %6974 = vmatpush.bf16.msra.mxu0 %v10801_v26 }
 0x489   :  { %v6534_v42 = vpop.f32.mrf.mxu2  ;;  %v6377_v11 = vadd.f32 %v6376_v48, %v6364_v29  ;;  %v15931_v39 = vpop.f32.mrf.mxu1 }
 0x48a   :  { %7025 = vmatpush.bf16.msra.mxu3 %v10813_v61  ;;  %v5254_v42 = vperm.slane %v15545_v56, 2  ;;  %v11819_v61 = vld [vmem:[#allocation10 + $0xf4] sm:$0xf] }
 0x48b   :  { %v6390_v53 = vadd.f32 %v15856_v32, %v6377_v11  ;;  %v10797_v32 = vor.u32 %v11827_v44, %v10794_v58  ;;  %v10765_v56 = vor.u32 %v11819_v61, %v10762_v51  ;;  %v11817_v44 = vld [vmem:[#allocation10 + $0xe4] sm:$0xf]  ;;  %v10754_v58 = vld [vmem:[#allocation10 + $0xe8] sm:$0xf0]  ;;  %v10890_v51 = vld [vmem:[%s16133_s7 + $0x60] sm:$0xf] }
 0x48c   :  { %6975 = vmatpush.bf16.msra.mxu0 %v10793_v5  ;;  %v6455_v48 = vadd.f32 %v15925_v17, %v5254_v42 }
 0x48d   :  { %v6403_v4 = vadd.f32 %v15919_v52, %v6390_v53  ;;  %v11823_v52 = vld [vmem:[#allocation10 + $0x114] sm:$0xf]  ;;  %v11838_v53 = vld [vmem:[#allocation10 + $0x184] sm:$0xf0] }
 0x48e   :  { %7026 = vmatpush.bf16.msra.mxu3 %v10805_v34  ;;  %v10781_v35 = vor.u32 %v11823_v52, %v10778_v12  ;;  %v6468_v24 = vadd.f32 %v15931_v39, %v6455_v48  ;;  %v10833_v47 = vor.u32 %v11838_v53, %v10832_v50  ;;  %v10898_v50 = vld [vmem:[%s16133_s7 + $0x70] sm:$0xf]  ;;  %v11853_v53 = vld [vmem:[%s16133_s7 + $0x74] sm:$0xf] }
 0x48f   :  { %7005 = vmatmul.bf16.vlgmr.msra.gmra.mxu1 %v6683_v43  ;;  %v6416_v6 = vadd.f32 %v15775_v46, %v6403_v4  ;;  %v10768_v46 = vld [vmem:[#allocation10 + $0x100] sm:$0xf]  ;;  %v10746_v4 = vld [vmem:[#allocation10 + $0xd8] sm:$0xf0] }
 0x490   :  { %v6378_v1 = vpop.f32.mrf.mxu0  ;;  %6976 = vmatpush.bf16.msra.mxu0 %v10785_v21  ;;  %v10769_v41 = vor.u32 %v11822_v19, %v10768_v46  ;;  %v6481_v11 = vadd.f32 %v15846_v31, %v6468_v24  ;;  %6991 = vmatpush.bf16.msrb.mxu2 %v10833_v47  ;;  %v10834_v21 = vld [vmem:[#allocation10 + $0x188] sm:$0xf0] }
 0x491   :  { %v15934_v36 = vpop.f32.mrf.mxu2  ;;  %v6469_v62 = vpop.f32.mrf.mxu1  ;;  %v10757_v1 = vor.u32 %v11817_v44, %v10754_v58  ;;  %v10837_v10 = vor.u32 %v11837_v16, %v10834_v21  ;;  %v10706_v46 = vld [vmem:[#allocation10 + $0x88] sm:$0xf0]  ;;  %v11849_v44 = vld [vmem:[%s16133_s7 + $0x54] sm:$0xf]  ;;  %v10866_v16 = vld [vmem:[%s16133_s7 + $0x30] sm:$0xf] }
 0x492   :  { %7027 = vmatpush.bf16.msra.mxu3 %v10797_v32  ;;  %v11815_v32 = vld [vmem:[#allocation10 + $0xd4] sm:$0xf]  ;;  %v10900_v47 = vld [vmem:[%s16133_s7 + $0x78] sm:$0xf0]  ;;  %v11845_v21 = vld [vmem:[%s16133_s7 + $0x34] sm:$0xf] }
 0x493   :  { %v10884_v58 = vld [vmem:[%s16133_s7 + $0x58] sm:$0xf0] }
 0x494   :  { %6977 = vmatpush.bf16.msra.mxu0 %v10777_v18  ;;  %7010 = vmatpush.bf16.msra.mxu2 %v10765_v56  ;;  %v10714_v18 = vld [vmem:[#allocation10 + $0x98] sm:$0xf0]  ;;  %v10903_v56 = vor.u32 %v11853_v53, %v10900_v47  ;;  %v10922_v47 = vld [vmem:[%s16133_s7 + $0xa0] sm:$0xf] }
 0x496   :  { %7028 = vmatpush.bf16.msra.mxu3 %v10789_v2  ;;  %v10730_v2 = vld [vmem:[#allocation10 + $0xb8] sm:$0xf0] }
 0x498   :  { %v6428_v0 = vpop.f32.mrf.mxu0  ;;  %6978 = vmatpush.bf16.msra.mxu0 %v10769_v41  ;;  %7011 = vmatpush.bf16.msra.mxu2 %v10757_v1 }
 0x499   :  { %v6560_v13 = vpop.f32.mrf.mxu2  ;;  %v6429_v43 = vadd.f32 %v6428_v0, %v6416_v6  ;;  %v10741_v6 = vor.u32 %v11813_v3, %v10738_v57  ;;  %v11811_v0 = vld [vmem:[#allocation10 + $0xb4] sm:$0xf] }
 0x49a   :  { %7029 = vmatpush.bf16.msra.mxu3 %v10781_v35 }
 0x49b   :  { %v6519_v45 = vpop.f32.mrf.mxu1  ;;  %v6442_v7 = vadd.f32 %v15923_v63, %v6429_v43  ;;  %v10733_v43 = vor.u32 %v11811_v0, %v10730_v2 }
 0x49c   :  { %7043 = vmatpush.bf16.msrb.mxu0 %v10837_v10  ;;  %v10868_v10 = vld [vmem:[%s16133_s7 + $0x38] sm:$0xf0] }
 0x49d   :  { %v6628_v30 = vmax.f32 %v6442_v7, 0.0  ;;  %v11807_v7 = vld [vmem:[#allocation10 + $0x94] sm:$0xf]  ;;  %v10871_v0 = vor.u32 %v11845_v21, %v10868_v10 }
 0x49e   :  { %7030 = vmatpush.bf16.msra.mxu3 %v10773_v28  ;;  %v10717_v12 = vor.u32 %v11807_v7, %v10714_v18  ;;  %v10860_v18 = vld [vmem:[%s16133_s7 + $0x28] sm:$0xf0] }
 0x49f   :  { %v6506_v54 = vpop.f32.mrf.mxu3  ;;  %v15939_v59 = vpack.c.bf16 %v6628_v30, %v6628_v30  ;;  %v11805_v30 = vld [vmem:[#allocation10 + $0x84] sm:$0xf] }
 0x4a0   :  { %v6430_v20 = vpop.f32.mrf.mxu0  ;;  %v10709_v19 = vor.u32 %v11805_v30, %v10706_v46  ;;  %v11842_v30 = vld [vmem:[%s16133_s7 + $0x14] sm:$0xf0]  ;;  %v11841_v46 = vld [vmem:[%s16133_s7 + $0x14] sm:$0xf] }
 0x4a1   :  { %v15941_v29 = vpop.f32.mrf.mxu2  ;;  %6966 = vmatmul.bf16.vlgmr.msrb.gmra.mxu3 %v15939_v59 }
 0x4a3   :  { %v6521_v8 = vpop.f32.mrf.mxu1 }
 0x4a7   :  { %v6508_v63 = vpop.f32.mrf.mxu3 }
 0x4a9   :  { %v6612_v33 = vpop.f32.mrf.mxu2 }
 0x4b8   :  { %v6493_v27 = vpop.f32.mrf.mxu0 }
 0x4b9   :  { %v6494_v22 = vadd.f32 %v6493_v27, %v6481_v11 }
 0x4bb   :  { %v6584_v23 = vpop.f32.mrf.mxu1  ;;  %v6507_v37 = vadd.f32 %v6506_v54, %v6494_v22  ;;  %v10722_v54 = vld [vmem:[#allocation10 + $0xa8] sm:$0xf0] }
 0x4bc   :  { %v15956_v22 = vld [vmem:[#allocation14 + $0x5] ss:$8 sm:$0x3] }
 0x4bd   :  { %v6520_v49 = vadd.f32 %v6519_v45, %v6507_v37  ;;  %v11809_v45 = vld [vmem:[#allocation10 + $0xa4] sm:$0xf] }
 0x4be   :  { %v10725_v52 = vor.u32 %v11809_v45, %v10722_v54 }
 0x4bf   :  { %v6571_v40 = vpop.f32.mrf.mxu3  ;;  %v6533_v26 = vadd.f32 %v15927_v15, %v6520_v49  ;;  %v10749_v15 = vor.u32 %v11815_v32, %v10746_v4  ;;  %v11848_v32 = vld [vmem:[%s16133_s7 + $0x44] sm:$0xf0]  ;;  %v11847_v4 = vld [vmem:[%s16133_s7 + $0x44] sm:$0xf] }
 0x4c0   :  { %v6495_v34 = vpop.f32.mrf.mxu0 }
 0x4c1   :  { %v6629_v17 = vmax.f32 %v6533_v26, 0.0  ;;  %7012 = vmatpush.bf16.msra.mxu2 %v10749_v15  ;;  %v11852_v26 = vld [vmem:[%s16133_s7 + $0x64] sm:$0xf0]  ;;  %v11851_v34 = vld [vmem:[%s16133_s7 + $0x64] sm:$0xf] }
 0x4c2   :  { %v10876_v15 = vld [vmem:[%s16133_s7 + $0x48] sm:$0xf0] }
 0x4c3   :  { %v6586_v39 = vpop.f32.mrf.mxu1  ;;  %v6685_v31 = vpack.c.bf16 %v6629_v17, %v6629_v17  ;;  %v10892_v17 = vld [vmem:[%s16133_s7 + $0x68] sm:$0xf0]  ;;  %v10879_v57 = vor.u32 %v11847_v4, %v10876_v15 }
 0x4c4   :  { %v10891_v39 = vor.u32 %v11852_v26, %v10890_v51  ;;  %v11860_v51 = vld [vmem:[%s16133_s7 + $0xa4] sm:$0xf0]  ;;  %v11859_v26 = vld [vmem:[%s16133_s7 + $0xa4] sm:$0xf]  ;;  %v10908_v4 = vld [vmem:[%s16133_s7 + $0x88] sm:$0xf0] }
 0x4c5   :  { %6979 = vmatmul.bf16.vlgmr.msra.gmra.mxu0 %v6685_v31  ;;  %7031 = vmatmul.bf16.vlgmr.msra.gmra.mxu3 %v6685_v31  ;;  %v10895_v31 = vor.u32 %v11851_v34, %v10892_v17  ;;  %v10924_v34 = vld [vmem:[%s16133_s7 + $0xa8] sm:$0xf0] }
 0x4c6   :  { %7013 = vmatpush.bf16.msra.mxu2 %v10741_v6  ;;  %v11846_v6 = vld [vmem:[%s16133_s7 + $0x34] sm:$0xf0]  ;;  %v10927_v17 = vor.u32 %v11859_v26, %v10924_v34 }
 0x4c7   :  { %v6573_v9 = vpop.f32.mrf.mxu3 }
 0x4c8   :  { %v10882_v9 = vld [vmem:[%s16133_s7 + $0x50] sm:$0xf] }
 0x4ca   :  { %7014 = vmatpush.bf16.msra.mxu2 %v10733_v43 }
 0x4ce   :  { %7015 = vmatpush.bf16.msra.mxu2 %v10725_v52  ;;  %v11843_v52 = vld [vmem:[%s16133_s7 + $0x24] sm:$0xf] }
 0x4cf   :  { %v6623_v55 = vpop.f32.mrf.mxu3 }
 0x4d2   :  { %7016 = vmatpush.bf16.msra.mxu2 %v10717_v12  ;;  %v10863_v12 = vor.u32 %v11843_v52, %v10860_v18 }
 0x4d6   :  { %7017 = vmatpush.bf16.msra.mxu2 %v10709_v19 }
 0x4d7   :  { %v6625_v62 = vpop.f32.mrf.mxu3 }
 0x4d8   :  { %v6545_v5 = vpop.f32.mrf.mxu0  ;;  %v10887_v62 = vor.u32 %v11849_v44, %v10884_v58  ;;  %v10916_v44 = vld [vmem:[%s16133_s7 + $0x98] sm:$0xf0] }
 0x4d9   :  { %v6546_v35 = vadd.f32 %v6545_v5, %v5255_v14  ;;  %v10874_v5 = vld [vmem:[%s16133_s7 + $0x40] sm:$0xf]  ;;  %v11844_v14 = vld [vmem:[%s16133_s7 + $0x24] sm:$0xf0] }
 0x4da   :  { %v10875_v3 = vor.u32 %v11848_v32, %v10874_v5  ;;  %v10859_v7 = vor.u32 %v11844_v14, %v10858_v38  ;;  %v11855_v5 = vld [vmem:[%s16133_s7 + $0x84] sm:$0xf] }
 0x4db   :  { %v6559_v60 = vadd.f32 %v15934_v36, %v6546_v35  ;;  %v10850_v35 = vld [vmem:[%s16133_s7 + $0x10] sm:$0xf]  ;;  %v10911_v15 = vor.u32 %v11855_v5, %v10908_v4 }
 0x4dc   :  { %v10851_v19 = vor.u32 %v11842_v30, %v10850_v35  ;;  %v11868_v30 = vld [vmem:[#allocation11 + $0x28] sm:$0xff] }
 0x4dd   :  { %v6572_v41 = vadd.f32 %v6571_v40, %v6559_v60  ;;  %v10852_v60 = vld [vmem:[%s16133_s7 + $0x18] sm:$0xf0]  ;;  %v11876_v5 = vld [vmem:[#allocation13 + $0x8] sm:$0xff] }
 0x4df   :  { %v6585_v25 = vadd.f32 %v6584_v23, %v6572_v41  ;;  %v6688_v23 = vperm.slane %v15956_v22, 0  ;;  %v10855_v41 = vor.u32 %v11841_v46, %v10852_v60  ;;  %v11867_v46 = vld [vmem:[#allocation11 + $0x20] sm:$0xff] }
 0x4e0   :  { %v6547_v13 = vpop.f32.mrf.mxu0 }
 0x4e1   :  { %v10867_v13 = vor.u32 %v11846_v6, %v10866_v16 }
 0x4f8   :  { %v6597_v20 = vpop.f32.mrf.mxu0 }
 0x4f9   :  { %v6598_v28 = vadd.f32 %v6597_v20, %v6585_v25  ;;  %v10842_v25 = vld [vmem:[%s16133_s7] sm:$0xf]  ;;  %v11840_v20 = vld [vmem:[%s16133_s7 + $0x4] sm:$0xf0] }
 0x4fb   :  { %v6611_v8 = vadd.f32 %v15941_v29, %v6598_v28  ;;  %v11839_v28 = vld [vmem:[%s16133_s7 + $0x4] sm:$0xf] }
 0x4fc   :  { %v6954_v24 = vpop.f32.mrf.mxu1 }
 0x4fd   :  { %v6624_v63 = vadd.f32 %v6623_v55, %v6611_v8  ;;  %v6955_v29 = vadd.f32 %v6954_v24, %v6688_v23  ;;  %v11850_v55 = vld [vmem:[%s16133_s7 + $0x54] sm:$0xf0]  ;;  %v10843_v8 = vor.u32 %v11840_v20, %v10842_v25  ;;  %v10930_v23 = vld [vmem:[%s16133_s7 + $0xb0] sm:$0xf]  ;;  %v11864_v20 = vld [vmem:[#allocation11 + $0x8] sm:$0xff] }
 0x4fe   :  { %v10883_v1 = vor.u32 %v11850_v55, %v10882_v9  ;;  %v11857_v9 = vld [vmem:[%s16133_s7 + $0x94] sm:$0xf]  ;;  %v11874_v25 = vld [vmem:[#allocation11 + $0x58] sm:$0xff] }
 0x4ff   :  { %v6630_v33 = vmax.f32 %v6624_v63, 0.0  ;;  %v10844_v63 = vld [vmem:[%s16133_s7 + $0x8] sm:$0xf0]  ;;  %v10919_v58 = vor.u32 %v11857_v9, %v10916_v44 }
 0x500   :  { %v6599_v42 = vpop.f32.mrf.mxu0 }
 0x501   :  { %v6686_v48 = vpack.c.bf16 %v6630_v33, %v6630_v33  ;;  %v7075_v33 = vld [vmem:[%s16133_s7 + $0xc0] sm:$0xff]  ;;  %v10847_v42 = vor.u32 %v11839_v28, %v10844_v63  ;;  %v11873_v28 = vld [vmem:[#allocation11 + $0x50] sm:$0xff]  ;;  %v11872_v63 = vld [vmem:[#allocation11 + $0x48] sm:$0xff] }
 0x502   :  { %v7159_v24 = vunpack.c.h.b16 %v7075_v33 }
 0x503   :  { %10838 = vmatmul.msk.bf16.vlgmr.msrb.gmra.mxu2 %vm1793_vm4, %v6686_v48  ;;  %10839 = vmatmul.msk.bf16.vlgmr.msrb.gmra.mxu0 %vm1793_vm4, %v6686_v48  ;;  %v7158_v48 = vunpack.c.l.b16 %v7075_v33  ;;  %v11871_v33 = vld [vmem:[#allocation11 + $0x40] sm:$0xff] }
 0x504   :  { %v6956_v11 = vpop.f32.mrf.mxu1  ;;  %7245 = vmatpush.bf16.msrb.mxu2 %v10903_v56  ;;  %v10923_v56 = vor.u32 %v11860_v51, %v10922_v47 }
 0x505   :  { %v7184_v11 = vpack.c.b16 %v7158_v48, %v7158_v48  ;;  %v7421_v48 = vld [vmem:[#allocation13 + $0x30] sm:$0x3] }
 0x508   :  { %7246 = vmatpush.bf16.msrb.mxu2 %v10895_v31  ;;  %v11858_v31 = vld [vmem:[%s16133_s7 + $0x94] sm:$0xf0] }
 0x50c   :  { %v15954_v36 = vpop.f32.mrf.mxu1  ;;  %7247 = vmatpush.bf16.msrb.mxu2 %v10887_v62  ;;  %v11856_v62 = vld [vmem:[%s16133_s7 + $0x84] sm:$0xf0] }
 0x510   :  { %7248 = vmatpush.bf16.msrb.mxu2 %v10879_v57  ;;  %v11870_v57 = vld [vmem:[#allocation11 + $0x38] sm:$0xff] }
 0x513   :  { %7018 = vmatmul.bf16.vlgmr.msra.gmra.mxu2 %v15939_v59  ;;  %v11854_v59 = vld [vmem:[%s16133_s7 + $0x74] sm:$0xf0] }
 0x514   :  { %v7008_v27 = vpop.f32.mrf.mxu1  ;;  %v10899_v61 = vor.u32 %v11854_v59, %v10898_v50  ;;  %7249 = vmatpush.bf16.msrb.mxu2 %v10871_v0  ;;  %v10932_v59 = vld [vmem:[%s16133_s7 + $0xb8] sm:$0xf0] }
 0x515   :  { %v7185_v27 = vpack.c.b16 %v7159_v24, %v7159_v24  ;;  %v7449_v24 = vunpack.c.l.b16 %v7421_v48 }
 0x516   :  { %7219 = vmatpush.bf16.msra.mxu0 %v10899_v61 }
 0x517   :  { %v7217_v50 = vsel %vm549_vm1, %v7185_v27, 0 }
 0x518   :  { %7250 = vmatpush.bf16.msrb.mxu2 %v10863_v12  ;;  %7261 = vmatpush.bf16.msrb.mxu3 %v7217_v50 }
 0x51a   :  { %7220 = vmatpush.bf16.msra.mxu0 %v10891_v39  ;;  %v10914_v39 = vld [vmem:[%s16133_s7 + $0x90] sm:$0xf] }
 0x51b   :  { %v10915_v55 = vor.u32 %v11858_v31, %v10914_v39 }
 0x51c   :  { %7251 = vmatpush.bf16.msrb.mxu2 %v10855_v41 }
 0x51e   :  { %7221 = vmatpush.bf16.msra.mxu0 %v10883_v1  ;;  %v10906_v1 = vld [vmem:[%s16133_s7 + $0x80] sm:$0xf] }
 0x51f   :  { %v10907_v32 = vor.u32 %v11856_v62, %v10906_v1  ;;  %v11878_v1 = vld [vmem:[#allocation13 + $0x18] sm:$0xff]  ;;  %v11877_v62 = vld [vmem:[#allocation13 + $0x10] sm:$0xff] }
 0x520   :  { %7252 = vmatpush.bf16.msrb.mxu2 %v10847_v42 }
 0x522   :  { %7222 = vmatpush.bf16.msra.mxu0 %v10875_v3 }
 0x524   :  { %v6967_v37 = vpop.f32.mrf.mxu3 }
 0x525   :  { %v15959_v40 = vadd.f32 %v6967_v37, %v6955_v29  ;;  %v11862_v29 = vld [vmem:[%s16133_s7 + $0xb4] sm:$0xf0]  ;;  %v11861_v37 = vld [vmem:[%s16133_s7 + $0xb4] sm:$0xf]  ;;  %s12147_s7 = smov [#allocation16]  }
 0x526   :  { %7223 = vmatpush.bf16.msra.mxu0 %v10867_v13  ;;  %v10931_v53 = vor.u32 %v11862_v29, %v10930_v23  ;;  %v10935_v61 = vor.u32 %v11861_v37, %v10932_v59  ;;  %v11880_v37 = vld [vmem:[#allocation13 + $0x28] sm:$0xff]  ;;  %s7490_s22 = sshll.u32 %s12147_s7, 4  ;;  %s7491_s22 = int_to_ptr.vmem [resolvable:$true] %s7490_s22 }
 0x528   :  { %7262 = vmatpush.bf16.msrb.mxu3 %v10935_v61 }
 0x52a   :  { %7224 = vmatpush.bf16.msra.mxu0 %v10859_v7 }
 0x52c   :  { %v6969_v49 = vpop.f32.mrf.mxu3  ;;  %7263 = vmatpush.bf16.msrb.mxu3 %v10927_v17 }
 0x52d   :  { %v7214_v49 = vsel %vm549_vm1, %v7184_v11, 0  ;;  %v7456_v11 = vpack.c.b16 %v7449_v24, %v7449_v24 }
 0x52e   :  { %7225 = vmatpush.bf16.msra.mxu0 %v10851_v19  ;;  %7235 = vmatpush.bf16.msrb.mxu1 %v7214_v49  ;;  %v7077_v49 = vld [vmem:[#allocation14 + $0x6] ss:$8 sm:$0x3] }
 0x52f   :  { %v7469_v23 = vsel %vm7467_vm6, %v7456_v11, 0  ;;  %v7081_v59 = vperm.slane %v7077_v49, 0  ;;  %v7082_v47 = vperm.slane %v7077_v49, 1 }
 0x530   :  { %7264 = vmatpush.bf16.msrb.mxu3 %v10919_v58  ;;  %v11879_v58 = vld [vmem:[#allocation13 + $0x20] sm:$0xff] }
 0x532   :  { %7226 = vmatpush.bf16.msra.mxu0 %v10843_v8  ;;  %7236 = vmatpush.bf16.msrb.mxu1 %v10931_v53  ;;  %v11863_v8 = vld [vmem:[#allocation11] sm:$0xff] }
 0x534   :  { %7265 = vmatpush.bf16.msrb.mxu3 %v10911_v15  ;;  %v7298_v15 = vld [vmem:[#allocation14 + $0x7] ss:$0 sm:$0xff] }
 0x536   :  { %7237 = vmatpush.bf16.msrb.mxu1 %v10923_v56  ;;  %7472 = vmatpush.bf16.msrb.mxu0 %v7469_v23 }
 0x53a   :  { %7238 = vmatpush.bf16.msrb.mxu1 %v10915_v55  ;;  %7473 = vmatpush.bf16.msrb.mxu0 %v11880_v37 }
 0x53e   :  { %7239 = vmatpush.bf16.msrb.mxu1 %v10907_v32  ;;  %7474 = vmatpush.bf16.msrb.mxu0 %v11879_v58  ;;  %v11875_v32 = vld [vmem:[#allocation13] sm:$0xff] }
 0x542   :  { %v16021_v2 = vpop.f32.mrf.mxu0  ;;  %7382 = vmatpush.bf16.msra.mxu1 %v11870_v57  ;;  %7475 = vmatpush.bf16.msrb.mxu0 %v11878_v1 }
 0x543   :  { %v6981_v16 = vadd.f32 %v16021_v2, %v15959_v40  ;;  %v11869_v2 = vld [vmem:[#allocation11 + $0x30] sm:$0xff] }
 0x546   :  { %7383 = vmatpush.bf16.msra.mxu1 %v11869_v2  ;;  %7476 = vmatpush.bf16.msrb.mxu0 %v11877_v62 }
 0x548   :  { %v16023_v43 = vpop.f32.mrf.mxu3 }
 0x54a   :  { %v6982_v45 = vpop.f32.mrf.mxu0  ;;  %7384 = vmatpush.bf16.msra.mxu1 %v11868_v30  ;;  %7477 = vmatpush.bf16.msrb.mxu0 %v11876_v5 }
 0x54e   :  { %7385 = vmatpush.bf16.msra.mxu1 %v11867_v46  ;;  %7478 = vmatpush.bf16.msrb.mxu0 %v11875_v32 }
 0x550   :  { %v7034_v54 = vpop.f32.mrf.mxu3 }
 0x551   :  { %v6689_v54 = vperm.slane %v15956_v22, 1  ;;  %v11866_v22 = vld [vmem:[#allocation11 + $0x18] sm:$0xff] }
 0x552   :  { %7386 = vmatpush.bf16.msra.mxu1 %v11866_v22 }
 0x553   :  { %v7007_v38 = vadd.f32 %v15954_v36, %v6689_v54  ;;  %v7297_v36 = vld [vmem:[#allocation11 + $0x60] sm:$0xf] }
 0x554   :  { %v7350_v19 = vunpack.c.l.b16 %v7297_v36 }
 0x556   :  { %v7363_v60 = vpack.c.b16 %v7350_v19, %v7350_v19 }
 0x558   :  { %v7380_v41 = vsel %vm549_vm1, %v7363_v60, 0 }
 0x559   :  { %7398 = vmatpush.bf16.msra.mxu3 %v7380_v41 }
 0x55d   :  { %7399 = vmatpush.bf16.msra.mxu3 %v11874_v25 }
 0x561   :  { %7400 = vmatpush.bf16.msra.mxu3 %v11873_v28 }
 0x565   :  { %7401 = vmatpush.bf16.msra.mxu3 %v11872_v63 }
 0x569   :  { %7402 = vmatpush.bf16.msra.mxu3 %v11871_v33 }
 0x580   :  { %v7045_v3 = vpop.f32.mrf.mxu0 }
 0x586   :  { %v6993_v6 = vpop.f32.mrf.mxu2 }
 0x587   :  { %v6994_v21 = vadd.f32 %v6993_v6, %v6981_v16 }
 0x588   :  { %v7047_v10 = vpop.f32.mrf.mxu0 }
 0x589   :  { %v7049_v13 = vmax.f32 %v6994_v21, 0.0 }
 0x58b   :  { %v7078_v0 = vpack.c.bf16 %v7049_v13, %v7049_v13 }
 0x58d   :  { %7227 = vmatmul.bf16.vlgmr.msra.gmra.mxu0 %v7078_v0  ;;  %7253 = vmatmul.bf16.vlgmr.msrb.gmra.mxu2 %v7078_v0  ;;  %v7422_v0 = vld [vmem:[#allocation14 + $0x38] ss:$0 sm:$0xff] }
 0x58e   :  { %v6995_v45 = vpop.f32.mrf.mxu2 }
 0x596   :  { %v7019_v14 = vpop.f32.mrf.mxu2 }
 0x597   :  { %v7020_v52 = vadd.f32 %v7019_v14, %v7007_v38 }
 0x599   :  { %v7033_v7 = vadd.f32 %v16023_v43, %v7020_v52  ;;  %v11865_v43 = vld [vmem:[#allocation11 + $0x10] sm:$0xff] }
 0x59a   :  { %7387 = vmatpush.bf16.msra.mxu1 %v11865_v43 }
 0x59b   :  { %v7046_v18 = vadd.f32 %v7045_v3, %v7033_v7 }
 0x59d   :  { %v7050_v12 = vmax.f32 %v7046_v18, 0.0 }
 0x59e   :  { %v7021_v35 = vpop.f32.mrf.mxu2  ;;  %7388 = vmatpush.bf16.msra.mxu1 %v11864_v20 }
 0x59f   :  { %v7079_v40 = vpack.c.bf16 %v7050_v12, %v7050_v12 }
 0x5a1   :  { %10936 = vmatmul.msk.bf16.vlgmr.msrb.gmra.mxu1 %vm545_vm3, %v7079_v40  ;;  %10937 = vmatmul.msk.bf16.vlgmr.msrb.gmra.mxu3 %vm545_vm3, %v7079_v40 }
 0x5a2   :  { %7389 = vmatpush.bf16.msra.mxu1 %v11863_v8 }
 0x60a   :  { %v7228_v42 = vpop.f32.mrf.mxu0 }
 0x60b   :  { %v7229_v53 = vadd.f32 %v7228_v42, %v7081_v59 }
 0x610   :  { %v7254_v27 = vpop.f32.mrf.mxu2 }
 0x611   :  { %v7255_v56 = vadd.f32 %v7254_v27, %v7082_v47 }
 0x612   :  { %v7230_v29 = vpop.f32.mrf.mxu0 }
 0x618   :  { %v7256_v50 = vpop.f32.mrf.mxu2 }
 0x61e   :  { %v7241_v61 = vpop.f32.mrf.mxu1 }
 0x61f   :  { %v7242_v51 = vadd.f32 %v7241_v61, %v7229_v53 }
 0x621   :  { %v7271_v26 = vmax.f32 %v7242_v51, 0.0 }
 0x623   :  { %v7299_v34 = vpack.c.bf16 %v7271_v26, %v7271_v26 }
 0x624   :  { %v7267_v17 = vpop.f32.mrf.mxu3 }
 0x625   :  { %v7268_v39 = vadd.f32 %v7267_v17, %v7255_v56  ;;  %7390 = vmatmul.bf16.vlgmr.msra.gmra.mxu1 %v7299_v34 }
 0x626   :  { %v7243_v31 = vpop.f32.mrf.mxu1 }
 0x627   :  { %v7272_v9 = vmax.f32 %v7268_v39, 0.0 }
 0x629   :  { %v7300_v55 = vpack.c.bf16 %v7272_v9, %v7272_v9 }
 0x62b   :  { %10986 = vmatmul.msk.bf16.vlgmr.msra.gmra.mxu3 %vm545_vm3, %v7300_v55 }
 0x62c   :  { %v7269_v44 = vpop.f32.mrf.mxu3 }
 0x6a2   :  { %v7391_v4 = vpop.f32.mrf.mxu1 }
 0x6a3   :  { %v7392_v57 = vadd.f32 %v7391_v4, %v7298_v15 }
 0x6aa   :  { %v7393_v3 = vpop.f32.mrf.mxu1 }
 0x6ae   :  { %v7404_v16 = vpop.f32.mrf.mxu3 }
 0x6af   :  { %v7405_v6 = vadd.f32 %v7404_v16, %v7392_v57 }
 0x6b1   :  { %v7408_v21 = vmax.f32 %v7405_v6, 0.0 }
 0x6b3   :  { %v7423_v10 = vpack.c.bf16 %v7408_v21, %v7408_v21 }
 0x6b5   :  { %11011 = vmatmul.msk.bf16.vlgmr.msrb.gmra.mxu0 %vm7463_vm7, %v7423_v10 }
 0x6b6   :  { %v7406_v13 = vpop.f32.mrf.mxu3 }
 0x732   :  { %v7480_v45 = vpop.f32.mrf.mxu0 }
 0x733   :  { %v7481_v54 = vadd.f32 %v7480_v45, %v7422_v0 }
 0x735   :  { %7484 = vst [vmem:[#allocation16] sm:$0xff] %v7481_v54 }
 0x736   :  { %7495 = dma.vmem_to_hbm [thread:$0]  %s7491_s22, 128, %s7493_s10, [#allocation4]  }
 0x73a   :  { %v7482_v38 = vpop.f32.mrf.mxu0 }
 0x73b   :  { %12127 = dma.done.wait [#allocation4], 128  }
 0x73c   :  { %12128 = vsyncadd [#allocation4], 4294967168 }
 0x73d   :  { %7500 = vsyncpa [#allocation3], 1 }
 0x73e   :  { %7501 = vsyncpa [#allocation6], 1 }
 0x73f   :  { %7502 = vsyncpa [#allocation9], 1 }
 0x740   :  { %7503 = vsyncpa [#allocation12], 1 }
 0x741   :  { %7504 = vsyncpa [#allocation15], 1 }
 0x742   :  { %7505 = vsyncpa [#allocation4], 1 }

</bundles_post_ra>
